<compile_context>
chip_gen: v6e
topology: v6e:2x2x1
jax: 0.10.0
libtpu: 0.0.40
codegen_flags: <defaults>
</compile_context>

<pallas_src>
import math

import jax
import jax.numpy as jnp
from jax.experimental import pallas as pl
from jax.experimental.pallas import tpu as pltpu

# Full-precision f32 matmuls everywhere so kernel vs. pure-JAX reference match.
jax.config.update("jax_default_matmul_precision", "float32")

F_MIN, F_MAX, F_STEPS = -20.0, 6.0, 9
GAMMA = (F_MAX - F_MIN) / (F_STEPS - 1)
INV_GAMMA2 = 1.0 / (GAMMA * GAMMA)
SEQ_LEN = 9          # sequence length implied by the module's forward pass
N_FC = 32            # fc: Linear(9, 32)


def _round_up(n, m):
    return ((n + m - 1) // m) * m


def _relu(x):
    return jnp.maximum(x, 0.0)


def _erf(z):
    # Abramowitz & Stegun 7.1.26 rational approximation, |err| < 1.5e-7.
    p = 0.3275911
    a1, a2, a3, a4, a5 = (0.254829592, -0.284496736, 1.421413741,
                          -1.453152027, 1.061405429)
    sgn = jnp.where(z >= 0.0, 1.0, -1.0)
    az = jnp.abs(z)
    t = 1.0 / (1.0 + p * az)
    poly = ((((a5 * t + a4) * t + a3) * t + a2) * t + a1) * t
    return sgn * (1.0 - poly * jnp.exp(-az * az))


def _gelu_exact(x):
    return 0.5 * x * (1.0 + _erf(x * (1.0 / math.sqrt(2.0))))


# ---------------------------------------------------------------------------
# Kernel: one grid step handles TB batch rows; every op is a 2-D (TB, .) tensor.
# ---------------------------------------------------------------------------
def _seq_embedding_kernel(x_ref, rep_ref, filt_ref, wfc_ref, bfc_ref,
                          w1_ref, b1_ref, w2_ref, b2_ref,
                          wr1_ref, br1_ref, w3_ref, b3_ref,
                          wr2_ref, br2_ref, wfc5_ref, bfc5_ref,
                          out_ref):
    def mm(a, w_ref, b_ref):
        return jnp.dot(a, w_ref[...],
                       preferred_element_type=jnp.float32) + b_ref[...]

    # RBF expansion, lane-flat: column l*9+f = exp(-(x[:,l]-filt[f])^2/gamma^2)
    x = x_ref[...]                                        # (TB, 9)
    xr = jnp.dot(x, rep_ref[...],
                 preferred_element_type=jnp.float32)      # (TB, 81) column-repeat
    d = xr - filt_ref[...]
    rbf = jnp.exp(-(d * d) * INV_GAMMA2)                  # (TB, 81)

    h0 = _relu(mm(rbf, wfc_ref, bfc_ref))                 # fc           (TB, 9*32)
    h1 = _relu(mm(h0, w1_ref, b1_ref))                    # fc1+bn1      (TB, 7*8)
    h2 = _relu(mm(h1, w2_ref, b2_ref))                    # fc2+bn2      (TB, 5*64)
    r1 = mm(h0, wr1_ref, br1_ref)                         # fc_res1+bn   (TB, 5*64)
    h3 = _relu(r1 + h2)                                   # residual add

    h4 = _relu(mm(h3, w3_ref, b3_ref))                    # fc3+bn3      (TB, 3*NE)
    r2 = mm(h3, wr2_ref, br2_ref)                         # fc_res2+bn   (TB, NE)
    ne = wr2_ref.shape[1]
    # relu(r2 + h4_p) followed by MaxPool1d(3): ReLU is monotone, so pool first.
    h4m = jnp.maximum(jnp.maximum(h4[:, 0:ne], h4[:, ne:2 * ne]),
                      h4[:, 2 * ne:3 * ne])
    mp = _relu(r2 + h4m)                                  # (TB, NE)
    # Dropout: identity in eval mode.
    y = mm(mp, wfc5_ref, bfc5_ref)                        # fc5          (TB, NE_pad)
    out_ref[...] = _gelu_exact(y)                         # nn.GELU (exact-erf poly)


# ---------------------------------------------------------------------------
# Wrapper
# ---------------------------------------------------------------------------
def seq_embedding(x, packed, *, block_b=512):
    """x: (B, SEQ_LEN, 1) or (B, SEQ_LEN) f32 -> (B, n_embd) f32."""
    if x.ndim == 3:
        x = x[..., 0]
    B, L = x.shape
    assert L == SEQ_LEN
    n_embd = packed["wr2"].shape[1]
    ne_pad = packed["wfc5"].shape[1]

    # TB batch rows per grid step (multiple of 8 sublanes).  For v7x, pick
    # block_b so the grid length B/TB is even to keep both TensorCores busy.
    TB = min(block_b, _round_up(B, 8))
    Bp = _round_up(B, TB)
    if Bp != B:
        x = jnp.pad(x, ((0, Bp - B), (0, 0)))

    names = ("rep", "filt", "wfc", "bfc", "w1", "b1", "w2", "b2",
             "wr1", "br1", "w3", "b3", "wr2", "br2", "wfc5", "bfc5")
    weights = [packed[k] for k in names]

    in_specs = ([pl.BlockSpec((TB, L), lambda b: (b, 0))]
                + [pl.BlockSpec(w.shape, lambda b: (0, 0)) for w in weights])

    out = pl.pallas_call(
        _seq_embedding_kernel,
        out_shape=jax.ShapeDtypeStruct((Bp, ne_pad), jnp.float32),
        grid=(Bp // TB,),
        in_specs=in_specs,
        out_specs=pl.BlockSpec((TB, ne_pad), lambda b: (b, 0)),
        compiler_params=pltpu.CompilerParams(
            dimension_semantics=("parallel",),
            vmem_limit_bytes=32 * 1024 * 1024),
    )(x, *weights)
    return out[:B, :n_embd]


# ---------------------------------------------------------------------------
# Parameter preparation (plain-JAX glue, runs once)
# ---------------------------------------------------------------------------
def _fold_bn(w, b, gamma, beta, rm, rv, eps=1e-5):
    """Fold eval-mode BatchNorm1d into (k, Cin, Cout) conv weights + bias."""
    scale = gamma / jnp.sqrt(rv + eps)
    return w * scale[None, None, :], ((b - rm) * scale + beta)[None, :]


def _banded_conv(w, b, lin):
    """Lower Conv1d (k, Cin, Cout) to a banded (lin*Cin, lout*Cout) matrix so
    the whole conv becomes one matmul on lane-flat (position-major) inputs."""
    k, cin, cout = w.shape
    lout = lin - k + 1
    big = jnp.zeros((lin * cin, lout * cout), jnp.float32)
    for t in range(lout):
        for s in range(k):
            big = big.at[(t + s) * cin:(t + s + 1) * cin,
                         t * cout:(t + 1) * cout].set(w[s])
    return big, jnp.tile(b, (1, lout))


def init_params(key, n_embd):
    """Random 'natural' params (conv weights stored (k, Cin, Cout), BN folded)."""
    ks = iter(jax.random.split(key, 32))

    def w(shape, scale=0.1):
        return scale * jax.random.normal(next(ks), shape, jnp.float32)

    def bn(c):
        gamma = 1.0 + 0.1 * jax.random.normal(next(ks), (c,), jnp.float32)
        beta = 0.1 * jax.random.normal(next(ks), (c,), jnp.float32)
        rm = jnp.zeros((c,), jnp.float32)   # fresh running stats (eval mode)
        rv = jnp.ones((c,), jnp.float32)
        return gamma, beta, rm, rv

    def conv_bn(cin, cout, k):
        return _fold_bn(w((k, cin, cout)), w((cout,)), *bn(cout))

    nat = {}
    nat["wfc"] = w((F_STEPS, N_FC))            # Linear(9, 32), stored transposed
    nat["bfc"] = w((N_FC,))[None, :]
    nat["w1"], nat["b1"] = conv_bn(32, 8, 3)          # fc1 + bn1
    nat["w2"], nat["b2"] = conv_bn(8, 64, 3)          # fc2 + bn2
    nat["wr1"], nat["br1"] = conv_bn(32, 64, 5)       # fc_res1 + bn_res1
    nat["w3"], nat["b3"] = conv_bn(64, n_embd, 3)     # fc3 + bn3
    nat["wr2"], nat["br2"] = conv_bn(64, n_embd, 5)   # fc_res2 + bn_res2
    nat["wfc5"] = w((n_embd, n_embd))          # Linear(n_embd, n_embd), transposed
    nat["bfc5"] = w((n_embd,))[None, :]
    return nat


def pack_params(nat, n_embd):
    """Pre-lower params to the kernel's lane-flat operands."""
    eye = jnp.eye(SEQ_LEN, dtype=jnp.float32)
    filt = jnp.linspace(F_MIN, F_MAX, F_STEPS, dtype=jnp.float32)
    ne_pad = _round_up(n_embd, 128)

    p = {}
    p["rep"] = jnp.kron(eye, jnp.ones((1, F_STEPS), jnp.float32))   # (9, 81)
    p["filt"] = jnp.tile(filt, SEQ_LEN)[None, :]                    # (1, 81)
    p["wfc"] = jnp.kron(eye, nat["wfc"])                            # (81, 288)
    p["bfc"] = jnp.tile(nat["bfc"], (1, SEQ_LEN))                   # (1, 288)
    p["w1"], p["b1"] = _banded_conv(nat["w1"], nat["b1"], 9)        # (288, 56)
    p["w2"], p["b2"] = _banded_conv(nat["w2"], nat["b2"], 7)        # (56, 320)
    p["wr1"], p["br1"] = _banded_conv(nat["wr1"], nat["br1"], 9)    # (288, 320)
    p["w3"], p["b3"] = _banded_conv(nat["w3"], nat["b3"], 5)        # (320, 3*NE)
    p["wr2"], p["br2"] = _banded_conv(nat["wr2"], nat["br2"], 5)    # (320, NE)
    # Pad fc5's output dim to a multiple of 128 so the final store is lane-dense.
    p["wfc5"] = jnp.pad(nat["wfc5"], ((0, 0), (0, ne_pad - n_embd)))
    p["bfc5"] = jnp.pad(nat["bfc5"], ((0, 0), (0, ne_pad - n_embd)))
    return p


# ---------------------------------------------------------------------------
# Pure-JAX reference (mirrors the PyTorch module in eval mode, BN folded)
# ---------------------------------------------------------------------------
def reference_forward(x, nat):
    filt = jnp.linspace(F_MIN, F_MAX, F_STEPS, dtype=jnp.float32)
    rbf = jnp.exp(-((x - filt) ** 2) / GAMMA ** 2)            # (B, 9, 9)
    h0 = jax.nn.relu(rbf @ nat["wfc"] + nat["bfc"])           # (B, 9, 32)

    def conv(h, w, b):                                        # h: (B, Lin, Cin)
        k = w.shape[0]
        lout = h.shape[1] - k + 1
        acc = sum(jnp.einsum("blc,cd->bld", h[:, s:s + lout, :], w[s])
                  for s in range(k))
        return acc + b

    h1 = jax.nn.relu(conv(h0, nat["w1"], nat["b1"]))
    h2 = jax.nn.relu(conv(h1, nat["w2"], nat["b2"]))
    h3 = jax.nn.relu(conv(h0, nat["wr1"], nat["br1"]) + h2)
    h4 = jax.nn.relu(conv(h3, nat["w3"], nat["b3"]))          # (B, 3, NE)
    h5 = jax.nn.relu(conv(h3, nat["wr2"], nat["br2"]) + h4)   # broadcast residual
    mp = jnp.max(h5, axis=1)                                  # MaxPool1d(3)+squeeze
    y = mp @ nat["wfc5"] + nat["bfc5"]
    return jax.nn.gelu(y, approximate=False)


if __name__ == "__main__":
    B, n_embd = 2, 32
    key = jax.random.PRNGKey(0)
    kx, kp = jax.random.split(key)
    # Input: (batch, seq_len=9, 1) scalar sequence, RBF-expanded in the kernel.
    x = jax.random.uniform(kx, (B, SEQ_LEN, 1), jnp.float32,
                           minval=F_MIN, maxval=F_MAX)
    nat = init_params(kp, n_embd)
    packed = pack_params(nat, n_embd)

    out = seq_embedding(x, packed)
    jax.block_until_ready(out)

    ref = reference_forward(x, nat)
    assert out.shape == (B, n_embd)
    assert bool(jnp.all(jnp.isfinite(out)))
    err = float(jnp.max(jnp.abs(out - ref)))
    assert err < 2e-3, f"max abs error vs reference: {err}"
    print("KERNEL_OK")
</pallas_src>

<mosaic_0001>
module attributes {stable_mosaic.version = 11 : i64} {
  func.func @_seq_embedding_kernel(%arg0: i32, %arg1: memref<8x9xf32, #tpu.memory_space<vmem>>, %arg2: memref<9x81xf32, #tpu.memory_space<vmem>>, %arg3: memref<1x81xf32, #tpu.memory_space<vmem>>, %arg4: memref<81x288xf32, #tpu.memory_space<vmem>>, %arg5: memref<1x288xf32, #tpu.memory_space<vmem>>, %arg6: memref<288x56xf32, #tpu.memory_space<vmem>>, %arg7: memref<1x56xf32, #tpu.memory_space<vmem>>, %arg8: memref<56x320xf32, #tpu.memory_space<vmem>>, %arg9: memref<1x320xf32, #tpu.memory_space<vmem>>, %arg10: memref<288x320xf32, #tpu.memory_space<vmem>>, %arg11: memref<1x320xf32, #tpu.memory_space<vmem>>, %arg12: memref<320x96xf32, #tpu.memory_space<vmem>>, %arg13: memref<1x96xf32, #tpu.memory_space<vmem>>, %arg14: memref<320x32xf32, #tpu.memory_space<vmem>>, %arg15: memref<1x32xf32, #tpu.memory_space<vmem>>, %arg16: memref<32x128xf32, #tpu.memory_space<vmem>>, %arg17: memref<1x128xf32, #tpu.memory_space<vmem>>, %arg18: memref<8x128xf32, #tpu.memory_space<vmem>>) attributes {dimension_semantics = [#tpu.dimension_semantics<parallel>], iteration_bounds = array<i64: 1>, scalar_prefetch = 0 : i64, scratch_operands = 0 : i64, tpu.core_type = #tpu.core_type<tc>, window_params = [{transform_indices = @transform_0, window_bounds = array<i64: 8, 9>}, {pipeline_mode = #tpu.pipeline_mode<synchronous>, transform_indices = @transform_1, window_bounds = array<i64: 9, 81>}, {pipeline_mode = #tpu.pipeline_mode<synchronous>, transform_indices = @transform_2, window_bounds = array<i64: 1, 81>}, {pipeline_mode = #tpu.pipeline_mode<synchronous>, transform_indices = @transform_3, window_bounds = array<i64: 81, 288>}, {pipeline_mode = #tpu.pipeline_mode<synchronous>, transform_indices = @transform_4, window_bounds = array<i64: 1, 288>}, {pipeline_mode = #tpu.pipeline_mode<synchronous>, transform_indices = @transform_5, window_bounds = array<i64: 288, 56>}, {pipeline_mode = #tpu.pipeline_mode<synchronous>, transform_indices = @transform_6, window_bounds = array<i64: 1, 56>}, {pipeline_mode = #tpu.pipeline_mode<synchronous>, transform_indices = @transform_7, window_bounds = array<i64: 56, 320>}, {pipeline_mode = #tpu.pipeline_mode<synchronous>, transform_indices = @transform_8, window_bounds = array<i64: 1, 320>}, {pipeline_mode = #tpu.pipeline_mode<synchronous>, transform_indices = @transform_9, window_bounds = array<i64: 288, 320>}, {pipeline_mode = #tpu.pipeline_mode<synchronous>, transform_indices = @transform_10, window_bounds = array<i64: 1, 320>}, {pipeline_mode = #tpu.pipeline_mode<synchronous>, transform_indices = @transform_11, window_bounds = array<i64: 320, 96>}, {pipeline_mode = #tpu.pipeline_mode<synchronous>, transform_indices = @transform_12, window_bounds = array<i64: 1, 96>}, {pipeline_mode = #tpu.pipeline_mode<synchronous>, transform_indices = @transform_13, window_bounds = array<i64: 320, 32>}, {pipeline_mode = #tpu.pipeline_mode<synchronous>, transform_indices = @transform_14, window_bounds = array<i64: 1, 32>}, {pipeline_mode = #tpu.pipeline_mode<synchronous>, transform_indices = @transform_15, window_bounds = array<i64: 32, 128>}, {pipeline_mode = #tpu.pipeline_mode<synchronous>, transform_indices = @transform_16, window_bounds = array<i64: 1, 128>}, {transform_indices = @transform_17, window_bounds = array<i64: 8, 128>}]} {
    %c0 = arith.constant 0 : index
    %c0_0 = arith.constant 0 : index
    %0 = vector.load %arg1[%c0, %c0_0] : memref<8x9xf32, #tpu.memory_space<vmem>>, vector<8x9xf32>
    %c0_1 = arith.constant 0 : index
    %c0_2 = arith.constant 0 : index
    %1 = vector.load %arg2[%c0_1, %c0_2] : memref<9x81xf32, #tpu.memory_space<vmem>>, vector<9x81xf32>
    %cst = arith.constant dense<0.000000e+00> : vector<8x81xf32>
    %2 = tpu.matmul %0, %1, %cst {dimension_numbers = #tpu.dot_dimension_numbers<[1], [0], [0], [1], [0, 0, 1, 1], [], []>, precision = #tpu.contract_precision<fp32>} : vector<8x9xf32>, vector<9x81xf32>, vector<8x81xf32> -> vector<8x81xf32>
    %c0_3 = arith.constant 0 : index
    %c0_4 = arith.constant 0 : index
    %3 = vector.load %arg3[%c0_3, %c0_4] : memref<1x81xf32, #tpu.memory_space<vmem>>, vector<1x81xf32>
    %4 = vector.broadcast %3 : vector<1x81xf32> to vector<8x81xf32>
    %5 = arith.subf %2, %4 : vector<8x81xf32>
    %6 = arith.mulf %5, %5 : vector<8x81xf32>
    %cst_5 = arith.constant 0.000000e+00 : f32
    %7 = vector.broadcast %cst_5 : f32 to vector<8x81xf32>
    %8 = arith.subf %7, %6 : vector<8x81xf32>
    %cst_6 = arith.constant 0.0946745574 : f32
    %9 = vector.broadcast %cst_6 : f32 to vector<8x81xf32>
    %10 = arith.mulf %8, %9 : vector<8x81xf32>
    %11 = math.exp %10 : vector<8x81xf32>
    %c0_7 = arith.constant 0 : index
    %c0_8 = arith.constant 0 : index
    %12 = vector.load %arg4[%c0_7, %c0_8] : memref<81x288xf32, #tpu.memory_space<vmem>>, vector<81x288xf32>
    %cst_9 = arith.constant dense<0.000000e+00> : vector<8x288xf32>
    %13 = tpu.matmul %11, %12, %cst_9 {dimension_numbers = #tpu.dot_dimension_numbers<[1], [0], [0], [1], [0, 0, 1, 1], [], []>, precision = #tpu.contract_precision<fp32>} : vector<8x81xf32>, vector<81x288xf32>, vector<8x288xf32> -> vector<8x288xf32>
    %c0_10 = arith.constant 0 : index
    %c0_11 = arith.constant 0 : index
    %14 = vector.load %arg5[%c0_10, %c0_11] : memref<1x288xf32, #tpu.memory_space<vmem>>, vector<1x288xf32>
    %15 = vector.broadcast %14 : vector<1x288xf32> to vector<8x288xf32>
    %16 = arith.addf %13, %15 : vector<8x288xf32>
    %cst_12 = arith.constant 0.000000e+00 : f32
    %17 = vector.broadcast %cst_12 : f32 to vector<8x288xf32>
    %18 = arith.maximumf %16, %17 : vector<8x288xf32>
    %c0_13 = arith.constant 0 : index
    %c0_14 = arith.constant 0 : index
    %19 = vector.load %arg6[%c0_13, %c0_14] : memref<288x56xf32, #tpu.memory_space<vmem>>, vector<288x56xf32>
    %cst_15 = arith.constant dense<0.000000e+00> : vector<8x56xf32>
    %20 = tpu.matmul %18, %19, %cst_15 {dimension_numbers = #tpu.dot_dimension_numbers<[1], [0], [0], [1], [0, 0, 1, 1], [], []>, precision = #tpu.contract_precision<fp32>} : vector<8x288xf32>, vector<288x56xf32>, vector<8x56xf32> -> vector<8x56xf32>
    %c0_16 = arith.constant 0 : index
    %c0_17 = arith.constant 0 : index
    %21 = vector.load %arg7[%c0_16, %c0_17] : memref<1x56xf32, #tpu.memory_space<vmem>>, vector<1x56xf32>
    %22 = vector.broadcast %21 : vector<1x56xf32> to vector<8x56xf32>
    %23 = arith.addf %20, %22 : vector<8x56xf32>
    %cst_18 = arith.constant 0.000000e+00 : f32
    %24 = vector.broadcast %cst_18 : f32 to vector<8x56xf32>
    %25 = arith.maximumf %23, %24 : vector<8x56xf32>
    %c0_19 = arith.constant 0 : index
    %c0_20 = arith.constant 0 : index
    %26 = vector.load %arg8[%c0_19, %c0_20] : memref<56x320xf32, #tpu.memory_space<vmem>>, vector<56x320xf32>
    %cst_21 = arith.constant dense<0.000000e+00> : vector<8x320xf32>
    %27 = tpu.matmul %25, %26, %cst_21 {dimension_numbers = #tpu.dot_dimension_numbers<[1], [0], [0], [1], [0, 0, 1, 1], [], []>, precision = #tpu.contract_precision<fp32>} : vector<8x56xf32>, vector<56x320xf32>, vector<8x320xf32> -> vector<8x320xf32>
    %c0_22 = arith.constant 0 : index
    %c0_23 = arith.constant 0 : index
    %28 = vector.load %arg9[%c0_22, %c0_23] : memref<1x320xf32, #tpu.memory_space<vmem>>, vector<1x320xf32>
    %29 = vector.broadcast %28 : vector<1x320xf32> to vector<8x320xf32>
    %30 = arith.addf %27, %29 : vector<8x320xf32>
    %cst_24 = arith.constant 0.000000e+00 : f32
    %31 = vector.broadcast %cst_24 : f32 to vector<8x320xf32>
    %32 = arith.maximumf %30, %31 : vector<8x320xf32>
    %c0_25 = arith.constant 0 : index
    %c0_26 = arith.constant 0 : index
    %33 = vector.load %arg10[%c0_25, %c0_26] : memref<288x320xf32, #tpu.memory_space<vmem>>, vector<288x320xf32>
    %cst_27 = arith.constant dense<0.000000e+00> : vector<8x320xf32>
    %34 = tpu.matmul %18, %33, %cst_27 {dimension_numbers = #tpu.dot_dimension_numbers<[1], [0], [0], [1], [0, 0, 1, 1], [], []>, precision = #tpu.contract_precision<fp32>} : vector<8x288xf32>, vector<288x320xf32>, vector<8x320xf32> -> vector<8x320xf32>
    %c0_28 = arith.constant 0 : index
    %c0_29 = arith.constant 0 : index
    %35 = vector.load %arg11[%c0_28, %c0_29] : memref<1x320xf32, #tpu.memory_space<vmem>>, vector<1x320xf32>
    %36 = vector.broadcast %35 : vector<1x320xf32> to vector<8x320xf32>
    %37 = arith.addf %34, %36 : vector<8x320xf32>
    %38 = arith.addf %37, %32 : vector<8x320xf32>
    %cst_30 = arith.constant 0.000000e+00 : f32
    %39 = vector.broadcast %cst_30 : f32 to vector<8x320xf32>
    %40 = arith.maximumf %38, %39 : vector<8x320xf32>
    %c0_31 = arith.constant 0 : index
    %c0_32 = arith.constant 0 : index
    %41 = vector.load %arg12[%c0_31, %c0_32] : memref<320x96xf32, #tpu.memory_space<vmem>>, vector<320x96xf32>
    %cst_33 = arith.constant dense<0.000000e+00> : vector<8x96xf32>
    %42 = tpu.matmul %40, %41, %cst_33 {dimension_numbers = #tpu.dot_dimension_numbers<[1], [0], [0], [1], [0, 0, 1, 1], [], []>, precision = #tpu.contract_precision<fp32>} : vector<8x320xf32>, vector<320x96xf32>, vector<8x96xf32> -> vector<8x96xf32>
    %c0_34 = arith.constant 0 : index
    %c0_35 = arith.constant 0 : index
    %43 = vector.load %arg13[%c0_34, %c0_35] : memref<1x96xf32, #tpu.memory_space<vmem>>, vector<1x96xf32>
    %44 = vector.broadcast %43 : vector<1x96xf32> to vector<8x96xf32>
    %45 = arith.addf %42, %44 : vector<8x96xf32>
    %cst_36 = arith.constant 0.000000e+00 : f32
    %46 = vector.broadcast %cst_36 : f32 to vector<8x96xf32>
    %47 = arith.maximumf %45, %46 : vector<8x96xf32>
    %c0_37 = arith.constant 0 : index
    %c0_38 = arith.constant 0 : index
    %48 = vector.load %arg14[%c0_37, %c0_38] : memref<320x32xf32, #tpu.memory_space<vmem>>, vector<320x32xf32>
    %cst_39 = arith.constant dense<0.000000e+00> : vector<8x32xf32>
    %49 = tpu.matmul %40, %48, %cst_39 {dimension_numbers = #tpu.dot_dimension_numbers<[1], [0], [0], [1], [0, 0, 1, 1], [], []>, precision = #tpu.contract_precision<fp32>} : vector<8x320xf32>, vector<320x32xf32>, vector<8x32xf32> -> vector<8x32xf32>
    %c0_40 = arith.constant 0 : index
    %c0_41 = arith.constant 0 : index
    %50 = vector.load %arg15[%c0_40, %c0_41] : memref<1x32xf32, #tpu.memory_space<vmem>>, vector<1x32xf32>
    %51 = vector.broadcast %50 : vector<1x32xf32> to vector<8x32xf32>
    %52 = arith.addf %49, %51 : vector<8x32xf32>
    %53 = vector.extract_strided_slice %47 {offsets = [0, 0], sizes = [8, 32], strides = [1, 1]} : vector<8x96xf32> to vector<8x32xf32>
    %54 = vector.extract_strided_slice %47 {offsets = [0, 32], sizes = [8, 32], strides = [1, 1]} : vector<8x96xf32> to vector<8x32xf32>
    %55 = arith.maximumf %53, %54 : vector<8x32xf32>
    %56 = vector.extract_strided_slice %47 {offsets = [0, 64], sizes = [8, 32], strides = [1, 1]} : vector<8x96xf32> to vector<8x32xf32>
    %57 = arith.maximumf %55, %56 : vector<8x32xf32>
    %58 = arith.addf %52, %57 : vector<8x32xf32>
    %cst_42 = arith.constant 0.000000e+00 : f32
    %59 = vector.broadcast %cst_42 : f32 to vector<8x32xf32>
    %60 = arith.maximumf %58, %59 : vector<8x32xf32>
    %c0_43 = arith.constant 0 : index
    %c0_44 = arith.constant 0 : index
    %61 = vector.load %arg16[%c0_43, %c0_44] : memref<32x128xf32, #tpu.memory_space<vmem>>, vector<32x128xf32>
    %cst_45 = arith.constant dense<0.000000e+00> : vector<8x128xf32>
    %62 = tpu.matmul %60, %61, %cst_45 {dimension_numbers = #tpu.dot_dimension_numbers<[1], [0], [0], [1], [0, 0, 1, 1], [], []>, precision = #tpu.contract_precision<fp32>} : vector<8x32xf32>, vector<32x128xf32>, vector<8x128xf32> -> vector<8x128xf32>
    %c0_46 = arith.constant 0 : index
    %c0_47 = arith.constant 0 : index
    %63 = vector.load %arg17[%c0_46, %c0_47] : memref<1x128xf32, #tpu.memory_space<vmem>>, vector<1x128xf32>
    %64 = vector.broadcast %63 : vector<1x128xf32> to vector<8x128xf32>
    %65 = arith.addf %62, %64 : vector<8x128xf32>
    %cst_48 = arith.constant 5.000000e-01 : f32
    %66 = vector.broadcast %cst_48 : f32 to vector<8x128xf32>
    %67 = arith.mulf %66, %65 : vector<8x128xf32>
    %cst_49 = arith.constant 0.707106769 : f32
    %68 = vector.broadcast %cst_49 : f32 to vector<8x128xf32>
    %69 = arith.mulf %65, %68 : vector<8x128xf32>
    %cst_50 = arith.constant 0.000000e+00 : f32
    %70 = vector.broadcast %cst_50 : f32 to vector<8x128xf32>
    %71 = arith.cmpf oge, %69, %70 : vector<8x128xf32>
    %cst_51 = arith.constant 1.000000e+00 : f32
    %cst_52 = arith.constant -1.000000e+00 : f32
    %72 = vector.broadcast %cst_51 : f32 to vector<8x128xf32>
    %73 = vector.broadcast %cst_52 : f32 to vector<8x128xf32>
    %74 = arith.select %71, %72, %73 : vector<8x128xi1>, vector<8x128xf32>
    %75 = math.absf %69 : vector<8x128xf32>
    %cst_53 = arith.constant 0.327591091 : f32
    %76 = vector.broadcast %cst_53 : f32 to vector<8x128xf32>
    %77 = arith.mulf %76, %75 : vector<8x128xf32>
    %cst_54 = arith.constant 1.000000e+00 : f32
    %78 = vector.broadcast %cst_54 : f32 to vector<8x128xf32>
    %79 = arith.addf %78, %77 : vector<8x128xf32>
    %cst_55 = arith.constant 1.000000e+00 : f32
    %80 = vector.broadcast %cst_55 : f32 to vector<8x128xf32>
    %81 = arith.divf %80, %79 : vector<8x128xf32>
    %cst_56 = arith.constant 1.06140542 : f32
    %82 = vector.broadcast %cst_56 : f32 to vector<8x128xf32>
    %83 = arith.mulf %82, %81 : vector<8x128xf32>
    %cst_57 = arith.constant -1.45315206 : f32
    %84 = vector.broadcast %cst_57 : f32 to vector<8x128xf32>
    %85 = arith.addf %83, %84 : vector<8x128xf32>
    %86 = arith.mulf %85, %81 : vector<8x128xf32>
    %cst_58 = arith.constant 1.42141378 : f32
    %87 = vector.broadcast %cst_58 : f32 to vector<8x128xf32>
    %88 = arith.addf %86, %87 : vector<8x128xf32>
    %89 = arith.mulf %88, %81 : vector<8x128xf32>
    %cst_59 = arith.constant -0.284496725 : f32
    %90 = vector.broadcast %cst_59 : f32 to vector<8x128xf32>
    %91 = arith.addf %89, %90 : vector<8x128xf32>
    %92 = arith.mulf %91, %81 : vector<8x128xf32>
    %cst_60 = arith.constant 0.254829586 : f32
    %93 = vector.broadcast %cst_60 : f32 to vector<8x128xf32>
    %94 = arith.addf %92, %93 : vector<8x128xf32>
    %95 = arith.mulf %94, %81 : vector<8x128xf32>
    %cst_61 = arith.constant 0.000000e+00 : f32
    %96 = vector.broadcast %cst_61 : f32 to vector<8x128xf32>
    %97 = arith.subf %96, %75 : vector<8x128xf32>
    %98 = arith.mulf %97, %75 : vector<8x128xf32>
    %99 = math.exp %98 : vector<8x128xf32>
    %100 = arith.mulf %95, %99 : vector<8x128xf32>
    %cst_62 = arith.constant 1.000000e+00 : f32
    %101 = vector.broadcast %cst_62 : f32 to vector<8x128xf32>
    %102 = arith.subf %101, %100 : vector<8x128xf32>
    %103 = arith.mulf %74, %102 : vector<8x128xf32>
    %cst_63 = arith.constant 1.000000e+00 : f32
    %104 = vector.broadcast %cst_63 : f32 to vector<8x128xf32>
    %105 = arith.addf %104, %103 : vector<8x128xf32>
    %106 = arith.mulf %67, %105 : vector<8x128xf32>
    %c0_64 = arith.constant 0 : index
    %c0_65 = arith.constant 0 : index
    %107 = vector.load %arg18[%c0_64, %c0_65] : memref<8x128xf32, #tpu.memory_space<vmem>>, vector<8x128xf32>
    tpu.vector_store %arg18[%c0_64, %c0_65], %106 {strides = array<i32>} : memref<8x128xf32, #tpu.memory_space<vmem>>, vector<8x128xf32>,
    return
  }
  func.func @transform_0(%arg0: i32) -> (i32, i32) {
    %c0_i32 = arith.constant 0 : i32
    %c0_i32_0 = arith.constant 0 : i32
    return %arg0, %c0_i32 : i32, i32
  }
  func.func @transform_1(%arg0: i32) -> (i32, i32) {
    %c0_i32 = arith.constant 0 : i32
    %c0_i32_0 = arith.constant 0 : i32
    %c0_i32_1 = arith.constant 0 : i32
    return %c0_i32, %c0_i32_0 : i32, i32
  }
  func.func @transform_2(%arg0: i32) -> (i32, i32) {
    %c0_i32 = arith.constant 0 : i32
    %c0_i32_0 = arith.constant 0 : i32
    %c0_i32_1 = arith.constant 0 : i32
    return %c0_i32, %c0_i32_0 : i32, i32
  }
  func.func @transform_3(%arg0: i32) -> (i32, i32) {
    %c0_i32 = arith.constant 0 : i32
    %c0_i32_0 = arith.constant 0 : i32
    %c0_i32_1 = arith.constant 0 : i32
    return %c0_i32, %c0_i32_0 : i32, i32
  }
  func.func @transform_4(%arg0: i32) -> (i32, i32) {
    %c0_i32 = arith.constant 0 : i32
    %c0_i32_0 = arith.constant 0 : i32
    %c0_i32_1 = arith.constant 0 : i32
    return %c0_i32, %c0_i32_0 : i32, i32
  }
  func.func @transform_5(%arg0: i32) -> (i32, i32) {
    %c0_i32 = arith.constant 0 : i32
    %c0_i32_0 = arith.constant 0 : i32
    %c0_i32_1 = arith.constant 0 : i32
    return %c0_i32, %c0_i32_0 : i32, i32
  }
  func.func @transform_6(%arg0: i32) -> (i32, i32) {
    %c0_i32 = arith.constant 0 : i32
    %c0_i32_0 = arith.constant 0 : i32
    %c0_i32_1 = arith.constant 0 : i32
    return %c0_i32, %c0_i32_0 : i32, i32
  }
  func.func @transform_7(%arg0: i32) -> (i32, i32) {
    %c0_i32 = arith.constant 0 : i32
    %c0_i32_0 = arith.constant 0 : i32
    %c0_i32_1 = arith.constant 0 : i32
    return %c0_i32, %c0_i32_0 : i32, i32
  }
  func.func @transform_8(%arg0: i32) -> (i32, i32) {
    %c0_i32 = arith.constant 0 : i32
    %c0_i32_0 = arith.constant 0 : i32
    %c0_i32_1 = arith.constant 0 : i32
    return %c0_i32, %c0_i32_0 : i32, i32
  }
  func.func @transform_9(%arg0: i32) -> (i32, i32) {
    %c0_i32 = arith.constant 0 : i32
    %c0_i32_0 = arith.constant 0 : i32
    %c0_i32_1 = arith.constant 0 : i32
    return %c0_i32, %c0_i32_0 : i32, i32
  }
  func.func @transform_10(%arg0: i32) -> (i32, i32) {
    %c0_i32 = arith.constant 0 : i32
    %c0_i32_0 = arith.constant 0 : i32
    %c0_i32_1 = arith.constant 0 : i32
    return %c0_i32, %c0_i32_0 : i32, i32
  }
  func.func @transform_11(%arg0: i32) -> (i32, i32) {
    %c0_i32 = arith.constant 0 : i32
    %c0_i32_0 = arith.constant 0 : i32
    %c0_i32_1 = arith.constant 0 : i32
    return %c0_i32, %c0_i32_0 : i32, i32
  }
  func.func @transform_12(%arg0: i32) -> (i32, i32) {
    %c0_i32 = arith.constant 0 : i32
    %c0_i32_0 = arith.constant 0 : i32
    %c0_i32_1 = arith.constant 0 : i32
    return %c0_i32, %c0_i32_0 : i32, i32
  }
  func.func @transform_13(%arg0: i32) -> (i32, i32) {
    %c0_i32 = arith.constant 0 : i32
    %c0_i32_0 = arith.constant 0 : i32
    %c0_i32_1 = arith.constant 0 : i32
    return %c0_i32, %c0_i32_0 : i32, i32
  }
  func.func @transform_14(%arg0: i32) -> (i32, i32) {
    %c0_i32 = arith.constant 0 : i32
    %c0_i32_0 = arith.constant 0 : i32
    %c0_i32_1 = arith.constant 0 : i32
    return %c0_i32, %c0_i32_0 : i32, i32
  }
  func.func @transform_15(%arg0: i32) -> (i32, i32) {
    %c0_i32 = arith.constant 0 : i32
    %c0_i32_0 = arith.constant 0 : i32
    %c0_i32_1 = arith.constant 0 : i32
    return %c0_i32, %c0_i32_0 : i32, i32
  }
  func.func @transform_16(%arg0: i32) -> (i32, i32) {
    %c0_i32 = arith.constant 0 : i32
    %c0_i32_0 = arith.constant 0 : i32
    %c0_i32_1 = arith.constant 0 : i32
    return %c0_i32, %c0_i32_0 : i32, i32
  }
  func.func @transform_17(%arg0: i32) -> (i32, i32) {
    %c0_i32 = arith.constant 0 : i32
    %c0_i32_0 = arith.constant 0 : i32
    return %arg0, %c0_i32 : i32, i32
  }
}

</mosaic_0001>

<bundles_post_ra>
// kernel: tpu_custom_call.1
= control target key start
LH: loop header
LB: loop body
LE: loop exit
PB: predicated region body
PF: predicated region fallthrough
CT: control target
= control target key end

     0   :  { %s19454_s0 = inlined_call_operand.vmem [shape: f32[8,9], index: 0, kind: input, shape index: {}]   ;;  %s19455_s1 = inlined_call_operand.vmem [shape: f32[9,81], index: 1, kind: input, shape index: {}]   ;;  %s19456_s2 = inlined_call_operand.vmem [shape: f32[1,81], index: 2, kind: input, shape index: {}]   ;;  %s19457_s3 = inlined_call_operand.vmem [shape: f32[81,288], index: 3, kind: input, shape index: {}]   ;;  %s19458_s4 = inlined_call_operand.vmem [shape: f32[1,288], index: 4, kind: input, shape index: {}]   ;;  %s19459_s5 = inlined_call_operand.vmem [shape: f32[288,56], index: 5, kind: input, shape index: {}]   ;;  %s19460_s6 = inlined_call_operand.vmem [shape: f32[1,56], index: 6, kind: input, shape index: {}]   ;;  %s19461_s7 = inlined_call_operand.hbm [shape: f32[56,320], index: 7, kind: input, shape index: {}]   ;;  %s19462_s8 = inlined_call_operand.vmem [shape: f32[1,320], index: 8, kind: input, shape index: {}]   ;;  %s19463_s9 = inlined_call_operand.vmem [shape: f32[288,320], index: 9, kind: input, shape index: {}]   ;;  %s19464_s10 = inlined_call_operand.vmem [shape: f32[1,320], index: 10, kind: input, shape index: {}]   ;;  %s19465_s11 = inlined_call_operand.vmem [shape: f32[320,96], index: 11, kind: input, shape index: {}]   ;;  %s19466_s12 = inlined_call_operand.vmem [shape: f32[1,96], index: 12, kind: input, shape index: {}]   ;;  %s19467_s13 = inlined_call_operand.vmem [shape: f32[320,32], index: 13, kind: input, shape index: {}]   ;;  %s19468_s14 = inlined_call_operand.vmem [shape: f32[1,32], index: 14, kind: input, shape index: {}]   ;;  %s19469_s15 = inlined_call_operand.vmem [shape: f32[32,128], index: 15, kind: input, shape index: {}]   ;;  %s19470_s16 = inlined_call_operand.vmem [shape: f32[1,128], index: 16, kind: input, shape index: {}]   ;;  %s19471_s17 = inlined_call_operand.hbm [shape: f32[8,128], index: 17, kind: output, shape index: {}]  }
   0x1   :  { %19993 = sst [smem:[#allocation121_spill]] %s19454_s0 }
   0x2   :  { %19994 = sst [smem:[#allocation122_spill]] %s19455_s1 }
   0x3   :  { %22 = vsyncpa [#allocation3], 0 }
   0x4   :  { %23 = vsyncpa [#allocation4], 0  ;;  %s13221_s24 = smov [#allocation2]  }
   0x5   :  { %s43_s25 = sshll.u32 %s13221_s24, 4  ;;  %s44_s25 = int_to_ptr.vmem [resolvable:$true] %s43_s25 }
   0x6   :  { %s13185_s26 = scalar_lea.vmem %s44_s25, 2688  ;;  %p13190_p1 = scmp.lt.s32.totalorder %s44_s25, %s44_s25 }
   0x7   :  { %p13186_p0 = scmp.ne.s32.totalorder %s44_s25, %s13185_s26  ;;  %p13191_p2 = scmp.lt.s32.totalorder %s13185_s26, %s13185_s26 }
   0x9   :  { %p13192_p3 = por %p13191_p2, %p13190_p1 }
   0xb   :  { %p13193_p4 = pnand %p13192_p3, %p13186_p0 }
   0xd   :  { %13196 = shalt.err (!%p13193_p4)
}
   0xe   :  { %s13222_s27 = smov 384   ;;  %s13223_s28 = smov 24  }
   0xf   :  { %49 = dma.hbm_to_vmem [thread:$0]  %s19461_s7, 2688, %s44_s25, [#allocation3], %s13222_s27, %s13222_s27, %s13223_s28  }
  0x10   :  { %13217 = dma.done.wait [#allocation3], 2688  }
  0x11   :  { %13218 = vsyncadd [#allocation3], 4294964608  ;;  %v19516_v0 = vmov 0.0   ;;  %vm13225_vm0 = vmmov 0   ;;  %vm78_vm1 = vcmask 1040384   ;;  %vm74_vm2 = vcmask 72704  }
  0x12   :  { %12442 = vmatprep.subr.mxu0 %v19516_v0  ;;  %12446 = vmatprep.mubr.msk.f32.mxu0 %vm13225_vm0, %v19516_v0  ;;  %s19995_s19 = sld [smem:[#allocation122_spill]]  ;;  %v585_v21 = vld [vmem:[%s19457_s3 + $0xf8] sm:$0x1]  ;;  %v584_v23 = vld [vmem:[%s19457_s3 + $0xf0] sm:$0x1]  ;;  %v582_v27 = vld [vmem:[%s19457_s3 + $0xe0] sm:$0xff] }
  0x13   :  { %12449 = vmatprep.subr.mxu1 %v19516_v0  ;;  %12453 = vmatprep.mubr.msk.f32.mxu1 %vm13225_vm0, %v19516_v0  ;;  %s19996_s22 = sld [smem:[#allocation121_spill]]  ;;  %v612_v22 = vsel %vm78_vm1, %v585_v21, 0  ;;  %v609_v25 = vsel %vm78_vm1, %v584_v23, 0  ;;  %v13377_v29 = vand.u32 4294901760, %v582_v27  ;;  %v581_v30 = vld [vmem:[%s19457_s3 + $0xd8] sm:$0xff]  ;;  %v579_v33 = vld [vmem:[%s19457_s3 + $0xc8] sm:$0xff] }
  0x14   :  { %v13366_v24 = vand.u32 4294901760, %v612_v22  ;;  %v13369_v26 = vand.u32 4294901760, %v609_v25  ;;  %v13386_v32 = vand.u32 4294901760, %v581_v30  ;;  %v13396_v36 = vand.u32 4294901760, %v579_v33  ;;  %v578_v37 = vld [vmem:[%s19457_s3 + $0xc0] sm:$0xff]  ;;  %v576_v41 = vld [vmem:[%s19457_s3 + $0xb0] sm:$0xff] }
  0x15   :  { %v13394_v35 = vsub.f32 %v582_v27, %v13377_v29  ;;  %v13406_v40 = vand.u32 4294901760, %v578_v37  ;;  %v13419_v45 = vand.u32 4294901760, %v576_v41  ;;  %v575_v46 = vld [vmem:[%s19457_s3 + $0xa8] sm:$0xff]  ;;  %v573_v51 = vld [vmem:[%s19457_s3 + $0x98] sm:$0xff]  ;;  %v572_v56 = vld [vmem:[%s19457_s3 + $0x90] sm:$0xff]  ;;  %vm604_vm3 = vcmask 662528  }
  0x16   :  { %v13375_v28 = vsub.f32 %v612_v22, %v13366_v24  ;;  %v13384_v31 = vsub.f32 %v609_v25, %v13369_v26  ;;  %v13404_v39 = vsub.f32 %v581_v30, %v13386_v32  ;;  %v13417_v44 = vsub.f32 %v579_v33, %v13396_v36  ;;  %v570_v61 = vld [vmem:[%s19457_s3 + $0x80] sm:$0xff]  ;;  %v564_v22 = vld [vmem:[%s19457_s3 + $0x50] sm:$0xff]  ;;  %v563_v33 = vld [vmem:[%s19457_s3 + $0x48] sm:$0xff] }
  0x17   :  { %v19491_v43 = vand.u32 4294901760, %v13394_v35  ;;  %v13430_v49 = vsub.f32 %v578_v37, %v13406_v40  ;;  %v13432_v50 = vand.u32 4294901760, %v575_v46  ;;  %v13443_v55 = vsub.f32 %v576_v41, %v13419_v45 }
  0x18   :  { %v73_v1 = vld [vmem:[%s19995_s19 + $0x8] sm:$0x1]  ;;  %v72_v2 = vld [vmem:[%s19995_s19] sm:$0xff]  ;;  %v19494_v34 = vand.u32 4294901760, %v13375_v28  ;;  %v19492_v38 = vand.u32 4294901760, %v13384_v31  ;;  %v19490_v48 = vand.u32 4294901760, %v13404_v39 }
  0x19   :  { %v71_v3 = vld [vmem:[%s19996_s22] sm:$0xff]  ;;  %v80_v4 = vsel %vm78_vm1, %v73_v1, 0  ;;  %v114_v5 = vand.u32 4294901760, %v72_v2  ;;  %v740_v53 = vsub.f32 %v13394_v35, %v19491_v43  ;;  %v19488_v54 = vand.u32 4294901760, %v13417_v44 }
  0x1a   :  { %v76_v6 = vsel %vm74_vm2, %v71_v3, 0  ;;  %v111_v7 = vand.u32 4294901760, %v80_v4  ;;  %v728_v42 = vsub.f32 %v13375_v28, %v19494_v34  ;;  %v734_v47 = vsub.f32 %v13384_v31, %v19492_v38  ;;  %v569_v3 = vld [vmem:[%s19457_s3 + $0x78] sm:$0xff] }
  0x1b   :  { %v149_v8 = vand.u32 4294901760, %v76_v6  ;;  %v196_v9 = vsub.f32 %v72_v2, %v114_v5  ;;  %v746_v58 = vsub.f32 %v13404_v39, %v19490_v48  ;;  %v19487_v59 = vand.u32 4294901760, %v13430_v49 }
  0x1c   :  { %12443 = vmatpush3.msra.mxu0 %v111_v7  ;;  %v189_v11 = vsub.f32 %v80_v4, %v111_v7  ;;  %v729_v52 = vand.u32 4294901760, %v728_v42  ;;  %v735_v57 = vand.u32 4294901760, %v734_v47  ;;  %v13454_v60 = vsub.f32 %v575_v46, %v13432_v50 }
  0x1d   :  { %v150_v10 = vsub.f32 %v76_v6, %v149_v8  ;;  %12444 = vmatprep.subr.mxu0 %v19516_v0  ;;  %v197_v12 = vand.u32 4294901760, %v196_v9  ;;  %v741_v62 = vand.u32 4294901760, %v740_v53  ;;  %v752_v63 = vsub.f32 %v13417_v44, %v19488_v54  ;;  %v561_v53 = vld [vmem:[%s19457_s3 + $0x38] sm:$0xff] }
  0x1e   :  { %12445 = vmatpush3.msra.mxu0 %v114_v5  ;;  %v190_v14 = vand.u32 4294901760, %v189_v11  ;;  %v19485_v1 = vand.u32 4294901760, %v13443_v55  ;;  %v13464_v2 = vand.u32 4294901760, %v573_v51  ;;  %v747_v4 = vand.u32 4294901760, %v746_v58 }
  0x1f   :  { %v151_v13 = vand.u32 4294901760, %v150_v10  ;;  %12456 = vmatprep.subr.mxu0 %v19516_v0  ;;  %v198_v15 = vsub.f32 %v196_v9, %v197_v12  ;;  %v19483_v6 = vand.u32 4294901760, %v13454_v60  ;;  %vm1964_vm4 = vcmask 261120  }
  0x20   :  { %v191_v17 = vsub.f32 %v189_v11, %v190_v14  ;;  %vm3354_vm5 = vcmask 457728   ;;  %vm7858_vm6 = vcmask 523264  }
  0x21   :  { %v152_v16 = vsub.f32 %v150_v10, %v151_v13  ;;  %v199_v20 = vand.u32 4294901760, %v198_v15  ;;  %v770_v15 = vsub.f32 %v13454_v60, %v19483_v6 }
  0x22   :  { %v192_v19 = vand.u32 4294901760, %v191_v17  ;;  %v13496_v17 = vand.u32 4294901760, %v569_v3 }
  0x23   :  { %v153_v18 = vand.u32 4294901760, %v152_v16  ;;  %v771_v23 = vand.u32 4294901760, %v770_v15  ;;  %v557_v15 = vld [vmem:[%s19457_s3 + $0x18] sm:$0xff] }
  0x24   :  { %12450 = vmatpush3.msra.mxu1 %v192_v19  ;;  %v13511_v27 = vsub.f32 %v569_v3, %v13496_v17 }
  0x25   :  { %12447 = vmatmul.mubr.f32.vlgmr.msra.gmra.mxu0 %v153_v18  ;;  %12451 = vmatprep.subr.mxu1 %v19516_v0 }
  0x26   :  { %12457 = vmatpush3.msra.mxu0 %v189_v11  ;;  %12452 = vmatpush3.msra.mxu1 %v199_v20  ;;  %v13482_v11 = vsub.f32 %v573_v51, %v13464_v2  ;;  %v19475_v47 = vand.u32 4294901760, %v13511_v27 }
  0x27   :  { %12458 = vmatprep.subr.mxu0 %v19516_v0  ;;  %12454 = vmatmul.mubr.f32.vlgmr.msra.gmra.mxu1 %v149_v8 }
  0x28   :  { %12459 = vmatpush3.msra.mxu0 %v196_v9  ;;  %12460 = vmatprep.mubr.msk.f32.mxu0 %vm13225_vm0, %v19516_v0  ;;  %v753_v9 = vand.u32 4294901760, %v752_v63  ;;  %v19480_v19 = vand.u32 4294901760, %v13482_v11  ;;  %v794_v3 = vsub.f32 %v13511_v27, %v19475_v47 }
  0x29   :  { %12463 = vmatprep.subr.mxu1 %v19516_v0  ;;  %12461 = vmatmul.mubr.f32.vlgmr.msra.gmra.mxu0 %v150_v10  ;;  %v764_v10 = vsub.f32 %v13443_v55, %v19485_v1 }
  0x2a   :  { %12464 = vmatpush3.msra.mxu1 %v111_v7  ;;  %12470 = vmatprep.subr.mxu0 %v19516_v0  ;;  %v776_v37 = vsub.f32 %v13482_v11, %v19480_v19 }
  0x2b   :  { %12465 = vmatprep.subr.mxu1 %v19516_v0  ;;  %12471 = vmatpush3.msra.mxu0 %v190_v14  ;;  %v765_v18 = vand.u32 4294901760, %v764_v10 }
  0x2c   :  { %12466 = vmatpush3.msra.mxu1 %v114_v5  ;;  %12467 = vmatprep.mubr.msk.f32.mxu1 %vm13225_vm0, %v19516_v0 }
  0x2d   :  { %12472 = vmatprep.subr.mxu0 %v19516_v0  ;;  %12468 = vmatmul.mubr.f32.vlgmr.msra.gmra.mxu1 %v151_v13  ;;  %v566_v13 = vld [vmem:[%s19457_s3 + $0x60] sm:$0xff] }
  0x2e   :  { %12473 = vmatpush3.msra.mxu0 %v197_v12  ;;  %12474 = vmatprep.mubr.msk.f32.mxu0 %vm13225_vm0, %v19516_v0  ;;  %v13484_v12 = vand.u32 4294901760, %v570_v61  ;;  %v13513_v30 = vand.u32 4294901760, %v566_v13 }
  0x2f   :  { %12477 = vmatprep.subr.mxu1 %v19516_v0  ;;  %12475 = vmatmul.mubr.f32.vlgmr.msra.gmra.mxu0 %v149_v8 }
  0x30   :  { %12478 = vmatpush3.msra.mxu1 %v111_v7  ;;  %12481 = vmatprep.mubr.msk.f32.mxu1 %vm13225_vm0, %v19516_v0  ;;  %v13473_v7 = vand.u32 4294901760, %v572_v56  ;;  %v13501_v20 = vsub.f32 %v570_v61, %v13484_v12  ;;  %v13532_v51 = vsub.f32 %v566_v13, %v13513_v30  ;;  %v13544_v61 = vand.u32 4294901760, %v563_v33 }
  0x31   :  { %12479 = vmatprep.subr.mxu1 %v19516_v0  ;;  %703 = vmatprep.mubr.f32.mxu0 %v19516_v0 }
  0x32   :  { %12480 = vmatpush3.msra.mxu1 %v114_v5  ;;  %628 = vmatprep.subr.mxu0 %v13366_v24  ;;  %v758_v5 = vsub.f32 %v13430_v49, %v19487_v59  ;;  %v13494_v16 = vsub.f32 %v572_v56, %v13473_v7  ;;  %v19477_v41 = vand.u32 4294901760, %v13501_v20  ;;  %v777_v56 = vand.u32 4294901760, %v776_v37 }
  0x33   :  { %12482 = vmatmul.mubr.f32.vlgmr.msra.gmra.mxu1 %v149_v8  ;;  %630 = vmatpush1.msra.mxu0 %v13369_v26  ;;  %v567_v8 = vld [vmem:[%s19457_s3 + $0x68] sm:$0xff]  ;;  %v13564_v13 = vsub.f32 %v563_v33, %v13544_v61 }
  0x34   :  { %889 = vmatprep.mubr.f32.mxu1 %v19516_v0  ;;  %632 = vmatprep.subr.mxu0 %v13377_v29  ;;  %v759_v14 = vand.u32 4294901760, %v758_v5  ;;  %v13503_v21 = vand.u32 4294901760, %v567_v8  ;;  %v19479_v25 = vand.u32 4294901760, %v13494_v16  ;;  %v555_v33 = vld [vmem:[%s19457_s3 + $0x8] sm:$0xff] }
  0x35   :  { %634 = vmatpush1.msra.mxu0 %v13386_v32  ;;  %730 = vmatprep.subr.mxu1 %v729_v52  ;;  %v13534_v52 = vand.u32 4294901760, %v564_v22 }
  0x36   :  { %636 = vmatprep.subr.mxu0 %v13396_v36  ;;  %736 = vmatpush1.msra.mxu1 %v735_v57  ;;  %v13524_v42 = vsub.f32 %v567_v8, %v13503_v21  ;;  %v782_v46 = vsub.f32 %v13494_v16, %v19479_v25  ;;  %v788_v57 = vsub.f32 %v13501_v20, %v19477_v41  ;;  %v558_v8 = vld [vmem:[%s19457_s3 + $0x20] sm:$0xff] }
  0x37   :  { %638 = vmatpush1.msra.mxu0 %v13406_v40  ;;  %742 = vmatprep.subr.mxu1 %v741_v62  ;;  %v560_v62 = vld [vmem:[%s19457_s3 + $0x30] sm:$0xff]  ;;  %v13554_v5 = vsub.f32 %v564_v22, %v13534_v52 }
  0x38   :  { %640 = vmatprep.subr.mxu0 %v13419_v45  ;;  %748 = vmatpush1.msra.mxu1 %v747_v4  ;;  %v19474_v58 = vand.u32 4294901760, %v13524_v42  ;;  %v783_v63 = vand.u32 4294901760, %v782_v46  ;;  %v19473_v4 = vand.u32 4294901760, %v13532_v51  ;;  %v13576_v37 = vand.u32 4294901760, %v560_v62 }
  0x39   :  { %642 = vmatpush1.msra.mxu0 %v13432_v50  ;;  %754 = vmatprep.subr.mxu1 %v753_v9  ;;  %v789_v9 = vand.u32 4294901760, %v788_v57 }
  0x3a   :  { %644 = vmatprep.subr.mxu0 %v13464_v2  ;;  %760 = vmatpush1.msra.mxu1 %v759_v14  ;;  %v800_v10 = vsub.f32 %v13524_v42, %v19474_v58  ;;  %v13566_v14 = vand.u32 4294901760, %v561_v53  ;;  %v806_v22 = vsub.f32 %v13532_v51, %v19473_v4  ;;  %v13597_v58 = vand.u32 4294901760, %v557_v15 }
  0x3b   :  { %646 = vmatpush1.msra.mxu0 %v13473_v7  ;;  %766 = vmatprep.subr.mxu1 %v765_v18  ;;  %v795_v18 = vand.u32 4294901760, %v794_v3  ;;  %v554_v3 = vld [vmem:[%s19457_s3] sm:$0xff] }
  0x3c   :  { %648 = vmatprep.subr.mxu0 %v13484_v12  ;;  %772 = vmatpush1.msra.mxu1 %v771_v23  ;;  %v19476_v23 = vand.u32 4294901760, %v13554_v5  ;;  %v801_v46 = vand.u32 4294901760, %v800_v10  ;;  %v13583_v57 = vsub.f32 %v561_v53, %v13566_v14  ;;  %v807_v4 = vand.u32 4294901760, %v806_v22 }
  0x3d   :  { %650 = vmatpush1.msra.mxu0 %v13496_v17  ;;  %778 = vmatprep.subr.mxu1 %v777_v56  ;;  %v19478_v56 = vand.u32 4294901760, %v13564_v13  ;;  %v13595_v10 = vsub.f32 %v560_v62, %v13576_v37  ;;  %v13607_v22 = vand.u32 4294901760, %v555_v33  ;;  %v13612_v41 = vsub.f32 %v557_v15, %v13597_v58 }
  0x3e   :  { %652 = vmatprep.subr.mxu0 %v13503_v21  ;;  %784 = vmatpush1.msra.mxu1 %v783_v63  ;;  %v13585_v63 = vand.u32 4294901760, %v558_v8  ;;  %v19481_v47 = vand.u32 4294901760, %v13583_v57 }
  0x3f   :  { %654 = vmatpush1.msra.mxu0 %v13513_v30  ;;  %790 = vmatprep.subr.mxu1 %v789_v9  ;;  %v812_v9 = vsub.f32 %v13554_v5, %v19476_v23  ;;  %v818_v53 = vsub.f32 %v13564_v13, %v19478_v56  ;;  %v19482_v23 = vand.u32 4294901760, %v13595_v10  ;;  %v13622_v19 = vsub.f32 %v555_v33, %v13607_v22 }
  0x40   :  { %656 = vmatprep.subr.mxu0 %v13534_v52  ;;  %796 = vmatpush1.msra.mxu1 %v795_v18  ;;  %v13605_v18 = vsub.f32 %v558_v8, %v13585_v63  ;;  %v824_v8 = vsub.f32 %v13583_v57, %v19481_v47  ;;  %v19486_v15 = vand.u32 4294901760, %v13612_v41 }
  0x41   :  { %658 = vmatpush1.msra.mxu0 %v13544_v61  ;;  %802 = vmatprep.subr.mxu1 %v801_v46  ;;  %v813_v62 = vand.u32 4294901760, %v812_v9  ;;  %v13614_v46 = vand.u32 4294901760, %v554_v3  ;;  %v819_v56 = vand.u32 4294901760, %v818_v53  ;;  %v19489_v47 = vand.u32 4294901760, %v13622_v19 }
  0x42   :  { %660 = vmatprep.subr.mxu0 %v13566_v14  ;;  %808 = vmatpush1.msra.mxu1 %v807_v4  ;;  %v19484_v25 = vand.u32 4294901760, %v13605_v18  ;;  %v830_v4 = vsub.f32 %v13595_v10, %v19482_v23  ;;  %v825_v53 = vand.u32 4294901760, %v824_v8  ;;  %v842_v23 = vsub.f32 %v13612_v41, %v19486_v15 }
  0x43   :  { %662 = vmatpush1.msra.mxu0 %v13576_v37  ;;  %814 = vmatprep.subr.mxu1 %v813_v62  ;;  %v13630_v9 = vsub.f32 %v554_v3, %v13614_v46 }
  0x44   :  { %664 = vmatprep.subr.mxu0 %v13585_v63  ;;  %820 = vmatpush1.msra.mxu1 %v819_v56  ;;  %v836_v33 = vsub.f32 %v13605_v18, %v19484_v25  ;;  %v831_v62 = vand.u32 4294901760, %v830_v4  ;;  %v848_v56 = vsub.f32 %v13622_v19, %v19489_v47  ;;  %v843_v8 = vand.u32 4294901760, %v842_v23 }
  0x45   :  { %666 = vmatpush1.msra.mxu0 %v13597_v58  ;;  %v19493_v3 = vand.u32 4294901760, %v13630_v9  ;;  %826 = vmatprep.subr.mxu1 %v825_v53 }
  0x46   :  { %668 = vmatprep.subr.mxu0 %v13607_v22  ;;  %v837_v6 = vand.u32 4294901760, %v836_v33  ;;  %832 = vmatpush1.msra.mxu1 %v831_v62  ;;  %v849_v4 = vand.u32 4294901760, %v848_v56 }
  0x47   :  { %670 = vmatpush1.msra.mxu0 %v13614_v46  ;;  %v854_v25 = vsub.f32 %v13630_v9, %v19493_v3 }
  0x48   :  { %909 = vmatprep.subr.mxu0 %v13375_v28  ;;  %838 = vmatprep.subr.mxu1 %v837_v6 }
  0x49   :  { %844 = vmatpush1.msra.mxu1 %v843_v8  ;;  %v855_v1 = vand.u32 4294901760, %v854_v25 }
  0x4a   :  { %850 = vmatprep.subr.mxu1 %v849_v4 }
  0x4b   :  { %856 = vmatpush1.msra.mxu1 %v855_v1  ;;  %v11261_v1 = vld [vmem:[%s19456_s2] ss:$0 sm:$0xff] }
  0x4c   :  { %1025 = vmatprep.subr.mxu1 %v13366_v24 }
  0xe5   :  { %v155_v53 = vpop.f32.mrf.mxu0 }
  0xe7   :  { %v12448_v33 = vpop.f32.mrf.mxu0  ;;  %v236_v15 = vpop.f32.mrf.mxu1 }
  0xe8   :  { %v237_v59 = vadd.f32 %v236_v15, %v155_v53 }
  0xe9   :  { %v312_v54 = vpop.f32.mrf.mxu0  ;;  %v12455_v47 = vpop.f32.mrf.mxu1 }
  0xea   :  { %v313_v62 = vadd.f32 %v312_v54, %v237_v59 }
  0xeb   :  { %v12462_v23 = vpop.f32.mrf.mxu0 }
  0xed   :  { %v387_v48 = vpop.f32.mrf.mxu1 }
  0xee   :  { %v388_v43 = vadd.f32 %v387_v48, %v313_v62  ;;  %v586_v62 = vld [vmem:[%s19457_s3 + $0x100] sm:$0x1] }
  0xef   :  { %v464_v38 = vpop.f32.mrf.mxu0  ;;  %v12469_v3 = vpop.f32.mrf.mxu1  ;;  %v615_v23 = vsel %vm78_vm1, %v586_v62, 0  ;;  %v20011_v62 = vand.u32 4294901760, %v13554_v5 }
  0xf0   :  { %v465_v6 = vadd.f32 %v464_v38, %v388_v43 }
  0xf1   :  { %v12476_v56 = vpop.f32.mrf.mxu0 }
  0xf2   :  { %v19999_v56 = vand.u32 4294901760, %v13394_v35 }
  0xf3   :  { %v537_v8 = vpop.f32.mrf.mxu1 }
  0xf4   :  { %v538_v25 = vadd.f32 %v537_v8, %v465_v6  ;;  %v574_v8 = vld [vmem:[%s19457_s3 + $0xa0] sm:$0xff] }
  0xf5   :  { %v12483_v4 = vpop.f32.mrf.mxu1 }
  0xf6   :  { %v548_v33 = vsub.f32 %v538_v25, %v11261_v1  ;;  %v571_v1 = vld [vmem:[%s19457_s3 + $0x88] sm:$0xff]  ;;  %v568_v4 = vld [vmem:[%s19457_s3 + $0x70] sm:$0xff] }
  0xf8   :  { %v549_v34 = vmul.f32 %v548_v33, %v548_v33 }
  0xfa   :  { %v550_v15 = vsub.f32 0.0, %v549_v34 }
  0xfc   :  { %v551_v53 = vmul.f32 0.09467456, %v550_v15  ;;  %v20008_v15 = vand.u32 4294901760, %v13511_v27 }
  0xfe   :  { %v552_v47 = vmul.f32 1.442695, %v551_v53 }
 0x100   :  { %13171 = vpow2.f32 %v552_v47 }
 0x10d   :  { %v13172_v54 = vpop.eup %13171 }
 0x10e   :  { %v606_v48 = vsel %vm604_vm3, %v13172_v54, 0  ;;  %v20010_v54 = vand.u32 4294901760, %v13532_v51 }
 0x10f   :  { %v13652_v59 = vand.u32 4294901760, %v606_v48 }
 0x111   :  { %891 = vmatmul.mubr.f32.vlgmr.msra.gmra.mxu1 %v13652_v59  ;;  %v13656_v38 = vsub.f32 %v606_v48, %v13652_v59 }
 0x112   :  { %1027 = vmatpush1.msra.mxu1 %v13369_v26  ;;  %1100 = vmatprep.mubr.f32.mxu1 %v19516_v0 }
 0x113   :  { %1029 = vmatprep.subr.mxu1 %v13377_v29  ;;  %v13662_v34 = vand.u32 4294901760, %v13656_v38 }
 0x114   :  { %1031 = vmatpush1.msra.mxu1 %v13386_v32 }
 0x115   :  { %1033 = vmatprep.subr.mxu1 %v13396_v36  ;;  %v707_v43 = vsub.f32 %v13656_v38, %v13662_v34 }
 0x116   :  { %1035 = vmatpush1.msra.mxu1 %v13406_v40 }
 0x117   :  { %1037 = vmatprep.subr.mxu1 %v13419_v45  ;;  %v13670_v3 = vand.u32 4294901760, %v707_v43 }
 0x118   :  { %1039 = vmatpush1.msra.mxu1 %v13432_v50 }
 0x119   :  { %1041 = vmatprep.subr.mxu1 %v13464_v2  ;;  %709 = vmatmul.mubr.f32.vlgmr.msra.gmra.mxu0 %v13670_v3 }
 0x11a   :  { %912 = vmatpush1.msra.mxu0 %v13384_v31  ;;  %1043 = vmatpush1.msra.mxu1 %v13473_v7 }
 0x11b   :  { %915 = vmatprep.subr.mxu0 %v13394_v35  ;;  %1045 = vmatprep.subr.mxu1 %v13484_v12  ;;  %v20002_v35 = vand.u32 4294901760, %v13430_v49 }
 0x11c   :  { %918 = vmatpush1.msra.mxu0 %v13404_v39  ;;  %1047 = vmatpush1.msra.mxu1 %v13496_v17 }
 0x11d   :  { %921 = vmatprep.subr.mxu0 %v13417_v44  ;;  %1049 = vmatprep.subr.mxu1 %v13503_v21 }
 0x11e   :  { %924 = vmatpush1.msra.mxu0 %v13430_v49  ;;  %1051 = vmatpush1.msra.mxu1 %v13513_v30  ;;  %v20004_v49 = vand.u32 4294901760, %v13454_v60 }
 0x11f   :  { %927 = vmatprep.subr.mxu0 %v13443_v55  ;;  %1053 = vmatprep.subr.mxu1 %v13534_v52 }
 0x120   :  { %930 = vmatpush1.msra.mxu0 %v13454_v60  ;;  %1055 = vmatpush1.msra.mxu1 %v13544_v61  ;;  %v20006_v60 = vand.u32 4294901760, %v13494_v16 }
 0x121   :  { %933 = vmatprep.subr.mxu0 %v13482_v11  ;;  %1057 = vmatprep.subr.mxu1 %v13566_v14 }
 0x122   :  { %936 = vmatpush1.msra.mxu0 %v13494_v16  ;;  %1059 = vmatpush1.msra.mxu1 %v13576_v37  ;;  %v13810_v16 = vand.u32 4294901760, %v568_v4 }
 0x123   :  { %939 = vmatprep.subr.mxu0 %v13501_v20  ;;  %1061 = vmatprep.subr.mxu1 %v13585_v63 }
 0x124   :  { %942 = vmatpush1.msra.mxu0 %v13511_v27  ;;  %1063 = vmatpush1.msra.mxu1 %v13597_v58 }
 0x125   :  { %945 = vmatprep.subr.mxu0 %v13524_v42  ;;  %1065 = vmatprep.subr.mxu1 %v13607_v22 }
 0x126   :  { %948 = vmatpush1.msra.mxu0 %v13532_v51  ;;  %1067 = vmatpush1.msra.mxu1 %v13614_v46 }
 0x127   :  { %951 = vmatprep.subr.mxu0 %v13554_v5  ;;  %1104 = vmatmul.mubr.f32.vlgmr.msra.gmra.mxu1 %v13662_v34 }
 0x128   :  { %1259 = vmatprep.subr.mxu1 %v13366_v24  ;;  %954 = vmatpush1.msra.mxu0 %v13564_v13  ;;  %v583_v24 = vld [vmem:[%s19457_s3 + $0xe8] sm:$0xff] }
 0x129   :  { %1261 = vmatpush1.msra.mxu1 %v13369_v26  ;;  %957 = vmatprep.subr.mxu0 %v13583_v57  ;;  %v13722_v26 = vand.u32 4294901760, %v615_v23 }
 0x12a   :  { %1263 = vmatprep.subr.mxu1 %v13377_v29  ;;  %960 = vmatpush1.msra.mxu0 %v13595_v10  ;;  %v580_v29 = vld [vmem:[%s19457_s3 + $0xd0] sm:$0xff] }
 0x12b   :  { %1265 = vmatpush1.msra.mxu1 %v13386_v32  ;;  %963 = vmatprep.subr.mxu0 %v13605_v18  ;;  %v13731_v32 = vand.u32 4294901760, %v583_v24  ;;  %v13743_v6 = vsub.f32 %v615_v23, %v13722_v26 }
 0x12c   :  { %1267 = vmatprep.subr.mxu1 %v13396_v36  ;;  %966 = vmatpush1.msra.mxu0 %v13612_v41  ;;  %v19997_v36 = vand.u32 4294901760, %v13375_v28  ;;  %v20000_v28 = vand.u32 4294901760, %v13404_v39 }
 0x12d   :  { %1269 = vmatpush1.msra.mxu1 %v13406_v40  ;;  %969 = vmatprep.subr.mxu0 %v13622_v19  ;;  %v577_v40 = vld [vmem:[%s19457_s3 + $0xb8] sm:$0xff]  ;;  %v1441_v39 = vand.u32 4294901760, %v13743_v6 }
 0x12e   :  { %1271 = vmatprep.subr.mxu1 %v13419_v45  ;;  %972 = vmatpush1.msra.mxu0 %v13630_v9  ;;  %v19998_v45 = vand.u32 4294901760, %v13384_v31  ;;  %v13756_v31 = vand.u32 4294901760, %v577_v40 }
 0x12f   :  { %1005 = vmatprep.mubr.f32.mxu0 %v19516_v0  ;;  %1273 = vmatpush1.msra.mxu1 %v13432_v50  ;;  %v13745_v50 = vand.u32 4294901760, %v580_v29 }
 0x130   :  { %1008 = vmatmul.mubr.f32.vlgmr.msra.gmra.mxu0 %v13656_v38  ;;  %1123 = vmatprep.subr.mxu0 %v19997_v36  ;;  %v13784_v25 = vsub.f32 %v577_v40, %v13756_v31 }
 0x131   :  { %1275 = vmatprep.subr.mxu1 %v13464_v2  ;;  %1127 = vmatpush1.msra.mxu0 %v19998_v45  ;;  %v13754_v2 = vsub.f32 %v583_v24, %v13731_v32  ;;  %v20013_v45 = vand.u32 4294901760, %v13583_v57  ;;  %v20015_v57 = vand.u32 4294901760, %v13605_v18  ;;  %v20018_v18 = vand.u32 4294901760, %v13630_v9 }
 0x132   :  { %1277 = vmatpush1.msra.mxu1 %v13473_v7  ;;  %1131 = vmatprep.subr.mxu0 %v19999_v56  ;;  %v20001_v7 = vand.u32 4294901760, %v13417_v44  ;;  %v13777_v44 = vand.u32 4294901760, %v574_v8  ;;  %v1462_v47 = vand.u32 4294901760, %v13784_v25 }
 0x133   :  { %1279 = vmatprep.subr.mxu1 %v13484_v12  ;;  %1135 = vmatpush1.msra.mxu0 %v20000_v28  ;;  %v13769_v12 = vsub.f32 %v580_v29, %v13745_v50  ;;  %v20012_v29 = vand.u32 4294901760, %v13564_v13  ;;  %v20014_v28 = vand.u32 4294901760, %v13595_v10  ;;  %v20016_v10 = vand.u32 4294901760, %v13612_v41 }
 0x134   :  { %1281 = vmatpush1.msra.mxu1 %v13496_v17  ;;  %1139 = vmatprep.subr.mxu0 %v20001_v7  ;;  %v20003_v17 = vand.u32 4294901760, %v13443_v55  ;;  %v20005_v55 = vand.u32 4294901760, %v13482_v11  ;;  %v20007_v11 = vand.u32 4294901760, %v13501_v20  ;;  %v562_v20 = vld [vmem:[%s19457_s3 + $0x40] sm:$0xff]  ;;  %v1463_v24 = vsub.f32 %v13784_v25, %v1462_v47 }
 0x135   :  { %1283 = vmatprep.subr.mxu1 %v13503_v21  ;;  %1143 = vmatpush1.msra.mxu0 %v20002_v35  ;;  %v1448_v21 = vand.u32 4294901760, %v13754_v2  ;;  %v1455_v33 = vand.u32 4294901760, %v13769_v12  ;;  %v13845_v51 = vand.u32 4294901760, %v562_v20 }
 0x136   :  { %1285 = vmatpush1.msra.mxu1 %v13513_v30  ;;  %1147 = vmatprep.subr.mxu0 %v20003_v17  ;;  %v13792_v30 = vand.u32 4294901760, %v571_v1 }
 0x137   :  { %1287 = vmatprep.subr.mxu1 %v13534_v52  ;;  %1151 = vmatpush1.msra.mxu0 %v20004_v49  ;;  %v1442_v52 = vsub.f32 %v13743_v6, %v1441_v39  ;;  %v1449_v53 = vsub.f32 %v13754_v2, %v1448_v21  ;;  %v1456_v43 = vsub.f32 %v13769_v12, %v1455_v33 }
 0x138   :  { %1289 = vmatpush1.msra.mxu1 %v13544_v61  ;;  %1155 = vmatprep.subr.mxu0 %v20005_v55  ;;  %v565_v61 = vld [vmem:[%s19457_s3 + $0x58] sm:$0xff]  ;;  %v13875_v7 = vsub.f32 %v562_v20, %v13845_v51  ;;  %v20017_v55 = vand.u32 4294901760, %v13622_v19 }
 0x139   :  { %1291 = vmatprep.subr.mxu1 %v13566_v14  ;;  %1159 = vmatpush1.msra.mxu0 %v20006_v60  ;;  %v13808_v14 = vsub.f32 %v574_v8, %v13777_v44  ;;  %v13828_v27 = vand.u32 4294901760, %v565_v61  ;;  %v1443_v48 = vand.u32 4294901760, %v1442_v52  ;;  %v1450_v23 = vand.u32 4294901760, %v1449_v53 }
 0x13a   :  { %1293 = vmatpush1.msra.mxu1 %v13576_v37  ;;  %1163 = vmatprep.subr.mxu0 %v20007_v11  ;;  %v20009_v37 = vand.u32 4294901760, %v13524_v42  ;;  %v559_v42 = vld [vmem:[%s19457_s3 + $0x28] sm:$0xff]  ;;  %v1457_v56 = vand.u32 4294901760, %v1456_v43  ;;  %v19507_v52 = vand.u32 4294901760, %v13875_v7 }
 0x13b   :  { %1295 = vmatprep.subr.mxu1 %v13585_v63  ;;  %1167 = vmatpush1.msra.mxu0 %v20008_v15  ;;  %v13826_v63 = vsub.f32 %v571_v1, %v13792_v30  ;;  %v13861_v5 = vsub.f32 %v565_v61, %v13828_v27  ;;  %v13863_v40 = vand.u32 4294901760, %v559_v42  ;;  %v1464_v1 = vand.u32 4294901760, %v1463_v24  ;;  %v1951_v24 = vld [vmem:[%s19459_s5 + $0xf0] sm:$0xff] }
 0x13c   :  { %1297 = vmatpush1.msra.mxu1 %v13597_v58  ;;  %1171 = vmatprep.subr.mxu0 %v20009_v37  ;;  %v1469_v58 = vand.u32 4294901760, %v13808_v14  ;;  %v1498_v53 = vsub.f32 %v13875_v7, %v19507_v52  ;;  %v1926_v52 = vld [vmem:[%s19459_s5 + $0x28] sm:$0xff] }
 0x13d   :  { %1299 = vmatprep.subr.mxu1 %v13607_v22  ;;  %1175 = vmatpush1.msra.mxu0 %v20010_v54  ;;  %v13843_v22 = vsub.f32 %v568_v4, %v13810_v16  ;;  %v1476_v36 = vand.u32 4294901760, %v13826_v63  ;;  %v1490_v49 = vand.u32 4294901760, %v13861_v5  ;;  %v13889_v4 = vsub.f32 %v559_v42, %v13863_v40 }
 0x13e   :  { %1301 = vmatpush1.msra.mxu1 %v13614_v46  ;;  %1334 = vmatprep.mubr.f32.mxu1 %v19516_v0  ;;  %v556_v46 = vld [vmem:[%s19457_s3 + $0x10] sm:$0xff]  ;;  %v1470_v13 = vsub.f32 %v13808_v14, %v1469_v58 }
 0x13f   :  { %1179 = vmatprep.subr.mxu0 %v20011_v62  ;;  %1336 = vmatmul.mubr.f32.vlgmr.msra.gmra.mxu1 %v13652_v59  ;;  %v1483_v8 = vand.u32 4294901760, %v13843_v22  ;;  %v13877_v35 = vand.u32 4294901760, %v556_v46  ;;  %v1477_v17 = vsub.f32 %v13826_v63, %v1476_v36  ;;  %v1491_v9 = vsub.f32 %v13861_v5, %v1490_v49 }
 0x140   :  { %12509 = vmatprep.subr.mxu1 %v19516_v0  ;;  %1183 = vmatpush1.msra.mxu0 %v20012_v29  ;;  %v1471_v41 = vand.u32 4294901760, %v1470_v13  ;;  %v19505_v11 = vand.u32 4294901760, %v13889_v4  ;;  %v1949_v13 = vld [vmem:[%s19459_s5 + $0xe0] sm:$0xff] }
 0x141   :  { %12510 = vmatpush3.msra.mxu1 %v1443_v48  ;;  %1187 = vmatprep.subr.mxu0 %v20013_v45  ;;  %v1484_v60 = vsub.f32 %v13843_v22, %v1483_v8  ;;  %v13901_v61 = vsub.f32 %v556_v46, %v13877_v35  ;;  %v1478_v19 = vand.u32 4294901760, %v1477_v17  ;;  %v1492_v37 = vand.u32 4294901760, %v1491_v9  ;;  %v1950_v45 = vld [vmem:[%s19459_s5 + $0xe8] sm:$0xff] }
 0x142   :  { %12511 = vmatprep.subr.mxu1 %v19516_v0  ;;  %1191 = vmatpush1.msra.mxu0 %v20014_v28  ;;  %v1505_v54 = vsub.f32 %v13889_v4, %v19505_v11  ;;  %v1499_v48 = vand.u32 4294901760, %v1498_v53  ;;  %v1931_v53 = vld [vmem:[%s19459_s5 + $0x50] sm:$0xff]  ;;  %v1942_v11 = vld [vmem:[%s19459_s5 + $0xa8] sm:$0xff] }
 0x143   :  { %12512 = vmatpush3.msra.mxu1 %v1450_v23  ;;  %1195 = vmatprep.subr.mxu0 %v20015_v57  ;;  %v1485_v15 = vand.u32 4294901760, %v1484_v60  ;;  %v19503_v20 = vand.u32 4294901760, %v13901_v61  ;;  %v1936_v23 = vld [vmem:[%s19459_s5 + $0x78] sm:$0xff]  ;;  %v14038_v57 = vand.u32 4294901760, %v1950_v45 }
 0x144   :  { %12513 = vmatprep.subr.mxu1 %v19516_v0  ;;  %1199 = vmatpush1.msra.mxu0 %v20016_v10  ;;  %v1506_v42 = vand.u32 4294901760, %v1505_v54  ;;  %v14014_v29 = vand.u32 4294901760, %v1936_v23  ;;  %v1946_v54 = vld [vmem:[%s19459_s5 + $0xc8] sm:$0xff] }
 0x145   :  { %12514 = vmatpush3.msra.mxu1 %v1457_v56  ;;  %1203 = vmatprep.subr.mxu0 %v20017_v55  ;;  %v1512_v43 = vsub.f32 %v13901_v61, %v19503_v20  ;;  %v1934_v56 = vld [vmem:[%s19459_s5 + $0x68] sm:$0xff]  ;;  %v1927_v20 = vld [vmem:[%s19459_s5 + $0x30] sm:$0xff] }
 0x146   :  { %12515 = vmatprep.subr.mxu1 %v19516_v0  ;;  %1207 = vmatpush1.msra.mxu0 %v20018_v18  ;;  %v14046_v10 = vsub.f32 %v1936_v23, %v14014_v29  ;;  %v14048_v17 = vand.u32 4294901760, %v1934_v56  ;;  %v14059_v18 = vand.u32 4294901760, %v1949_v13 }
 0x147   :  { %1240 = vmatprep.mubr.f32.mxu0 %v19516_v0  ;;  %12516 = vmatpush3.msra.mxu1 %v1464_v1  ;;  %v1513_v62 = vand.u32 4294901760, %v1512_v43  ;;  %v1933_v1 = vld [vmem:[%s19459_s5 + $0x60] sm:$0xff] }
 0x148   :  { %1242 = vmatmul.mubr.f32.vlgmr.msra.gmra.mxu0 %v13652_v59  ;;  %12484 = vmatprep.subr.mxu0 %v19516_v0 }
 0x149   :  { %12517 = vmatprep.subr.mxu1 %v19516_v0  ;;  %12485 = vmatpush3.msra.mxu0 %v13722_v26 }
 0x14a   :  { %12518 = vmatpush3.msra.mxu1 %v1471_v41  ;;  %12486 = vmatprep.subr.mxu0 %v19516_v0  ;;  %v1932_v41 = vld [vmem:[%s19459_s5 + $0x58] sm:$0xff] }
 0x14b   :  { %12519 = vmatprep.subr.mxu1 %v19516_v0  ;;  %12487 = vmatpush3.msra.mxu0 %v13731_v32 }
 0x14c   :  { %12520 = vmatpush3.msra.mxu1 %v1478_v19  ;;  %12488 = vmatprep.subr.mxu0 %v19516_v0  ;;  %v14069_v19 = vand.u32 4294901760, %v1933_v1 }
 0x14d   :  { %12521 = vmatprep.subr.mxu1 %v19516_v0  ;;  %12489 = vmatpush3.msra.mxu0 %v13745_v50 }
 0x14e   :  { %12522 = vmatpush3.msra.mxu1 %v1485_v15  ;;  %12490 = vmatprep.subr.mxu0 %v19516_v0 }
 0x14f   :  { %12523 = vmatprep.subr.mxu1 %v19516_v0  ;;  %12491 = vmatpush3.msra.mxu0 %v13756_v31 }
 0x150   :  { %12524 = vmatpush3.msra.mxu1 %v1492_v37  ;;  %12492 = vmatprep.subr.mxu0 %v19516_v0  ;;  %v19495_v37 = vand.u32 4294901760, %v14046_v10 }
 0x151   :  { %12525 = vmatprep.subr.mxu1 %v19516_v0  ;;  %12493 = vmatpush3.msra.mxu0 %v13777_v44 }
 0x152   :  { %12526 = vmatpush3.msra.mxu1 %v1499_v48  ;;  %12494 = vmatprep.subr.mxu0 %v19516_v0  ;;  %v14102_v48 = vsub.f32 %v1949_v13, %v14059_v18 }
 0x153   :  { %12527 = vmatprep.subr.mxu1 %v19516_v0  ;;  %12495 = vmatpush3.msra.mxu0 %v13792_v30 }
 0x154   :  { %12528 = vmatpush3.msra.mxu1 %v1506_v42  ;;  %12496 = vmatprep.subr.mxu0 %v19516_v0  ;;  %20024 = vst [vmem:[#allocation13_spill] sm:$0xff] %v14102_v48  ;;  %v1930_v42 = vld [vmem:[%s19459_s5 + $0x48] sm:$0xff] }
 0x155   :  { %12529 = vmatprep.subr.mxu1 %v19516_v0  ;;  %12497 = vmatpush3.msra.mxu0 %v13810_v16  ;;  %v14148_v13 = vand.u32 4294901760, %v1930_v42 }
 0x156   :  { %12530 = vmatpush3.msra.mxu1 %v1513_v62  ;;  %12531 = vmatprep.mubr.msk.f32.mxu1 %vm13225_vm0, %v19516_v0 }
 0x157   :  { %12498 = vmatprep.subr.mxu0 %v19516_v0  ;;  %12532 = vmatmul.mubr.f32.vlgmr.msra.gmra.mxu1 %v13652_v59 }
 0x158   :  { %12559 = vmatprep.subr.mxu1 %v19516_v0  ;;  %12499 = vmatpush3.msra.mxu0 %v13828_v27 }
 0x159   :  { %12560 = vmatpush3.msra.mxu1 %v13722_v26  ;;  %12500 = vmatprep.subr.mxu0 %v19516_v0 }
 0x15a   :  { %12561 = vmatprep.subr.mxu1 %v19516_v0  ;;  %12501 = vmatpush3.msra.mxu0 %v13845_v51 }
 0x15b   :  { %12562 = vmatpush3.msra.mxu1 %v13731_v32  ;;  %12502 = vmatprep.subr.mxu0 %v19516_v0 }
 0x15c   :  { %12563 = vmatprep.subr.mxu1 %v19516_v0  ;;  %12503 = vmatpush3.msra.mxu0 %v13863_v40 }
 0x15d   :  { %12564 = vmatpush3.msra.mxu1 %v13745_v50  ;;  %12504 = vmatprep.subr.mxu0 %v19516_v0 }
 0x15e   :  { %12565 = vmatprep.subr.mxu1 %v19516_v0  ;;  %12505 = vmatpush3.msra.mxu0 %v13877_v35 }
 0x15f   :  { %12506 = vmatprep.mubr.msk.f32.mxu0 %vm13225_vm0, %v19516_v0  ;;  %12566 = vmatpush3.msra.mxu1 %v13756_v31 }
 0x160   :  { %12507 = vmatmul.mubr.f32.vlgmr.msra.gmra.mxu0 %v13670_v3  ;;  %12534 = vmatprep.subr.mxu0 %v19516_v0  ;;  %v1952_v3 = vld [vmem:[%s19459_s5 + $0xf8] sm:$0xff] }
 0x161   :  { %12567 = vmatprep.subr.mxu1 %v19516_v0  ;;  %12535 = vmatpush3.msra.mxu0 %v13743_v6  ;;  %v14007_v46 = vand.u32 4294901760, %v1952_v3  ;;  %v14090_v6 = vsub.f32 %v1934_v56, %v14048_v17 }
 0x162   :  { %12568 = vmatpush3.msra.mxu1 %v13777_v44  ;;  %12536 = vmatprep.subr.mxu0 %v19516_v0 }
 0x163   :  { %12569 = vmatprep.subr.mxu1 %v19516_v0  ;;  %12537 = vmatpush3.msra.mxu0 %v13754_v2  ;;  %20019 = vst [vmem:[#allocation8_spill] sm:$0xff] %v14007_v46  ;;  %20023 = vst [vmem:[#allocation12_spill] sm:$0xff] %v14090_v6  ;;  %v14113_v2 = vsub.f32 %v1933_v1, %v14069_v19  ;;  %v19501_v1 = vand.u32 4294901760, %v14102_v48 }
 0x164   :  { %12570 = vmatpush3.msra.mxu1 %v13792_v30  ;;  %12538 = vmatprep.subr.mxu0 %v19516_v0 }
 0x165   :  { %12571 = vmatprep.subr.mxu1 %v19516_v0  ;;  %12539 = vmatpush3.msra.mxu0 %v13769_v12  ;;  %20025 = vst [vmem:[#allocation14_spill] sm:$0xff] %v14113_v2  ;;  %v14142_v12 = vsub.f32 %v14046_v10, %v19495_v37 }
 0x166   :  { %12572 = vmatpush3.msra.mxu1 %v13810_v16  ;;  %12540 = vmatprep.subr.mxu0 %v19516_v0 }
 0x167   :  { %12573 = vmatprep.subr.mxu1 %v19516_v0  ;;  %12541 = vmatpush3.msra.mxu0 %v13784_v25 }
 0x168   :  { %12574 = vmatpush3.msra.mxu1 %v13828_v27  ;;  %12542 = vmatprep.subr.mxu0 %v19516_v0 }
 0x169   :  { %12575 = vmatprep.subr.mxu1 %v19516_v0  ;;  %12543 = vmatpush3.msra.mxu0 %v13808_v14 }
 0x16a   :  { %12576 = vmatpush3.msra.mxu1 %v13845_v51  ;;  %12544 = vmatprep.subr.mxu0 %v19516_v0 }
 0x16b   :  { %12577 = vmatprep.subr.mxu1 %v19516_v0  ;;  %12545 = vmatpush3.msra.mxu0 %v13826_v63 }
 0x16c   :  { %12578 = vmatpush3.msra.mxu1 %v13863_v40  ;;  %12546 = vmatprep.subr.mxu0 %v19516_v0 }
 0x16d   :  { %12579 = vmatprep.subr.mxu1 %v19516_v0  ;;  %12547 = vmatpush3.msra.mxu0 %v13843_v22 }
 0x16e   :  { %12580 = vmatpush3.msra.mxu1 %v13877_v35  ;;  %12581 = vmatprep.mubr.msk.f32.mxu1 %vm13225_vm0, %v19516_v0 }
 0x16f   :  { %12548 = vmatprep.subr.mxu0 %v19516_v0  ;;  %12582 = vmatmul.mubr.f32.vlgmr.msra.gmra.mxu1 %v13662_v34  ;;  %v1935_v34 = vld [vmem:[%s19459_s5 + $0x70] sm:$0xff] }
 0x170   :  { %12609 = vmatprep.subr.mxu1 %v19516_v0  ;;  %12549 = vmatpush3.msra.mxu0 %v13861_v5  ;;  %v14028_v28 = vand.u32 4294901760, %v1935_v34 }
 0x171   :  { %12610 = vmatpush3.msra.mxu1 %v13722_v26  ;;  %12550 = vmatprep.subr.mxu0 %v19516_v0  ;;  %v14021_v26 = vand.u32 4294901760, %v1951_v24 }
 0x172   :  { %12611 = vmatprep.subr.mxu1 %v19516_v0  ;;  %12551 = vmatpush3.msra.mxu0 %v13875_v7  ;;  %v14067_v60 = vsub.f32 %v1935_v34, %v14028_v28  ;;  %v14132_v34 = vand.u32 4294901760, %v1946_v54 }
 0x173   :  { %12612 = vmatpush3.msra.mxu1 %v13731_v32  ;;  %12552 = vmatprep.subr.mxu0 %v19516_v0  ;;  %v14036_v32 = vsub.f32 %v1952_v3, %v14007_v46  ;;  %v14057_v55 = vsub.f32 %v1951_v24, %v14021_v26  ;;  %v1945_v3 = vld [vmem:[%s19459_s5 + $0xc0] sm:$0xff] }
 0x174   :  { %12613 = vmatprep.subr.mxu1 %v19516_v0  ;;  %12553 = vmatpush3.msra.mxu0 %v13889_v4  ;;  %20021 = vst [vmem:[#allocation10_spill] sm:$0xff] %v14067_v60  ;;  %v19497_v62 = vand.u32 4294901760, %v14067_v60  ;;  %v14162_v37 = vand.u32 4294901760, %v1945_v3 }
 0x175   :  { %12614 = vmatpush3.msra.mxu1 %v13745_v50  ;;  %12554 = vmatprep.subr.mxu0 %v19516_v0  ;;  %20020 = vst [vmem:[#allocation9_spill] sm:$0xff] %v14036_v32  ;;  %v1948_v50 = vld [vmem:[%s19459_s5 + $0xd8] sm:$0xff]  ;;  %v19498_v9 = vand.u32 4294901760, %v14036_v32 }
 0x176   :  { %12615 = vmatprep.subr.mxu1 %v19516_v0  ;;  %12555 = vmatpush3.msra.mxu0 %v13901_v61  ;;  %v14081_v15 = vand.u32 4294901760, %v1948_v50  ;;  %v14169_v25 = vsub.f32 %v14067_v60, %v19497_v62 }
 0x177   :  { %12556 = vmatprep.mubr.msk.f32.mxu0 %vm13225_vm0, %v19516_v0  ;;  %12616 = vmatpush3.msra.mxu1 %v13756_v31  ;;  %v1947_v31 = vld [vmem:[%s19459_s5 + $0xd0] sm:$0xff] }
 0x178   :  { %12557 = vmatmul.mubr.f32.vlgmr.msra.gmra.mxu0 %v13656_v38  ;;  %12584 = vmatprep.subr.mxu0 %v19516_v0  ;;  %v14079_v38 = vsub.f32 %v1950_v45, %v14038_v57  ;;  %v14104_v43 = vand.u32 4294901760, %v1947_v31  ;;  %v14130_v24 = vsub.f32 %v1948_v50, %v14081_v15  ;;  %v1929_v45 = vld [vmem:[%s19459_s5 + $0x40] sm:$0xff]  ;;  %v2092_v63 = vand.u32 4294901760, %v14169_v25 }
 0x179   :  { %12617 = vmatprep.subr.mxu1 %v19516_v0  ;;  %12585 = vmatpush3.msra.mxu0 %v1441_v39  ;;  %v14092_v39 = vand.u32 4294901760, %v1932_v41 }
 0x17a   :  { %20022 = vst [vmem:[#allocation11_spill] sm:$0xff] %v14079_v38  ;;  %12618 = vmatpush3.msra.mxu1 %v13777_v44  ;;  %12586 = vmatprep.subr.mxu0 %v19516_v0  ;;  %v19496_v44 = vand.u32 4294901760, %v14057_v55  ;;  %v19500_v23 = vand.u32 4294901760, %v14079_v38  ;;  %20026 = vst [vmem:[#allocation15_spill] sm:$0xff] %v14130_v24  ;;  %v14160_v50 = vsub.f32 %v1947_v31, %v14104_v43  ;;  %v19504_v62 = vand.u32 4294901760, %v14130_v24 }
 0x17b   :  { %12619 = vmatprep.subr.mxu1 %v19516_v0  ;;  %12587 = vmatpush3.msra.mxu0 %v1448_v21  ;;  %v14115_v21 = vand.u32 4294901760, %v1931_v53  ;;  %v14146_v56 = vsub.f32 %v1932_v41, %v14092_v39 }
 0x17c   :  { %12620 = vmatpush3.msra.mxu1 %v13792_v30  ;;  %12588 = vmatprep.subr.mxu0 %v19516_v0  ;;  %v14126_v30 = vsub.f32 %v14036_v32, %v19498_v9  ;;  %20028 = vst [vmem:[#allocation17_spill] sm:$0xff] %v14160_v50  ;;  %v14184_v31 = vsub.f32 %v14079_v38, %v19500_v23  ;;  %v1928_v23 = vld [vmem:[%s19459_s5 + $0x38] sm:$0xff] }
 0x17d   :  { %12621 = vmatprep.subr.mxu1 %v19516_v0  ;;  %12589 = vmatpush3.msra.mxu0 %v1455_v33  ;;  %v19499_v33 = vand.u32 4294901760, %v14090_v6  ;;  %20027 = vst [vmem:[#allocation16_spill] sm:$0xff] %v14146_v56  ;;  %v14173_v41 = vsub.f32 %v1931_v53, %v14115_v21  ;;  %v14188_v9 = vsub.f32 %v1946_v54, %v14132_v34  ;;  %v2085_v53 = vand.u32 4294901760, %v14142_v12  ;;  %v1944_v54 = vld [vmem:[%s19459_s5 + $0xb8] sm:$0xff] }
 0x17e   :  { %12622 = vmatpush3.msra.mxu1 %v13810_v16  ;;  %12590 = vmatprep.subr.mxu0 %v19516_v0  ;;  %v14156_v16 = vsub.f32 %v14057_v55, %v19496_v44  ;;  %v14175_v44 = vand.u32 4294901760, %v1929_v45  ;;  %v14212_v12 = vsub.f32 %v14102_v48, %v19501_v1  ;;  %v1943_v1 = vld [vmem:[%s19459_s5 + $0xb0] sm:$0xff]  ;;  %v14243_v25 = vsub.f32 %v14130_v24, %v19504_v62 }
 0x17f   :  { %12623 = vmatprep.subr.mxu1 %v19516_v0  ;;  %12591 = vmatpush3.msra.mxu0 %v1462_v47  ;;  %v19502_v47 = vand.u32 4294901760, %v14113_v2  ;;  %20029 = vst [vmem:[#allocation18_spill] sm:$0xff] %v14173_v41  ;;  %20030 = vst [vmem:[#allocation19_spill] sm:$0xff] %v14188_v9  ;;  %v14196_v14 = vsub.f32 %v14090_v6, %v19499_v33  ;;  %v19508_v33 = vand.u32 4294901760, %v14160_v50  ;;  %v14261_v62 = vand.u32 4294901760, %v1928_v23 }
 0x180   :  { %12624 = vmatpush3.msra.mxu1 %v13828_v27  ;;  %12592 = vmatprep.subr.mxu0 %v19516_v0  ;;  %v2197_v27 = vand.u32 4294901760, %v14126_v30  ;;  %v14200_v30 = vsub.f32 %v1930_v42, %v14148_v13  ;;  %v14216_v42 = vsub.f32 %v1945_v3, %v14162_v37  ;;  %v14231_v3 = vsub.f32 %v1929_v45, %v14175_v44 }
 0x181   :  { %12625 = vmatprep.subr.mxu1 %v19516_v0  ;;  %12593 = vmatpush3.msra.mxu0 %v1469_v58  ;;  %v19506_v58 = vand.u32 4294901760, %v14146_v56  ;;  %v14246_v45 = vand.u32 4294901760, %v1944_v54  ;;  %v2099_v22 = vand.u32 4294901760, %v14196_v14  ;;  %v14272_v14 = vsub.f32 %v14160_v50, %v19508_v33  ;;  %v1941_v50 = vld [vmem:[%s19459_s5 + $0xa0] sm:$0xff] }
 0x182   :  { %12626 = vmatpush3.msra.mxu1 %v13845_v51  ;;  %12594 = vmatprep.subr.mxu0 %v19516_v0  ;;  %20031 = vst [vmem:[#allocation20_spill] sm:$0xff] %v14200_v30  ;;  %v2204_v51 = vand.u32 4294901760, %v14156_v16  ;;  %20032 = vst [vmem:[#allocation21_spill] sm:$0xff] %v14216_v42  ;;  %v19511_v16 = vand.u32 4294901760, %v14173_v41  ;;  %v2225_v5 = vand.u32 4294901760, %v14243_v25  ;;  %v20037_v25 = vand.u32 4294901760, %v14200_v30 }
 0x183   :  { %12627 = vmatprep.subr.mxu1 %v19516_v0  ;;  %12595 = vmatpush3.msra.mxu0 %v1476_v36  ;;  %v14227_v36 = vsub.f32 %v14113_v2, %v19502_v47  ;;  %20033 = vst [vmem:[#allocation22_spill] sm:$0xff] %v14231_v3  ;;  %v14291_v47 = vand.u32 4294901760, %v1927_v20  ;;  %v20039_v24 = vmov 0.0   ;;  %v1939_v2 = vld [vmem:[%s19459_s5 + $0x90] sm:$0xff] }
 0x184   :  { %12628 = vmatpush3.msra.mxu1 %v13863_v40  ;;  %12596 = vmatprep.subr.mxu0 %v19516_v0  ;;  %v2211_v40 = vand.u32 4294901760, %v14184_v31  ;;  %v14275_v31 = vand.u32 4294901760, %v1943_v1  ;;  %v14288_v33 = vsub.f32 %v14173_v41, %v19511_v16  ;;  %v14304_v16 = vsub.f32 %v1944_v54, %v14246_v45  ;;  %v1925_v41 = vld [vmem:[%s19459_s5 + $0x20] sm:$0xff] }
 0x185   :  { %12629 = vmatprep.subr.mxu1 %v19516_v0  ;;  %12597 = vmatpush3.msra.mxu0 %v1483_v8  ;;  %v14258_v8 = vsub.f32 %v14146_v56, %v19506_v58  ;;  %v14306_v58 = vand.u32 4294901760, %v1942_v11  ;;  %v20036_v56 = vand.u32 4294901760, %v13875_v7  ;;  %v14320_v54 = vsub.f32 %v1928_v23, %v14261_v62 }
 0x186   :  { %12630 = vmatpush3.msra.mxu1 %v13877_v35  ;;  %12631 = vmatprep.mubr.msk.f32.mxu1 %vm13225_vm0, %v19516_v0  ;;  %v2218_v35 = vand.u32 4294901760, %v14212_v12  ;;  %v2106_v12 = vand.u32 4294901760, %v14227_v36  ;;  %20035 = vst [vmem:[#allocation23_spill] sm:$0xff] %v14304_v16  ;;  %v2232_v7 = vand.u32 4294901760, %v14272_v14  ;;  %v14337_v23 = vand.u32 4294901760, %v1941_v50 }
 0x187   :  { %12598 = vmatprep.subr.mxu0 %v19516_v0  ;;  %12632 = vmatmul.mubr.f32.vlgmr.msra.gmra.mxu1 %v13652_v59  ;;  %20038 = vst [vmem:[#allocation24_spill] sm:$0xff] %v14320_v54  ;;  %v20043_v14 = vand.u32 4294901760, %v14231_v3 }
 0x188   :  { %12599 = vmatpush3.msra.mxu0 %v1490_v49  ;;  %12606 = vmatprep.mubr.msk.f32.mxu0 %vm13225_vm0, %v19516_v0  ;;  %v20034_v49 = vand.u32 4294901760, %v14188_v9 }
 0x189   :  { %12600 = vmatprep.subr.mxu0 %v19516_v0  ;;  %11391 = vmatprep.subr.mxu1 %v2197_v27  ;;  %v2113_v27 = vand.u32 4294901760, %v14258_v8  ;;  %v14322_v0 = vand.u32 4294901760, %v1926_v52  ;;  %v14335_v8 = vsub.f32 %v1943_v1, %v14275_v31  ;;  %v14351_v1 = vsub.f32 %v1927_v20, %v14291_v47  ;;  %v1923_v20 = vld [vmem:[%s19459_s5 + $0x10] sm:$0xff] }
 0x18a   :  { %v14301_v36 = vsub.f32 %v14188_v9, %v20034_v49  ;;  %12601 = vmatpush3.msra.mxu0 %v20036_v56  ;;  %11392 = vmatpush3.msra.mxu1 %v2085_v53  ;;  %v14317_v49 = vsub.f32 %v14200_v30, %v20037_v25  ;;  %v1940_v9 = vld [vmem:[%s19459_s5 + $0x98] sm:$0xff]  ;;  %v20040_v56 = vand.u32 4294901760, %v14216_v42  ;;  %v20042_v30 = vand.u32 4294901760, %v13889_v4 }
 0x18b   :  { %12602 = vmatprep.subr.mxu0 %v20039_v24  ;;  %11393 = vmatprep.subr.mxu1 %v2204_v51  ;;  %20041 = vst [vmem:[#allocation25_spill] sm:$0xff] %v14335_v8  ;;  %v1924_v25 = vld [vmem:[%s19459_s5 + $0x18] sm:$0xff]  ;;  %v2120_v51 = vand.u32 4294901760, %v14288_v33 }
 0x18c   :  { %v14332_v53 = vsub.f32 %v14216_v42, %v20040_v56  ;;  %12603 = vmatpush3.msra.mxu0 %v20042_v30  ;;  %11394 = vmatpush3.msra.mxu1 %v2092_v63  ;;  %v14348_v56 = vsub.f32 %v14231_v3, %v20043_v14  ;;  %v14353_v42 = vand.u32 4294901760, %v1925_v41  ;;  %v2239_v4 = vand.u32 4294901760, %v14301_v36  ;;  %v1921_v3 = vld [vmem:[%s19459_s5] sm:$0xff] }
 0x18d   :  { %12604 = vmatprep.subr.mxu0 %v20039_v24  ;;  %11395 = vmatprep.subr.mxu1 %v2211_v40  ;;  %v14362_v30 = vsub.f32 %v1942_v11, %v14306_v58  ;;  %v14364_v63 = vand.u32 4294901760, %v1940_v9  ;;  %v20044_v14 = vand.u32 4294901760, %v13901_v61  ;;  %v2127_v24 = vand.u32 4294901760, %v14317_v49  ;;  %v1938_v11 = vld [vmem:[%s19459_s5 + $0x88] sm:$0xff] }
 0x18e   :  { %11396 = vmatpush3.msra.mxu1 %v2099_v22  ;;  %v14374_v36 = vsub.f32 %v1926_v52, %v14322_v0  ;;  %v14376_v33 = vand.u32 4294901760, %v1924_v25  ;;  %v2246_v61 = vand.u32 4294901760, %v14332_v53  ;;  %v14385_v49 = vsub.f32 %v1941_v50, %v14337_v23  ;;  %v1922_v52 = vld [vmem:[%s19459_s5 + $0x8] sm:$0xff]  ;;  %v1937_v50 = vld [vmem:[%s19459_s5 + $0x80] sm:$0xff] }
 0x18f   :  { %12605 = vmatpush3.msra.mxu0 %v20044_v14  ;;  %11397 = vmatprep.subr.mxu1 %v2218_v35  ;;  %v14387_v14 = vand.u32 4294901760, %v1939_v2  ;;  %v2134_v40 = vand.u32 4294901760, %v14348_v56  ;;  %v14396_v35 = vsub.f32 %v1925_v41, %v14353_v42  ;;  %v14398_v53 = vand.u32 4294901760, %v1923_v20 }
 0x190   :  { %12607 = vmatmul.mubr.f32.vlgmr.msra.gmra.mxu0 %v13652_v59  ;;  %20045 = vst [vmem:[#allocation26_spill] sm:$0xff] %v14385_v49  ;;  %11398 = vmatpush3.msra.mxu1 %v2106_v12  ;;  %v20047_v12 = vand.u32 4294901760, %v14304_v16  ;;  %v14409_v59 = vsub.f32 %v1940_v9, %v14364_v63  ;;  %v14411_v41 = vand.u32 4294901760, %v1938_v11  ;;  %v14422_v56 = vsub.f32 %v1924_v25, %v14376_v33 }
 0x191   :  { %11356 = vmatprep.subr.mxu0 %v14007_v46  ;;  %20046 = vst [vmem:[#allocation27_spill] sm:$0xff] %v14396_v35  ;;  %11399 = vmatprep.subr.mxu1 %v2225_v5  ;;  %v20049_v5 = vand.u32 4294901760, %v14320_v54  ;;  %v14424_v9 = vand.u32 4294901760, %v1922_v52  ;;  %v14432_v38 = vsub.f32 %v1939_v2, %v14387_v14  ;;  %v20053_v25 = vand.u32 4294901760, %v14351_v1 }
 0x192   :  { %11357 = vmatpush3.msra.mxu0 %v14014_v29  ;;  %v2252_v22 = vsub.f32 %v14304_v16, %v20047_v12  ;;  %20048 = vst [vmem:[#allocation28_spill] sm:$0xff] %v14409_v59  ;;  %11400 = vmatpush3.msra.mxu1 %v2113_v27  ;;  %20050 = vst [vmem:[#allocation29_spill] sm:$0xff] %v14422_v56  ;;  %v20051_v16 = vand.u32 4294901760, %v14335_v8  ;;  %v20055_v6 = vand.u32 4294901760, %v14362_v30 }
 0x193   :  { %11358 = vmatprep.subr.mxu0 %v14021_v26  ;;  %v2140_v48 = vsub.f32 %v14320_v54, %v20049_v5  ;;  %11401 = vmatprep.subr.mxu1 %v2232_v7  ;;  %20052 = vst [vmem:[#allocation30_spill] sm:$0xff] %v14432_v38  ;;  %v14434_v5 = vand.u32 4294901760, %v1937_v50  ;;  %v2147_v7 = vsub.f32 %v14351_v1, %v20053_v25  ;;  %v20057_v25 = vand.u32 4294901760, %v14374_v36 }
 0x194   :  { %11359 = vmatpush3.msra.mxu0 %v14028_v28  ;;  %v2259_v27 = vsub.f32 %v14335_v8, %v20051_v16  ;;  %11402 = vmatpush3.msra.mxu1 %v2120_v51  ;;  %v14442_v54 = vsub.f32 %v1923_v20, %v14398_v53  ;;  %v14444_v16 = vand.u32 4294901760, %v1921_v3  ;;  %v2253_v2 = vand.u32 4294901760, %v2252_v22 }
 0x195   :  { %11360 = vmatprep.subr.mxu0 %v14038_v57  ;;  %11403 = vmatprep.subr.mxu1 %v2239_v4  ;;  %v2266_v51 = vsub.f32 %v14362_v30, %v20055_v6  ;;  %v14452_v60 = vsub.f32 %v1938_v11, %v14411_v41  ;;  %v2141_v20 = vand.u32 4294901760, %v2140_v48  ;;  %v2154_v4 = vsub.f32 %v14374_v36, %v20057_v25 }
 0x196   :  { %20054 = vst [vmem:[#allocation31_spill] sm:$0xff] %v14442_v54  ;;  %11361 = vmatpush3.msra.mxu0 %v14048_v17  ;;  %11404 = vmatpush3.msra.mxu1 %v2127_v24  ;;  %v14460_v22 = vsub.f32 %v1922_v52, %v14424_v9  ;;  %v2260_v6 = vand.u32 4294901760, %v2259_v27  ;;  %v20059_v11 = vand.u32 4294901760, %v14385_v49  ;;  %v14468_v48 = vsub.f32 %v1937_v50, %v14434_v5 }
 0x197   :  { %20056 = vst [vmem:[#allocation32_spill] sm:$0xff] %v14452_v60  ;;  %11362 = vmatprep.subr.mxu0 %v14059_v18  ;;  %11405 = vmatprep.subr.mxu1 %v2246_v61  ;;  %v2148_v25 = vand.u32 4294901760, %v2147_v7  ;;  %v20061_v52 = vand.u32 4294901760, %v14396_v35  ;;  %v14476_v27 = vsub.f32 %v1921_v3, %v14444_v16  ;;  %v20063_v50 = vand.u32 4294901760, %v14409_v59 }
 0x198   :  { %20058 = vst [vmem:[#allocation33_spill] sm:$0xff] %v14460_v22  ;;  %11363 = vmatpush3.msra.mxu0 %v14069_v19  ;;  %v2273_v24 = vsub.f32 %v14385_v49, %v20059_v11  ;;  %20060 = vst [vmem:[#allocation34_spill] sm:$0xff] %v14468_v48  ;;  %11406 = vmatpush3.msra.mxu1 %v2134_v40  ;;  %v2267_v11 = vand.u32 4294901760, %v2266_v51  ;;  %v2155_v7 = vand.u32 4294901760, %v2154_v4  ;;  %v20065_v51 = vand.u32 4294901760, %v14432_v38 }
 0x199   :  { %11364 = vmatprep.subr.mxu0 %v14081_v15  ;;  %v2161_v61 = vsub.f32 %v14396_v35, %v20061_v52  ;;  %20062 = vst [vmem:[#allocation35_spill] sm:$0xff] %v14476_v27  ;;  %11407 = vmatprep.subr.mxu1 %v2253_v2  ;;  %v2280_v40 = vsub.f32 %v14409_v59, %v20063_v50  ;;  %v20064_v52 = vand.u32 4294901760, %v14422_v56  ;;  %v20066_v4 = vand.u32 4294901760, %v14442_v54 }
 0x19a   :  { %11365 = vmatpush3.msra.mxu0 %v14092_v39  ;;  %11408 = vmatpush3.msra.mxu1 %v2141_v20  ;;  %v2274_v2 = vand.u32 4294901760, %v2273_v24  ;;  %v2287_v50 = vsub.f32 %v14432_v38, %v20065_v51  ;;  %v19545_v3 = vand.u32 4294901760, %v14476_v27  ;;  %v20067_v24 = vand.u32 4294901760, %v14452_v60 }
 0x19b   :  { %11366 = vmatprep.subr.mxu0 %v14104_v43  ;;  %v2168_v12 = vsub.f32 %v14422_v56, %v20064_v52  ;;  %11409 = vmatprep.subr.mxu1 %v2260_v6  ;;  %v2162_v20 = vand.u32 4294901760, %v2161_v61  ;;  %v2175_v52 = vsub.f32 %v14442_v54, %v20066_v4  ;;  %v2281_v6 = vand.u32 4294901760, %v2280_v40 }
 0x19c   :  { %11367 = vmatpush3.msra.mxu0 %v14115_v21  ;;  %11410 = vmatpush3.msra.mxu1 %v2148_v25  ;;  %v2294_v51 = vsub.f32 %v14452_v60, %v20067_v24  ;;  %v20068_v61 = vand.u32 4294901760, %v14460_v22  ;;  %v2288_v4 = vand.u32 4294901760, %v2287_v50 }
 0x19d   :  { %11368 = vmatprep.subr.mxu0 %v14132_v34  ;;  %11411 = vmatprep.subr.mxu1 %v2267_v11  ;;  %v2169_v25 = vand.u32 4294901760, %v2168_v12  ;;  %v20069_v11 = vand.u32 4294901760, %v14468_v48  ;;  %v2176_v24 = vand.u32 4294901760, %v2175_v52  ;;  %v2189_v12 = vsub.f32 %v14476_v27, %v19545_v3 }
 0x19e   :  { %11369 = vmatpush3.msra.mxu0 %v14148_v13  ;;  %11412 = vmatpush3.msra.mxu1 %v2155_v7  ;;  %v2182_v8 = vsub.f32 %v14460_v22, %v20068_v61  ;;  %v2295_v7 = vand.u32 4294901760, %v2294_v51  ;;  %v14539_v51 = vld [vmem:[%s19458_s4] sm:$0x7] }
 0x19f   :  { %11370 = vmatprep.subr.mxu0 %v14162_v37  ;;  %11413 = vmatprep.subr.mxu1 %v2274_v2  ;;  %v2301_v40 = vsub.f32 %v14468_v48, %v20069_v11  ;;  %20072 = vst [vmem:[#allocation38_spill] sm:$0xff] %v14539_v51 }
 0x1a0   :  { %11371 = vmatpush3.msra.mxu0 %v14175_v44  ;;  %11414 = vmatpush3.msra.mxu1 %v2162_v20  ;;  %v2183_v2 = vand.u32 4294901760, %v2182_v8  ;;  %v2190_v20 = vand.u32 4294901760, %v2189_v12  ;;  %v589_v8 = vlaneseq }
 0x1a1   :  { %11372 = vmatprep.subr.mxu0 %v14246_v45  ;;  %11415 = vmatprep.subr.mxu1 %v2281_v6  ;;  %v2302_v50 = vand.u32 4294901760, %v2301_v40 }
 0x1a2   :  { %11373 = vmatpush3.msra.mxu0 %v14261_v62  ;;  %11416 = vmatpush3.msra.mxu1 %v2169_v25  ;;  %v14531_v52 = vshrl.u32 %v589_v8, 7 }
 0x1a3   :  { %11374 = vmatprep.subr.mxu0 %v14275_v31  ;;  %11417 = vmatprep.subr.mxu1 %v2288_v4 }
 0x1a4   :  { %11375 = vmatpush3.msra.mxu0 %v14291_v47  ;;  %11418 = vmatpush3.msra.mxu1 %v2176_v24  ;;  %20070 = vst [vmem:[#allocation36_spill] sm:$0xff] %v14531_v52  ;;  %v14534_v6 = vsub.s32 0, %v14531_v52  ;;  %v14542_v25 = vsub.s32 1, %v14531_v52 }
 0x1a5   :  { %11376 = vmatprep.subr.mxu0 %v14306_v58  ;;  %11419 = vmatprep.subr.mxu1 %v2295_v7 }
 0x1a6   :  { %11377 = vmatpush3.msra.mxu0 %v14322_v0  ;;  %11420 = vmatpush3.msra.mxu1 %v2183_v2  ;;  %20071 = vst [vmem:[#allocation37_spill] sm:$0xff] %v14534_v6  ;;  %20073 = vst [vmem:[#allocation39_spill] sm:$0xff] %v14542_v25  ;;  %v592_v4 = vrot.slane %v14539_v51, %v14534_v6  ;;  %v596_v11 = vrot.slane %v14539_v51, %v14542_v25 }
 0x1a7   :  { %11378 = vmatprep.subr.mxu0 %v14337_v23  ;;  %11421 = vmatprep.subr.mxu1 %v2302_v50 }
 0x1a8   :  { %11379 = vmatpush3.msra.mxu0 %v14353_v42  ;;  %11422 = vmatpush3.msra.mxu1 %v2190_v20 }
 0x1a9   :  { %11380 = vmatprep.subr.mxu0 %v14364_v63  ;;  %11461 = vmatprep.subr.mxu1 %v14007_v46 }
 0x1aa   :  { %11381 = vmatpush3.msra.mxu0 %v14376_v33 }
 0x1ab   :  { %11382 = vmatprep.subr.mxu0 %v14387_v14 }
 0x1ac   :  { %11383 = vmatpush3.msra.mxu0 %v14398_v53 }
 0x1ad   :  { %11384 = vmatprep.subr.mxu0 %v14411_v41 }
 0x1ae   :  { %11385 = vmatpush3.msra.mxu0 %v14424_v9 }
 0x1af   :  { %11386 = vmatprep.subr.mxu0 %v14434_v5 }
 0x1b0   :  { %11387 = vmatpush3.msra.mxu0 %v14444_v16 }
 0x1b1   :  { %11426 = vmatprep.subr.mxu0 %v14036_v32 }
 0x1d1   :  { %v892_v40 = vpop.f32.mrf.mxu1 }
 0x1d3   :  { %v894_v50 = vpop.f32.mrf.mxu1 }
 0x1d9   :  { %v710_v61 = vpop.f32.mrf.mxu0 }
 0x1da   :  { %v711_v12 = vadd.f32 %v710_v61, %v592_v4 }
 0x1db   :  { %v712_v24 = vpop.f32.mrf.mxu0 }
 0x1dc   :  { %v713_v2 = vadd.f32 %v712_v24, %v596_v11  ;;  %v893_v20 = vadd.f32 %v892_v40, %v711_v12 }
 0x1de   :  { %v895_v27 = vadd.f32 %v894_v50, %v713_v2  ;;  %v20086_v2 = vld [vmem:[#allocation14_spill] sm:$0xff]  ;;  %v20087_v50 = vld [vmem:[#allocation15_spill] sm:$0xff] }
 0x1e7   :  { %v1105_v8 = vpop.f32.mrf.mxu1 }
 0x1e9   :  { %v1107_v48 = vpop.f32.mrf.mxu1 }
 0x1f0   :  { %v1009_v7 = vpop.f32.mrf.mxu0 }
 0x1f1   :  { %v1010_v32 = vadd.f32 %v1009_v7, %v893_v20  ;;  %v20085_v7 = vld [vmem:[#allocation13_spill] sm:$0xff]  ;;  %v20088_v20 = vld [vmem:[#allocation16_spill] sm:$0xff] }
 0x1f2   :  { %v1011_v3 = vpop.f32.mrf.mxu0 }
 0x1f3   :  { %v1012_v52 = vadd.f32 %v1011_v3, %v895_v27  ;;  %v1106_v22 = vadd.f32 %v1105_v8, %v1010_v32  ;;  %v20082_v3 = vld [vmem:[#allocation10_spill] sm:$0xff]  ;;  %v20089_v8 = vld [vmem:[#allocation17_spill] sm:$0xff] }
 0x1f5   :  { %v1108_v38 = vadd.f32 %v1107_v48, %v1012_v52 }
 0x1ff   :  { %v1337_v60 = vpop.f32.mrf.mxu1 }
 0x201   :  { %v1339_v46 = vpop.f32.mrf.mxu1 }
 0x208   :  { %v1243_v54 = vpop.f32.mrf.mxu0 }
 0x209   :  { %v1244_v6 = vadd.f32 %v1243_v54, %v1106_v22 }
 0x20a   :  { %v1245_v56 = vpop.f32.mrf.mxu0 }
 0x20b   :  { %v1338_v25 = vadd.f32 %v1337_v60, %v1244_v6  ;;  %v1246_v51 = vadd.f32 %v1245_v56, %v1108_v38  ;;  %v20083_v6 = vld [vmem:[#allocation11_spill] sm:$0xff] }
 0x20d   :  { %v1918_v61 = vmax.f32 %v1338_v25, 0.0  ;;  %v1340_v4 = vadd.f32 %v1339_v46, %v1246_v51  ;;  %v20084_v51 = vld [vmem:[#allocation12_spill] sm:$0xff] }
 0x20f   :  { %v14548_v11 = vand.u32 4294901760, %v1918_v61  ;;  %v1919_v40 = vmax.f32 %v1340_v4, 0.0  ;;  %v20091_v4 = vld [vmem:[#allocation19_spill] sm:$0xff] }
 0x211   :  { %20074 = vst [vmem:[#allocation40_spill] sm:$0xff] %v14548_v11  ;;  %v14551_v24 = vsub.f32 %v1918_v61, %v14548_v11  ;;  %v14553_v12 = vand.u32 4294901760, %v1919_v40  ;;  %v20090_v61 = vld [vmem:[#allocation18_spill] sm:$0xff] }
 0x213   :  { %20075 = vst [vmem:[#allocation41_spill] sm:$0xff] %v14551_v24  ;;  %20076 = vst [vmem:[#allocation42_spill] sm:$0xff] %v14553_v12  ;;  %v14556_v32 = vsub.f32 %v1919_v40, %v14553_v12  ;;  %2305 = vmatprep.mubr.f32.mxu1 %v14553_v12  ;;  %v14560_v54 = vand.u32 4294901760, %v14551_v24  ;;  %v20092_v40 = vld [vmem:[#allocation20_spill] sm:$0xff] }
 0x214   :  { %2307 = vmatmul.mubr.f32.vlgmr.msra.gmra.mxu1 %v14548_v11  ;;  %v20100_v11 = vld [vmem:[#allocation30_spill] sm:$0xff] }
 0x215   :  { %20077 = vst [vmem:[#allocation43_spill] sm:$0xff] %v14556_v32  ;;  %20078 = vst [vmem:[#allocation44_spill] sm:$0xff] %v14560_v54  ;;  %11462 = vmatpush3.msra.mxu1 %v14014_v29  ;;  %v14565_v46 = vand.u32 4294901760, %v14556_v32  ;;  %v2073_v60 = vsub.f32 %v14551_v24, %v14560_v54 }
 0x216   :  { %11463 = vmatprep.subr.mxu1 %v14021_v26 }
 0x217   :  { %20079 = vst [vmem:[#allocation45_spill] sm:$0xff] %v14565_v46  ;;  %v14570_v38 = vpop.f32.mrf.mxu1  ;;  %11464 = vmatpush3.msra.mxu1 %v14028_v28  ;;  %2549 = vmatprep.mubr.f32.mxu1 %v14565_v46  ;;  %v2067_v56 = vsub.f32 %v14556_v32, %v14565_v46  ;;  %v14581_v27 = vand.u32 4294901760, %v2073_v60  ;;  %v20093_v60 = vld [vmem:[#allocation21_spill] sm:$0xff] }
 0x218   :  { %11465 = vmatprep.subr.mxu1 %v14038_v57 }
 0x219   :  { %v12533_v22 = vpop.f32.mrf.mxu1  ;;  %11466 = vmatpush3.msra.mxu1 %v14048_v17  ;;  %v14578_v48 = vand.u32 4294901760, %v2067_v56  ;;  %20081 = vst [vmem:[#allocation47_spill] sm:$0xff] %v14581_v27  ;;  %v20094_v56 = vld [vmem:[#allocation22_spill] sm:$0xff] }
 0x21a   :  { %11467 = vmatprep.subr.mxu1 %v14059_v18  ;;  %v20095_v22 = vld [vmem:[#allocation23_spill] sm:$0xff] }
 0x21b   :  { %20080 = vst [vmem:[#allocation46_spill] sm:$0xff] %v14578_v48  ;;  %11468 = vmatpush3.msra.mxu1 %v14069_v19  ;;  %2069 = vmatprep.mubr.f32.mxu0 %v14578_v48  ;;  %v20098_v48 = vld [vmem:[#allocation8_spill] sm:$0xff] }
 0x21c   :  { %11469 = vmatprep.subr.mxu1 %v14081_v15  ;;  %2075 = vmatmul.mubr.f32.vlgmr.msra.gmra.mxu0 %v14581_v27 }
 0x21d   :  { %11427 = vmatpush3.msra.mxu0 %v14046_v10  ;;  %11470 = vmatpush3.msra.mxu1 %v14092_v39 }
 0x21e   :  { %11428 = vmatprep.subr.mxu0 %v14057_v55  ;;  %2442 = vmatprep.mubr.f32.mxu0 %v14556_v32  ;;  %v20097_v32 = vld [vmem:[#allocation25_spill] sm:$0xff] }
 0x21f   :  { %11471 = vmatprep.subr.mxu1 %v14104_v43  ;;  %11429 = vmatpush3.msra.mxu0 %v20082_v3 }
 0x220   :  { %v14593_v52 = vpop.f32.mrf.mxu0  ;;  %11472 = vmatpush3.msra.mxu1 %v14115_v21  ;;  %11430 = vmatprep.subr.mxu0 %v20083_v6 }
 0x221   :  { %11473 = vmatprep.subr.mxu1 %v14132_v34  ;;  %11431 = vmatpush3.msra.mxu0 %v20084_v51 }
 0x222   :  { %v12508_v25 = vpop.f32.mrf.mxu0  ;;  %11474 = vmatpush3.msra.mxu1 %v14148_v13  ;;  %11432 = vmatprep.subr.mxu0 %v20085_v7 }
 0x223   :  { %11475 = vmatprep.subr.mxu1 %v14162_v37  ;;  %11433 = vmatpush3.msra.mxu0 %v20086_v2  ;;  %v20096_v25 = vld [vmem:[#allocation24_spill] sm:$0xff] }
 0x224   :  { %11476 = vmatpush3.msra.mxu1 %v14175_v44  ;;  %11434 = vmatprep.subr.mxu0 %v20087_v50 }
 0x225   :  { %11477 = vmatprep.subr.mxu1 %v14246_v45  ;;  %11435 = vmatpush3.msra.mxu0 %v20088_v20 }
 0x226   :  { %11478 = vmatpush3.msra.mxu1 %v14261_v62  ;;  %11436 = vmatprep.subr.mxu0 %v20089_v8 }
 0x227   :  { %11479 = vmatprep.subr.mxu1 %v14275_v31  ;;  %11437 = vmatpush3.msra.mxu0 %v20090_v61 }
 0x228   :  { %11480 = vmatpush3.msra.mxu1 %v14291_v47  ;;  %11438 = vmatprep.subr.mxu0 %v20091_v4 }
 0x229   :  { %11481 = vmatprep.subr.mxu1 %v14306_v58  ;;  %11439 = vmatpush3.msra.mxu0 %v20092_v40 }
 0x22a   :  { %11482 = vmatpush3.msra.mxu1 %v14322_v0  ;;  %11440 = vmatprep.subr.mxu0 %v20093_v60 }
 0x22b   :  { %11483 = vmatprep.subr.mxu1 %v14337_v23  ;;  %11441 = vmatpush3.msra.mxu0 %v20094_v56 }
 0x22c   :  { %11484 = vmatpush3.msra.mxu1 %v14353_v42  ;;  %11442 = vmatprep.subr.mxu0 %v20095_v22 }
 0x22d   :  { %11485 = vmatprep.subr.mxu1 %v14364_v63  ;;  %11443 = vmatpush3.msra.mxu0 %v20096_v25 }
 0x22e   :  { %11486 = vmatpush3.msra.mxu1 %v14376_v33  ;;  %11444 = vmatprep.subr.mxu0 %v20097_v32 }
 0x22f   :  { %v14625_v27 = vpop.f32.mrf.mxu1  ;;  %11487 = vmatprep.subr.mxu1 %v14387_v14  ;;  %11445 = vmatpush3.msra.mxu0 %v14351_v1 }
 0x230   :  { %11488 = vmatpush3.msra.mxu1 %v14398_v53  ;;  %11446 = vmatprep.subr.mxu0 %v14362_v30 }
 0x231   :  { %v12583_v46 = vpop.f32.mrf.mxu1  ;;  %11489 = vmatprep.subr.mxu1 %v14411_v41  ;;  %11447 = vmatpush3.msra.mxu0 %v14374_v36 }
 0x232   :  { %11490 = vmatpush3.msra.mxu1 %v14424_v9  ;;  %11448 = vmatprep.subr.mxu0 %v14385_v49  ;;  %v20099_v46 = vld [vmem:[#allocation29_spill] sm:$0xff] }
 0x233   :  { %11491 = vmatprep.subr.mxu1 %v14434_v5  ;;  %11449 = vmatpush3.msra.mxu0 %v14396_v35  ;;  %v20101_v35 = vld [vmem:[#allocation31_spill] sm:$0xff] }
 0x234   :  { %11492 = vmatpush3.msra.mxu1 %v14444_v16  ;;  %11450 = vmatprep.subr.mxu0 %v14409_v59  ;;  %v20102_v59 = vld [vmem:[#allocation32_spill] sm:$0xff] }
 0x235   :  { %2553 = vmatmul.mubr.f32.vlgmr.msra.gmra.mxu1 %v14560_v54  ;;  %11531 = vmatprep.subr.mxu1 %v20098_v48  ;;  %v20103_v48 = vld [vmem:[#allocation33_spill] sm:$0xff] }
 0x236   :  { %11451 = vmatpush3.msra.mxu0 %v20099_v46  ;;  %11532 = vmatpush3.msra.mxu1 %v14014_v29  ;;  %v20104_v29 = vld [vmem:[#allocation34_spill] sm:$0xff]  ;;  %v20105_v46 = vld [vmem:[#allocation36_spill] sm:$0xff] }
 0x237   :  { %2823 = vmatprep.mubr.f32.mxu1 %v14553_v12  ;;  %11452 = vmatprep.subr.mxu0 %v20100_v11  ;;  %v14654_v11 = vsub.s32 2, %v20105_v46 }
 0x238   :  { %v1644_v49 = vpop.f32.mrf.mxu0  ;;  %11533 = vmatprep.subr.mxu1 %v14021_v26  ;;  %11453 = vmatpush3.msra.mxu0 %v20101_v35  ;;  %v20107_v26 = vld [vmem:[#allocation35_spill] sm:$0xff] }
 0x239   :  { %11534 = vmatpush3.msra.mxu1 %v14028_v28  ;;  %11454 = vmatprep.subr.mxu0 %v20102_v59  ;;  %20106 = vst [vmem:[#allocation10_spill] sm:$0xff] %v14654_v11  ;;  %v20108_v28 = vld [vmem:[#allocation9_spill] sm:$0xff] }
 0x23a   :  { %v12558_v54 = vpop.f32.mrf.mxu0  ;;  %11535 = vmatprep.subr.mxu1 %v14038_v57  ;;  %11455 = vmatpush3.msra.mxu0 %v20103_v48  ;;  %v20110_v57 = vand.u32 4294901760, %v14046_v10  ;;  %v1956_v10 = vld [vmem:[%s19459_s5 + $0x118] sm:$0xff] }
 0x23b   :  { %11536 = vmatpush3.msra.mxu1 %v14048_v17  ;;  %11456 = vmatprep.subr.mxu0 %v20104_v29  ;;  %v20109_v54 = vand.u32 4294901760, %v20108_v28  ;;  %v20111_v17 = vld [vmem:[#allocation38_spill] sm:$0xff] }
 0x23c   :  { %11537 = vmatprep.subr.mxu1 %v14059_v18  ;;  %11457 = vmatpush3.msra.mxu0 %v20107_v26  ;;  %v600_v46 = vrot.slane %v20111_v17, %v14654_v11  ;;  %v20112_v18 = vand.u32 4294901760, %v14057_v55  ;;  %v1955_v55 = vld [vmem:[%s19459_s5 + $0x110] sm:$0xff] }
 0x23d   :  { %11538 = vmatpush3.msra.mxu1 %v14069_v19  ;;  %2445 = vmatmul.mubr.f32.vlgmr.msra.gmra.mxu0 %v14551_v24  ;;  %v20113_v19 = vand.u32 4294901760, %v20082_v3  ;;  %v20116_v3 = vand.u32 4294901760, %v20085_v7  ;;  %v20119_v7 = vand.u32 4294901760, %v20088_v20  ;;  %v20121_v20 = vand.u32 4294901760, %v20090_v61 }
 0x23e   :  { %11496 = vmatprep.subr.mxu0 %v20109_v54  ;;  %11539 = vmatprep.subr.mxu1 %v14081_v15  ;;  %v20114_v15 = vand.u32 4294901760, %v20083_v6  ;;  %v1954_v6 = vld [vmem:[%s19459_s5 + $0x108] sm:$0xff]  ;;  %v20125_v61 = vand.u32 4294901760, %v20094_v56 }
 0x23f   :  { %11497 = vmatpush3.msra.mxu0 %v20110_v57  ;;  %2719 = vmatprep.mubr.f32.mxu0 %v14553_v12  ;;  %v14716_v28 = vand.u32 4294901760, %v1954_v6  ;;  %v20123_v57 = vand.u32 4294901760, %v20092_v40 }
 0x240   :  { %11540 = vmatpush3.msra.mxu1 %v14092_v39  ;;  %11498 = vmatprep.subr.mxu0 %v20112_v18  ;;  %v20115_v39 = vand.u32 4294901760, %v20084_v51  ;;  %v20132_v18 = vld [vmem:[#allocation26_spill] sm:$0xff] }
 0x241   :  { %11541 = vmatprep.subr.mxu1 %v14104_v43  ;;  %11499 = vmatpush3.msra.mxu0 %v20113_v19  ;;  %v1425_v43 = vadd.f32 %v14593_v52, %v600_v46  ;;  %v20118_v52 = vand.u32 4294901760, %v20087_v50 }
 0x242   :  { %11542 = vmatpush3.msra.mxu1 %v14115_v21  ;;  %11500 = vmatprep.subr.mxu0 %v20114_v15  ;;  %v14690_v21 = vand.u32 4294901760, %v1956_v10 }
 0x243   :  { %11543 = vmatprep.subr.mxu1 %v14132_v34  ;;  %11501 = vmatpush3.msra.mxu0 %v20115_v39  ;;  %v20117_v34 = vand.u32 4294901760, %v20086_v2  ;;  %v1551_v2 = vadd.f32 %v14570_v38, %v1425_v43  ;;  %v20122_v38 = vand.u32 4294901760, %v20091_v4  ;;  %v20126_v4 = vand.u32 4294901760, %v20095_v22 }
 0x244   :  { %11544 = vmatpush3.msra.mxu1 %v14148_v13  ;;  %11502 = vmatprep.subr.mxu0 %v20116_v3  ;;  %v14701_v13 = vand.u32 4294901760, %v1955_v55  ;;  %v14714_v50 = vsub.f32 %v1956_v10, %v14690_v21  ;;  %v20134_v10 = vld [vmem:[#allocation27_spill] sm:$0xff]  ;;  %v20139_v3 = vld [vmem:[#allocation40_spill] sm:$0xff] }
 0x245   :  { %11545 = vmatprep.subr.mxu1 %v14162_v37  ;;  %11503 = vmatpush3.msra.mxu0 %v20117_v34  ;;  %v1953_v37 = vld [vmem:[%s19459_s5 + $0x100] sm:$0xff]  ;;  %v1645_v54 = vadd.f32 %v1644_v49, %v1551_v2  ;;  %v14737_v49 = vsub.f32 %v1954_v6, %v14716_v28  ;;  %v20135_v15 = vand.u32 4294901760, %v20134_v10  ;;  %v20141_v34 = vld [vmem:[#allocation29_spill] sm:$0xff]  ;;  %s13227_s5 = smov 64  }
 0x246   :  { %11546 = vmatpush3.msra.mxu1 %v14175_v44  ;;  %11504 = vmatprep.subr.mxu0 %v20118_v52  ;;  %v20120_v44 = vand.u32 4294901760, %v20089_v8  ;;  %v14727_v8 = vand.u32 4294901760, %v1953_v37  ;;  %v20142_v6 = vand.u32 4294901760, %v20141_v34  ;;  %v3319_v34 = vld [vmem:[#allocation2 + $0x18] sm:$0xff] }
 0x247   :  { %v1914_v51 = vpop.f32.mrf.mxu1  ;;  %11547 = vmatprep.subr.mxu1 %v14246_v45  ;;  %11505 = vmatpush3.msra.mxu0 %v20119_v7  ;;  %v2950_v22 = vand.u32 4294901760, %v14737_v49  ;;  %v20145_v7 = vand.u32 4294901760, %v20101_v35  ;;  %v20150_v35 = vand.u32 4294901760, %v20107_v26  ;;  %v3335_v26 = vld [vmem:[#allocation2 + $0x98] sm:$0xff] }
 0x248   :  { %11548 = vmatpush3.msra.mxu1 %v14261_v62  ;;  %11506 = vmatprep.subr.mxu0 %v20120_v44  ;;  %v14725_v62 = vsub.f32 %v1955_v55, %v14701_v13  ;;  %v14748_v40 = vsub.f32 %v1953_v37, %v14727_v8  ;;  %v20147_v44 = vand.u32 4294901760, %v20102_v59 }
 0x249   :  { %v12633_v45 = vpop.f32.mrf.mxu1  ;;  %11549 = vmatprep.subr.mxu1 %v14275_v31  ;;  %11507 = vmatpush3.msra.mxu0 %v20121_v20  ;;  %v20124_v31 = vand.u32 4294901760, %v20093_v60  ;;  %v2951_v19 = vsub.f32 %v14737_v49, %v2950_v22  ;;  %v20149_v20 = vand.u32 4294901760, %v20104_v29 }
 0x24a   :  { %11550 = vmatpush3.msra.mxu1 %v14291_v47  ;;  %11508 = vmatprep.subr.mxu0 %v20122_v38  ;;  %v2936_v47 = vand.u32 4294901760, %v14714_v50  ;;  %v2957_v46 = vand.u32 4294901760, %v14748_v40  ;;  %v20148_v45 = vand.u32 4294901760, %v20103_v48 }
 0x24b   :  { %11551 = vmatprep.subr.mxu1 %v14306_v58  ;;  %11509 = vmatpush3.msra.mxu0 %v20123_v57  ;;  %v1729_v58 = vadd.f32 %v14625_v27, %v1645_v54  ;;  %v20128_v27 = vand.u32 4294901760, %v20097_v32  ;;  %v2952_v52 = vand.u32 4294901760, %v2951_v19 }
 0x24c   :  { %11552 = vmatpush3.msra.mxu1 %v14322_v0  ;;  %11510 = vmatprep.subr.mxu0 %v20124_v31  ;;  %v2943_v0 = vand.u32 4294901760, %v14725_v62  ;;  %v2958_v55 = vsub.f32 %v14748_v40, %v2957_v46  ;;  %v3329_v31 = vld [vmem:[#allocation2 + $0x68] sm:$0xff] }
 0x24d   :  { %11553 = vmatprep.subr.mxu1 %v14337_v23  ;;  %11511 = vmatpush3.msra.mxu0 %v20125_v61  ;;  %v20127_v23 = vand.u32 4294901760, %v20096_v25  ;;  %v14905_v61 = vand.u32 4294901760, %v3329_v31 }
 0x24e   :  { %11554 = vmatpush3.msra.mxu1 %v14353_v42  ;;  %11512 = vmatprep.subr.mxu0 %v20126_v4  ;;  %v2937_v42 = vsub.f32 %v14714_v50, %v2936_v47  ;;  %v2944_v32 = vsub.f32 %v14725_v62, %v2943_v0  ;;  %v2959_v37 = vand.u32 4294901760, %v2958_v55 }
 0x24f   :  { %11555 = vmatprep.subr.mxu1 %v14364_v63  ;;  %11513 = vmatpush3.msra.mxu0 %v20127_v23  ;;  %v20129_v63 = vand.u32 4294901760, %v14351_v1 }
 0x250   :  { %v1832_v60 = vpop.f32.mrf.mxu0  ;;  %11556 = vmatpush3.msra.mxu1 %v14376_v33  ;;  %11514 = vmatprep.subr.mxu0 %v20128_v27  ;;  %v20130_v33 = vand.u32 4294901760, %v14362_v30  ;;  %v2938_v30 = vand.u32 4294901760, %v2937_v42  ;;  %v14920_v27 = vsub.f32 %v3329_v31, %v14905_v61 }
 0x251   :  { %v1833_v56 = vadd.f32 %v1832_v60, %v1729_v58  ;;  %11557 = vmatprep.subr.mxu1 %v14387_v14  ;;  %11515 = vmatpush3.msra.mxu0 %v20129_v63  ;;  %v20131_v14 = vand.u32 4294901760, %v14374_v36  ;;  %v20136_v36 = vld [vmem:[#allocation28_spill] sm:$0xff]  ;;  %v3328_v58 = vld [vmem:[#allocation2 + $0x60] sm:$0xff] }
 0x252   :  { %v12608_v17 = vpop.f32.mrf.mxu0  ;;  %11558 = vmatpush3.msra.mxu1 %v14398_v53  ;;  %11516 = vmatprep.subr.mxu0 %v20130_v33  ;;  %v20133_v53 = vand.u32 4294901760, %v20132_v18  ;;  %v20137_v39 = vand.u32 4294901760, %v20136_v36  ;;  %v3326_v60 = vld [vmem:[#allocation2 + $0x50] sm:$0xff] }
 0x253   :  { %v1915_v25 = vadd.f32 %v1914_v51, %v1833_v56  ;;  %11559 = vmatprep.subr.mxu1 %v14411_v41  ;;  %11517 = vmatpush3.msra.mxu0 %v20131_v14  ;;  %v14922_v42 = vand.u32 4294901760, %v3326_v60 }
 0x254   :  { %11560 = vmatpush3.msra.mxu1 %v14424_v9  ;;  %11518 = vmatprep.subr.mxu0 %v20133_v53  ;;  %v2945_v9 = vand.u32 4294901760, %v2944_v32  ;;  %v3323_v32 = vld [vmem:[#allocation2 + $0x38] sm:$0xff]  ;;  %v3322_v53 = vld [vmem:[#allocation2 + $0x30] sm:$0xff] }
 0x255   :  { %v1920_v1 = vmax.f32 %v1915_v25, 0.0  ;;  %11561 = vmatprep.subr.mxu1 %v14434_v5  ;;  %11519 = vmatpush3.msra.mxu0 %v20135_v15  ;;  %v20140_v5 = vmov 0.0   ;;  %v14940_v18 = vsub.f32 %v3326_v60, %v14922_v42  ;;  %v14955_v55 = vand.u32 4294901760, %v3323_v32 }
 0x256   :  { %11562 = vmatpush3.msra.mxu1 %v14444_v16  ;;  %11520 = vmatprep.subr.mxu0 %v20137_v39  ;;  %v20143_v16 = vld [vmem:[#allocation30_spill] sm:$0xff] }
 0x257   :  { %v1966_v41 = vsel %vm1964_vm4, %v1920_v1, 0  ;;  %2825 = vmatmul.mubr.f32.vlgmr.msra.gmra.mxu1 %v20139_v3  ;;  %12645 = vmatprep.subr.mxu1 %v20140_v5  ;;  %v20144_v51 = vand.u32 4294901760, %v20143_v16  ;;  %v19592_v1 = vand.u32 4294901760, %v14920_v27 }
 0x258   :  { %v14789_v43 = vand.u32 4294901760, %v1966_v41  ;;  %11521 = vmatpush3.msra.mxu0 %v20142_v6  ;;  %12646 = vmatpush3.msra.mxu1 %v2938_v30 }
 0x259   :  { %11522 = vmatprep.subr.mxu0 %v20144_v51  ;;  %12647 = vmatprep.subr.mxu1 %v20140_v5  ;;  %v3493_v39 = vsub.f32 %v14920_v27, %v19592_v1  ;;  %v14961_v51 = vand.u32 4294901760, %v3322_v53 }
 0x25a   :  { %20138 = vst [vmem:[#allocation11_spill] sm:$0xff] %v14789_v43  ;;  %11523 = vmatpush3.msra.mxu0 %v20145_v7  ;;  %12648 = vmatpush3.msra.mxu1 %v2945_v9  ;;  %v14801_v2 = vsub.f32 %v1966_v41, %v14789_v43  ;;  %v3320_v41 = vld [vmem:[#allocation2 + $0x20] sm:$0xff]  ;;  %v19590_v9 = vand.u32 4294901760, %v14940_v18  ;;  %v3317_v7 = vld [vmem:[#allocation2 + $0x8] sm:$0xff] }
 0x25b   :  { %11524 = vmatprep.subr.mxu0 %v20147_v44  ;;  %12649 = vmatprep.subr.mxu1 %v20140_v5  ;;  %v14985_v60 = vand.u32 4294901760, %v3317_v7 }
 0x25c   :  { %20146 = vst [vmem:[#allocation12_spill] sm:$0xff] %v14801_v2  ;;  %11525 = vmatpush3.msra.mxu0 %v20148_v45  ;;  %12650 = vmatpush3.msra.mxu1 %v2952_v52  ;;  %v14817_v59 = vand.u32 4294901760, %v14801_v2  ;;  %v3505_v44 = vsub.f32 %v14940_v18, %v19590_v9  ;;  %v14967_v45 = vsub.f32 %v3323_v32, %v14955_v55 }
 0x25d   :  { %11526 = vmatprep.subr.mxu0 %v20149_v20  ;;  %12651 = vmatprep.subr.mxu1 %v20140_v5  ;;  %v14969_v20 = vand.u32 4294901760, %v3320_v41 }
 0x25e   :  { %11527 = vmatpush3.msra.mxu0 %v20150_v35  ;;  %12652 = vmatpush3.msra.mxu1 %v2959_v37  ;;  %20151 = vst [vmem:[#allocation13_spill] sm:$0xff] %v14817_v59  ;;  %v2902_v48 = vsub.f32 %v14801_v2, %v14817_v59  ;;  %v3494_v37 = vand.u32 4294901760, %v3493_v39  ;;  %v3316_v35 = vld [vmem:[#allocation2] sm:$0xff]  ;;  %v19588_v31 = vand.u32 4294901760, %v14967_v45 }
 0x25f   :  { %12653 = vmatprep.mubr.msk.f32.mxu1 %vm13225_vm0, %v20140_v5  ;;  %2721 = vmatmul.mubr.f32.vlgmr.msra.gmra.mxu0 %v20139_v3  ;;  %v14992_v32 = vand.u32 4294901760, %v3316_v35  ;;  %v4512_v3 = vld [vmem:[%s19463_s9 + $0x30] sm:$0xff] }
 0x260   :  { %12634 = vmatprep.subr.mxu0 %v20140_v5  ;;  %12654 = vmatmul.mubr.f32.vlgmr.msra.gmra.mxu1 %v14789_v43  ;;  %v14837_v29 = vand.u32 4294901760, %v2902_v48 }
 0x261   :  { %12667 = vmatprep.subr.mxu1 %v20140_v5  ;;  %12635 = vmatpush3.msra.mxu0 %v14690_v21 }
 0x262   :  { %12668 = vmatpush3.msra.mxu1 %v14690_v21  ;;  %12636 = vmatprep.subr.mxu0 %v20140_v5  ;;  %20152 = vst [vmem:[#allocation14_spill] sm:$0xff] %v14837_v29 }
 0x263   :  { %12669 = vmatprep.subr.mxu1 %v20140_v5  ;;  %12637 = vmatpush3.msra.mxu0 %v14701_v13 }
 0x264   :  { %12670 = vmatpush3.msra.mxu1 %v14701_v13  ;;  %12638 = vmatprep.subr.mxu0 %v20140_v5 }
 0x265   :  { %12671 = vmatprep.subr.mxu1 %v20140_v5  ;;  %12639 = vmatpush3.msra.mxu0 %v14716_v28 }
 0x266   :  { %12672 = vmatpush3.msra.mxu1 %v14716_v28  ;;  %12640 = vmatprep.subr.mxu0 %v20140_v5 }
 0x267   :  { %12673 = vmatprep.subr.mxu1 %v20140_v5  ;;  %12641 = vmatpush3.msra.mxu0 %v14727_v8 }
 0x268   :  { %12642 = vmatprep.mubr.msk.f32.mxu0 %vm13225_vm0, %v20140_v5  ;;  %12674 = vmatpush3.msra.mxu1 %v14727_v8 }
 0x269   :  { %12675 = vmatprep.mubr.msk.f32.mxu1 %vm13225_vm0, %v20140_v5  ;;  %12643 = vmatmul.mubr.f32.vlgmr.msra.gmra.mxu0 %v14837_v29  ;;  %v4527_v29 = vld [vmem:[%s19463_s9 + $0xa8] sm:$0xff] }
 0x26a   :  { %12656 = vmatprep.subr.mxu0 %v20140_v5  ;;  %12676 = vmatmul.mubr.f32.vlgmr.msra.gmra.mxu1 %v14817_v59 }
 0x26b   :  { %12689 = vmatprep.subr.mxu1 %v20140_v5  ;;  %12657 = vmatpush3.msra.mxu0 %v14714_v50 }
 0x26c   :  { %12690 = vmatpush3.msra.mxu1 %v14690_v21  ;;  %12658 = vmatprep.subr.mxu0 %v20140_v5  ;;  %v14885_v21 = vand.u32 4294901760, %v3335_v26 }
 0x26d   :  { %12691 = vmatprep.subr.mxu1 %v20140_v5  ;;  %12659 = vmatpush3.msra.mxu0 %v14725_v62  ;;  %v3331_v62 = vld [vmem:[#allocation2 + $0x78] sm:$0xff] }
 0x26e   :  { %12692 = vmatpush3.msra.mxu1 %v14701_v13  ;;  %12660 = vmatprep.subr.mxu0 %v20140_v5  ;;  %v3334_v13 = vld [vmem:[#allocation2 + $0x90] sm:$0xff]  ;;  %v14890_v54 = vsub.f32 %v3335_v26, %v14885_v21  ;;  %v14898_v57 = vand.u32 4294901760, %v3331_v62 }
 0x26f   :  { %12693 = vmatprep.subr.mxu1 %v20140_v5  ;;  %12661 = vmatpush3.msra.mxu0 %v14737_v49  ;;  %v14887_v50 = vand.u32 4294901760, %v3334_v13 }
 0x270   :  { %12694 = vmatpush3.msra.mxu1 %v14716_v28  ;;  %12662 = vmatprep.subr.mxu0 %v20140_v5  ;;  %v3332_v28 = vld [vmem:[#allocation2 + $0x80] sm:$0xff] }
 0x271   :  { %12695 = vmatprep.subr.mxu1 %v20140_v5  ;;  %12663 = vmatpush3.msra.mxu0 %v14748_v40  ;;  %v14892_v38 = vand.u32 4294901760, %v3332_v28  ;;  %v14912_v40 = vand.u32 4294901760, %v3328_v58 }
 0x272   :  { %12664 = vmatprep.mubr.msk.f32.mxu0 %vm13225_vm0, %v20140_v5  ;;  %12696 = vmatpush3.msra.mxu1 %v14727_v8  ;;  %v14896_v8 = vsub.f32 %v3334_v13, %v14887_v50  ;;  %v14976_v13 = vsub.f32 %v3322_v53, %v14961_v51  ;;  %v15000_v53 = vsub.f32 %v3317_v7, %v14985_v60 }
 0x273   :  { %12697 = vmatprep.mubr.msk.f32.mxu1 %vm13225_vm0, %v20140_v5  ;;  %12665 = vmatmul.mubr.f32.vlgmr.msra.gmra.mxu0 %v14801_v2  ;;  %v14903_v49 = vsub.f32 %v3332_v28, %v14892_v38  ;;  %v14930_v25 = vsub.f32 %v3328_v58, %v14912_v40  ;;  %v14978_v28 = vand.u32 4294901760, %v3319_v34  ;;  %v14983_v58 = vsub.f32 %v3320_v41, %v14969_v20 }
 0x274   :  { %12678 = vmatprep.subr.mxu0 %v20140_v5  ;;  %12698 = vmatmul.mubr.f32.vlgmr.msra.gmra.mxu1 %v14789_v43  ;;  %v19595_v4 = vand.u32 4294901760, %v14896_v8  ;;  %v15008_v41 = vsub.f32 %v3316_v35, %v14992_v32 }
 0x275   :  { %12679 = vmatpush3.msra.mxu0 %v2936_v47  ;;  %12686 = vmatprep.mubr.msk.f32.mxu0 %vm13225_vm0, %v20140_v5  ;;  %v19596_v47 = vand.u32 4294901760, %v14890_v54  ;;  %v19594_v56 = vand.u32 4294901760, %v14903_v49  ;;  %v19591_v10 = vand.u32 4294901760, %v14930_v25 }
 0x276   :  { %12680 = vmatprep.subr.mxu0 %v20140_v5  ;;  %3582 = vmatprep.mubr.f32.mxu1 %v20140_v5  ;;  %v3475_v17 = vsub.f32 %v14896_v8, %v19595_v4  ;;  %v19584_v7 = vand.u32 4294901760, %v15008_v41 }
 0x277   :  { %12681 = vmatpush3.msra.mxu0 %v2943_v0  ;;  %v14910_v0 = vsub.f32 %v3331_v62, %v14898_v57  ;;  %v3469_v23 = vsub.f32 %v14890_v54, %v19596_v47  ;;  %v3481_v14 = vsub.f32 %v14903_v49, %v19594_v56  ;;  %v3499_v52 = vsub.f32 %v14930_v25, %v19591_v10 }
 0x278   :  { %12682 = vmatprep.subr.mxu0 %v20140_v5  ;;  %v3476_v30 = vand.u32 4294901760, %v3475_v17  ;;  %v3506_v62 = vand.u32 4294901760, %v3505_v44  ;;  %v14990_v17 = vsub.f32 %v3319_v34, %v14978_v28  ;;  %v19583_v34 = vand.u32 4294901760, %v15000_v53 }
 0x279   :  { %12683 = vmatpush3.msra.mxu0 %v2950_v22  ;;  %v3325_v22 = vld [vmem:[#allocation2 + $0x48] sm:$0xff]  ;;  %v19593_v63 = vand.u32 4294901760, %v14910_v0  ;;  %v3482_v36 = vand.u32 4294901760, %v3481_v14  ;;  %v3500_v48 = vand.u32 4294901760, %v3499_v52  ;;  %v19586_v14 = vand.u32 4294901760, %v14983_v58 }
 0x27a   :  { %12684 = vmatprep.subr.mxu0 %v20140_v5  ;;  %v14932_v33 = vand.u32 4294901760, %v3325_v22  ;;  %v3541_v44 = vsub.f32 %v15000_v53, %v19583_v34 }
 0x27b   :  { %12685 = vmatpush3.msra.mxu0 %v2957_v46  ;;  %v3470_v46 = vand.u32 4294901760, %v3469_v23  ;;  %v3487_v19 = vsub.f32 %v14910_v0, %v19593_v63  ;;  %v3529_v39 = vsub.f32 %v14983_v58, %v19586_v14 }
 0x27c   :  { %12687 = vmatmul.mubr.f32.vlgmr.msra.gmra.mxu0 %v14789_v43  ;;  %3377 = vmatprep.subr.mxu0 %v14885_v21  ;;  %v14948_v15 = vsub.f32 %v3325_v22, %v14932_v33  ;;  %v19587_v22 = vand.u32 4294901760, %v14976_v13 }
 0x27d   :  { %3436 = vmatprep.mubr.f32.mxu0 %v20140_v5  ;;  %3379 = vmatpush1.msra.mxu0 %v14887_v50  ;;  %v3488_v6 = vand.u32 4294901760, %v3487_v19  ;;  %v19585_v19 = vand.u32 4294901760, %v14990_v17 }
 0x27e   :  { %3381 = vmatprep.subr.mxu0 %v14892_v38  ;;  %3471 = vmatprep.subr.mxu1 %v3470_v46  ;;  %v19589_v16 = vand.u32 4294901760, %v14948_v15  ;;  %v3517_v46 = vsub.f32 %v14967_v45, %v19588_v31 }
 0x27f   :  { %3383 = vmatpush1.msra.mxu0 %v14898_v57  ;;  %3477 = vmatpush1.msra.mxu1 %v3476_v30  ;;  %v3523_v30 = vsub.f32 %v14976_v13, %v19587_v22  ;;  %v3535_v52 = vsub.f32 %v14990_v17, %v19585_v19 }
 0x280   :  { %3385 = vmatprep.subr.mxu0 %v14905_v61  ;;  %3483 = vmatprep.subr.mxu1 %v3482_v36  ;;  %v3511_v26 = vsub.f32 %v14948_v15, %v19589_v16  ;;  %v3518_v36 = vand.u32 4294901760, %v3517_v46 }
 0x281   :  { %3387 = vmatpush1.msra.mxu0 %v14912_v40  ;;  %3489 = vmatpush1.msra.mxu1 %v3488_v6  ;;  %v3524_v6 = vand.u32 4294901760, %v3523_v30  ;;  %v3536_v35 = vand.u32 4294901760, %v3535_v52 }
 0x282   :  { %3389 = vmatprep.subr.mxu0 %v14922_v42  ;;  %3495 = vmatprep.subr.mxu1 %v3494_v37  ;;  %v3512_v23 = vand.u32 4294901760, %v3511_v26  ;;  %v3530_v37 = vand.u32 4294901760, %v3529_v39  ;;  %v3542_v26 = vand.u32 4294901760, %v3541_v44 }
 0x283   :  { %3391 = vmatpush1.msra.mxu0 %v14932_v33  ;;  %3501 = vmatpush1.msra.mxu1 %v3500_v48  ;;  %v3547_v48 = vsub.f32 %v15008_v41, %v19584_v7  ;;  %v11262_v7 = vld [vmem:[%s19460_s6] ss:$0 sm:$0xff] }
 0x284   :  { %3393 = vmatprep.subr.mxu0 %v14955_v55  ;;  %3507 = vmatprep.subr.mxu1 %v3506_v62 }
 0x285   :  { %3395 = vmatpush1.msra.mxu0 %v14961_v51  ;;  %3513 = vmatpush1.msra.mxu1 %v3512_v23  ;;  %v3548_v62 = vand.u32 4294901760, %v3547_v48 }
 0x286   :  { %3397 = vmatprep.subr.mxu0 %v14969_v20  ;;  %3519 = vmatprep.subr.mxu1 %v3518_v36 }
 0x287   :  { %3399 = vmatpush1.msra.mxu0 %v14978_v28  ;;  %3525 = vmatpush1.msra.mxu1 %v3524_v6 }
 0x288   :  { %3401 = vmatprep.subr.mxu0 %v14985_v60  ;;  %3531 = vmatprep.subr.mxu1 %v3530_v37 }
 0x289   :  { %3403 = vmatpush1.msra.mxu0 %v14992_v32  ;;  %3537 = vmatpush1.msra.mxu1 %v3536_v35 }
 0x28a   :  { %3610 = vmatprep.subr.mxu0 %v14890_v54  ;;  %3543 = vmatprep.subr.mxu1 %v3542_v26 }
 0x28b   :  { %3549 = vmatpush1.msra.mxu1 %v3548_v62 }
 0x28c   :  { %3710 = vmatprep.subr.mxu1 %v14885_v21 }
 0x2d4   :  { %v11423_v23 = vpop.f32.mrf.mxu1 }
 0x2d6   :  { %v11424_v46 = vpop.f32.mrf.mxu1 }
 0x2d7   :  { %v11425_v26 = vadd.f32 %v11424_v46, %v11423_v23 }
 0x2dc   :  { %v11388_v30 = vpop.f32.mrf.mxu0 }
 0x2de   :  { %v11389_v39 = vpop.f32.mrf.mxu0 }
 0x2df   :  { %v11390_v52 = vadd.f32 %v11389_v39, %v11388_v30 }
 0x2e1   :  { %v2077_v35 = vadd.f32 %v11390_v52, %v11262_v7 }
 0x2e3   :  { %v2309_v22 = vadd.f32 %v11425_v26, %v2077_v35 }
 0x2f5   :  { %v11493_v36 = vpop.f32.mrf.mxu1 }
 0x2f7   :  { %v11494_v34 = vpop.f32.mrf.mxu1 }
 0x2f8   :  { %v11495_v10 = vadd.f32 %v11494_v34, %v11493_v36 }
 0x2fd   :  { %v11458_v6 = vpop.f32.mrf.mxu0 }
 0x2ff   :  { %v11459_v44 = vpop.f32.mrf.mxu0 }
 0x300   :  { %v11460_v62 = vadd.f32 %v11459_v44, %v11458_v6 }
 0x302   :  { %v2447_v9 = vadd.f32 %v11460_v62, %v2309_v22 }
 0x304   :  { %v2555_v63 = vadd.f32 %v11495_v10, %v2447_v9  ;;  %v3333_v9 = vld [vmem:[#allocation2 + $0x88] sm:$0xff] }
 0x305   :  { %v15067_v36 = vand.u32 4294901760, %v3333_v9 }
 0x317   :  { %v11563_v37 = vpop.f32.mrf.mxu1 }
 0x319   :  { %v11564_v48 = vpop.f32.mrf.mxu1 }
 0x31a   :  { %v11565_v4 = vadd.f32 %v11564_v48, %v11563_v37  ;;  %v3327_v37 = vld [vmem:[#allocation2 + $0x58] sm:$0xff] }
 0x31f   :  { %v11528_v19 = vpop.f32.mrf.mxu0 }
 0x320   :  { %v2996_v14 = vpop.f32.mrf.mxu1 }
 0x321   :  { %v11529_v31 = vpop.f32.mrf.mxu0 }
 0x322   :  { %v12655_v16 = vpop.f32.mrf.mxu1  ;;  %v11530_v1 = vadd.f32 %v11529_v31, %v11528_v19  ;;  %v3330_v19 = vld [vmem:[#allocation2 + $0x70] sm:$0xff] }
 0x323   :  { %v15076_v62 = vand.u32 4294901760, %v3330_v19 }
 0x324   :  { %v2723_v30 = vadd.f32 %v11530_v1, %v2555_v63 }
 0x326   :  { %v2827_v59 = vadd.f32 %v11565_v4, %v2723_v30  ;;  %v15085_v30 = vand.u32 4294901760, %v3327_v37 }
 0x329   :  { %v2905_v39 = vpop.f32.mrf.mxu0 }
 0x32a   :  { %v3153_v56 = vpop.f32.mrf.mxu1  ;;  %v2906_v7 = vadd.f32 %v2905_v39, %v2827_v59  ;;  %v3321_v39 = vld [vmem:[#allocation2 + $0x28] sm:$0xff] }
 0x32b   :  { %v12644_v47 = vpop.f32.mrf.mxu0 }
 0x32c   :  { %v12677_v2 = vpop.f32.mrf.mxu1  ;;  %v2997_v46 = vadd.f32 %v2996_v14, %v2906_v7 }
 0x333   :  { %v3076_v52 = vpop.f32.mrf.mxu0 }
 0x334   :  { %v3311_v23 = vpop.f32.mrf.mxu1  ;;  %v3077_v35 = vadd.f32 %v3076_v52, %v2997_v46  ;;  %v3318_v52 = vld [vmem:[#allocation2 + $0x10] sm:$0xff]  ;;  %v20154_v46 = vand.u32 4294901760, %v14896_v8 }
 0x335   :  { %v12666_v6 = vpop.f32.mrf.mxu0 }
 0x336   :  { %v12699_v44 = vpop.f32.mrf.mxu1  ;;  %v3154_v26 = vadd.f32 %v3153_v56, %v3077_v35  ;;  %v3336_v56 = vld [vmem:[#allocation2 + $0xa0] sm:$0xff]  ;;  %v15123_v35 = vand.u32 4294901760, %v3318_v52 }
 0x337   :  { %v15061_v14 = vand.u32 4294901760, %v3336_v56  ;;  %v20155_v44 = vand.u32 4294901760, %v14903_v49 }
 0x339   :  { %v15074_v48 = vsub.f32 %v3336_v56, %v15061_v14 }
 0x33c   :  { %v3236_v16 = vpop.f32.mrf.mxu0 }
 0x33d   :  { %v3237_v22 = vadd.f32 %v3236_v16, %v3154_v26 }
 0x33e   :  { %v12688_v34 = vpop.f32.mrf.mxu0 }
 0x33f   :  { %v3312_v31 = vadd.f32 %v3311_v23, %v3237_v22  ;;  %v20153_v23 = vand.u32 4294901760, %v14890_v54  ;;  %v20159_v22 = vand.u32 4294901760, %v14940_v18 }
 0x341   :  { %v3315_v63 = vmax.f32 %v3312_v31, 0.0  ;;  %v20161_v31 = vand.u32 4294901760, %v14967_v45 }
 0x343   :  { %v3356_v1 = vsel %vm3354_vm5, %v3315_v63, 0  ;;  %v20162_v63 = vand.u32 4294901760, %v14976_v13 }
 0x344   :  { %v15030_v10 = vand.u32 4294901760, %v3356_v1 }
 0x346   :  { %v15033_v2 = vsub.f32 %v3356_v1, %v15030_v10  ;;  %3584 = vmatmul.mubr.f32.vlgmr.msra.gmra.mxu1 %v15030_v10 }
 0x347   :  { %3712 = vmatpush1.msra.mxu1 %v14887_v50  ;;  %3769 = vmatprep.mubr.f32.mxu1 %v20140_v5 }
 0x348   :  { %3714 = vmatprep.subr.mxu1 %v14892_v38  ;;  %v15040_v59 = vand.u32 4294901760, %v15033_v2 }
 0x349   :  { %3716 = vmatpush1.msra.mxu1 %v14898_v57 }
 0x34a   :  { %3718 = vmatprep.subr.mxu1 %v14905_v61  ;;  %v3440_v47 = vsub.f32 %v15033_v2, %v15040_v59 }
 0x34b   :  { %3720 = vmatpush1.msra.mxu1 %v14912_v40 }
 0x34c   :  { %3722 = vmatprep.subr.mxu1 %v14922_v42  ;;  %v15048_v4 = vand.u32 4294901760, %v3440_v47 }
 0x34d   :  { %3724 = vmatpush1.msra.mxu1 %v14932_v33 }
 0x34e   :  { %3726 = vmatprep.subr.mxu1 %v14955_v55  ;;  %3442 = vmatmul.mubr.f32.vlgmr.msra.gmra.mxu0 %v15048_v4 }
 0x34f   :  { %3613 = vmatpush1.msra.mxu0 %v14896_v8  ;;  %3728 = vmatpush1.msra.mxu1 %v14961_v51  ;;  %v20156_v8 = vand.u32 4294901760, %v14910_v0 }
 0x350   :  { %3616 = vmatprep.subr.mxu0 %v14903_v49  ;;  %3730 = vmatprep.subr.mxu1 %v14969_v20  ;;  %v20157_v49 = vand.u32 4294901760, %v14920_v27 }
 0x351   :  { %3619 = vmatpush1.msra.mxu0 %v14910_v0  ;;  %3732 = vmatpush1.msra.mxu1 %v14978_v28 }
 0x352   :  { %3622 = vmatprep.subr.mxu0 %v14920_v27  ;;  %3734 = vmatprep.subr.mxu1 %v14985_v60 }
 0x353   :  { %3625 = vmatpush1.msra.mxu0 %v14930_v25  ;;  %3736 = vmatpush1.msra.mxu1 %v14992_v32 }
 0x354   :  { %3628 = vmatprep.subr.mxu0 %v14940_v18  ;;  %3773 = vmatmul.mubr.f32.vlgmr.msra.gmra.mxu1 %v15040_v59 }
 0x355   :  { %3912 = vmatprep.subr.mxu1 %v14885_v21  ;;  %3631 = vmatpush1.msra.mxu0 %v14948_v15  ;;  %v15083_v21 = vsub.f32 %v3333_v9, %v15067_v36  ;;  %v20165_v9 = vand.u32 4294901760, %v15000_v53 }
 0x356   :  { %3914 = vmatpush1.msra.mxu1 %v14887_v50  ;;  %3634 = vmatprep.subr.mxu0 %v14967_v45  ;;  %v3324_v50 = vld [vmem:[#allocation2 + $0x40] sm:$0xff]  ;;  %v20164_v45 = vand.u32 4294901760, %v14990_v17 }
 0x357   :  { %3916 = vmatprep.subr.mxu1 %v14892_v38  ;;  %3637 = vmatpush1.msra.mxu0 %v14976_v13  ;;  %v19609_v38 = vand.u32 4294901760, %v15074_v48  ;;  %v15097_v7 = vand.u32 4294901760, %v3324_v50 }
 0x358   :  { %3918 = vmatpush1.msra.mxu1 %v14898_v57  ;;  %3640 = vmatprep.subr.mxu0 %v14983_v58  ;;  %v15093_v57 = vsub.f32 %v3330_v19, %v15076_v62  ;;  %v20166_v19 = vand.u32 4294901760, %v15008_v41 }
 0x359   :  { %3920 = vmatprep.subr.mxu1 %v14905_v61  ;;  %3643 = vmatpush1.msra.mxu0 %v14990_v17  ;;  %v19608_v61 = vand.u32 4294901760, %v15083_v21  ;;  %v15121_v54 = vsub.f32 %v3324_v50, %v15097_v7  ;;  %v4551_v50 = vld [vmem:[%s19463_s9 + $0x168] sm:$0xff] }
 0x35a   :  { %3922 = vmatpush1.msra.mxu1 %v14912_v40  ;;  %3646 = vmatprep.subr.mxu0 %v15000_v53  ;;  %v15103_v40 = vsub.f32 %v3327_v37, %v15085_v30  ;;  %v19606_v6 = vand.u32 4294901760, %v15093_v57 }
 0x35b   :  { %3924 = vmatprep.subr.mxu1 %v14922_v42  ;;  %3649 = vmatpush1.msra.mxu0 %v15008_v41  ;;  %v15108_v42 = vand.u32 4294901760, %v3321_v39  ;;  %v19604_v27 = vand.u32 4294901760, %v15121_v54  ;;  %v4552_v41 = vld [vmem:[%s19463_s9 + $0x170] sm:$0xff] }
 0x35c   :  { %3682 = vmatprep.mubr.f32.mxu0 %v20140_v5  ;;  %3926 = vmatpush1.msra.mxu1 %v14932_v33  ;;  %v4083_v33 = vsub.f32 %v15074_v48, %v19609_v38  ;;  %v19605_v26 = vand.u32 4294901760, %v15103_v40  ;;  %v4097_v16 = vsub.f32 %v15093_v57, %v19606_v6 }
 0x35d   :  { %3685 = vmatmul.mubr.f32.vlgmr.msra.gmra.mxu0 %v15033_v2  ;;  %3800 = vmatprep.subr.mxu0 %v20153_v23  ;;  %v4111_v1 = vsub.f32 %v15121_v54, %v19604_v27  ;;  %v15217_v23 = vand.u32 4294901760, %v4551_v50 }
 0x35e   :  { %3928 = vmatprep.subr.mxu1 %v14955_v55  ;;  %3804 = vmatpush1.msra.mxu0 %v20154_v46  ;;  %v4090_v55 = vsub.f32 %v15083_v21, %v19608_v61  ;;  %v4084_v0 = vand.u32 4294901760, %v4083_v33  ;;  %v4098_v18 = vand.u32 4294901760, %v4097_v16  ;;  %v4548_v46 = vld [vmem:[%s19463_s9 + $0x150] sm:$0xff]  ;;  %v4546_v33 = vld [vmem:[%s19463_s9 + $0x140] sm:$0xff] }
 0x35f   :  { %3930 = vmatpush1.msra.mxu1 %v14961_v51  ;;  %3808 = vmatprep.subr.mxu0 %v20155_v44  ;;  %v15136_v51 = vsub.f32 %v3321_v39, %v15108_v42  ;;  %v15210_v39 = vand.u32 4294901760, %v4552_v41  ;;  %v15249_v16 = vand.u32 4294901760, %v4546_v33 }
 0x360   :  { %3932 = vmatprep.subr.mxu1 %v14969_v20  ;;  %3812 = vmatpush1.msra.mxu0 %v20156_v8  ;;  %v20158_v20 = vand.u32 4294901760, %v14930_v25  ;;  %v4091_v25 = vand.u32 4294901760, %v4090_v55  ;;  %v4545_v8 = vld [vmem:[%s19463_s9 + $0x138] sm:$0xff] }
 0x361   :  { %3934 = vmatpush1.msra.mxu1 %v14978_v28  ;;  %3816 = vmatprep.subr.mxu0 %v20157_v49  ;;  %v15148_v28 = vsub.f32 %v3318_v52, %v15123_v35  ;;  %v19603_v34 = vand.u32 4294901760, %v15136_v51  ;;  %v4549_v52 = vld [vmem:[%s19463_s9 + $0x158] sm:$0xff]  ;;  %v15237_v55 = vsub.f32 %v4552_v41, %v15210_v39  ;;  %v15239_v49 = vand.u32 4294901760, %v4548_v46 }
 0x362   :  { %3936 = vmatprep.subr.mxu1 %v14985_v60  ;;  %3820 = vmatpush1.msra.mxu0 %v20158_v20  ;;  %v4104_v60 = vsub.f32 %v15103_v40, %v19605_v26  ;;  %v15229_v44 = vand.u32 4294901760, %v4549_v52  ;;  %v4543_v20 = vld [vmem:[%s19463_s9 + $0x128] sm:$0xff] }
 0x363   :  { %3938 = vmatpush1.msra.mxu1 %v14992_v32  ;;  %3971 = vmatprep.mubr.f32.mxu1 %v20140_v5  ;;  %v20160_v32 = vand.u32 4294901760, %v14948_v15  ;;  %v19602_v47 = vand.u32 4294901760, %v15148_v28  ;;  %v20163_v15 = vand.u32 4294901760, %v14983_v58  ;;  %v4118_v13 = vsub.f32 %v15136_v51, %v19603_v34  ;;  %20167 = vst [vmem:[#allocation15_spill] sm:$0xff] %v15237_v55 }
 0x364   :  { %3824 = vmatprep.subr.mxu0 %v20159_v22  ;;  %3973 = vmatmul.mubr.f32.vlgmr.msra.gmra.mxu1 %v15030_v10  ;;  %v4105_v56 = vand.u32 4294901760, %v4104_v60  ;;  %v4112_v58 = vand.u32 4294901760, %v4111_v1  ;;  %v4542_v22 = vld [vmem:[%s19463_s9 + $0x120] sm:$0xff]  ;;  %v4540_v60 = vld [vmem:[%s19463_s9 + $0x110] sm:$0xff]  ;;  %v15276_v1 = vsub.f32 %v4548_v46, %v15239_v49 }
 0x365   :  { %12717 = vmatprep.subr.mxu1 %v20140_v5  ;;  %3828 = vmatpush1.msra.mxu0 %v20160_v32  ;;  %v4125_v37 = vsub.f32 %v15148_v28, %v19602_v47  ;;  %v4119_v17 = vand.u32 4294901760, %v4118_v13  ;;  %v15265_v32 = vsub.f32 %v4549_v52, %v15229_v44  ;;  %v15289_v13 = vand.u32 4294901760, %v4540_v60 }
 0x366   :  { %12718 = vmatpush3.msra.mxu1 %v4084_v0  ;;  %3832 = vmatprep.subr.mxu0 %v20161_v31  ;;  %v15247_v0 = vsub.f32 %v4551_v50, %v15217_v23  ;;  %v15267_v31 = vand.u32 4294901760, %v4543_v20  ;;  %20172 = vst [vmem:[#allocation20_spill] sm:$0xff] %v15276_v1  ;;  %v4533_v50 = vld [vmem:[%s19463_s9 + $0xd8] sm:$0xff]  ;;  %v19611_v46 = vand.u32 4294901760, %v15276_v1 }
 0x367   :  { %12719 = vmatprep.subr.mxu1 %v20140_v5  ;;  %3836 = vmatpush1.msra.mxu0 %v20162_v63  ;;  %v4126_v53 = vand.u32 4294901760, %v4125_v37  ;;  %20170 = vst [vmem:[#allocation18_spill] sm:$0xff] %v15265_v32  ;;  %v19601_v63 = vand.u32 4294901760, %v15237_v55  ;;  %20175 = vst [vmem:[#allocation23_spill] sm:$0xff] %v15289_v13  ;;  %v4534_v37 = vld [vmem:[%s19463_s9 + $0xe0] sm:$0xff]  ;;  %v15351_v6 = vand.u32 4294901760, %v4533_v50 }
 0x368   :  { %12720 = vmatpush3.msra.mxu1 %v4091_v25  ;;  %3840 = vmatprep.subr.mxu0 %v20163_v15  ;;  %20168 = vst [vmem:[#allocation16_spill] sm:$0xff] %v15247_v0  ;;  %v15257_v25 = vand.u32 4294901760, %v4545_v8  ;;  %20171 = vst [vmem:[#allocation19_spill] sm:$0xff] %v15267_v31  ;;  %v4537_v15 = vld [vmem:[%s19463_s9 + $0xf8] sm:$0xff]  ;;  %v15343_v34 = vand.u32 4294901760, %v4534_v37 }
 0x369   :  { %12721 = vmatprep.subr.mxu1 %v20140_v5  ;;  %3844 = vmatpush1.msra.mxu0 %v20164_v45  ;;  %v15287_v45 = vsub.f32 %v4546_v33, %v15249_v16  ;;  %v15310_v41 = vand.u32 4294901760, %v4537_v15  ;;  %v15320_v52 = vsub.f32 %v15237_v55, %v19601_v63  ;;  %20185 = vst [vmem:[#allocation9_spill] sm:$0xff] %v15351_v6  ;;  %v4516_v55 = vld [vmem:[%s19463_s9 + $0x50] sm:$0xff] }
 0x36a   :  { %12722 = vmatpush3.msra.mxu1 %v4098_v18  ;;  %3848 = vmatprep.subr.mxu0 %v20165_v9  ;;  %20169 = vst [vmem:[#allocation17_spill] sm:$0xff] %v15257_v25  ;;  %v4539_v18 = vld [vmem:[%s19463_s9 + $0x108] sm:$0xff]  ;;  %v4536_v9 = vld [vmem:[%s19463_s9 + $0xf0] sm:$0xff]  ;;  %20183 = vst [vmem:[#allocation36_spill] sm:$0xff] %v15343_v34  ;;  %v15405_v27 = vsub.f32 %v4533_v50, %v15351_v6 }
 0x36b   :  { %12723 = vmatprep.subr.mxu1 %v20140_v5  ;;  %3852 = vmatpush1.msra.mxu0 %v20166_v19  ;;  %20174 = vst [vmem:[#allocation22_spill] sm:$0xff] %v15287_v45  ;;  %v15297_v19 = vsub.f32 %v4545_v8, %v15257_v25  ;;  %20179 = vst [vmem:[#allocation31_spill] sm:$0xff] %v15310_v41  ;;  %v15326_v8 = vand.u32 4294901760, %v4536_v9  ;;  %v19612_v47 = vand.u32 4294901760, %v15287_v45 }
 0x36c   :  { %3885 = vmatprep.mubr.f32.mxu0 %v20140_v5  ;;  %12724 = vmatpush3.msra.mxu1 %v4105_v56  ;;  %v19607_v56 = vand.u32 4294901760, %v15247_v0  ;;  %20191 = vst [vmem:[#allocation29_spill] sm:$0xff] %v15405_v27 }
 0x36d   :  { %3887 = vmatmul.mubr.f32.vlgmr.msra.gmra.mxu0 %v15030_v10  ;;  %12700 = vmatprep.subr.mxu0 %v20140_v5  ;;  %20176 = vst [vmem:[#allocation24_spill] sm:$0xff] %v15297_v19  ;;  %20181 = vst [vmem:[#allocation33_spill] sm:$0xff] %v15326_v8  ;;  %v15387_v38 = vsub.f32 %v15287_v45, %v19612_v47  ;;  %v4522_v45 = vld [vmem:[%s19463_s9 + $0x80] sm:$0xff] }
 0x36e   :  { %12725 = vmatprep.subr.mxu1 %v20140_v5  ;;  %12701 = vmatpush3.msra.mxu0 %v15061_v14  ;;  %v15337_v63 = vsub.f32 %v15247_v0, %v19607_v56  ;;  %v15379_v56 = vsub.f32 %v4536_v9, %v15326_v8  ;;  %v4528_v9 = vld [vmem:[%s19463_s9 + $0xb0] sm:$0xff]  ;;  %v20211_v0 = vand.u32 4294901760, %v15405_v27 }
 0x36f   :  { %12726 = vmatpush3.msra.mxu1 %v4112_v58  ;;  %12702 = vmatprep.subr.mxu0 %v20140_v5  ;;  %v15299_v58 = vand.u32 4294901760, %v4539_v18 }
 0x370   :  { %12727 = vmatprep.subr.mxu1 %v20140_v5  ;;  %12703 = vmatpush3.msra.mxu0 %v15067_v36  ;;  %20188 = vst [vmem:[#allocation27_spill] sm:$0xff] %v15379_v56 }
 0x371   :  { %12728 = vmatpush3.msra.mxu1 %v4119_v17  ;;  %12704 = vmatprep.subr.mxu0 %v20140_v5  ;;  %20177 = vst [vmem:[#allocation25_spill] sm:$0xff] %v15299_v58  ;;  %v19610_v17 = vand.u32 4294901760, %v15265_v32  ;;  %v15349_v26 = vsub.f32 %v4539_v18, %v15299_v58  ;;  %v4530_v18 = vld [vmem:[%s19463_s9 + $0xc0] sm:$0xff] }
 0x372   :  { %12729 = vmatprep.subr.mxu1 %v20140_v5  ;;  %12705 = vmatpush3.msra.mxu0 %v15076_v62 }
 0x373   :  { %12730 = vmatpush3.msra.mxu1 %v4126_v53  ;;  %12731 = vmatprep.mubr.msk.f32.mxu1 %vm13225_vm0, %v20140_v5  ;;  %v15308_v53 = vsub.f32 %v4543_v20, %v15267_v31  ;;  %v4531_v20 = vld [vmem:[%s19463_s9 + $0xc8] sm:$0xff]  ;;  %20184 = vst [vmem:[#allocation35_spill] sm:$0xff] %v15349_v26 }
 0x374   :  { %12706 = vmatprep.subr.mxu0 %v20140_v5  ;;  %12732 = vmatmul.mubr.f32.vlgmr.msra.gmra.mxu1 %v15030_v10  ;;  %v15364_v61 = vand.u32 4294901760, %v4531_v20 }
 0x375   :  { %12751 = vmatprep.subr.mxu1 %v20140_v5  ;;  %12707 = vmatpush3.msra.mxu0 %v15085_v30  ;;  %20178 = vst [vmem:[#allocation8_spill] sm:$0xff] %v15308_v53 }
 0x376   :  { %12752 = vmatpush3.msra.mxu1 %v15061_v14  ;;  %12708 = vmatprep.subr.mxu0 %v20140_v5  ;;  %20187 = vst [vmem:[#allocation26_spill] sm:$0xff] %v15364_v61  ;;  %v15422_v47 = vsub.f32 %v4531_v20, %v15364_v61  ;;  %v4525_v20 = vld [vmem:[%s19463_s9 + $0x98] sm:$0xff] }
 0x377   :  { %12753 = vmatprep.subr.mxu1 %v20140_v5  ;;  %12709 = vmatpush3.msra.mxu0 %v15097_v7 }
 0x378   :  { %12754 = vmatpush3.msra.mxu1 %v15067_v36  ;;  %12710 = vmatprep.subr.mxu0 %v20140_v5  ;;  %20194 = vst [vmem:[#allocation48_spill] sm:$0xff] %v15422_v47 }
 0x379   :  { %12755 = vmatprep.subr.mxu1 %v20140_v5  ;;  %12711 = vmatpush3.msra.mxu0 %v15108_v42 }
 0x37a   :  { %12756 = vmatpush3.msra.mxu1 %v15076_v62  ;;  %12712 = vmatprep.subr.mxu0 %v20140_v5 }
 0x37b   :  { %12757 = vmatprep.subr.mxu1 %v20140_v5  ;;  %12713 = vmatpush3.msra.mxu0 %v15123_v35 }
 0x37c   :  { %12714 = vmatprep.mubr.msk.f32.mxu0 %vm13225_vm0, %v20140_v5  ;;  %12758 = vmatpush3.msra.mxu1 %v15085_v30 }
 0x37d   :  { %12715 = vmatmul.mubr.f32.vlgmr.msra.gmra.mxu0 %v15048_v4  ;;  %12734 = vmatprep.subr.mxu0 %v20140_v5  ;;  %v15278_v4 = vand.u32 4294901760, %v4542_v22 }
 0x37e   :  { %12759 = vmatprep.subr.mxu1 %v20140_v5  ;;  %12735 = vmatpush3.msra.mxu0 %v15074_v48 }
 0x37f   :  { %20173 = vst [vmem:[#allocation21_spill] sm:$0xff] %v15278_v4  ;;  %12760 = vmatpush3.msra.mxu1 %v15097_v7  ;;  %12736 = vmatprep.subr.mxu0 %v20140_v5  ;;  %v15324_v33 = vsub.f32 %v4542_v22, %v15278_v4  ;;  %v15341_v22 = vsub.f32 %v4540_v60, %v15289_v13 }
 0x380   :  { %12761 = vmatprep.subr.mxu1 %v20140_v5  ;;  %12737 = vmatpush3.msra.mxu0 %v15083_v21  ;;  %v15358_v60 = vsub.f32 %v15265_v32, %v19610_v17  ;;  %v15375_v17 = vsub.f32 %v15276_v1, %v19611_v46  ;;  %v15391_v46 = vsub.f32 %v4534_v37, %v15343_v34  ;;  %v15407_v37 = vand.u32 4294901760, %v4530_v18  ;;  %v4519_v32 = vld [vmem:[%s19463_s9 + $0x68] sm:$0xff] }
 0x381   :  { %12762 = vmatpush3.msra.mxu1 %v15108_v42  ;;  %12738 = vmatprep.subr.mxu0 %v20140_v5  ;;  %20180 = vst [vmem:[#allocation32_spill] sm:$0xff] %v15324_v33  ;;  %20182 = vst [vmem:[#allocation34_spill] sm:$0xff] %v15341_v22  ;;  %v20195_v24 = vand.u32 4294901760, %v15324_v33  ;;  %v20197_v11 = vand.u32 4294901760, %v15341_v22  ;;  %v20204_v1 = vand.u32 4294901760, %v15379_v56 }
 0x382   :  { %12763 = vmatprep.subr.mxu1 %v20140_v5  ;;  %12739 = vmatpush3.msra.mxu0 %v15093_v57  ;;  %20189 = vst [vmem:[#allocation28_spill] sm:$0xff] %v15391_v46  ;;  %20192 = vst [vmem:[#allocation30_spill] sm:$0xff] %v15407_v37 }
 0x383   :  { %12764 = vmatpush3.msra.mxu1 %v15123_v35  ;;  %12765 = vmatprep.mubr.msk.f32.mxu1 %vm13225_vm0, %v20140_v5  ;;  %v15444_v50 = vsub.f32 %v15341_v22, %v20197_v11  ;;  %v15463_v22 = vsub.f32 %v4530_v18, %v15407_v37  ;;  %v4521_v18 = vld [vmem:[%s19463_s9 + $0x78] sm:$0xff] }
 0x384   :  { %12740 = vmatprep.subr.mxu0 %v20140_v5  ;;  %12766 = vmatmul.mubr.f32.vlgmr.msra.gmra.mxu1 %v15040_v59  ;;  %v15362_v59 = vsub.f32 %v4537_v15, %v15310_v41 }
 0x385   :  { %12785 = vmatprep.subr.mxu1 %v20140_v5  ;;  %12741 = vmatpush3.msra.mxu0 %v15103_v40  ;;  %20200 = vst [vmem:[#allocation51_spill] sm:$0xff] %v15463_v22 }
 0x386   :  { %20186 = vst [vmem:[#allocation38_spill] sm:$0xff] %v15362_v59  ;;  %12786 = vmatpush3.msra.mxu1 %v15061_v14  ;;  %12742 = vmatprep.subr.mxu0 %v20140_v5  ;;  %v20190_v14 = vand.u32 4294901760, %v15297_v19 }
 0x387   :  { %12787 = vmatprep.subr.mxu1 %v20140_v5  ;;  %12743 = vmatpush3.msra.mxu0 %v15121_v54 }
 0x388   :  { %12788 = vmatpush3.msra.mxu1 %v15067_v36  ;;  %12744 = vmatprep.subr.mxu0 %v20140_v5  ;;  %v15401_v15 = vsub.f32 %v15297_v19, %v20190_v14  ;;  %v20193_v14 = vand.u32 4294901760, %v15308_v53  ;;  %v15430_v36 = vsub.f32 %v15324_v33, %v20195_v24  ;;  %v15447_v19 = vand.u32 4294901760, %v4527_v29  ;;  %v4524_v33 = vld [vmem:[%s19463_s9 + $0x90] sm:$0xff] }
 0x389   :  { %12789 = vmatprep.subr.mxu1 %v20140_v5  ;;  %12745 = vmatpush3.msra.mxu0 %v15136_v51 }
 0x38a   :  { %v15418_v43 = vsub.f32 %v15308_v53, %v20193_v14  ;;  %12790 = vmatpush3.msra.mxu1 %v15076_v62  ;;  %12746 = vmatprep.subr.mxu0 %v20140_v5  ;;  %v15433_v14 = vand.u32 4294901760, %v4528_v9  ;;  %20198 = vst [vmem:[#allocation50_spill] sm:$0xff] %v15447_v19  ;;  %v20199_v53 = vand.u32 4294901760, %v15349_v26  ;;  %v20201_v62 = vand.u32 4294901760, %v15362_v59 }
 0x38b   :  { %12791 = vmatprep.subr.mxu1 %v20140_v5  ;;  %12747 = vmatpush3.msra.mxu0 %v15148_v28 }
 0x38c   :  { %20196 = vst [vmem:[#allocation49_spill] sm:$0xff] %v15433_v14  ;;  %12748 = vmatprep.mubr.msk.f32.mxu0 %vm13225_vm0, %v20140_v5  ;;  %12792 = vmatpush3.msra.mxu1 %v15085_v30  ;;  %v15459_v11 = vsub.f32 %v15349_v26, %v20199_v53  ;;  %v15474_v53 = vsub.f32 %v15362_v59, %v20201_v62  ;;  %v15477_v26 = vand.u32 4294901760, %v4525_v20  ;;  %v15494_v59 = vand.u32 4294901760, %v4524_v33 }
 0x38d   :  { %12749 = vmatmul.mubr.f32.vlgmr.msra.gmra.mxu0 %v15033_v2  ;;  %12768 = vmatprep.subr.mxu0 %v20140_v5  ;;  %v20203_v2 = vand.u32 4294901760, %v15074_v48  ;;  %v15489_v62 = vsub.f32 %v15379_v56, %v20204_v1  ;;  %v15492_v24 = vsub.f32 %v4528_v9, %v15433_v14  ;;  %v15508_v9 = vsub.f32 %v4527_v29, %v15447_v19  ;;  %v4518_v56 = vld [vmem:[%s19463_s9 + $0x60] sm:$0xff] }
 0x38e   :  { %20202 = vst [vmem:[#allocation52_spill] sm:$0xff] %v15477_v26  ;;  %12793 = vmatprep.subr.mxu1 %v20140_v5  ;;  %20206 = vst [vmem:[#allocation54_spill] sm:$0xff] %v15494_v59  ;;  %v15510_v30 = vand.u32 4294901760, %v4522_v45  ;;  %v15541_v29 = vand.u32 4294901760, %v4519_v32  ;;  %12799 = vmatprep.mubr.msk.f32.mxu1 %vm13225_vm0, %v20140_v5  ;;  %v20225_v19 = vand.u32 4294901760, %v15103_v40  ;;  %v20228_v14 = vand.u32 4294901760, %v15337_v63 }
 0x38f   :  { %12769 = vmatpush3.msra.mxu0 %v20203_v2  ;;  %20205 = vst [vmem:[#allocation53_spill] sm:$0xff] %v15492_v24  ;;  %12794 = vmatpush3.msra.mxu1 %v15097_v7  ;;  %v20207_v2 = vand.u32 4294901760, %v15391_v46  ;;  %20208 = vst [vmem:[#allocation55_spill] sm:$0xff] %v15508_v9  ;;  %v20210_v7 = vand.u32 4294901760, %v15083_v21  ;;  %v20229_v40 = vand.u32 4294901760, %v15492_v24  ;;  %v20232_v63 = vand.u32 4294901760, %v15358_v60 }
 0x390   :  { %12770 = vmatprep.subr.mxu0 %v20140_v5  ;;  %20209 = vst [vmem:[#allocation56_spill] sm:$0xff] %v15510_v30  ;;  %12795 = vmatprep.subr.mxu1 %v20140_v5  ;;  %20215 = vst [vmem:[#allocation59_spill] sm:$0xff] %v15541_v29  ;;  %v15565_v21 = vsub.f32 %v4522_v45, %v15510_v30  ;;  %v4510_v30 = vld [vmem:[%s19463_s9 + $0x20] sm:$0xff] }
 0x391   :  { %v15505_v1 = vsub.f32 %v15391_v46, %v20207_v2  ;;  %12771 = vmatpush3.msra.mxu0 %v20210_v7  ;;  %v15522_v2 = vsub.f32 %v15405_v27, %v20211_v0  ;;  %v15525_v46 = vand.u32 4294901760, %v4521_v18  ;;  %12796 = vmatpush3.msra.mxu1 %v15108_v42  ;;  %v20213_v7 = vand.u32 4294901760, %v15422_v47  ;;  %v4515_v27 = vld [vmem:[%s19463_s9 + $0x48] sm:$0xff] }
 0x392   :  { %12772 = vmatprep.subr.mxu0 %v20140_v5  ;;  %v15539_v0 = vsub.f32 %v4525_v20, %v15477_v26  ;;  %12797 = vmatprep.subr.mxu1 %v20140_v5  ;;  %v20216_v42 = vand.u32 4294901760, %v15093_v57  ;;  %v15554_v20 = vand.u32 4294901760, %v4518_v56  ;;  %20219 = vst [vmem:[#allocation62_spill] sm:$0xff] %v15565_v21  ;;  %v20224_v26 = vand.u32 4294901760, %v15320_v52 }
 0x393   :  { %20212 = vst [vmem:[#allocation57_spill] sm:$0xff] %v15525_v46  ;;  %v15536_v48 = vsub.f32 %v15422_v47, %v20213_v7  ;;  %v15552_v7 = vsub.f32 %v4524_v33, %v15494_v59  ;;  %v4513_v47 = vld [vmem:[%s19463_s9 + $0x38] sm:$0xff]  ;;  %12798 = vmatpush3.msra.mxu1 %v15123_v35  ;;  %v15567_v33 = vand.u32 4294901760, %v4516_v55  ;;  %v20221_v59 = vand.u32 4294901760, %v15463_v22  ;;  %v4507_v35 = vld [vmem:[%s19463_s9 + $0x8] sm:$0xff]  ;;  %12782 = vmatprep.mubr.msk.f32.mxu0 %vm13225_vm0, %v20140_v5 }
 0x394   :  { %20214 = vst [vmem:[#allocation58_spill] sm:$0xff] %v15539_v0  ;;  %12773 = vmatpush3.msra.mxu0 %v20216_v42  ;;  %20218 = vst [vmem:[#allocation61_spill] sm:$0xff] %v15554_v20  ;;  %12800 = vmatmul.mubr.f32.vlgmr.msra.gmra.mxu1 %v15030_v10  ;;  %v15581_v45 = vsub.f32 %v4521_v18, %v15525_v46  ;;  %v15583_v42 = vand.u32 4294901760, %v4515_v27  ;;  %v15597_v18 = vand.u32 4294901760, %v4513_v47  ;;  %v4509_v46 = vld [vmem:[%s19463_s9 + $0x18] sm:$0xff]  ;;  %v15614_v52 = vand.u32 4294901760, %v4512_v3 }
 0x395   :  { %20217 = vst [vmem:[#allocation60_spill] sm:$0xff] %v15552_v7  ;;  %20220 = vst [vmem:[#allocation63_spill] sm:$0xff] %v15567_v33  ;;  %12774 = vmatprep.subr.mxu0 %v20140_v5  ;;  %v15578_v57 = vsub.f32 %v15463_v22, %v20221_v59  ;;  %4781 = vmatprep.subr.mxu1 %v20224_v26  ;;  %v15595_v22 = vsub.f32 %v4519_v32, %v15541_v29  ;;  %v15631_v59 = vand.u32 4294901760, %v4510_v30 }
 0x396   :  { %20222 = vst [vmem:[#allocation64_spill] sm:$0xff] %v15581_v45  ;;  %20223 = vst [vmem:[#allocation65_spill] sm:$0xff] %v15583_v42  ;;  %12775 = vmatpush3.msra.mxu0 %v20225_v19  ;;  %4787 = vmatpush1.msra.mxu1 %v20228_v14  ;;  %v15608_v26 = vsub.f32 %v15492_v24, %v20229_v40  ;;  %v15612_v32 = vsub.f32 %v4518_v56, %v15554_v20  ;;  %v20233_v14 = vand.u32 4294901760, %v15508_v9 }
 0x397   :  { %20226 = vst [vmem:[#allocation66_spill] sm:$0xff] %v15595_v22  ;;  %20227 = vst [vmem:[#allocation67_spill] sm:$0xff] %v15597_v18  ;;  %5161 = vmatprep.mubr.f32.mxu1 %v14553_v12  ;;  %12776 = vmatprep.subr.mxu0 %v20140_v5  ;;  %v15629_v56 = vsub.f32 %v4516_v55, %v15567_v33  ;;  %v20236_v12 = vand.u32 4294901760, %v15121_v54  ;;  %v20237_v24 = vand.u32 4294901760, %v15375_v17  ;;  %v20240_v55 = vand.u32 4294901760, %v15387_v38 }
 0x398   :  { %20230 = vst [vmem:[#allocation68_spill] sm:$0xff] %v15612_v32  ;;  %20231 = vst [vmem:[#allocation69_spill] sm:$0xff] %v15614_v52  ;;  %4793 = vmatprep.subr.mxu1 %v20232_v63  ;;  %v15625_v40 = vsub.f32 %v15508_v9, %v20233_v14  ;;  %v15640_v14 = vsub.f32 %v4515_v27, %v15583_v42  ;;  %v15642_v9 = vand.u32 4294901760, %v4509_v46  ;;  %v20241_v54 = vand.u32 4294901760, %v15539_v0  ;;  %v4506_v27 = vld [vmem:[%s19463_s9] sm:$0xff] }
 0x399   :  { %20234 = vst [vmem:[#allocation70_spill] sm:$0xff] %v15629_v56  ;;  %20235 = vst [vmem:[#allocation71_spill] sm:$0xff] %v15631_v59  ;;  %12777 = vmatpush3.msra.mxu0 %v20236_v12  ;;  %4799 = vmatpush1.msra.mxu1 %v20237_v24  ;;  %v15654_v24 = vsub.f32 %v4513_v47, %v15597_v18  ;;  %v15656_v60 = vand.u32 4294901760, %v4507_v35  ;;  %v20244_v63 = vand.u32 4294901760, %v15136_v51  ;;  %v20245_v38 = vand.u32 4294901760, %v15401_v15 }
 0x39a   :  { %20238 = vst [vmem:[#allocation72_spill] sm:$0xff] %v15640_v14  ;;  %20239 = vst [vmem:[#allocation73_spill] sm:$0xff] %v15642_v9  ;;  %12778 = vmatprep.subr.mxu0 %v20140_v5  ;;  %4805 = vmatprep.subr.mxu1 %v20240_v55  ;;  %v15650_v12 = vsub.f32 %v15539_v0, %v20241_v54  ;;  %v20246_v54 = vand.u32 4294901760, %v15552_v7  ;;  %v15673_v19 = vsub.f32 %v4512_v3, %v15614_v52  ;;  %v4600_v3 = vld [vmem:[%s19463_s9 + $0x2f0] sm:$0xff]  ;;  %v4590_v0 = vld [vmem:[%s19463_s9 + $0x2a0] sm:$0xff] }
 0x39b   :  { %20242 = vst [vmem:[#allocation74_spill] sm:$0xff] %v15654_v24  ;;  %20243 = vst [vmem:[#allocation75_spill] sm:$0xff] %v15656_v60  ;;  %12779 = vmatpush3.msra.mxu0 %v20244_v63  ;;  %4811 = vmatpush1.msra.mxu1 %v20245_v38  ;;  %v20248_v51 = vand.u32 4294901760, %v15418_v43  ;;  %v20249_v63 = vand.u32 4294901760, %v15565_v21  ;;  %v15686_v55 = vsub.f32 %v4510_v30, %v15631_v59  ;;  %v20251_v47 = vand.u32 4294901760, %v15148_v28  ;;  %v4599_v28 = vld [vmem:[%s19463_s9 + $0x2e8] sm:$0xff] }
 0x39c   :  { %v15669_v17 = vsub.f32 %v15552_v7, %v20246_v54  ;;  %20247 = vst [vmem:[#allocation76_spill] sm:$0xff] %v15673_v19  ;;  %12780 = vmatprep.subr.mxu0 %v20140_v5  ;;  %v20252_v43 = vand.u32 4294901760, %v15581_v45  ;;  %v15702_v30 = vsub.f32 %v4509_v46, %v15642_v9  ;;  %v15704_v15 = vand.u32 4294901760, %v4506_v27  ;;  %v20261_v46 = vld [vmem:[#allocation46_spill] sm:$0xff]  ;;  %v4591_v7 = vld [vmem:[%s19463_s9 + $0x2a8] sm:$0xff] }
 0x39d   :  { %4817 = vmatprep.subr.mxu1 %v20248_v51  ;;  %v15682_v38 = vsub.f32 %v15565_v21, %v20249_v63  ;;  %20250 = vst [vmem:[#allocation77_spill] sm:$0xff] %v15686_v55  ;;  %12781 = vmatpush3.msra.mxu0 %v20251_v47  ;;  %v20255_v47 = vand.u32 4294901760, %v15430_v36  ;;  %v15720_v5 = vsub.f32 %v4507_v35, %v15656_v60  ;;  %v15732_v54 = vand.u32 4294901760, %v4600_v3  ;;  %v4597_v35 = vld [vmem:[%s19463_s9 + $0x2d8] sm:$0xff]  ;;  %v4594_v21 = vld [vmem:[%s19463_s9 + $0x2c0] sm:$0xff] }
 0x39e   :  { %v15698_v51 = vsub.f32 %v15581_v45, %v20252_v43  ;;  %20253 = vst [vmem:[#allocation78_spill] sm:$0xff] %v15702_v30  ;;  %20254 = vst [vmem:[#allocation79_spill] sm:$0xff] %v15704_v15  ;;  %12783 = vmatmul.mubr.f32.vlgmr.msra.gmra.mxu0 %v15030_v10  ;;  %v20256_v43 = vand.u32 4294901760, %v15595_v22  ;;  %4632 = vmatprep.subr.mxu0 %v15210_v39  ;;  %v20258_v45 = vand.u32 4294901760, %v15444_v50  ;;  %v20259_v10 = vand.u32 4294901760, %v15612_v32 }
 0x39f   :  { %4823 = vmatpush1.msra.mxu1 %v20255_v47  ;;  %20257 = vst [vmem:[#allocation80_spill] sm:$0xff] %v15720_v5  ;;  %20260 = vst [vmem:[#allocation81_spill] sm:$0xff] %v15732_v54  ;;  %4634 = vmatpush1.msra.mxu0 %v15217_v23  ;;  %v20268_v50 = vand.u32 4294901760, %v15654_v24 }
 0x3a0   :  { %v15716_v63 = vsub.f32 %v15595_v22, %v20256_v43  ;;  %4829 = vmatprep.subr.mxu1 %v20258_v45  ;;  %v15729_v47 = vsub.f32 %v15612_v32, %v20259_v10  ;;  %4764 = vmatprep.mubr.f32.mxu0 %v20261_v46  ;;  %v20262_v45 = vand.u32 4294901760, %v15629_v56  ;;  %v15746_v43 = vand.u32 4294901760, %v4599_v28  ;;  %v4596_v32 = vld [vmem:[%s19463_s9 + $0x2d0] sm:$0xff] }
 0x3a1   :  { %v20264_v22 = vand.u32 4294901760, %v15459_v11  ;;  %4636 = vmatprep.subr.mxu0 %v15229_v44  ;;  %v20265_v46 = vand.u32 4294901760, %v15640_v14  ;;  %v20271_v11 = vand.u32 4294901760, %v15673_v19  ;;  %v15792_v10 = vsub.f32 %v4600_v3, %v15732_v54 }
 0x3a2   :  { %v15743_v36 = vsub.f32 %v15629_v56, %v20262_v45  ;;  %20263 = vst [vmem:[#allocation82_spill] sm:$0xff] %v15746_v43  ;;  %v15762_v56 = vsub.f32 %v4506_v27, %v15704_v15  ;;  %4638 = vmatpush1.msra.mxu0 %v15239_v49  ;;  %v15777_v27 = vand.u32 4294901760, %v4597_v35  ;;  %v15809_v3 = vsub.f32 %v4599_v28, %v15746_v43 }
 0x3a3   :  { %4835 = vmatpush1.msra.mxu1 %v20264_v22  ;;  %v15758_v45 = vsub.f32 %v15640_v14, %v20265_v46  ;;  %v20267_v22 = vand.u32 4294901760, %v15474_v53  ;;  %v15774_v46 = vsub.f32 %v15654_v24, %v20268_v50  ;;  %v4593_v14 = vld [vmem:[%s19463_s9 + $0x2b8] sm:$0xff]  ;;  %v20270_v53 = vand.u32 4294901760, %v15489_v62  ;;  %4640 = vmatprep.subr.mxu0 %v15249_v16  ;;  %20272 = vst [vmem:[#allocation85_spill] sm:$0xff] %v15792_v10 }
 0x3a4   :  { %20266 = vst [vmem:[#allocation83_spill] sm:$0xff] %v15762_v56  ;;  %20269 = vst [vmem:[#allocation84_spill] sm:$0xff] %v15777_v27  ;;  %v15789_v50 = vsub.f32 %v15673_v19, %v20271_v11  ;;  %v15794_v24 = vand.u32 4294901760, %v4596_v32  ;;  %v20274_v62 = vand.u32 4294901760, %v15505_v1  ;;  %4642 = vmatpush1.msra.mxu0 %v15257_v25  ;;  %v15811_v19 = vand.u32 4294901760, %v4594_v21  ;;  %v4588_v25 = vld [vmem:[%s19463_s9 + $0x290] sm:$0xff] }
 0x3a5   :  { %4841 = vmatprep.subr.mxu1 %v20267_v22  ;;  %v20275_v22 = vand.u32 4294901760, %v15686_v55  ;;  %20276 = vst [vmem:[#allocation87_spill] sm:$0xff] %v15809_v3  ;;  %v20278_v1 = vand.u32 4294901760, %v15522_v2  ;;  %4644 = vmatprep.subr.mxu0 %v15267_v31  ;;  %v20281_v2 = vand.u32 4294901760, %v15536_v48  ;;  %v15841_v28 = vsub.f32 %v4597_v35, %v15777_v27  ;;  %v4587_v31 = vld [vmem:[%s19463_s9 + $0x288] sm:$0xff] }
 0x3a6   :  { %4847 = vmatpush1.msra.mxu1 %v20270_v53  ;;  %20273 = vst [vmem:[#allocation86_spill] sm:$0xff] %v15794_v24  ;;  %20277 = vst [vmem:[#allocation88_spill] sm:$0xff] %v15811_v19  ;;  %v20279_v53 = vand.u32 4294901760, %v15702_v30  ;;  %4646 = vmatpush1.msra.mxu0 %v15278_v4  ;;  %v20285_v48 = vand.u32 4294901760, %v15578_v57  ;;  %v15856_v35 = vand.u32 4294901760, %v4590_v0  ;;  %v20288_v4 = vand.u32 4294901760, %v15608_v26 }
 0x3a7   :  { %4853 = vmatprep.subr.mxu1 %v20274_v62  ;;  %v15806_v11 = vsub.f32 %v15686_v55, %v20275_v22  ;;  %v15826_v55 = vand.u32 4294901760, %v4593_v14  ;;  %v20282_v62 = vand.u32 4294901760, %v15720_v5  ;;  %20283 = vst [vmem:[#allocation90_spill] sm:$0xff] %v15841_v28  ;;  %4648 = vmatprep.subr.mxu0 %v15289_v13  ;;  %v20291_v13 = vand.u32 4294901760, %v15625_v40 }
 0x3a8   :  { %4859 = vmatpush1.msra.mxu1 %v20278_v1  ;;  %v15823_v22 = vsub.f32 %v15702_v30, %v20279_v53  ;;  %v15843_v30 = vand.u32 4294901760, %v4591_v7  ;;  %20287 = vst [vmem:[#allocation93_spill] sm:$0xff] %v15856_v35  ;;  %4650 = vmatpush1.msra.mxu0 %v15299_v58  ;;  %v4584_v1 = vld [vmem:[%s19463_s9 + $0x270] sm:$0xff]  ;;  %v20292_v26 = vand.u32 4294901760, %v15762_v56  ;;  %v4582_v58 = vld [vmem:[%s19463_s9 + $0x260] sm:$0xff]  ;;  %v20307_v40 = vand.u32 4294901760, %v15716_v63 }
 0x3a9   :  { %20280 = vst [vmem:[#allocation89_spill] sm:$0xff] %v15826_v55  ;;  %4865 = vmatprep.subr.mxu1 %v20281_v2  ;;  %v15838_v53 = vsub.f32 %v15720_v5, %v20282_v62  ;;  %v15854_v62 = vsub.f32 %v4596_v32, %v15794_v24  ;;  %v4585_v5 = vld [vmem:[%s19463_s9 + $0x278] sm:$0xff]  ;;  %v15867_v2 = vsub.f32 %v4594_v21, %v15811_v19  ;;  %v15869_v32 = vand.u32 4294901760, %v4588_v25 }
 0x3aa   :  { %20284 = vst [vmem:[#allocation91_spill] sm:$0xff] %v15843_v30  ;;  %4871 = vmatpush1.msra.mxu1 %v20285_v48  ;;  %4652 = vmatprep.subr.mxu0 %v15310_v41  ;;  %v15881_v57 = vsub.f32 %v15762_v56, %v20292_v26  ;;  %v15884_v21 = vsub.f32 %v4593_v14, %v15826_v55  ;;  %v15886_v48 = vand.u32 4294901760, %v4587_v31  ;;  %v15899_v14 = vand.u32 4294901760, %v4585_v5  ;;  %v4581_v56 = vld [vmem:[%s19463_s9 + $0x258] sm:$0xff] }
 0x3ab   :  { %20286 = vst [vmem:[#allocation92_spill] sm:$0xff] %v15854_v62  ;;  %4877 = vmatprep.subr.mxu1 %v20288_v4  ;;  %20289 = vst [vmem:[#allocation94_spill] sm:$0xff] %v15867_v2  ;;  %4654 = vmatpush1.msra.mxu0 %v15326_v8  ;;  %v15897_v26 = vsub.f32 %v4591_v7, %v15843_v30  ;;  %v20298_v41 = vand.u32 4294901760, %v15669_v17  ;;  %v15914_v7 = vsub.f32 %v4590_v0, %v15856_v35  ;;  %v4579_v8 = vld [vmem:[%s19463_s9 + $0x248] sm:$0xff] }
 0x3ac   :  { %20290 = vst [vmem:[#allocation95_spill] sm:$0xff] %v15869_v32  ;;  %4883 = vmatpush1.msra.mxu1 %v20291_v13  ;;  %20293 = vst [vmem:[#allocation96_spill] sm:$0xff] %v15884_v21  ;;  %v20295_v13 = vand.u32 4294901760, %v15650_v12  ;;  %4656 = vmatprep.subr.mxu0 %v15343_v34  ;;  %v20299_v12 = vand.u32 4294901760, %v15792_v10  ;;  %v15916_v4 = vand.u32 4294901760, %v4584_v1  ;;  %v20302_v17 = vand.u32 4294901760, %v15809_v3 }
 0x3ad   :  { %20294 = vst [vmem:[#allocation97_spill] sm:$0xff] %v15886_v48  ;;  %20296 = vst [vmem:[#allocation98_spill] sm:$0xff] %v15897_v26  ;;  %4658 = vmatpush1.msra.mxu0 %v15351_v6  ;;  %v15931_v0 = vsub.f32 %v4588_v25, %v15869_v32  ;;  %v20304_v34 = vand.u32 4294901760, %v15698_v51  ;;  %v15941_v6 = vsub.f32 %v4587_v31, %v15886_v48  ;;  %v20308_v25 = vand.u32 4294901760, %v15841_v28  ;;  %v4578_v31 = vld [vmem:[%s19463_s9 + $0x240] sm:$0xff] }
 0x3ae   :  { %4889 = vmatprep.subr.mxu1 %v20295_v13  ;;  %20297 = vst [vmem:[#allocation99_spill] sm:$0xff] %v15899_v14  ;;  %v15910_v13 = vsub.f32 %v15792_v10, %v20299_v12  ;;  %20300 = vst [vmem:[#allocation100_spill] sm:$0xff] %v15914_v7  ;;  %v15927_v12 = vsub.f32 %v15809_v3, %v20302_v17  ;;  %v15933_v10 = vand.u32 4294901760, %v4582_v58  ;;  %4660 = vmatprep.subr.mxu0 %v15364_v61  ;;  %v20316_v61 = vld [vmem:[#allocation50_spill] sm:$0xff] }
 0x3af   :  { %4895 = vmatpush1.msra.mxu1 %v20298_v41  ;;  %v20301_v41 = vand.u32 4294901760, %v15682_v38  ;;  %20303 = vst [vmem:[#allocation101_spill] sm:$0xff] %v15931_v0  ;;  %20305 = vst [vmem:[#allocation102_spill] sm:$0xff] %v15941_v6  ;;  %v15943_v17 = vand.u32 4294901760, %v4581_v56  ;;  %4662 = vmatpush1.msra.mxu0 %v15407_v37  ;;  %v15955_v38 = vsub.f32 %v4585_v5, %v15899_v14  ;;  %v20311_v63 = vand.u32 4294901760, %v15729_v47 }
 0x3b0   :  { %v4972_v3 = vand.u32 4294901760, %v15910_v13  ;;  %v20315_v37 = vand.u32 4294901760, %v15743_v36  ;;  %v4978_v47 = vand.u32 4294901760, %v15927_v12  ;;  %v20320_v36 = vld [vmem:[#allocation52_spill] sm:$0xff]  ;;  %v20321_v12 = vand.u32 4294901760, %v15884_v21 }
 0x3b1   :  { %4901 = vmatprep.subr.mxu1 %v20301_v41  ;;  %20306 = vst [vmem:[#allocation103_spill] sm:$0xff] %v15943_v17  ;;  %20309 = vst [vmem:[#allocation104_spill] sm:$0xff] %v15955_v38  ;;  %v15957_v41 = vand.u32 4294901760, %v4579_v8 }
 0x3b2   :  { %4907 = vmatpush1.msra.mxu1 %v20304_v34  ;;  %v15951_v34 = vsub.f32 %v15841_v28, %v20308_v25  ;;  %v20313_v25 = vand.u32 4294901760, %v15854_v62  ;;  %v15973_v28 = vsub.f32 %v4584_v1, %v15916_v4  ;;  %v4576_v1 = vld [vmem:[%s19463_s9 + $0x230] sm:$0xff]  ;;  %v15997_v5 = vsub.f32 %v15884_v21, %v20321_v12 }
 0x3b3   :  { %4913 = vmatprep.subr.mxu1 %v20307_v40  ;;  %20310 = vst [vmem:[#allocation105_spill] sm:$0xff] %v15957_v41  ;;  %v20312_v40 = vld [vmem:[#allocation49_spill] sm:$0xff]  ;;  %v20326_v12 = vand.u32 4294901760, %v15897_v26  ;;  %v16019_v21 = vsub.f32 %v4579_v8, %v15957_v41 }
 0x3b4   :  { %4919 = vmatpush1.msra.mxu1 %v20311_v63  ;;  %4664 = vmatprep.subr.mxu0 %v20312_v40  ;;  %v15969_v51 = vsub.f32 %v15854_v62, %v20313_v25  ;;  %20314 = vst [vmem:[#allocation106_spill] sm:$0xff] %v15973_v28  ;;  %v20317_v63 = vand.u32 4294901760, %v15867_v2  ;;  %v15986_v62 = vsub.f32 %v4582_v58, %v15933_v10  ;;  %v16003_v58 = vand.u32 4294901760, %v4578_v31  ;;  %v20329_v40 = vld [vmem:[#allocation56_spill] sm:$0xff]  ;;  %v4573_v8 = vld [vmem:[%s19463_s9 + $0x218] sm:$0xff] }
 0x3b5   :  { %4925 = vmatprep.subr.mxu1 %v20315_v37  ;;  %4666 = vmatpush1.msra.mxu0 %v20316_v61  ;;  %v20319_v37 = vand.u32 4294901760, %v15758_v45  ;;  %v16001_v25 = vsub.f32 %v4581_v56, %v15943_v17  ;;  %v20324_v45 = vand.u32 4294901760, %v15774_v46  ;;  %20327 = vst [vmem:[#allocation110_spill] sm:$0xff] %v16019_v21  ;;  %v20328_v61 = vand.u32 4294901760, %v15789_v50 }
 0x3b6   :  { %v15982_v13 = vsub.f32 %v15867_v2, %v20317_v63  ;;  %20318 = vst [vmem:[#allocation107_spill] sm:$0xff] %v15986_v62  ;;  %4668 = vmatprep.subr.mxu0 %v20320_v36  ;;  %20323 = vst [vmem:[#allocation109_spill] sm:$0xff] %v16003_v58  ;;  %v4575_v2 = vld [vmem:[%s19463_s9 + $0x228] sm:$0xff]  ;;  %v4984_v36 = vand.u32 4294901760, %v15951_v34  ;;  %v16015_v63 = vsub.f32 %v15897_v26, %v20326_v12  ;;  %v4990_v46 = vand.u32 4294901760, %v15969_v51 }
 0x3b7   :  { %4931 = vmatpush1.msra.mxu1 %v20319_v37  ;;  %20322 = vst [vmem:[#allocation108_spill] sm:$0xff] %v16001_v25  ;;  %v20325_v37 = vld [vmem:[#allocation54_spill] sm:$0xff]  ;;  %v16031_v26 = vand.u32 4294901760, %v4576_v1  ;;  %v20332_v50 = vand.u32 4294901760, %v15806_v11  ;;  %v20334_v56 = vand.u32 4294901760, %v15931_v0  ;;  %v20336_v11 = vand.u32 4294901760, %v15823_v22 }
 0x3b8   :  { %4937 = vmatprep.subr.mxu1 %v20324_v45  ;;  %4670 = vmatpush1.msra.mxu0 %v20325_v37  ;;  %v20330_v45 = vand.u32 4294901760, %v15914_v7  ;;  %v4996_v51 = vand.u32 4294901760, %v15982_v13  ;;  %v5002_v13 = vand.u32 4294901760, %v15997_v5  ;;  %v20339_v22 = vand.u32 4294901760, %v15838_v53 }
 0x3b9   :  { %4943 = vmatpush1.msra.mxu1 %v20328_v61  ;;  %4672 = vmatprep.subr.mxu0 %v20329_v40  ;;  %20331 = vst [vmem:[#allocation111_spill] sm:$0xff] %v16031_v26  ;;  %v20333_v61 = vld [vmem:[#allocation57_spill] sm:$0xff]  ;;  %v4572_v40 = vld [vmem:[%s19463_s9 + $0x210] sm:$0xff]  ;;  %v5008_v5 = vand.u32 4294901760, %v16015_v63  ;;  %v20342_v53 = vand.u32 4294901760, %v15881_v57  ;;  %v16092_v12 = vsub.f32 %v4576_v1, %v16031_v26 }
 0x3ba   :  { %v16028_v34 = vsub.f32 %v15914_v7, %v20330_v45  ;;  %4949 = vmatprep.subr.mxu1 %v20332_v50  ;;  %4674 = vmatpush1.msra.mxu0 %v20333_v61  ;;  %v16043_v45 = vsub.f32 %v15931_v0, %v20334_v56  ;;  %v16046_v7 = vand.u32 4294901760, %v4575_v2  ;;  %v20337_v50 = vand.u32 4294901760, %v15941_v6  ;;  %v4570_v61 = vld [vmem:[%s19463_s9 + $0x200] sm:$0xff] }
 0x3bb   :  { %4955 = vmatpush1.msra.mxu1 %v20336_v11  ;;  %4676 = vmatprep.subr.mxu0 %v15541_v29  ;;  %v16062_v0 = vsub.f32 %v4578_v31, %v16003_v58  ;;  %v20340_v11 = vand.u32 4294901760, %v15955_v38  ;;  %v16077_v31 = vand.u32 4294901760, %v4573_v8  ;;  %20344 = vst [vmem:[#allocation115_spill] sm:$0xff] %v16092_v12  ;;  %v16109_v1 = vand.u32 4294901760, %v4570_v61 }
 0x3bc   :  { %20335 = vst [vmem:[#allocation112_spill] sm:$0xff] %v16046_v7  ;;  %v16058_v56 = vsub.f32 %v15941_v6, %v20337_v50  ;;  %4961 = vmatprep.subr.mxu1 %v20339_v22  ;;  %4678 = vmatpush1.msra.mxu0 %v15554_v20  ;;  %v4569_v6 = vld [vmem:[%s19463_s9 + $0x1f8] sm:$0xff]  ;;  %v5014_v63 = vand.u32 4294901760, %v16028_v34  ;;  %v20343_v22 = vand.u32 4294901760, %v15973_v28  ;;  %v4567_v20 = vld [vmem:[%s19463_s9 + $0x1e8] sm:$0xff]  ;;  %v5020_v57 = vand.u32 4294901760, %v16043_v45 }
 0x3bd   :  { %20338 = vst [vmem:[#allocation113_spill] sm:$0xff] %v16062_v0  ;;  %v16074_v50 = vsub.f32 %v15955_v38, %v20340_v11  ;;  %20341 = vst [vmem:[#allocation114_spill] sm:$0xff] %v16077_v31  ;;  %4967 = vmatpush1.msra.mxu1 %v20342_v53  ;;  %4680 = vmatprep.subr.mxu0 %v15567_v33  ;;  %v16094_v38 = vand.u32 4294901760, %v4572_v40  ;;  %v20346_v34 = vand.u32 4294901760, %v15986_v62  ;;  %v20349_v45 = vand.u32 4294901760, %v16001_v25 }
 0x3be   :  { %v16089_v11 = vsub.f32 %v15973_v28, %v20343_v22  ;;  %4973 = vmatprep.subr.mxu1 %v4972_v3  ;;  %4682 = vmatpush1.msra.mxu0 %v15583_v42  ;;  %v16107_v22 = vsub.f32 %v4575_v2, %v16046_v7  ;;  %20348 = vst [vmem:[#allocation118_spill] sm:$0xff] %v16109_v1  ;;  %v4566_v28 = vld [vmem:[%s19463_s9 + $0x1e0] sm:$0xff]  ;;  %v5026_v3 = vand.u32 4294901760, %v16058_v56  ;;  %v16122_v2 = vand.u32 4294901760, %v4569_v6 }
 0x3bf   :  { %20345 = vst [vmem:[#allocation116_spill] sm:$0xff] %v16094_v38  ;;  %v16104_v53 = vsub.f32 %v15986_v62, %v20346_v34  ;;  %4979 = vmatpush2.msra.mxu1 %v4978_v47  ;;  %4684 = vmatprep.subr.mxu0 %v15597_v18  ;;  %v16119_v42 = vsub.f32 %v16001_v25, %v20349_v45  ;;  %v4564_v62 = vld [vmem:[%s19463_s9 + $0x1d0] sm:$0xff]  ;;  %v5032_v47 = vand.u32 4294901760, %v16074_v50  ;;  %v20351_v56 = vand.u32 4294901760, %v16019_v21  ;;  %v4563_v25 = vld [vmem:[%s19463_s9 + $0x1c8] sm:$0xff] }
 0x3c0   :  { %20347 = vst [vmem:[#allocation117_spill] sm:$0xff] %v16107_v22  ;;  %20350 = vst [vmem:[#allocation119_spill] sm:$0xff] %v16122_v2  ;;  %4985 = vmatprep.subr.mxu1 %v4984_v36  ;;  %4686 = vmatpush1.msra.mxu0 %v15614_v52  ;;  %v16135_v45 = vsub.f32 %v4573_v8, %v16077_v31  ;;  %v16137_v34 = vand.u32 4294901760, %v4567_v20  ;;  %v5038_v36 = vand.u32 4294901760, %v16089_v11  ;;  %v4561_v8 = vld [vmem:[%s19463_s9 + $0x1b8] sm:$0xff]  ;;  %v16159_v50 = vand.u32 4294901760, %v4564_v62 }
 0x3c1   :  { %v16132_v18 = vsub.f32 %v16019_v21, %v20351_v56  ;;  %4991 = vmatpush2.msra.mxu1 %v4990_v46  ;;  %4688 = vmatprep.subr.mxu0 %v15631_v59  ;;  %v16146_v52 = vsub.f32 %v4572_v40, %v16094_v38  ;;  %v16148_v56 = vand.u32 4294901760, %v4566_v28  ;;  %v5044_v46 = vand.u32 4294901760, %v16104_v53  ;;  %v4560_v40 = vld [vmem:[%s19463_s9 + $0x1b0] sm:$0xff]  ;;  %v4558_v59 = vld [vmem:[%s19463_s9 + $0x1a0] sm:$0xff] }
 0x3c2   :  { %20352 = vst [vmem:[#allocation120_spill] sm:$0xff] %v16135_v45  ;;  %4997 = vmatprep.subr.mxu1 %v4996_v51  ;;  %4690 = vmatpush1.msra.mxu0 %v15642_v9  ;;  %v16157_v11 = vsub.f32 %v4570_v61, %v16109_v1  ;;  %v5050_v51 = vand.u32 4294901760, %v16119_v42  ;;  %v20353_v9 = vand.u32 4294901760, %v16062_v0  ;;  %v16170_v21 = vsub.f32 %v4569_v6, %v16122_v2  ;;  %v4557_v6 = vld [vmem:[%s19463_s9 + $0x198] sm:$0xff] }
 0x3c3   :  { %5003 = vmatpush2.msra.mxu1 %v5002_v13  ;;  %4692 = vmatprep.subr.mxu0 %v15656_v60  ;;  %v16172_v61 = vand.u32 4294901760, %v4563_v25  ;;  %v5056_v13 = vand.u32 4294901760, %v16132_v18  ;;  %v16181_v60 = vsub.f32 %v4567_v20, %v16137_v34  ;;  %v16194_v42 = vsub.f32 %v4566_v28, %v16148_v56 }
 0x3c4   :  { %v5061_v53 = vsub.f32 %v16062_v0, %v20353_v9  ;;  %5009 = vmatprep.subr.mxu1 %v5008_v5  ;;  %4694 = vmatpush1.msra.mxu0 %v15704_v15  ;;  %v16183_v9 = vand.u32 4294901760, %v4561_v8  ;;  %v20354_v5 = vand.u32 4294901760, %v16092_v12  ;;  %v16196_v20 = vand.u32 4294901760, %v4560_v40  ;;  %v4555_v15 = vld [vmem:[%s19463_s9 + $0x188] sm:$0xff] }
 0x3c5   :  { %5015 = vmatpush2.msra.mxu1 %v5014_v63  ;;  %4696 = vmatprep.subr.mxu0 %v15732_v54  ;;  %v20355_v63 = vand.u32 4294901760, %v16107_v22  ;;  %v16207_v18 = vsub.f32 %v4564_v62, %v16159_v50  ;;  %v16209_v28 = vand.u32 4294901760, %v4558_v59  ;;  %v16217_v33 = vsub.f32 %v4563_v25, %v16172_v61 }
 0x3c6   :  { %v5067_v0 = vsub.f32 %v16092_v12, %v20354_v5  ;;  %5021 = vmatprep.subr.mxu1 %v5020_v57  ;;  %4698 = vmatpush2.msra.mxu0 %v15746_v43  ;;  %v4554_v12 = vld [vmem:[%s19463_s9 + $0x180] sm:$0xff]  ;;  %v5062_v57 = vand.u32 4294901760, %v5061_v53  ;;  %v20356_v62 = vand.u32 4294901760, %v16135_v45  ;;  %v16229_v53 = vand.u32 4294901760, %v4555_v15 }
 0x3c7   :  { %v5073_v54 = vsub.f32 %v16107_v22, %v20355_v63  ;;  %5027 = vmatpush2.msra.mxu1 %v5026_v3  ;;  %4700 = vmatprep.subr.mxu0 %v15777_v27  ;;  %v16219_v63 = vand.u32 4294901760, %v4557_v6  ;;  %v16227_v3 = vsub.f32 %v4561_v8, %v16183_v9  ;;  %v20357_v25 = vand.u32 4294901760, %v16146_v52 }
 0x3c8   :  { %5033 = vmatprep.subr.mxu1 %v5032_v47  ;;  %4702 = vmatpush2.msra.mxu0 %v15794_v24  ;;  %v5079_v5 = vsub.f32 %v16135_v45, %v20356_v62  ;;  %v16237_v24 = vsub.f32 %v4560_v40, %v16196_v20  ;;  %v16239_v62 = vand.u32 4294901760, %v4554_v12  ;;  %v5068_v8 = vand.u32 4294901760, %v5067_v0 }
 0x3c9   :  { %5039 = vmatpush2.msra.mxu1 %v5038_v36  ;;  %4704 = vmatprep.subr.mxu0 %v15811_v19  ;;  %v5085_v47 = vsub.f32 %v16146_v52, %v20357_v25  ;;  %v20358_v22 = vand.u32 4294901760, %v16157_v11  ;;  %v16247_v19 = vsub.f32 %v4558_v59, %v16209_v28  ;;  %v5074_v40 = vand.u32 4294901760, %v5073_v54 }
 0x3ca   :  { %5045 = vmatprep.subr.mxu1 %v5044_v46  ;;  %4706 = vmatpush2.msra.mxu0 %v15826_v55  ;;  %v20359_v25 = vand.u32 4294901760, %v16170_v21  ;;  %v16255_v0 = vsub.f32 %v4557_v6, %v16219_v63  ;;  %v20360_v59 = vand.u32 4294901760, %v16181_v60  ;;  %v16263_v54 = vsub.f32 %v4555_v15, %v16229_v53 }
 0x3cb   :  { %v5091_v36 = vsub.f32 %v16157_v11, %v20358_v22  ;;  %5051 = vmatpush2.msra.mxu1 %v5050_v51  ;;  %4708 = vmatprep.subr.mxu0 %v15843_v30  ;;  %v5080_v22 = vand.u32 4294901760, %v5079_v5  ;;  %v20361_v6 = vand.u32 4294901760, %v16194_v42  ;;  %v16271_v5 = vsub.f32 %v4554_v12, %v16239_v62 }
 0x3cc   :  { %v5097_v46 = vsub.f32 %v16170_v21, %v20359_v25  ;;  %5057 = vmatprep.subr.mxu1 %v5056_v13  ;;  %4710 = vmatpush2.msra.mxu0 %v15856_v35  ;;  %v5103_v51 = vsub.f32 %v16181_v60, %v20360_v59  ;;  %v5086_v25 = vand.u32 4294901760, %v5085_v47  ;;  %v20362_v15 = vand.u32 4294901760, %v16207_v18 }
 0x3cd   :  { %5063 = vmatpush2.msra.mxu1 %v5062_v57  ;;  %4712 = vmatprep.subr.mxu0 %v15869_v32  ;;  %v5109_v13 = vsub.f32 %v16194_v42, %v20361_v6  ;;  %v5092_v59 = vand.u32 4294901760, %v5091_v36  ;;  %v20363_v6 = vand.u32 4294901760, %v16217_v33  ;;  %v20364_v36 = vand.u32 4294901760, %v16227_v3 }
 0x3ce   :  { %5069 = vmatprep.subr.mxu1 %v5068_v8  ;;  %4714 = vmatpush2.msra.mxu0 %v15886_v48  ;;  %v5115_v57 = vsub.f32 %v16207_v18, %v20362_v15  ;;  %v5098_v47 = vand.u32 4294901760, %v5097_v46  ;;  %v5104_v8 = vand.u32 4294901760, %v5103_v51  ;;  %v20365_v46 = vand.u32 4294901760, %v16237_v24 }
 0x3cf   :  { %5075 = vmatpush2.msra.mxu1 %v5074_v40  ;;  %4716 = vmatprep.subr.mxu0 %v15899_v14  ;;  %v5121_v43 = vsub.f32 %v16217_v33, %v20363_v6  ;;  %v5127_v15 = vsub.f32 %v16227_v3, %v20364_v36  ;;  %v5110_v40 = vand.u32 4294901760, %v5109_v13  ;;  %v19787_v12 = vand.u32 4294901760, %v16271_v5 }
 0x3d0   :  { %5081 = vmatprep.subr.mxu1 %v5080_v22  ;;  %4718 = vmatpush2.msra.mxu0 %v15916_v4  ;;  %v5133_v6 = vsub.f32 %v16237_v24, %v20365_v46  ;;  %v5116_v22 = vand.u32 4294901760, %v5115_v57  ;;  %v20366_v51 = vand.u32 4294901760, %v16247_v19  ;;  %v20367_v13 = vand.u32 4294901760, %v16255_v0 }
 0x3d1   :  { %5087 = vmatpush2.msra.mxu1 %v5086_v25  ;;  %4720 = vmatprep.subr.mxu0 %v15933_v10  ;;  %v5122_v25 = vand.u32 4294901760, %v5121_v43  ;;  %v5128_v46 = vand.u32 4294901760, %v5127_v15  ;;  %v5157_v43 = vsub.f32 %v16271_v5, %v19787_v12  ;;  %v20384_v12 = vld [vmem:[#allocation22_spill] sm:$0xff] }
 0x3d2   :  { %5093 = vmatprep.subr.mxu1 %v5092_v59  ;;  %4722 = vmatpush2.msra.mxu0 %v15943_v17  ;;  %v5139_v36 = vsub.f32 %v16247_v19, %v20366_v51  ;;  %v5145_v45 = vsub.f32 %v16255_v0, %v20367_v13  ;;  %v20368_v59 = vand.u32 4294901760, %v16263_v54  ;;  %v5134_v51 = vand.u32 4294901760, %v5133_v6  ;;  %v20370_v6 = vld [vmem:[#allocation45_spill] sm:$0xff]  ;;  %v20374_v13 = vld [vmem:[#allocation47_spill] sm:$0xff] }
 0x3d3   :  { %5099 = vmatpush2.msra.mxu1 %v5098_v47  ;;  %4724 = vmatprep.subr.mxu0 %v15957_v41 }
 0x3d4   :  { %5105 = vmatprep.subr.mxu1 %v5104_v8  ;;  %4726 = vmatpush2.msra.mxu0 %v16003_v58  ;;  %v5151_v57 = vsub.f32 %v16263_v54, %v20368_v59  ;;  %v5140_v47 = vand.u32 4294901760, %v5139_v36  ;;  %v5146_v8 = vand.u32 4294901760, %v5145_v45  ;;  %v20369_v45 = vld [vmem:[#allocation40_spill] sm:$0xff]  ;;  %v20372_v36 = vld [vmem:[#allocation19_spill] sm:$0xff] }
 0x3d5   :  { %5111 = vmatpush2.msra.mxu1 %v5110_v40  ;;  %4728 = vmatprep.subr.mxu0 %v16031_v26  ;;  %v5158_v40 = vand.u32 4294901760, %v5157_v43  ;;  %v20376_v59 = vld [vmem:[#allocation23_spill] sm:$0xff]  ;;  %v20379_v43 = vld [vmem:[#allocation25_spill] sm:$0xff] }
 0x3d6   :  { %5117 = vmatprep.subr.mxu1 %v5116_v22  ;;  %4730 = vmatpush2.msra.mxu0 %v16046_v7  ;;  %v5152_v15 = vand.u32 4294901760, %v5151_v57  ;;  %v20371_v22 = vld [vmem:[#allocation17_spill] sm:$0xff]  ;;  %v20377_v57 = vld [vmem:[#allocation16_spill] sm:$0xff] }
 0x3d7   :  { %5123 = vmatpush2.msra.mxu1 %v5122_v25  ;;  %4732 = vmatprep.subr.mxu0 %v16077_v31  ;;  %v20373_v25 = vld [vmem:[#allocation21_spill] sm:$0xff] }
 0x3d8   :  { %5129 = vmatprep.subr.mxu1 %v5128_v46  ;;  %4734 = vmatpush2.msra.mxu0 %v16094_v38  ;;  %v20375_v46 = vld [vmem:[#allocation15_spill] sm:$0xff] }
 0x3d9   :  { %5135 = vmatpush2.msra.mxu1 %v5134_v51  ;;  %4736 = vmatprep.subr.mxu0 %v16109_v1  ;;  %v20378_v51 = vld [vmem:[#allocation43_spill] sm:$0xff] }
 0x3da   :  { %5141 = vmatprep.subr.mxu1 %v5140_v47  ;;  %4738 = vmatpush2.msra.mxu0 %v16122_v2  ;;  %v20380_v47 = vld [vmem:[#allocation18_spill] sm:$0xff] }
 0x3db   :  { %5147 = vmatpush2.msra.mxu1 %v5146_v8  ;;  %4740 = vmatprep.subr.mxu0 %v16137_v34  ;;  %v20381_v8 = vld [vmem:[#allocation31_spill] sm:$0xff] }
 0x3dc   :  { %5153 = vmatprep.subr.mxu1 %v5152_v15  ;;  %4742 = vmatpush2.msra.mxu0 %v16148_v56  ;;  %v20382_v15 = vld [vmem:[#allocation20_spill] sm:$0xff] }
 0x3dd   :  { %5159 = vmatpush2.msra.mxu1 %v5158_v40  ;;  %4744 = vmatprep.subr.mxu0 %v16159_v50  ;;  %v20383_v40 = vld [vmem:[#allocation33_spill] sm:$0xff] }
 0x3de   :  { %5163 = vmatmul.mubr.f32.vlgmr.msra.gmra.mxu1 %v20369_v45  ;;  %5373 = vmatprep.subr.mxu1 %v15210_v39  ;;  %v20387_v45 = vld [vmem:[#allocation9_spill] sm:$0xff] }
 0x3df   :  { %4746 = vmatpush2.msra.mxu0 %v16172_v61  ;;  %5375 = vmatpush1.msra.mxu1 %v15217_v23 }
 0x3e0   :  { %5503 = vmatprep.mubr.f32.mxu1 %v20370_v6  ;;  %4748 = vmatprep.subr.mxu0 %v16183_v9  ;;  %v20386_v6 = vld [vmem:[#allocation24_spill] sm:$0xff] }
 0x3e1   :  { %5377 = vmatprep.subr.mxu1 %v15229_v44  ;;  %4750 = vmatpush2.msra.mxu0 %v16196_v20 }
 0x3e2   :  { %5379 = vmatpush1.msra.mxu1 %v15239_v49  ;;  %4752 = vmatprep.subr.mxu0 %v16209_v28 }
 0x3e3   :  { %5381 = vmatprep.subr.mxu1 %v15249_v16  ;;  %4754 = vmatpush2.msra.mxu0 %v16219_v63 }
 0x3e4   :  { %5383 = vmatpush1.msra.mxu1 %v20371_v22  ;;  %4756 = vmatprep.subr.mxu0 %v16229_v53 }
 0x3e5   :  { %5385 = vmatprep.subr.mxu1 %v20372_v36  ;;  %4758 = vmatpush2.msra.mxu0 %v16239_v62 }
 0x3e6   :  { %5387 = vmatpush1.msra.mxu1 %v20373_v25  ;;  %4770 = vmatmul.mubr.f32.vlgmr.msra.gmra.mxu0 %v20374_v13  ;;  %v20385_v13 = vld [vmem:[#allocation36_spill] sm:$0xff] }
 0x3e7   :  { %5171 = vmatprep.subr.mxu0 %v20375_v46  ;;  %5389 = vmatprep.subr.mxu1 %v20376_v59 }
 0x3e8   :  { %5174 = vmatpush1.msra.mxu0 %v20377_v57  ;;  %5363 = vmatprep.mubr.f32.mxu0 %v20378_v51  ;;  %v20388_v57 = vld [vmem:[#allocation8_spill] sm:$0xff]  ;;  %v20389_v51 = vld [vmem:[#allocation26_spill] sm:$0xff] }
 0x3e9   :  { %5391 = vmatpush1.msra.mxu1 %v20379_v43  ;;  %5177 = vmatprep.subr.mxu0 %v20380_v47  ;;  %v20390_v43 = vld [vmem:[#allocation32_spill] sm:$0xff]  ;;  %v20391_v47 = vld [vmem:[#allocation30_spill] sm:$0xff] }
 0x3ea   :  { %5393 = vmatprep.subr.mxu1 %v20381_v8  ;;  %5180 = vmatpush1.msra.mxu0 %v20382_v15  ;;  %v20392_v8 = vld [vmem:[#allocation34_spill] sm:$0xff]  ;;  %v20393_v15 = vld [vmem:[#allocation49_spill] sm:$0xff] }
 0x3eb   :  { %5395 = vmatpush1.msra.mxu1 %v20383_v40  ;;  %5183 = vmatprep.subr.mxu0 %v20384_v12  ;;  %v20394_v40 = vld [vmem:[#allocation35_spill] sm:$0xff]  ;;  %v20395_v12 = vld [vmem:[#allocation50_spill] sm:$0xff] }
 0x3ec   :  { %5397 = vmatprep.subr.mxu1 %v20385_v13  ;;  %5186 = vmatpush1.msra.mxu0 %v20386_v6  ;;  %v20396_v13 = vld [vmem:[#allocation38_spill] sm:$0xff]  ;;  %v20397_v6 = vld [vmem:[#allocation52_spill] sm:$0xff] }
 0x3ed   :  { %5399 = vmatpush1.msra.mxu1 %v20387_v45  ;;  %5189 = vmatprep.subr.mxu0 %v20388_v57  ;;  %v20398_v45 = vld [vmem:[#allocation27_spill] sm:$0xff] }
 0x3ee   :  { %5401 = vmatprep.subr.mxu1 %v20389_v51  ;;  %5192 = vmatpush1.msra.mxu0 %v20390_v43  ;;  %v20399_v51 = vld [vmem:[#allocation28_spill] sm:$0xff] }
 0x3ef   :  { %5403 = vmatpush1.msra.mxu1 %v20391_v47  ;;  %5195 = vmatprep.subr.mxu0 %v20392_v8  ;;  %v20400_v43 = vld [vmem:[#allocation56_spill] sm:$0xff]  ;;  %v20401_v47 = vld [vmem:[#allocation29_spill] sm:$0xff] }
 0x3f0   :  { %5405 = vmatprep.subr.mxu1 %v20393_v15  ;;  %5198 = vmatpush1.msra.mxu0 %v20394_v40  ;;  %v20402_v8 = vld [vmem:[#allocation57_spill] sm:$0xff]  ;;  %v20403_v15 = vld [vmem:[#allocation48_spill] sm:$0xff] }
 0x3f1   :  { %5407 = vmatpush1.msra.mxu1 %v20395_v12  ;;  %5201 = vmatprep.subr.mxu0 %v20396_v13  ;;  %v20404_v12 = vld [vmem:[#allocation51_spill] sm:$0xff]  ;;  %v20405_v13 = vld [vmem:[#allocation61_spill] sm:$0xff] }
 0x3f2   :  { %5409 = vmatprep.subr.mxu1 %v20397_v6  ;;  %5204 = vmatpush1.msra.mxu0 %v20398_v45  ;;  %v20406_v6 = vld [vmem:[#allocation53_spill] sm:$0xff]  ;;  %v20407_v45 = vld [vmem:[#allocation63_spill] sm:$0xff] }
 0x3f3   :  { %5411 = vmatpush1.msra.mxu1 %v20325_v37  ;;  %5207 = vmatprep.subr.mxu0 %v20399_v51  ;;  %v20408_v37 = vld [vmem:[#allocation55_spill] sm:$0xff]  ;;  %v20409_v51 = vld [vmem:[#allocation65_spill] sm:$0xff] }
 0x3f4   :  { %5413 = vmatprep.subr.mxu1 %v20400_v43  ;;  %5210 = vmatpush1.msra.mxu0 %v20401_v47  ;;  %v20410_v43 = vld [vmem:[#allocation58_spill] sm:$0xff]  ;;  %v20411_v47 = vld [vmem:[#allocation67_spill] sm:$0xff] }
 0x3f5   :  { %5415 = vmatpush1.msra.mxu1 %v20402_v8  ;;  %5213 = vmatprep.subr.mxu0 %v20403_v15  ;;  %v20412_v8 = vld [vmem:[#allocation60_spill] sm:$0xff]  ;;  %v20413_v15 = vld [vmem:[#allocation69_spill] sm:$0xff] }
 0x3f6   :  { %5417 = vmatprep.subr.mxu1 %v15541_v29  ;;  %5216 = vmatpush1.msra.mxu0 %v20404_v12  ;;  %v20414_v29 = vld [vmem:[#allocation62_spill] sm:$0xff]  ;;  %v20415_v12 = vld [vmem:[#allocation71_spill] sm:$0xff] }
 0x3f7   :  { %5419 = vmatpush1.msra.mxu1 %v20405_v13  ;;  %5219 = vmatprep.subr.mxu0 %v20406_v6  ;;  %v20416_v13 = vld [vmem:[#allocation64_spill] sm:$0xff]  ;;  %v20417_v6 = vld [vmem:[#allocation73_spill] sm:$0xff] }
 0x3f8   :  { %5421 = vmatprep.subr.mxu1 %v20407_v45  ;;  %5222 = vmatpush1.msra.mxu0 %v20408_v37  ;;  %v20418_v45 = vld [vmem:[#allocation66_spill] sm:$0xff]  ;;  %v20419_v37 = vld [vmem:[#allocation75_spill] sm:$0xff] }
 0x3f9   :  { %5423 = vmatpush1.msra.mxu1 %v20409_v51  ;;  %5225 = vmatprep.subr.mxu0 %v20410_v43  ;;  %v20420_v51 = vld [vmem:[#allocation68_spill] sm:$0xff]  ;;  %v20421_v43 = vld [vmem:[#allocation79_spill] sm:$0xff] }
 0x3fa   :  { %5425 = vmatprep.subr.mxu1 %v20411_v47  ;;  %5228 = vmatpush1.msra.mxu0 %v20412_v8  ;;  %v20422_v47 = vld [vmem:[#allocation70_spill] sm:$0xff]  ;;  %v20423_v8 = vld [vmem:[#allocation81_spill] sm:$0xff] }
 0x3fb   :  { %5427 = vmatpush1.msra.mxu1 %v20413_v15  ;;  %5231 = vmatprep.subr.mxu0 %v20414_v29  ;;  %v20424_v15 = vld [vmem:[#allocation72_spill] sm:$0xff]  ;;  %v20425_v29 = vld [vmem:[#allocation82_spill] sm:$0xff] }
 0x3fc   :  { %5429 = vmatprep.subr.mxu1 %v20415_v12  ;;  %5234 = vmatpush1.msra.mxu0 %v20416_v13  ;;  %v20426_v12 = vld [vmem:[#allocation74_spill] sm:$0xff] }
 0x3fd   :  { %5431 = vmatpush1.msra.mxu1 %v20417_v6  ;;  %5237 = vmatprep.subr.mxu0 %v20418_v45  ;;  %v20427_v6 = vld [vmem:[#allocation76_spill] sm:$0xff]  ;;  %v20428_v45 = vld [vmem:[#allocation86_spill] sm:$0xff] }
 0x3fe   :  { %5433 = vmatprep.subr.mxu1 %v20419_v37  ;;  %5240 = vmatpush1.msra.mxu0 %v20420_v51  ;;  %v20429_v37 = vld [vmem:[#allocation77_spill] sm:$0xff]  ;;  %v20430_v51 = vld [vmem:[#allocation88_spill] sm:$0xff] }
 0x3ff   :  { %5435 = vmatpush1.msra.mxu1 %v20421_v43  ;;  %5243 = vmatprep.subr.mxu0 %v20422_v47  ;;  %v20431_v43 = vld [vmem:[#allocation78_spill] sm:$0xff] }
 0x400   :  { %5437 = vmatprep.subr.mxu1 %v20423_v8  ;;  %5246 = vmatpush1.msra.mxu0 %v20424_v15  ;;  %v20432_v8 = vld [vmem:[#allocation80_spill] sm:$0xff] }
 0x401   :  { %5439 = vmatpush2.msra.mxu1 %v20425_v29  ;;  %5249 = vmatprep.subr.mxu0 %v20426_v12  ;;  %v20433_v29 = vld [vmem:[#allocation83_spill] sm:$0xff] }
 0x402   :  { %5441 = vmatprep.subr.mxu1 %v15777_v27  ;;  %5252 = vmatpush1.msra.mxu0 %v20427_v6  ;;  %v20434_v27 = vld [vmem:[#allocation85_spill] sm:$0xff] }
 0x403   :  { %5443 = vmatpush2.msra.mxu1 %v20428_v45  ;;  %5255 = vmatprep.subr.mxu0 %v20429_v37  ;;  %v20435_v45 = vld [vmem:[#allocation87_spill] sm:$0xff] }
 0x404   :  { %5445 = vmatprep.subr.mxu1 %v20430_v51  ;;  %5258 = vmatpush1.msra.mxu0 %v20431_v43  ;;  %v20436_v51 = vld [vmem:[#allocation90_spill] sm:$0xff] }
 0x405   :  { %5447 = vmatpush2.msra.mxu1 %v15826_v55  ;;  %5261 = vmatprep.subr.mxu0 %v20432_v8  ;;  %v20437_v55 = vld [vmem:[#allocation92_spill] sm:$0xff] }
 0x406   :  { %5449 = vmatprep.subr.mxu1 %v15843_v30  ;;  %5264 = vmatpush1.msra.mxu0 %v20433_v29  ;;  %v20438_v30 = vld [vmem:[#allocation94_spill] sm:$0xff] }
 0x407   :  { %5451 = vmatpush2.msra.mxu1 %v15856_v35  ;;  %5267 = vmatprep.subr.mxu0 %v20434_v27  ;;  %v20439_v35 = vld [vmem:[#allocation96_spill] sm:$0xff] }
 0x408   :  { %5453 = vmatprep.subr.mxu1 %v15869_v32  ;;  %5270 = vmatpush2.msra.mxu0 %v20435_v45  ;;  %v20440_v32 = vld [vmem:[#allocation98_spill] sm:$0xff] }
 0x409   :  { %5455 = vmatpush2.msra.mxu1 %v15886_v48  ;;  %5273 = vmatprep.subr.mxu0 %v20436_v51  ;;  %v20441_v48 = vld [vmem:[#allocation100_spill] sm:$0xff] }
 0x40a   :  { %5457 = vmatprep.subr.mxu1 %v15899_v14  ;;  %5276 = vmatpush2.msra.mxu0 %v20437_v55  ;;  %v20442_v14 = vld [vmem:[#allocation101_spill] sm:$0xff] }
 0x40b   :  { %5459 = vmatpush2.msra.mxu1 %v15916_v4  ;;  %5279 = vmatprep.subr.mxu0 %v20438_v30  ;;  %v16420_v30 = vld [vmem:[%s19462_s8] sm:$0x7] }
 0x40c   :  { %5461 = vmatprep.subr.mxu1 %v15933_v10  ;;  %5282 = vmatpush2.msra.mxu0 %v20439_v35  ;;  %v20443_v35 = vld [vmem:[#allocation102_spill] sm:$0xff] }
 0x40d   :  { %5463 = vmatpush2.msra.mxu1 %v15943_v17  ;;  %5285 = vmatprep.subr.mxu0 %v20440_v32  ;;  %v20444_v32 = vld [vmem:[#allocation104_spill] sm:$0xff] }
 0x40e   :  { %5465 = vmatprep.subr.mxu1 %v15957_v41  ;;  %5288 = vmatpush2.msra.mxu0 %v20441_v48  ;;  %v20445_v48 = vld [vmem:[#allocation106_spill] sm:$0xff]  ;;  %v20447_v41 = vld [vmem:[#allocation107_spill] sm:$0xff] }
 0x40f   :  { %5467 = vmatpush2.msra.mxu1 %v16003_v58  ;;  %5291 = vmatprep.subr.mxu0 %v20442_v14  ;;  %v20446_v58 = vld [vmem:[#allocation37_spill] sm:$0xff] }
 0x410   :  { %5469 = vmatprep.subr.mxu1 %v16031_v26  ;;  %5294 = vmatpush2.msra.mxu0 %v20443_v35  ;;  %v3342_v14 = vrot.slane %v16420_v30, %v20446_v58  ;;  %v20448_v26 = vld [vmem:[#allocation108_spill] sm:$0xff]  ;;  %v20449_v35 = vld [vmem:[#allocation39_spill] sm:$0xff]  ;;  %v20451_v58 = vld [vmem:[#allocation113_spill] sm:$0xff] }
 0x411   :  { %5471 = vmatpush2.msra.mxu1 %v16046_v7  ;;  %5297 = vmatprep.subr.mxu0 %v20444_v32  ;;  %v3346_v7 = vrot.slane %v16420_v30, %v20449_v35  ;;  %v20450_v32 = vld [vmem:[#allocation110_spill] sm:$0xff] }
 0x412   :  { %5473 = vmatprep.subr.mxu1 %v16077_v31  ;;  %5300 = vmatpush2.msra.mxu0 %v20445_v48  ;;  %v3585_v31 = vpop.f32.mrf.mxu1  ;;  %v3443_v48 = vpop.f32.mrf.mxu0 }
 0x413   :  { %5475 = vmatpush2.msra.mxu1 %v16094_v38  ;;  %5303 = vmatprep.subr.mxu0 %v20447_v41  ;;  %v3444_v38 = vadd.f32 %v3443_v48, %v3342_v14  ;;  %v20452_v41 = vld [vmem:[#allocation115_spill] sm:$0xff]  ;;  %v20456_v14 = vld [vmem:[#allocation42_spill] sm:$0xff] }
 0x414   :  { %5477 = vmatprep.subr.mxu1 %v16109_v1  ;;  %5306 = vmatpush2.msra.mxu0 %v20448_v26  ;;  %v3445_v1 = vpop.f32.mrf.mxu0  ;;  %v20453_v26 = vld [vmem:[#allocation117_spill] sm:$0xff]  ;;  %v3587_v17 = vpop.f32.mrf.mxu1 }
 0x415   :  { %5479 = vmatpush2.msra.mxu1 %v16122_v2  ;;  %5309 = vmatprep.subr.mxu0 %v20450_v32  ;;  %v3446_v35 = vadd.f32 %v3445_v1, %v3346_v7  ;;  %v3586_v2 = vadd.f32 %v3585_v31, %v3444_v38  ;;  %v20454_v32 = vld [vmem:[#allocation120_spill] sm:$0xff] }
 0x416   :  { %5481 = vmatprep.subr.mxu1 %v16137_v34  ;;  %5312 = vmatpush2.msra.mxu0 %v20451_v58  ;;  %v3774_v7 = vpop.f32.mrf.mxu1 }
 0x417   :  { %5483 = vmatpush2.msra.mxu1 %v16148_v56  ;;  %5315 = vmatprep.subr.mxu0 %v20452_v41  ;;  %v3588_v48 = vadd.f32 %v3587_v17, %v3446_v35  ;;  %v20455_v35 = vld [vmem:[#allocation44_spill] sm:$0xff]  ;;  %v20457_v17 = vld [vmem:[#allocation41_spill] sm:$0xff] }
 0x418   :  { %5485 = vmatprep.subr.mxu1 %v16159_v50  ;;  %5318 = vmatpush2.msra.mxu0 %v20453_v26  ;;  %v3776_v31 = vpop.f32.mrf.mxu1 }
 0x419   :  { %5487 = vmatpush2.msra.mxu1 %v16172_v61  ;;  %5321 = vmatprep.subr.mxu0 %v20454_v32 }
 0x41a   :  { %5489 = vmatprep.subr.mxu1 %v16183_v9  ;;  %5324 = vmatpush2.msra.mxu0 %v16146_v52 }
 0x41b   :  { %5491 = vmatpush2.msra.mxu1 %v16196_v20  ;;  %5327 = vmatprep.subr.mxu0 %v16157_v11 }
 0x41c   :  { %5493 = vmatprep.subr.mxu1 %v16209_v28  ;;  %5330 = vmatpush2.msra.mxu0 %v16170_v21 }
 0x41d   :  { %5495 = vmatpush2.msra.mxu1 %v16219_v63  ;;  %5333 = vmatprep.subr.mxu0 %v16181_v60  ;;  %v3686_v38 = vpop.f32.mrf.mxu0 }
 0x41e   :  { %5497 = vmatprep.subr.mxu1 %v16229_v53  ;;  %5336 = vmatpush2.msra.mxu0 %v16194_v42 }
 0x41f   :  { %5499 = vmatpush2.msra.mxu1 %v16239_v62  ;;  %5339 = vmatprep.subr.mxu0 %v16207_v18 }
 0x420   :  { %5507 = vmatmul.mubr.f32.vlgmr.msra.gmra.mxu1 %v20455_v35  ;;  %5779 = vmatprep.subr.mxu1 %v15210_v39  ;;  %v3687_v39 = vadd.f32 %v3686_v38, %v3586_v2  ;;  %v20459_v2 = vld [vmem:[#allocation16_spill] sm:$0xff] }
 0x421   :  { %5342 = vmatpush2.msra.mxu0 %v16217_v33  ;;  %5781 = vmatpush1.msra.mxu1 %v15217_v23  ;;  %v3688_v23 = vpop.f32.mrf.mxu0  ;;  %v20465_v38 = vld [vmem:[#allocation20_spill] sm:$0xff] }
 0x422   :  { %5907 = vmatprep.mubr.f32.mxu1 %v20456_v14  ;;  %5345 = vmatprep.subr.mxu0 %v16227_v3 }
 0x423   :  { %5783 = vmatprep.subr.mxu1 %v15229_v44  ;;  %5348 = vmatpush2.msra.mxu0 %v16237_v24  ;;  %v3689_v44 = vadd.f32 %v3688_v23, %v3588_v48  ;;  %v20462_v48 = vld [vmem:[#allocation18_spill] sm:$0xff] }
 0x424   :  { %5785 = vmatpush1.msra.mxu1 %v15239_v49  ;;  %5351 = vmatprep.subr.mxu0 %v16247_v19  ;;  %v3775_v49 = vadd.f32 %v3774_v7, %v3687_v39  ;;  %v20463_v7 = vand.u32 4294901760, %v20462_v48  ;;  %v20466_v39 = vand.u32 4294901760, %v20465_v38  ;;  %v20468_v23 = vld [vmem:[#allocation22_spill] sm:$0xff]  ;;  %v20476_v48 = vld [vmem:[#allocation32_spill] sm:$0xff] }
 0x425   :  { %5787 = vmatprep.subr.mxu1 %v15249_v16  ;;  %5354 = vmatpush2.msra.mxu0 %v16255_v0  ;;  %v20458_v16 = vand.u32 4294901760, %v20375_v46  ;;  %v3777_v1 = vadd.f32 %v3776_v31, %v3689_v44  ;;  %v20467_v46 = vld [vmem:[#allocation33_spill] sm:$0xff]  ;;  %v20470_v44 = vld [vmem:[#allocation36_spill] sm:$0xff]  ;;  %v20479_v38 = vld [vmem:[#allocation34_spill] sm:$0xff] }
 0x426   :  { %5789 = vmatpush1.msra.mxu1 %v20371_v22  ;;  %5357 = vmatprep.subr.mxu0 %v16263_v54  ;;  %v20460_v22 = vand.u32 4294901760, %v20459_v2  ;;  %v20471_v31 = vld [vmem:[#allocation24_spill] sm:$0xff]  ;;  %v20473_v2 = vld [vmem:[#allocation9_spill] sm:$0xff] }
 0x427   :  { %5791 = vmatprep.subr.mxu1 %v20372_v36  ;;  %5360 = vmatpush2.msra.mxu0 %v16271_v5  ;;  %v20461_v36 = vld [vmem:[#allocation25_spill] sm:$0xff] }
 0x428   :  { %5793 = vmatpush1.msra.mxu1 %v20373_v25  ;;  %5366 = vmatmul.mubr.f32.vlgmr.msra.gmra.mxu0 %v20457_v17  ;;  %v20464_v25 = vld [vmem:[#allocation31_spill] sm:$0xff]  ;;  %v4526_v17 = vld [vmem:[%s19463_s9 + $0xa0] sm:$0xff] }
 0x429   :  { %5516 = vmatprep.subr.mxu0 %v20458_v16  ;;  %5795 = vmatprep.subr.mxu1 %v20376_v59  ;;  %v20469_v59 = vand.u32 4294901760, %v20468_v23  ;;  %v20472_v16 = vand.u32 4294901760, %v20471_v31  ;;  %v20482_v23 = vand.u32 4294901760, %v20394_v40  ;;  %v20486_v31 = vld [vmem:[#allocation52_spill] sm:$0xff] }
 0x42a   :  { %5520 = vmatpush1.msra.mxu0 %v20460_v22  ;;  %5770 = vmatprep.mubr.f32.mxu0 %v20456_v14  ;;  %v20474_v22 = vand.u32 4294901760, %v20388_v57  ;;  %v20492_v40 = vld [vmem:[#allocation56_spill] sm:$0xff] }
 0x42b   :  { %5797 = vmatpush1.msra.mxu1 %v20461_v36  ;;  %5524 = vmatprep.subr.mxu0 %v20463_v7  ;;  %v20475_v36 = vld [vmem:[#allocation26_spill] sm:$0xff]  ;;  %v20477_v7 = vand.u32 4294901760, %v20476_v48 }
 0x42c   :  { %5799 = vmatprep.subr.mxu1 %v20464_v25  ;;  %5528 = vmatpush1.msra.mxu0 %v20466_v39  ;;  %v20478_v25 = vld [vmem:[#allocation30_spill] sm:$0xff]  ;;  %v20480_v39 = vand.u32 4294901760, %v20479_v38 }
 0x42d   :  { %5801 = vmatpush1.msra.mxu1 %v20467_v46  ;;  %5532 = vmatprep.subr.mxu0 %v20469_v59  ;;  %v20481_v46 = vld [vmem:[#allocation49_spill] sm:$0xff]  ;;  %v20483_v59 = vld [vmem:[#allocation50_spill] sm:$0xff] }
 0x42e   :  { %5803 = vmatprep.subr.mxu1 %v20470_v44  ;;  %5536 = vmatpush1.msra.mxu0 %v20472_v16  ;;  %v20484_v44 = vld [vmem:[#allocation38_spill] sm:$0xff]  ;;  %v20487_v16 = vld [vmem:[#allocation27_spill] sm:$0xff] }
 0x42f   :  { %5805 = vmatpush1.msra.mxu1 %v20473_v2  ;;  %5540 = vmatprep.subr.mxu0 %v20474_v22  ;;  %v20485_v57 = vand.u32 4294901760, %v20484_v44  ;;  %v20488_v2 = vand.u32 4294901760, %v20487_v16  ;;  %v3974_v22 = vpop.f32.mrf.mxu1  ;;  %v20489_v48 = vld [vmem:[#allocation54_spill] sm:$0xff]  ;;  %v20496_v44 = vld [vmem:[#allocation48_spill] sm:$0xff] }
 0x430   :  { %5807 = vmatprep.subr.mxu1 %v20475_v36  ;;  %5544 = vmatpush1.msra.mxu0 %v20477_v7  ;;  %v3888_v36 = vpop.f32.mrf.mxu0  ;;  %v20490_v7 = vld [vmem:[#allocation28_spill] sm:$0xff] }
 0x431   :  { %5809 = vmatpush1.msra.mxu1 %v20478_v25  ;;  %5548 = vmatprep.subr.mxu0 %v20480_v39  ;;  %v20491_v25 = vand.u32 4294901760, %v20490_v7  ;;  %v3889_v38 = vadd.f32 %v3888_v36, %v3775_v49  ;;  %v20493_v39 = vld [vmem:[#allocation29_spill] sm:$0xff]  ;;  %v3976_v49 = vpop.f32.mrf.mxu1 }
 0x432   :  { %5811 = vmatprep.subr.mxu1 %v20481_v46  ;;  %5552 = vmatpush1.msra.mxu0 %v20482_v23  ;;  %v20494_v46 = vand.u32 4294901760, %v20493_v39  ;;  %v3890_v23 = vpop.f32.mrf.mxu0  ;;  %v20502_v36 = vld [vmem:[#allocation61_spill] sm:$0xff] }
 0x433   :  { %5813 = vmatpush1.msra.mxu1 %v20483_v59  ;;  %5556 = vmatprep.subr.mxu0 %v20485_v57  ;;  %v20495_v59 = vld [vmem:[#allocation57_spill] sm:$0xff]  ;;  %v20497_v57 = vand.u32 4294901760, %v20496_v44  ;;  %v3891_v16 = vadd.f32 %v3890_v23, %v3777_v1  ;;  %v20510_v1 = vld [vmem:[#allocation58_spill] sm:$0xff] }
 0x434   :  { %5815 = vmatprep.subr.mxu1 %v20486_v31  ;;  %5560 = vmatpush1.msra.mxu0 %v20488_v2  ;;  %v16521_v31 = vadd.f32 %v3974_v22, %v3889_v38  ;;  %v20499_v2 = vld [vmem:[#allocation59_spill] sm:$0xff]  ;;  %v20509_v22 = vld [vmem:[#allocation65_spill] sm:$0xff]  ;;  %v20511_v38 = vand.u32 4294901760, %v20510_v1  ;;  %v4163_v23 = vpop.f32.mrf.mxu1  ;;  %v20524_v1 = vld [vmem:[#allocation68_spill] sm:$0xff] }
 0x435   :  { %5817 = vmatpush1.msra.mxu1 %v20489_v48  ;;  %5564 = vmatprep.subr.mxu0 %v20491_v25  ;;  %v20500_v48 = vld [vmem:[#allocation51_spill] sm:$0xff]  ;;  %v20503_v25 = vld [vmem:[#allocation53_spill] sm:$0xff]  ;;  %v16529_v39 = vadd.f32 %v3976_v49, %v3891_v16  ;;  %v20516_v16 = vld [vmem:[#allocation62_spill] sm:$0xff] }
 0x436   :  { %5819 = vmatprep.subr.mxu1 %v20492_v40  ;;  %5568 = vmatpush1.msra.mxu0 %v20494_v46  ;;  %20498 = vst [vmem:[#allocation17_spill] sm:$0xff] %v16521_v31  ;;  %v20501_v7 = vand.u32 4294901760, %v20500_v48  ;;  %v20504_v40 = vand.u32 4294901760, %v20503_v25  ;;  %v20506_v46 = vld [vmem:[#allocation63_spill] sm:$0xff]  ;;  %v20517_v49 = vand.u32 4294901760, %v20516_v16  ;;  %v20530_v16 = vand.u32 4294901760, %v20424_v15 }
 0x437   :  { %5821 = vmatpush1.msra.mxu1 %v20495_v59  ;;  %5572 = vmatprep.subr.mxu0 %v20497_v57  ;;  %20505 = vst [vmem:[#allocation19_spill] sm:$0xff] %v16529_v39  ;;  %v20507_v59 = vld [vmem:[#allocation55_spill] sm:$0xff]  ;;  %v20538_v15 = vand.u32 4294901760, %v20431_v43  ;;  %v20546_v43 = vand.u32 4294901760, %v20435_v45 }
 0x438   :  { %5823 = vmatprep.subr.mxu1 %v20499_v2  ;;  %5576 = vmatpush1.msra.mxu0 %v20501_v7  ;;  %v20508_v44 = vand.u32 4294901760, %v20507_v59  ;;  %v20512_v57 = vld [vmem:[#allocation67_spill] sm:$0xff]  ;;  %v20513_v2 = vld [vmem:[#allocation60_spill] sm:$0xff]  ;;  %v20515_v7 = vld [vmem:[#allocation69_spill] sm:$0xff] }
 0x439   :  { %5825 = vmatpush1.msra.mxu1 %v20502_v36  ;;  %5580 = vmatprep.subr.mxu0 %v20504_v40  ;;  %v20514_v48 = vand.u32 4294901760, %v20513_v2  ;;  %v12733_v36 = vpop.f32.mrf.mxu1  ;;  %v20518_v25 = vld [vmem:[#allocation71_spill] sm:$0xff]  ;;  %v20519_v40 = vand.u32 4294901760, %v20416_v13  ;;  %v20521_v59 = vld [vmem:[#allocation66_spill] sm:$0xff]  ;;  %v20527_v2 = vand.u32 4294901760, %v20422_v47  ;;  %v20529_v13 = vld [vmem:[#allocation81_spill] sm:$0xff] }
 0x43a   :  { %5827 = vmatprep.subr.mxu1 %v20506_v46  ;;  %5584 = vmatpush1.msra.mxu0 %v20508_v44  ;;  %v20520_v46 = vld [vmem:[#allocation73_spill] sm:$0xff]  ;;  %v20522_v44 = vand.u32 4294901760, %v20521_v59  ;;  %v20532_v36 = vand.u32 4294901760, %v20426_v12  ;;  %v4611_v45 = vld [vmem:[%s19463_s9 + $0x348] sm:$0xff] }
 0x43b   :  { %5829 = vmatpush1.msra.mxu1 %v20509_v22  ;;  %5588 = vmatprep.subr.mxu0 %v20511_v38  ;;  %v20523_v22 = vld [vmem:[#allocation75_spill] sm:$0xff]  ;;  %v20525_v38 = vand.u32 4294901760, %v20524_v1  ;;  %v20539_v12 = vld [vmem:[#allocation89_spill] sm:$0xff]  ;;  %v20540_v1 = vand.u32 4294901760, %v20432_v8  ;;  %v20548_v8 = vand.u32 4294901760, %v20436_v51 }
 0x43c   :  { %5831 = vmatprep.subr.mxu1 %v20512_v57  ;;  %5592 = vmatpush1.msra.mxu0 %v20514_v48  ;;  %v20526_v57 = vld [vmem:[#allocation79_spill] sm:$0xff]  ;;  %v20528_v48 = vld [vmem:[#allocation10_spill] sm:$0xff] }
 0x43d   :  { %5833 = vmatpush1.msra.mxu1 %v20515_v7  ;;  %5596 = vmatprep.subr.mxu0 %v20517_v49  ;;  %v3350_v7 = vrot.slane %v16420_v30, %v20528_v48  ;;  %v20531_v49 = vld [vmem:[#allocation82_spill] sm:$0xff]  ;;  %v4057_v47 = vpop.f32.mrf.mxu0  ;;  %v20536_v30 = vand.u32 4294901760, %v20429_v37  ;;  %v20543_v37 = vld [vmem:[#allocation93_spill] sm:$0xff] }
 0x43e   :  { %5835 = vmatprep.subr.mxu1 %v20518_v25  ;;  %5600 = vmatpush1.msra.mxu0 %v20519_v40  ;;  %v20533_v25 = vld [vmem:[#allocation84_spill] sm:$0xff]  ;;  %v20534_v40 = vand.u32 4294901760, %v20427_v6 }
 0x43f   :  { %5837 = vmatpush1.msra.mxu1 %v20520_v46  ;;  %5604 = vmatprep.subr.mxu0 %v20522_v44  ;;  %v20535_v46 = vld [vmem:[#allocation86_spill] sm:$0xff]  ;;  %v4058_v59 = vadd.f32 %v4057_v47, %v3350_v7  ;;  %v20537_v44 = vld [vmem:[#allocation88_spill] sm:$0xff]  ;;  %v20545_v7 = vld [vmem:[#allocation95_spill] sm:$0xff] }
 0x440   :  { %5839 = vmatprep.subr.mxu1 %v20523_v22  ;;  %5608 = vmatpush1.msra.mxu0 %v20525_v38  ;;  %v12716_v22 = vpop.f32.mrf.mxu0  ;;  %v20541_v38 = vld [vmem:[#allocation91_spill] sm:$0xff] }
 0x441   :  { %5841 = vmatpush1.msra.mxu1 %v20526_v57  ;;  %5612 = vmatprep.subr.mxu0 %v20527_v2  ;;  %v4164_v6 = vadd.f32 %v4163_v23, %v4058_v59  ;;  %v20542_v57 = vand.u32 4294901760, %v20433_v29  ;;  %v20544_v2 = vand.u32 4294901760, %v20434_v27  ;;  %v4612_v29 = vld [vmem:[%s19463_s9 + $0x350] sm:$0xff]  ;;  %v20550_v27 = vand.u32 4294901760, %v20437_v55 }
 0x442   :  { %5843 = vmatprep.subr.mxu1 %v20529_v13  ;;  %5616 = vmatpush1.msra.mxu0 %v20530_v16  ;;  %v20547_v13 = vld [vmem:[#allocation97_spill] sm:$0xff]  ;;  %v20549_v16 = vld [vmem:[#allocation99_spill] sm:$0xff]  ;;  %v16605_v55 = vand.u32 4294901760, %v4612_v29  ;;  %v20559_v22 = vld [vmem:[#allocation100_spill] sm:$0xff] }
 0x443   :  { %5845 = vmatpush2.msra.mxu1 %v20531_v49  ;;  %5620 = vmatprep.subr.mxu0 %v20532_v36  ;;  %v20551_v49 = vld [vmem:[#allocation94_spill] sm:$0xff] }
 0x444   :  { %5847 = vmatprep.subr.mxu1 %v20533_v25  ;;  %5624 = vmatpush1.msra.mxu0 %v20534_v40  ;;  %v4329_v23 = vpop.f32.mrf.mxu1  ;;  %v20552_v36 = vand.u32 4294901760, %v20551_v49  ;;  %v4609_v25 = vld [vmem:[%s19463_s9 + $0x338] sm:$0xff]  ;;  %v20553_v40 = vld [vmem:[#allocation96_spill] sm:$0xff] }
 0x445   :  { %5849 = vmatpush2.msra.mxu1 %v20535_v46  ;;  %5628 = vmatprep.subr.mxu0 %v20536_v30  ;;  %v20554_v47 = vand.u32 4294901760, %v20553_v40  ;;  %v4608_v46 = vld [vmem:[%s19463_s9 + $0x330] sm:$0xff]  ;;  %v20556_v30 = vld [vmem:[#allocation98_spill] sm:$0xff] }
 0x446   :  { %5851 = vmatprep.subr.mxu1 %v20537_v44  ;;  %5632 = vmatpush1.msra.mxu0 %v20538_v15  ;;  %v12767_v51 = vpop.f32.mrf.mxu1  ;;  %v20557_v59 = vand.u32 4294901760, %v20556_v30  ;;  %v16613_v44 = vand.u32 4294901760, %v4611_v45  ;;  %v20558_v15 = vld [vmem:[#allocation105_spill] sm:$0xff]  ;;  %v20568_v40 = vld [vmem:[#allocation104_spill] sm:$0xff] }
 0x447   :  { %5853 = vmatpush2.msra.mxu1 %v20539_v12  ;;  %5636 = vmatprep.subr.mxu0 %v20540_v1  ;;  %v20560_v12 = vand.u32 4294901760, %v20559_v22  ;;  %v16621_v1 = vand.u32 4294901760, %v4609_v25  ;;  %v20567_v51 = vld [vmem:[#allocation112_spill] sm:$0xff] }
 0x448   :  { %5855 = vmatprep.subr.mxu1 %v20541_v38  ;;  %5640 = vmatpush1.msra.mxu0 %v20542_v57  ;;  %v4605_v38 = vld [vmem:[%s19463_s9 + $0x318] sm:$0xff] }
 0x449   :  { %5857 = vmatpush2.msra.mxu1 %v20543_v37  ;;  %5644 = vmatprep.subr.mxu0 %v20544_v2  ;;  %v20561_v57 = vld [vmem:[#allocation109_spill] sm:$0xff]  ;;  %v16651_v30 = vand.u32 4294901760, %v4605_v38 }
 0x44a   :  { %5859 = vmatprep.subr.mxu1 %v20545_v7  ;;  %5648 = vmatpush2.msra.mxu0 %v20546_v43  ;;  %v20562_v37 = vld [vmem:[#allocation101_spill] sm:$0xff]  ;;  %v16629_v7 = vand.u32 4294901760, %v4608_v46  ;;  %v4603_v43 = vld [vmem:[%s19463_s9 + $0x308] sm:$0xff] }
 0x44b   :  { %5861 = vmatpush2.msra.mxu1 %v20547_v13  ;;  %5652 = vmatprep.subr.mxu0 %v20548_v8  ;;  %v20563_v2 = vand.u32 4294901760, %v20562_v37  ;;  %v20564_v13 = vld [vmem:[#allocation111_spill] sm:$0xff]  ;;  %v20565_v8 = vld [vmem:[#allocation102_spill] sm:$0xff]  ;;  %v20573_v37 = vld [vmem:[#allocation116_spill] sm:$0xff] }
 0x44c   :  { %5863 = vmatprep.subr.mxu1 %v20549_v16  ;;  %5656 = vmatpush2.msra.mxu0 %v20550_v27  ;;  %v20566_v16 = vand.u32 4294901760, %v20565_v8  ;;  %v16638_v27 = vsub.f32 %v4612_v29, %v16605_v55  ;;  %v20571_v29 = vld [vmem:[#allocation106_spill] sm:$0xff]  ;;  %v16665_v8 = vsub.f32 %v4608_v46, %v16629_v7 }
 0x44d   :  { %5865 = vmatpush2.msra.mxu1 %v15916_v4  ;;  %5660 = vmatprep.subr.mxu0 %v20552_v36  ;;  %v20555_v4 = vld [vmem:[#allocation103_spill] sm:$0xff]  ;;  %v4602_v36 = vld [vmem:[%s19463_s9 + $0x300] sm:$0xff]  ;;  %v4249_v22 = vpop.f32.mrf.mxu0 }
 0x44e   :  { %5867 = vmatprep.subr.mxu1 %v15933_v10  ;;  %5664 = vmatpush2.msra.mxu0 %v20554_v47  ;;  %v4606_v10 = vld [vmem:[%s19463_s9 + $0x320] sm:$0xff]  ;;  %v20569_v47 = vand.u32 4294901760, %v20568_v40  ;;  %v20577_v40 = vld [vmem:[#allocation108_spill] sm:$0xff]  ;;  %v20625_v35 = vand.u32 4294901760, %v16638_v27 }
 0x44f   :  { %5869 = vmatpush2.msra.mxu1 %v20555_v4  ;;  %5668 = vmatprep.subr.mxu0 %v20557_v59  ;;  %v16640_v49 = vand.u32 4294901760, %v4606_v10  ;;  %v16649_v4 = vsub.f32 %v4611_v45, %v16613_v44  ;;  %v20570_v59 = vld [vmem:[#allocation114_spill] sm:$0xff]  ;;  %v4250_v45 = vadd.f32 %v4249_v22, %v4164_v6  ;;  %v16681_v22 = vsub.f32 %v4605_v38, %v16651_v30 }
 0x450   :  { %5871 = vmatprep.subr.mxu1 %v20558_v15  ;;  %5672 = vmatpush2.msra.mxu0 %v20560_v12  ;;  %v20572_v15 = vand.u32 4294901760, %v20571_v29  ;;  %v16657_v12 = vsub.f32 %v4609_v25, %v16621_v1  ;;  %v12750_v25 = vpop.f32.mrf.mxu0 }
 0x451   :  { %5873 = vmatpush2.msra.mxu1 %v20561_v57  ;;  %5676 = vmatprep.subr.mxu0 %v20563_v2  ;;  %v16659_v57 = vand.u32 4294901760, %v4603_v43  ;;  %v20574_v2 = vld [vmem:[#allocation107_spill] sm:$0xff]  ;;  %v16674_v29 = vsub.f32 %v4606_v10, %v16640_v49  ;;  %v19813_v46 = vand.u32 4294901760, %v16649_v4 }
 0x452   :  { %5875 = vmatprep.subr.mxu1 %v20564_v13  ;;  %5680 = vmatpush2.msra.mxu0 %v20566_v16  ;;  %v20575_v13 = vand.u32 4294901760, %v20574_v2  ;;  %v16667_v16 = vand.u32 4294901760, %v4602_v36  ;;  %v4330_v2 = vadd.f32 %v4329_v23, %v4250_v45 }
 0x453   :  { %5877 = vmatpush2.msra.mxu1 %v20567_v51  ;;  %5684 = vmatprep.subr.mxu0 %v20569_v47  ;;  %v20576_v51 = vld [vmem:[#allocation118_spill] sm:$0xff]  ;;  %v20578_v47 = vand.u32 4294901760, %v20577_v40  ;;  %v16688_v10 = vsub.f32 %v4603_v43, %v16659_v57  ;;  %v20583_v40 = vand.u32 4294901760, %v20452_v41  ;;  %v19809_v23 = vand.u32 4294901760, %v16674_v29 }
 0x454   :  { %5879 = vmatprep.subr.mxu1 %v20570_v59  ;;  %5688 = vmatpush2.msra.mxu0 %v20572_v15  ;;  %v19814_v59 = vand.u32 4294901760, %v16638_v27  ;;  %v20579_v15 = vld [vmem:[#allocation119_spill] sm:$0xff]  ;;  %v16695_v38 = vsub.f32 %v4602_v36, %v16667_v16  ;;  %v20585_v41 = vand.u32 4294901760, %v20454_v32  ;;  %v6032_v43 = vsub.f32 %v16649_v4, %v19813_v46 }
 0x455   :  { %5881 = vmatpush2.msra.mxu1 %v20573_v37  ;;  %5692 = vmatprep.subr.mxu0 %v20575_v13  ;;  %v20580_v37 = vld [vmem:[#allocation110_spill] sm:$0xff]  ;;  %v20582_v13 = vand.u32 4294901760, %v20451_v58  ;;  %v20584_v58 = vand.u32 4294901760, %v20453_v26  ;;  %v20586_v26 = vand.u32 4294901760, %v16146_v52  ;;  %v20587_v32 = vand.u32 4294901760, %v16157_v11 }
 0x456   :  { %5883 = vmatprep.subr.mxu1 %v20576_v51  ;;  %5696 = vmatpush2.msra.mxu0 %v20578_v47  ;;  %v20581_v6 = vand.u32 4294901760, %v20580_v37  ;;  %v19811_v51 = vand.u32 4294901760, %v16657_v12  ;;  %v19810_v47 = vand.u32 4294901760, %v16665_v8  ;;  %v20588_v52 = vand.u32 4294901760, %v16170_v21 }
 0x457   :  { %5885 = vmatpush2.msra.mxu1 %v20579_v15  ;;  %v20589_v11 = vand.u32 4294901760, %v16181_v60  ;;  %v6033_v37 = vand.u32 4294901760, %v6032_v43  ;;  %v20590_v21 = vand.u32 4294901760, %v16194_v42  ;;  %v20591_v60 = vand.u32 4294901760, %v16207_v18 }
 0x458   :  { %5700 = vmatprep.subr.mxu0 %v20581_v6  ;;  %5887 = vmatprep.subr.mxu1 %v16137_v34  ;;  %v6026_v34 = vsub.f32 %v16638_v27, %v19814_v59  ;;  %v6038_v36 = vsub.f32 %v16657_v12, %v19811_v51  ;;  %v6044_v25 = vsub.f32 %v16665_v8, %v19810_v47  ;;  %v20595_v43 = vand.u32 4294901760, %v16237_v24  ;;  %v4580_v47 = vld [vmem:[%s19463_s9 + $0x250] sm:$0xff] }
 0x459   :  { %5704 = vmatpush2.msra.mxu0 %v20582_v13  ;;  %5889 = vmatpush2.msra.mxu1 %v16148_v56  ;;  %v4499_v56 = vpop.f32.mrf.mxu1  ;;  %v20599_v24 = vand.u32 4294901760, %v16263_v54  ;;  %v4550_v54 = vld [vmem:[%s19463_s9 + $0x160] sm:$0xff] }
 0x45a   :  { %5708 = vmatprep.subr.mxu0 %v20583_v40  ;;  %5891 = vmatprep.subr.mxu1 %v16159_v50  ;;  %v19808_v50 = vand.u32 4294901760, %v16681_v22  ;;  %v6027_v15 = vand.u32 4294901760, %v6026_v34 }
 0x45b   :  { %5712 = vmatpush2.msra.mxu0 %v20584_v58  ;;  %5893 = vmatpush2.msra.mxu1 %v16172_v61  ;;  %v19807_v61 = vand.u32 4294901760, %v16688_v10  ;;  %v12801_v45 = vpop.f32.mrf.mxu1  ;;  %v20592_v58 = vld [vmem:[#allocation40_spill] sm:$0xff] }
 0x45c   :  { %5716 = vmatprep.subr.mxu0 %v20585_v41  ;;  %5895 = vmatprep.subr.mxu1 %v16183_v9  ;;  %v19806_v9 = vand.u32 4294901760, %v16695_v38  ;;  %v6056_v6 = vsub.f32 %v16681_v22, %v19808_v50  ;;  %v20594_v41 = vand.u32 4294901760, %v16227_v3  ;;  %v4601_v45 = vld [vmem:[%s19463_s9 + $0x2f8] sm:$0xff]  ;;  %v20597_v3 = vand.u32 4294901760, %v16255_v0  ;;  %v4598_v0 = vld [vmem:[%s19463_s9 + $0x2e0] sm:$0xff] }
 0x45d   :  { %5720 = vmatpush2.msra.mxu0 %v20586_v26  ;;  %5897 = vmatpush2.msra.mxu1 %v16196_v20  ;;  %v6050_v20 = vsub.f32 %v16674_v29, %v19809_v23  ;;  %v6062_v13 = vsub.f32 %v16688_v10, %v19807_v61 }
 0x45e   :  { %5724 = vmatprep.subr.mxu0 %v20587_v32  ;;  %5899 = vmatprep.subr.mxu1 %v16209_v28  ;;  %v6039_v28 = vand.u32 4294901760, %v6038_v36  ;;  %v6068_v40 = vsub.f32 %v16695_v38, %v19806_v9  ;;  %v6057_v34 = vand.u32 4294901760, %v6056_v6  ;;  %v20596_v32 = vand.u32 4294901760, %v16247_v19  ;;  %v4553_v19 = vld [vmem:[%s19463_s9 + $0x178] sm:$0xff] }
 0x45f   :  { %5728 = vmatpush2.msra.mxu0 %v20588_v52  ;;  %5901 = vmatpush2.msra.mxu1 %v16219_v63  ;;  %v6045_v63 = vand.u32 4294901760, %v6044_v25  ;;  %v6051_v42 = vand.u32 4294901760, %v6050_v20  ;;  %v6063_v18 = vand.u32 4294901760, %v6062_v13  ;;  %v16772_v52 = vand.u32 4294901760, %v4601_v45  ;;  %v4595_v20 = vld [vmem:[%s19463_s9 + $0x2c8] sm:$0xff]  ;;  %v20609_v9 = vld [vmem:[#allocation13_spill] sm:$0xff] }
 0x460   :  { %5732 = vmatprep.subr.mxu0 %v20589_v11  ;;  %5903 = vmatprep.subr.mxu1 %v16229_v53  ;;  %v20593_v53 = vand.u32 4294901760, %v16217_v33  ;;  %v6069_v26 = vand.u32 4294901760, %v6068_v40  ;;  %v16791_v11 = vand.u32 4294901760, %v4598_v0  ;;  %v16808_v13 = vand.u32 4294901760, %v4595_v20 }
 0x461   :  { %5736 = vmatpush2.msra.mxu0 %v20590_v21  ;;  %5905 = vmatpush2.msra.mxu1 %v16239_v62  ;;  %v4421_v62 = vpop.f32.mrf.mxu0  ;;  %v16799_v6 = vsub.f32 %v4601_v45, %v16772_v52  ;;  %v16801_v21 = vand.u32 4294901760, %v4550_v54 }
 0x462   :  { %5740 = vmatprep.subr.mxu0 %v20591_v60  ;;  %5909 = vmatmul.mubr.f32.vlgmr.msra.gmra.mxu1 %v20592_v58  ;;  %v4422_v36 = vadd.f32 %v4421_v62, %v4330_v2  ;;  %v20600_v2 = vand.u32 4294901760, %v16271_v5  ;;  %v16784_v5 = vand.u32 4294901760, %v4553_v19  ;;  %v4544_v60 = vld [vmem:[%s19463_s9 + $0x130] sm:$0xff] }
 0x463   :  { %6028 = vmatprep.subr.mxu1 %v6027_v15  ;;  %5744 = vmatpush2.msra.mxu0 %v20593_v53  ;;  %v12784_v33 = vpop.f32.mrf.mxu0  ;;  %v20602_v15 = vld [vmem:[#allocation11_spill] sm:$0xff]  ;;  %v16826_v53 = vsub.f32 %v4598_v0, %v16791_v11  ;;  %v16837_v62 = vsub.f32 %v4550_v54, %v16801_v21 }
 0x464   :  { %6034 = vmatpush1.msra.mxu1 %v6033_v37  ;;  %5748 = vmatprep.subr.mxu0 %v20594_v41  ;;  %v16763_v25 = vadd.f32 %v4499_v56, %v4422_v36  ;;  %v20601_v56 = vmov 0.0   ;;  %v4547_v37 = vld [vmem:[%s19463_s9 + $0x148] sm:$0xff]  ;;  %v4541_v41 = vld [vmem:[%s19463_s9 + $0x118] sm:$0xff]  ;;  %v16847_v36 = vsub.f32 %v4595_v20, %v16808_v13  ;;  %v4538_v33 = vld [vmem:[%s19463_s9 + $0x100] sm:$0xff] }
 0x465   :  { %6040 = vmatprep.subr.mxu1 %v6039_v28  ;;  %5752 = vmatpush2.msra.mxu0 %v20595_v43  ;;  %v4592_v28 = vld [vmem:[%s19463_s9 + $0x2b0] sm:$0xff]  ;;  %v16818_v40 = vand.u32 4294901760, %v4547_v37  ;;  %20603 = vst [vmem:[#allocation15_spill] sm:$0xff] %v16826_v53  ;;  %20604 = vst [vmem:[#allocation23_spill] sm:$0xff] %v16837_v62  ;;  %v16839_v43 = vand.u32 4294901760, %v4544_v60  ;;  %v19816_v0 = vand.u32 4294901760, %v16826_v53 }
 0x466   :  { %6046 = vmatpush1.msra.mxu1 %v6045_v63  ;;  %5756 = vmatprep.subr.mxu0 %v20596_v32  ;;  %20598 = vst [vmem:[#allocation21_spill] sm:$0xff] %v16763_v25  ;;  %v16816_v63 = vsub.f32 %v4553_v19, %v16784_v5  ;;  %20605 = vst [vmem:[#allocation8_spill] sm:$0xff] %v16847_v36  ;;  %v4583_v19 = vld [vmem:[%s19463_s9 + $0x268] sm:$0xff]  ;;  %v19817_v50 = vand.u32 4294901760, %v16837_v62  ;;  %v16887_v23 = vand.u32 4294901760, %v4538_v33 }
 0x467   :  { %6052 = vmatprep.subr.mxu1 %v6051_v42  ;;  %5760 = vmatpush2.msra.mxu0 %v20597_v3  ;;  %v4589_v42 = vld [vmem:[%s19463_s9 + $0x298] sm:$0xff]  ;;  %v16858_v3 = vsub.f32 %v4547_v37, %v16818_v40  ;;  %v4535_v37 = vld [vmem:[%s19463_s9 + $0xe8] sm:$0xff]  ;;  %v16898_v46 = vand.u32 4294901760, %v4583_v19 }
 0x468   :  { %6058 = vmatpush1.msra.mxu1 %v6057_v34  ;;  %5764 = vmatprep.subr.mxu0 %v20599_v24  ;;  %v16828_v34 = vand.u32 4294901760, %v4592_v28  ;;  %v16849_v32 = vand.u32 4294901760, %v4589_v42  ;;  %v19815_v45 = vand.u32 4294901760, %v16816_v63  ;;  %v16860_v24 = vand.u32 4294901760, %v4541_v41 }
 0x469   :  { %6064 = vmatprep.subr.mxu1 %v6063_v18  ;;  %5768 = vmatpush2.msra.mxu0 %v20600_v2  ;;  %v19812_v18 = vand.u32 4294901760, %v16799_v6  ;;  %20606 = vst [vmem:[#allocation35_spill] sm:$0xff] %v16858_v3  ;;  %v20607_v2 = vld [vmem:[#allocation14_spill] sm:$0xff]  ;;  %v16911_v51 = vand.u32 4294901760, %v4535_v37  ;;  %v16935_v25 = vsub.f32 %v16837_v62, %v19817_v50  ;;  %v16950_v48 = vsub.f32 %v4583_v19, %v16898_v46 }
 0x46a   :  { %6070 = vmatpush1.msra.mxu1 %v6069_v26  ;;  %6103 = vmatprep.mubr.f32.mxu1 %v20601_v56  ;;  %v4586_v26 = vld [vmem:[%s19463_s9 + $0x280] sm:$0xff]  ;;  %v16869_v54 = vsub.f32 %v4592_v28, %v16828_v34  ;;  %v16885_v28 = vsub.f32 %v4544_v60, %v16839_v43  ;;  %v16905_v60 = vsub.f32 %v16816_v63, %v19815_v45 }
 0x46b   :  { %5772 = vmatmul.mubr.f32.vlgmr.msra.gmra.mxu0 %v20592_v58  ;;  %5940 = vmatprep.subr.mxu0 %v16605_v55  ;;  %v16871_v20 = vand.u32 4294901760, %v4586_v26  ;;  %v16881_v61 = vsub.f32 %v16799_v6, %v19812_v18  ;;  %v16896_v18 = vsub.f32 %v4589_v42, %v16849_v32  ;;  %v16909_v59 = vsub.f32 %v4541_v41, %v16860_v24  ;;  %v4532_v42 = vld [vmem:[%s19463_s9 + $0xd0] sm:$0xff] }
 0x46c   :  { %6105 = vmatmul.mubr.f32.vlgmr.msra.gmra.mxu1 %v20602_v15  ;;  %6225 = vmatprep.subr.mxu1 %v16605_v55  ;;  %20608 = vst [vmem:[#allocation64_spill] sm:$0xff] %v16869_v54  ;;  %20610 = vst [vmem:[#allocation70_spill] sm:$0xff] %v16885_v28  ;;  %v16939_v45 = vsub.f32 %v4538_v33, %v16887_v23  ;;  %v16952_v50 = vand.u32 4294901760, %v4532_v42  ;;  %v4577_v33 = vld [vmem:[%s19463_s9 + $0x238] sm:$0xff]  ;;  %v20619_v39 = vand.u32 4294901760, %v16869_v54 }
 0x46d   :  { %5942 = vmatpush1.msra.mxu0 %v16613_v44  ;;  %6227 = vmatpush1.msra.mxu1 %v16613_v44  ;;  %20611 = vst [vmem:[#allocation72_spill] sm:$0xff] %v16896_v18  ;;  %20612 = vst [vmem:[#allocation74_spill] sm:$0xff] %v16909_v59  ;;  %v16925_v41 = vsub.f32 %v4586_v26, %v16871_v20  ;;  %v16993_v19 = vand.u32 4294901760, %v4577_v33 }
 0x46e   :  { %5944 = vmatprep.subr.mxu0 %v16621_v1  ;;  %6229 = vmatprep.subr.mxu1 %v16621_v1  ;;  %20614 = vst [vmem:[#allocation77_spill] sm:$0xff] %v16939_v45  ;;  %20616 = vst [vmem:[#allocation78_spill] sm:$0xff] %v16950_v48  ;;  %v17008_v31 = vsub.f32 %v4532_v42, %v16952_v50 }
 0x46f   :  { %5946 = vmatpush1.msra.mxu0 %v16629_v7  ;;  %6231 = vmatpush1.msra.mxu1 %v16629_v7  ;;  %20613 = vst [vmem:[#allocation76_spill] sm:$0xff] %v16925_v41 }
 0x470   :  { %5948 = vmatprep.subr.mxu0 %v16640_v49  ;;  %6233 = vmatprep.subr.mxu1 %v16640_v49  ;;  %20624 = vst [vmem:[#allocation85_spill] sm:$0xff] %v17008_v31 }
 0x471   :  { %5950 = vmatpush1.msra.mxu0 %v16651_v30  ;;  %6235 = vmatpush1.msra.mxu1 %v16651_v30 }
 0x472   :  { %5952 = vmatprep.subr.mxu0 %v16659_v57  ;;  %6237 = vmatprep.subr.mxu1 %v16659_v57 }
 0x473   :  { %5954 = vmatpush1.msra.mxu0 %v16667_v16  ;;  %5987 = vmatprep.mubr.f32.mxu0 %v20601_v56 }
 0x474   :  { %6239 = vmatpush1.msra.mxu1 %v16667_v16  ;;  %6272 = vmatprep.mubr.f32.mxu1 %v20601_v56 }
 0x475   :  { %5993 = vmatmul.mubr.f32.vlgmr.msra.gmra.mxu0 %v20607_v2  ;;  %6137 = vmatprep.subr.mxu0 %v16638_v27 }
 0x476   :  { %6276 = vmatmul.mubr.f32.vlgmr.msra.gmra.mxu1 %v20609_v9  ;;  %6403 = vmatprep.subr.mxu1 %v16605_v55  ;;  %v16927_v55 = vand.u32 4294901760, %v4580_v47  ;;  %v20622_v9 = vld [vmem:[#allocation12_spill] sm:$0xff] }
 0x477   :  { %6140 = vmatpush1.msra.mxu0 %v16649_v4  ;;  %6405 = vmatpush1.msra.mxu1 %v16613_v44  ;;  %v16921_v44 = vsub.f32 %v16826_v53, %v19816_v0 }
 0x478   :  { %6143 = vmatprep.subr.mxu0 %v16657_v12  ;;  %6407 = vmatprep.subr.mxu1 %v16621_v1  ;;  %v6687_v1 = vand.u32 4294901760, %v16881_v61  ;;  %v16967_v61 = vsub.f32 %v4535_v37, %v16911_v51  ;;  %v4529_v37 = vld [vmem:[%s19463_s9 + $0xb8] sm:$0xff] }
 0x479   :  { %6146 = vmatpush1.msra.mxu0 %v16665_v8  ;;  %6409 = vmatpush1.msra.mxu1 %v16629_v7  ;;  %v20615_v7 = vand.u32 4294901760, %v16847_v36  ;;  %v17023_v42 = vand.u32 4294901760, %v4529_v37 }
 0x47a   :  { %6149 = vmatprep.subr.mxu0 %v16674_v29  ;;  %6411 = vmatprep.subr.mxu1 %v16640_v49  ;;  %v6575_v49 = vand.u32 4294901760, %v16905_v60  ;;  %20618 = vst [vmem:[#allocation80_spill] sm:$0xff] %v16967_v61  ;;  %v16975_v60 = vsub.f32 %v16869_v54, %v20619_v39  ;;  %v20633_v54 = vand.u32 4294901760, %v16665_v8  ;;  %v20636_v8 = vand.u32 4294901760, %v16674_v29 }
 0x47b   :  { %6152 = vmatpush1.msra.mxu0 %v16681_v22  ;;  %v16946_v26 = vsub.f32 %v16847_v36, %v20615_v7  ;;  %6413 = vmatpush1.msra.mxu1 %v16651_v30  ;;  %v20617_v7 = vand.u32 4294901760, %v16858_v3  ;;  %v6694_v30 = vand.u32 4294901760, %v16921_v44  ;;  %v20621_v44 = vand.u32 4294901760, %v16885_v28 }
 0x47c   :  { %6155 = vmatprep.subr.mxu0 %v16688_v10  ;;  %6415 = vmatprep.subr.mxu1 %v16659_v57  ;;  %v6582_v57 = vand.u32 4294901760, %v16935_v25  ;;  %v20623_v25 = vand.u32 4294901760, %v16896_v18  ;;  %v6708_v27 = vand.u32 4294901760, %v16975_v60  ;;  %v20639_v29 = vand.u32 4294901760, %v16681_v22 }
 0x47d   :  { %v16963_v0 = vsub.f32 %v16858_v3, %v20617_v7  ;;  %6158 = vmatpush1.msra.mxu0 %v16695_v38  ;;  %v16979_v7 = vsub.f32 %v4580_v47, %v16927_v55  ;;  %6191 = vmatprep.mubr.f32.mxu0 %v20601_v56  ;;  %v16990_v39 = vsub.f32 %v16885_v28, %v20621_v44  ;;  %v4574_v47 = vld [vmem:[%s19463_s9 + $0x220] sm:$0xff] }
 0x47e   :  { %6417 = vmatpush1.msra.mxu1 %v16667_v16  ;;  %6450 = vmatprep.mubr.f32.mxu1 %v20601_v56  ;;  %v6701_v16 = vand.u32 4294901760, %v16946_v26  ;;  %v17004_v2 = vsub.f32 %v16896_v18, %v20623_v25  ;;  %v4571_v18 = vld [vmem:[%s19463_s9 + $0x208] sm:$0xff]  ;;  %v17037_v44 = vand.u32 4294901760, %v4574_v47 }
 0x47f   :  { %20620 = vst [vmem:[#allocation83_spill] sm:$0xff] %v16979_v7  ;;  %6194 = vmatmul.mubr.f32.vlgmr.msra.gmra.mxu0 %v20622_v9  ;;  %6309 = vmatprep.subr.mxu0 %v20625_v35  ;;  %v6589_v26 = vand.u32 4294901760, %v16963_v0  ;;  %v20626_v9 = vand.u32 4294901760, %v16909_v59  ;;  %v20627_v35 = vand.u32 4294901760, %v16649_v4  ;;  %v20628_v0 = vand.u32 4294901760, %v16925_v41 }
 0x480   :  { %6452 = vmatmul.mubr.f32.vlgmr.msra.gmra.mxu1 %v20602_v15  ;;  %11679 = vmatprep.subr.mxu1 %v6687_v1  ;;  %v6596_v4 = vand.u32 4294901760, %v16990_v39  ;;  %v20629_v1 = vand.u32 4294901760, %v16939_v45  ;;  %v6715_v39 = vand.u32 4294901760, %v17004_v2  ;;  %v20634_v2 = vand.u32 4294901760, %v16967_v61 }
 0x481   :  { %v17020_v25 = vsub.f32 %v16909_v59, %v20626_v9  ;;  %6313 = vmatpush1.msra.mxu0 %v20627_v35  ;;  %v17034_v28 = vsub.f32 %v16925_v41, %v20628_v0  ;;  %v4523_v59 = vld [vmem:[%s19463_s9 + $0x88] sm:$0xff]  ;;  %11680 = vmatpush3.msra.mxu1 %v6575_v49  ;;  %v17050_v35 = vsub.f32 %v4577_v33, %v16993_v19  ;;  %v17052_v0 = vand.u32 4294901760, %v4526_v17  ;;  %v4568_v9 = vld [vmem:[%s19463_s9 + $0x1f0] sm:$0xff]  ;;  %v4565_v33 = vld [vmem:[%s19463_s9 + $0x1d8] sm:$0xff] }
 0x482   :  { %6795 = vmatprep.mubr.f32.mxu1 %v20456_v14  ;;  %v17047_v60 = vsub.f32 %v16939_v45, %v20629_v1  ;;  %v20631_v49 = vand.u32 4294901760, %v16657_v12  ;;  %11681 = vmatprep.subr.mxu1 %v6694_v30  ;;  %v20632_v14 = vand.u32 4294901760, %v16950_v48  ;;  %v17066_v45 = vand.u32 4294901760, %v4571_v18  ;;  %v4520_v41 = vld [vmem:[%s19463_s9 + $0x70] sm:$0xff] }
 0x483   :  { %20630 = vst [vmem:[#allocation87_spill] sm:$0xff] %v17050_v35  ;;  %11682 = vmatpush3.msra.mxu1 %v6582_v57  ;;  %v6603_v12 = vand.u32 4294901760, %v17020_v25  ;;  %v17077_v30 = vsub.f32 %v16967_v61, %v20634_v2  ;;  %v20637_v57 = vand.u32 4294901760, %v16979_v7  ;;  %v17098_v2 = vand.u32 4294901760, %v4568_v9  ;;  %v4517_v61 = vld [vmem:[%s19463_s9 + $0x58] sm:$0xff]  ;;  %6370 = vmatprep.mubr.f32.mxu0 %v20601_v56  ;;  %v4556_v56 = vld [vmem:[%s19463_s9 + $0x190] sm:$0xff] }
 0x484   :  { %6317 = vmatprep.subr.mxu0 %v20631_v49  ;;  %v17063_v1 = vsub.f32 %v16950_v48, %v20632_v14  ;;  %v17080_v14 = vsub.f32 %v4529_v37, %v17023_v42  ;;  %v17082_v49 = vand.u32 4294901760, %v4523_v59  ;;  %11683 = vmatprep.subr.mxu1 %v6701_v16  ;;  %v17096_v37 = vsub.f32 %v4574_v47, %v17037_v44  ;;  %v4562_v47 = vld [vmem:[%s19463_s9 + $0x1c0] sm:$0xff] }
 0x485   :  { %6321 = vmatpush1.msra.mxu0 %v20633_v54  ;;  %v6722_v54 = vand.u32 4294901760, %v17034_v28  ;;  %v17093_v25 = vsub.f32 %v16979_v7, %v20637_v57  ;;  %11684 = vmatpush3.msra.mxu1 %v6589_v26  ;;  %v6610_v28 = vand.u32 4294901760, %v17047_v60  ;;  %v17110_v57 = vand.u32 4294901760, %v4520_v41  ;;  %v4514_v16 = vld [vmem:[%s19463_s9 + $0x40] sm:$0xff] }
 0x486   :  { %20635 = vst [vmem:[#allocation90_spill] sm:$0xff] %v17080_v14  ;;  %6325 = vmatprep.subr.mxu0 %v20636_v8  ;;  %20638 = vst [vmem:[#allocation92_spill] sm:$0xff] %v17096_v37  ;;  %v17108_v8 = vsub.f32 %v4526_v17, %v17052_v0  ;;  %v20641_v7 = vand.u32 4294901760, %v16688_v10  ;;  %11685 = vmatprep.subr.mxu1 %v6708_v27  ;;  %v6729_v22 = vand.u32 4294901760, %v17063_v1  ;;  %v20642_v26 = vand.u32 4294901760, %v17008_v31 }
 0x487   :  { %6329 = vmatpush1.msra.mxu0 %v20639_v29  ;;  %v17124_v17 = vsub.f32 %v4571_v18, %v17066_v45  ;;  %v17126_v29 = vand.u32 4294901760, %v4565_v33  ;;  %v20643_v10 = vand.u32 4294901760, %v16695_v38  ;;  %v17137_v1 = vsub.f32 %v4523_v59, %v17082_v49  ;;  %11686 = vmatpush3.msra.mxu1 %v6596_v4  ;;  %v4511_v59 = vld [vmem:[%s19463_s9 + $0x28] sm:$0xff] }
 0x488   :  { %20640 = vst [vmem:[#allocation113_spill] sm:$0xff] %v17108_v8  ;;  %6333 = vmatprep.subr.mxu0 %v20641_v7  ;;  %v17121_v60 = vsub.f32 %v17008_v31, %v20642_v26  ;;  %v6617_v7 = vand.u32 4294901760, %v17077_v30  ;;  %v17139_v18 = vand.u32 4294901760, %v4517_v61  ;;  %v4559_v26 = vld [vmem:[%s19463_s9 + $0x1a8] sm:$0xff]  ;;  %v6736_v38 = vand.u32 4294901760, %v17093_v25  ;;  %11687 = vmatprep.subr.mxu1 %v6715_v39  ;;  %v20646_v31 = vld [vmem:[#allocation46_spill] sm:$0xff] }
 0x489   :  { %6337 = vmatpush1.msra.mxu0 %v20643_v10  ;;  %20644 = vst [vmem:[#allocation115_spill] sm:$0xff] %v17137_v1  ;;  %v17148_v30 = vsub.f32 %v4568_v9, %v17098_v2  ;;  %v17150_v27 = vand.u32 4294901760, %v4562_v47  ;;  %v20645_v4 = vand.u32 4294901760, %v17050_v35  ;;  %v17161_v10 = vsub.f32 %v4520_v41, %v17110_v57  ;;  %v4508_v41 = vld [vmem:[%s19463_s9 + $0x10] sm:$0xff]  ;;  %11688 = vmatpush3.msra.mxu1 %v6603_v12 }
 0x48a   :  { %6372 = vmatmul.mubr.f32.vlgmr.msra.gmra.mxu0 %v20602_v15  ;;  %11644 = vmatprep.subr.mxu0 %v16772_v52  ;;  %v17163_v9 = vand.u32 4294901760, %v4514_v16  ;;  %v6624_v39 = vand.u32 4294901760, %v17121_v60  ;;  %v17175_v25 = vand.u32 4294901760, %v4559_v26  ;;  %v17186_v48 = vsub.f32 %v4517_v61, %v17139_v18 }
 0x48b   :  { %v6742_v15 = vsub.f32 %v17050_v35, %v20645_v4  ;;  %11645 = vmatpush3.msra.mxu0 %v16784_v5  ;;  %6559 = vmatprep.mubr.f32.mxu0 %v20646_v31  ;;  %v17173_v4 = vsub.f32 %v4565_v33, %v17126_v29  ;;  %v20647_v35 = vand.u32 4294901760, %v17080_v14  ;;  %v17188_v33 = vand.u32 4294901760, %v4511_v59 }
 0x48c   :  { %11646 = vmatprep.subr.mxu0 %v16791_v11  ;;  %11689 = vmatprep.subr.mxu1 %v6722_v54  ;;  %v20648_v3 = vand.u32 4294901760, %v17096_v37  ;;  %v17196_v62 = vsub.f32 %v4562_v47, %v17150_v27  ;;  %v20649_v61 = vand.u32 4294901760, %v17108_v8  ;;  %v20650_v36 = vand.u32 4294901760, %v17124_v17 }
 0x48d   :  { %v6630_v31 = vsub.f32 %v17080_v14, %v20647_v35  ;;  %11647 = vmatpush3.msra.mxu0 %v16801_v21  ;;  %v17198_v35 = vand.u32 4294901760, %v4556_v56  ;;  %11690 = vmatpush3.msra.mxu1 %v6610_v28  ;;  %v17206_v14 = vsub.f32 %v4514_v16, %v17163_v9  ;;  %v6743_v47 = vand.u32 4294901760, %v6742_v15 }
 0x48e   :  { %v6749_v12 = vsub.f32 %v17096_v37, %v20648_v3  ;;  %11648 = vmatprep.subr.mxu0 %v16808_v13  ;;  %v6637_v54 = vsub.f32 %v17108_v8, %v20649_v61  ;;  %v17208_v3 = vand.u32 4294901760, %v4508_v41  ;;  %11691 = vmatprep.subr.mxu1 %v6729_v22  ;;  %v6756_v28 = vsub.f32 %v17124_v17, %v20650_v36 }
 0x48f   :  { %11649 = vmatpush3.msra.mxu0 %v16818_v40  ;;  %v17216_v53 = vsub.f32 %v4559_v26, %v17175_v25  ;;  %11692 = vmatpush3.msra.mxu1 %v6617_v7  ;;  %v6631_v16 = vand.u32 4294901760, %v6630_v31  ;;  %v20651_v61 = vand.u32 4294901760, %v17137_v1  ;;  %v17224_v15 = vsub.f32 %v4511_v59, %v17188_v33 }
 0x490   :  { %11650 = vmatprep.subr.mxu0 %v16828_v34  ;;  %11693 = vmatprep.subr.mxu1 %v6736_v38  ;;  %v6750_v36 = vand.u32 4294901760, %v6749_v12  ;;  %v20652_v26 = vand.u32 4294901760, %v17148_v30  ;;  %v17232_v31 = vsub.f32 %v4556_v56, %v17198_v35  ;;  %v20653_v59 = vand.u32 4294901760, %v17161_v10 }
 0x491   :  { %v6644_v22 = vsub.f32 %v17137_v1, %v20651_v61  ;;  %11651 = vmatpush3.msra.mxu0 %v16839_v43  ;;  %11694 = vmatpush3.msra.mxu1 %v6624_v39  ;;  %v6638_v61 = vand.u32 4294901760, %v6637_v54  ;;  %v17240_v12 = vsub.f32 %v4508_v41, %v17208_v3  ;;  %v20654_v56 = vand.u32 4294901760, %v17173_v4 }
 0x492   :  { %v6763_v7 = vsub.f32 %v17148_v30, %v20652_v26  ;;  %11652 = vmatprep.subr.mxu0 %v16849_v32  ;;  %v6651_v38 = vsub.f32 %v17161_v10, %v20653_v59  ;;  %11695 = vmatprep.subr.mxu1 %v6743_v47  ;;  %v6757_v26 = vand.u32 4294901760, %v6756_v28  ;;  %v20655_v59 = vand.u32 4294901760, %v17186_v48 }
 0x493   :  { %11653 = vmatpush3.msra.mxu0 %v16860_v24  ;;  %v6770_v39 = vsub.f32 %v17173_v4, %v20654_v56  ;;  %11696 = vmatpush3.msra.mxu1 %v6631_v16  ;;  %v6645_v54 = vand.u32 4294901760, %v6644_v22  ;;  %v20656_v28 = vand.u32 4294901760, %v17196_v62  ;;  %v20657_v22 = vand.u32 4294901760, %v17206_v14 }
 0x494   :  { %11654 = vmatprep.subr.mxu0 %v16871_v20  ;;  %v6658_v60 = vsub.f32 %v17186_v48, %v20655_v59  ;;  %11697 = vmatprep.subr.mxu1 %v6750_v36  ;;  %v6764_v47 = vand.u32 4294901760, %v6763_v7  ;;  %v6652_v16 = vand.u32 4294901760, %v6651_v38  ;;  %v19855_v41 = vand.u32 4294901760, %v17240_v12 }
 0x495   :  { %11655 = vmatpush3.msra.mxu0 %v16887_v23  ;;  %v6777_v56 = vsub.f32 %v17196_v62, %v20656_v28  ;;  %11698 = vmatpush3.msra.mxu1 %v6638_v61  ;;  %v6665_v59 = vsub.f32 %v17206_v14, %v20657_v22  ;;  %v6771_v36 = vand.u32 4294901760, %v6770_v39  ;;  %v20658_v7 = vand.u32 4294901760, %v17216_v53 }
 0x496   :  { %11656 = vmatprep.subr.mxu0 %v16898_v46  ;;  %11699 = vmatprep.subr.mxu1 %v6757_v26  ;;  %v6659_v61 = vand.u32 4294901760, %v6658_v60  ;;  %v20659_v38 = vand.u32 4294901760, %v17224_v15  ;;  %v20660_v26 = vand.u32 4294901760, %v17232_v31  ;;  %v6679_v60 = vsub.f32 %v17240_v12, %v19855_v41  ;;  %v20679_v41 = vld [vmem:[#allocation90_spill] sm:$0xff] }
 0x497   :  { %11657 = vmatpush3.msra.mxu0 %v16911_v51  ;;  %v6784_v28 = vsub.f32 %v17216_v53, %v20658_v7  ;;  %11700 = vmatpush3.msra.mxu1 %v6645_v54  ;;  %v6778_v22 = vand.u32 4294901760, %v6777_v56  ;;  %v6666_v7 = vand.u32 4294901760, %v6665_v59  ;;  %v20662_v59 = vld [vmem:[#allocation47_spill] sm:$0xff] }
 0x498   :  { %11658 = vmatprep.subr.mxu0 %v16927_v55  ;;  %v6672_v37 = vsub.f32 %v17224_v15, %v20659_v38  ;;  %11701 = vmatprep.subr.mxu1 %v6764_v47  ;;  %v6791_v39 = vsub.f32 %v17232_v31, %v20660_v26  ;;  %v20666_v38 = vld [vmem:[#allocation8_spill] sm:$0xff] }
 0x499   :  { %11659 = vmatpush3.msra.mxu0 %v16952_v50  ;;  %11702 = vmatpush3.msra.mxu1 %v6652_v16  ;;  %v6785_v54 = vand.u32 4294901760, %v6784_v28  ;;  %v6680_v16 = vand.u32 4294901760, %v6679_v60  ;;  %v20664_v28 = vld [vmem:[#allocation15_spill] sm:$0xff]  ;;  %v20668_v26 = vld [vmem:[#allocation64_spill] sm:$0xff]  ;;  %v20671_v60 = vld [vmem:[#allocation74_spill] sm:$0xff] }
 0x49a   :  { %11660 = vmatprep.subr.mxu0 %v16993_v19  ;;  %11703 = vmatprep.subr.mxu1 %v6771_v36  ;;  %v6673_v47 = vand.u32 4294901760, %v6672_v37  ;;  %v6792_v56 = vand.u32 4294901760, %v6791_v39  ;;  %v20661_v37 = vld [vmem:[#allocation45_spill] sm:$0xff]  ;;  %v20663_v36 = vld [vmem:[#allocation43_spill] sm:$0xff]  ;;  %v20669_v39 = vld [vmem:[#allocation70_spill] sm:$0xff] }
 0x49b   :  { %11661 = vmatpush3.msra.mxu0 %v17023_v42  ;;  %11704 = vmatpush3.msra.mxu1 %v6659_v61  ;;  %v20665_v61 = vld [vmem:[#allocation23_spill] sm:$0xff] }
 0x49c   :  { %11662 = vmatprep.subr.mxu0 %v17037_v44  ;;  %11705 = vmatprep.subr.mxu1 %v6778_v22  ;;  %v20667_v22 = vld [vmem:[#allocation35_spill] sm:$0xff] }
 0x49d   :  { %11663 = vmatpush3.msra.mxu0 %v17052_v0  ;;  %11706 = vmatpush3.msra.mxu1 %v6666_v7  ;;  %v20670_v7 = vld [vmem:[#allocation72_spill] sm:$0xff] }
 0x49e   :  { %11664 = vmatprep.subr.mxu0 %v17066_v45  ;;  %11707 = vmatprep.subr.mxu1 %v6785_v54  ;;  %v20672_v54 = vld [vmem:[#allocation76_spill] sm:$0xff] }
 0x49f   :  { %11665 = vmatpush3.msra.mxu0 %v17082_v49  ;;  %11708 = vmatpush3.msra.mxu1 %v6673_v47  ;;  %v20673_v47 = vld [vmem:[#allocation77_spill] sm:$0xff] }
 0x4a0   :  { %11666 = vmatprep.subr.mxu0 %v17098_v2  ;;  %11709 = vmatprep.subr.mxu1 %v6792_v56  ;;  %v20674_v56 = vld [vmem:[#allocation78_spill] sm:$0xff] }
 0x4a1   :  { %11667 = vmatpush3.msra.mxu0 %v17110_v57  ;;  %11710 = vmatpush3.msra.mxu1 %v6680_v16  ;;  %v20675_v16 = vld [vmem:[#allocation80_spill] sm:$0xff] }
 0x4a2   :  { %11668 = vmatprep.subr.mxu0 %v17126_v29  ;;  %6797 = vmatmul.mubr.f32.vlgmr.msra.gmra.mxu1 %v20592_v58  ;;  %v20680_v58 = vld [vmem:[#allocation92_spill] sm:$0xff] }
 0x4a3   :  { %11749 = vmatprep.subr.mxu1 %v16772_v52  ;;  %11669 = vmatpush3.msra.mxu0 %v17139_v18 }
 0x4a4   :  { %11750 = vmatpush3.msra.mxu1 %v16784_v5  ;;  %7039 = vmatprep.mubr.f32.mxu1 %v20661_v37  ;;  %v20676_v37 = vld [vmem:[#allocation83_spill] sm:$0xff] }
 0x4a5   :  { %11670 = vmatprep.subr.mxu0 %v17150_v27  ;;  %11751 = vmatprep.subr.mxu1 %v16791_v11 }
 0x4a6   :  { %11671 = vmatpush3.msra.mxu0 %v17163_v9  ;;  %11752 = vmatpush3.msra.mxu1 %v16801_v21 }
 0x4a7   :  { %11672 = vmatprep.subr.mxu0 %v17175_v25  ;;  %11753 = vmatprep.subr.mxu1 %v16808_v13 }
 0x4a8   :  { %11673 = vmatpush3.msra.mxu0 %v17188_v33  ;;  %11754 = vmatpush3.msra.mxu1 %v16818_v40 }
 0x4a9   :  { %11674 = vmatprep.subr.mxu0 %v17198_v35  ;;  %11755 = vmatprep.subr.mxu1 %v16828_v34 }
 0x4aa   :  { %11675 = vmatpush3.msra.mxu0 %v17208_v3  ;;  %11756 = vmatpush3.msra.mxu1 %v16839_v43 }
 0x4ab   :  { %6565 = vmatmul.mubr.f32.vlgmr.msra.gmra.mxu0 %v20662_v59  ;;  %11714 = vmatprep.subr.mxu0 %v16799_v6  ;;  %v20677_v59 = vld [vmem:[#allocation85_spill] sm:$0xff] }
 0x4ac   :  { %11757 = vmatprep.subr.mxu1 %v16849_v32  ;;  %11715 = vmatpush3.msra.mxu0 %v16816_v63 }
 0x4ad   :  { %6932 = vmatprep.mubr.f32.mxu0 %v20663_v36  ;;  %11758 = vmatpush3.msra.mxu1 %v16860_v24  ;;  %v20678_v36 = vld [vmem:[#allocation87_spill] sm:$0xff] }
 0x4ae   :  { %11716 = vmatprep.subr.mxu0 %v20664_v28  ;;  %11759 = vmatprep.subr.mxu1 %v16871_v20 }
 0x4af   :  { %11717 = vmatpush3.msra.mxu0 %v20665_v61  ;;  %11760 = vmatpush3.msra.mxu1 %v16887_v23 }
 0x4b0   :  { %11718 = vmatprep.subr.mxu0 %v20666_v38  ;;  %11761 = vmatprep.subr.mxu1 %v16898_v46 }
 0x4b1   :  { %11719 = vmatpush3.msra.mxu0 %v20667_v22  ;;  %11762 = vmatpush3.msra.mxu1 %v16911_v51 }
 0x4b2   :  { %11720 = vmatprep.subr.mxu0 %v20668_v26  ;;  %11763 = vmatprep.subr.mxu1 %v16927_v55 }
 0x4b3   :  { %11721 = vmatpush3.msra.mxu0 %v20669_v39  ;;  %11764 = vmatpush3.msra.mxu1 %v16952_v50 }
 0x4b4   :  { %11722 = vmatprep.subr.mxu0 %v20670_v7  ;;  %11765 = vmatprep.subr.mxu1 %v16993_v19 }
 0x4b5   :  { %11723 = vmatpush3.msra.mxu0 %v20671_v60  ;;  %11766 = vmatpush3.msra.mxu1 %v17023_v42 }
 0x4b6   :  { %11724 = vmatprep.subr.mxu0 %v20672_v54  ;;  %11767 = vmatprep.subr.mxu1 %v17037_v44 }
 0x4b7   :  { %11725 = vmatpush3.msra.mxu0 %v20673_v47  ;;  %11768 = vmatpush3.msra.mxu1 %v17052_v0 }
 0x4b8   :  { %11726 = vmatprep.subr.mxu0 %v20674_v56  ;;  %11769 = vmatprep.subr.mxu1 %v17066_v45 }
 0x4b9   :  { %11727 = vmatpush3.msra.mxu0 %v20675_v16  ;;  %11770 = vmatpush3.msra.mxu1 %v17082_v49 }
 0x4ba   :  { %11728 = vmatprep.subr.mxu0 %v20676_v37  ;;  %11771 = vmatprep.subr.mxu1 %v17098_v2 }
 0x4bb   :  { %11729 = vmatpush3.msra.mxu0 %v20677_v59  ;;  %11772 = vmatpush3.msra.mxu1 %v17110_v57 }
 0x4bc   :  { %11730 = vmatprep.subr.mxu0 %v20678_v36  ;;  %11773 = vmatprep.subr.mxu1 %v17126_v29 }
 0x4bd   :  { %11731 = vmatpush3.msra.mxu0 %v20679_v41  ;;  %11774 = vmatpush3.msra.mxu1 %v17139_v18 }
 0x4be   :  { %11732 = vmatprep.subr.mxu0 %v20680_v58  ;;  %11775 = vmatprep.subr.mxu1 %v17150_v27 }
 0x4bf   :  { %11733 = vmatpush3.msra.mxu0 %v17108_v8  ;;  %11776 = vmatpush3.msra.mxu1 %v17163_v9  ;;  %v20681_v8 = vld [vmem:[#allocation44_spill] sm:$0xff] }
 0x4c0   :  { %11734 = vmatprep.subr.mxu0 %v17124_v17  ;;  %11777 = vmatprep.subr.mxu1 %v17175_v25 }
 0x4c1   :  { %11735 = vmatpush3.msra.mxu0 %v17137_v1  ;;  %11778 = vmatpush3.msra.mxu1 %v17188_v33  ;;  %v20682_v1 = vld [vmem:[#allocation42_spill] sm:$0xff] }
 0x4c2   :  { %11736 = vmatprep.subr.mxu0 %v17148_v30  ;;  %11779 = vmatprep.subr.mxu1 %v17198_v35 }
 0x4c3   :  { %11737 = vmatpush3.msra.mxu0 %v17161_v10  ;;  %11780 = vmatpush3.msra.mxu1 %v17208_v3 }
 0x4c4   :  { %11738 = vmatprep.subr.mxu0 %v17173_v4  ;;  %7043 = vmatmul.mubr.f32.vlgmr.msra.gmra.mxu1 %v20681_v8  ;;  %v20694_v8 = vand.u32 4294901760, %v20672_v54  ;;  %v20703_v54 = vld [vmem:[#allocation113_spill] sm:$0xff] }
 0x4c5   :  { %11819 = vmatprep.subr.mxu1 %v16772_v52  ;;  %11739 = vmatpush3.msra.mxu0 %v17186_v48  ;;  %v20683_v52 = vld [vmem:[#allocation41_spill] sm:$0xff] }
 0x4c6   :  { %11820 = vmatpush3.msra.mxu1 %v16784_v5  ;;  %7313 = vmatprep.mubr.f32.mxu1 %v20682_v1  ;;  %v20684_v5 = vand.u32 4294901760, %v16799_v6  ;;  %v4613_v6 = vld [vmem:[%s19463_s9 + $0x358] sm:$0xff] }
 0x4c7   :  { %11740 = vmatprep.subr.mxu0 %v17196_v62  ;;  %11821 = vmatprep.subr.mxu1 %v16791_v11  ;;  %v20685_v11 = vand.u32 4294901760, %v16816_v63  ;;  %v20688_v63 = vand.u32 4294901760, %v20666_v38  ;;  %v20697_v38 = vand.u32 4294901760, %v20675_v16  ;;  %v20709_v16 = vand.u32 4294901760, %v17161_v10 }
 0x4c8   :  { %11741 = vmatpush3.msra.mxu0 %v17206_v14  ;;  %11822 = vmatpush3.msra.mxu1 %v16801_v21  ;;  %v20686_v21 = vand.u32 4294901760, %v20664_v28  ;;  %v20696_v28 = vand.u32 4294901760, %v20674_v56 }
 0x4c9   :  { %11742 = vmatprep.subr.mxu0 %v17216_v53  ;;  %11823 = vmatprep.subr.mxu1 %v16808_v13  ;;  %v20687_v13 = vand.u32 4294901760, %v20665_v61 }
 0x4ca   :  { %11743 = vmatpush3.msra.mxu0 %v17224_v15  ;;  %11824 = vmatpush3.msra.mxu1 %v16818_v40  ;;  %v20689_v40 = vand.u32 4294901760, %v20667_v22 }
 0x4cb   :  { %11744 = vmatprep.subr.mxu0 %v17232_v31  ;;  %11825 = vmatprep.subr.mxu1 %v16828_v34  ;;  %v4610_v34 = vld [vmem:[%s19463_s9 + $0x340] sm:$0xff] }
 0x4cc   :  { %11745 = vmatpush3.msra.mxu0 %v17240_v12  ;;  %11826 = vmatpush3.msra.mxu1 %v16839_v43  ;;  %v20690_v43 = vand.u32 4294901760, %v20668_v26  ;;  %v20699_v26 = vand.u32 4294901760, %v20677_v59  ;;  %v20712_v59 = vmov 0.0  }
 0x4cd   :  { %6935 = vmatmul.mubr.f32.vlgmr.msra.gmra.mxu0 %v20683_v52  ;;  %11784 = vmatprep.subr.mxu0 %v20684_v5  ;;  %v20715_v52 = vand.u32 4294901760, %v17206_v14  ;;  %v20716_v5 = vand.u32 4294901760, %v17216_v53  ;;  %v20719_v14 = vand.u32 4294901760, %v17232_v31  ;;  %v20720_v53 = vand.u32 4294901760, %v17240_v12  ;;  %v7840_v31 = vld [vmem:[%s19465_s11 + $0xe8] sm:$0xff] }
 0x4ce   :  { %11827 = vmatprep.subr.mxu1 %v16849_v32  ;;  %11785 = vmatpush3.msra.mxu0 %v20685_v11  ;;  %v17399_v32 = vand.u32 4294901760, %v4613_v6  ;;  %v20722_v12 = vld [vmem:[#allocation11_spill] sm:$0xff] }
 0x4cf   :  { %7209 = vmatprep.mubr.f32.mxu0 %v20682_v1  ;;  %11828 = vmatpush3.msra.mxu1 %v16860_v24  ;;  %v20692_v24 = vand.u32 4294901760, %v20670_v7  ;;  %v20701_v7 = vand.u32 4294901760, %v20679_v41  ;;  %v20706_v41 = vld [vmem:[#allocation115_spill] sm:$0xff] }
 0x4d0   :  { %11786 = vmatprep.subr.mxu0 %v20686_v21  ;;  %11829 = vmatprep.subr.mxu1 %v16871_v20  ;;  %v20693_v20 = vand.u32 4294901760, %v20671_v60  ;;  %v20707_v56 = vand.u32 4294901760, %v20706_v41  ;;  %v20718_v21 = vand.u32 4294901760, %v17224_v15 }
 0x4d1   :  { %11787 = vmatpush3.msra.mxu0 %v20687_v13  ;;  %11830 = vmatpush3.msra.mxu1 %v16887_v23  ;;  %v20691_v23 = vand.u32 4294901760, %v20669_v39 }
 0x4d2   :  { %11788 = vmatprep.subr.mxu0 %v20688_v63  ;;  %11831 = vmatprep.subr.mxu1 %v16898_v46  ;;  %v4607_v46 = vld [vmem:[%s19463_s9 + $0x328] sm:$0xff]  ;;  %v7825_v63 = vld [vmem:[%s19465_s11 + $0x70] sm:$0xff] }
 0x4d3   :  { %11789 = vmatpush3.msra.mxu0 %v20689_v40  ;;  %11832 = vmatpush3.msra.mxu1 %v16911_v51  ;;  %v17410_v51 = vand.u32 4294901760, %v4610_v34  ;;  %v17424_v1 = vand.u32 4294901760, %v4607_v46 }
 0x4d4   :  { %11790 = vmatprep.subr.mxu0 %v20690_v43  ;;  %11833 = vmatprep.subr.mxu1 %v16927_v55  ;;  %v4604_v55 = vld [vmem:[%s19463_s9 + $0x310] sm:$0xff]  ;;  %v7824_v43 = vld [vmem:[%s19465_s11 + $0x68] sm:$0xff] }
 0x4d5   :  { %11791 = vmatpush3.msra.mxu0 %v20691_v23  ;;  %11834 = vmatpush3.msra.mxu1 %v16952_v50  ;;  %v17422_v50 = vsub.f32 %v4613_v6, %v17399_v32  ;;  %v17435_v61 = vand.u32 4294901760, %v4604_v55  ;;  %v17445_v22 = vsub.f32 %v4607_v46, %v17424_v1  ;;  %v7839_v23 = vld [vmem:[%s19465_s11 + $0xe0] sm:$0xff] }
 0x4d6   :  { %11792 = vmatprep.subr.mxu0 %v20692_v24  ;;  %11835 = vmatprep.subr.mxu1 %v16993_v19  ;;  %v20695_v19 = vand.u32 4294901760, %v20673_v47  ;;  %v20704_v47 = vand.u32 4294901760, %v20703_v54  ;;  %v17561_v24 = vand.u32 4294901760, %v7840_v31 }
 0x4d7   :  { %11793 = vmatpush3.msra.mxu0 %v20693_v20  ;;  %11836 = vmatpush3.msra.mxu1 %v17023_v42  ;;  %v17433_v42 = vsub.f32 %v4610_v34, %v17410_v51  ;;  %v17455_v39 = vsub.f32 %v4604_v55, %v17435_v61  ;;  %v19866_v60 = vand.u32 4294901760, %v17445_v22  ;;  %v17548_v34 = vand.u32 4294901760, %v7825_v63  ;;  %v7823_v20 = vld [vmem:[%s19465_s11 + $0x60] sm:$0xff] }
 0x4d8   :  { %11794 = vmatprep.subr.mxu0 %v20694_v8  ;;  %11837 = vmatprep.subr.mxu1 %v17037_v44  ;;  %v20698_v44 = vand.u32 4294901760, %v20676_v37  ;;  %v7838_v8 = vld [vmem:[%s19465_s11 + $0xd8] sm:$0xff] }
 0x4d9   :  { %11795 = vmatpush3.msra.mxu0 %v20695_v19  ;;  %11838 = vmatpush3.msra.mxu1 %v17052_v0  ;;  %v7426_v0 = vand.u32 4294901760, %v17422_v50  ;;  %v17598_v54 = vand.u32 4294901760, %v7838_v8 }
 0x4da   :  { %11796 = vmatprep.subr.mxu0 %v20696_v28  ;;  %11839 = vmatprep.subr.mxu1 %v17066_v45  ;;  %v20700_v45 = vand.u32 4294901760, %v20678_v36  ;;  %v20713_v36 = vand.u32 4294901760, %v17186_v48  ;;  %v17575_v28 = vand.u32 4294901760, %v7824_v43 }
 0x4db   :  { %11797 = vmatpush3.msra.mxu0 %v20697_v38  ;;  %11840 = vmatpush3.msra.mxu1 %v17082_v49  ;;  %v19870_v49 = vand.u32 4294901760, %v17433_v42  ;;  %v17577_v38 = vand.u32 4294901760, %v7839_v23 }
 0x4dc   :  { %11798 = vmatprep.subr.mxu0 %v20698_v44  ;;  %11841 = vmatprep.subr.mxu1 %v17098_v2  ;;  %v20702_v2 = vand.u32 4294901760, %v20680_v58  ;;  %v7822_v44 = vld [vmem:[%s19465_s11 + $0x58] sm:$0xff] }
 0x4dd   :  { %11799 = vmatpush3.msra.mxu0 %v20699_v26  ;;  %11842 = vmatpush3.msra.mxu1 %v17110_v57  ;;  %v7427_v57 = vsub.f32 %v17422_v50, %v7426_v0  ;;  %v7434_v58 = vsub.f32 %v17433_v42, %v19870_v49  ;;  %v7837_v26 = vld [vmem:[%s19465_s11 + $0xd0] sm:$0xff] }
 0x4de   :  { %11800 = vmatprep.subr.mxu0 %v20700_v45  ;;  %11843 = vmatprep.subr.mxu1 %v17126_v29  ;;  %v20705_v29 = vand.u32 4294901760, %v17124_v17  ;;  %v7441_v17 = vsub.f32 %v17445_v22, %v19866_v60  ;;  %v17588_v45 = vsub.f32 %v7825_v63, %v17548_v34  ;;  %v17612_v41 = vand.u32 4294901760, %v7837_v26  ;;  %v7819_v63 = vld [vmem:[%s19465_s11 + $0x40] sm:$0xff] }
 0x4df   :  { %11801 = vmatpush3.msra.mxu0 %v20701_v7  ;;  %11844 = vmatpush3.msra.mxu1 %v17139_v18  ;;  %v19864_v18 = vand.u32 4294901760, %v17455_v39  ;;  %v7435_v37 = vand.u32 4294901760, %v7434_v58  ;;  %v17590_v7 = vand.u32 4294901760, %v7823_v20  ;;  %v17610_v58 = vand.u32 4294901760, %v7822_v44 }
 0x4e0   :  { %11802 = vmatprep.subr.mxu0 %v20702_v2  ;;  %11845 = vmatprep.subr.mxu1 %v17150_v27  ;;  %v20708_v27 = vand.u32 4294901760, %v17148_v30  ;;  %v7442_v10 = vand.u32 4294901760, %v7441_v17  ;;  %20723 = vst [vmem:[#allocation16_spill] sm:$0xff] %v17588_v45  ;;  %v7836_v17 = vld [vmem:[%s19465_s11 + $0xc8] sm:$0xff] }
 0x4e1   :  { %11803 = vmatpush3.msra.mxu0 %v20704_v47  ;;  %11846 = vmatpush3.msra.mxu1 %v17163_v9  ;;  %v7428_v9 = vand.u32 4294901760, %v7427_v57  ;;  %v7448_v30 = vsub.f32 %v17455_v39, %v19864_v18  ;;  %v17596_v57 = vsub.f32 %v7840_v31, %v17561_v24  ;;  %v7821_v47 = vld [vmem:[%s19465_s11 + $0x50] sm:$0xff] }
 0x4e2   :  { %11804 = vmatprep.subr.mxu0 %v20705_v29  ;;  %11847 = vmatprep.subr.mxu1 %v17175_v25  ;;  %v20710_v25 = vand.u32 4294901760, %v17173_v4  ;;  %v20714_v4 = vand.u32 4294901760, %v17196_v62  ;;  %v7841_v62 = vld [vmem:[%s19465_s11 + $0xf0] sm:$0xff] }
 0x4e3   :  { %11805 = vmatpush3.msra.mxu0 %v20707_v56  ;;  %11848 = vmatpush3.msra.mxu1 %v17188_v33  ;;  %v20711_v33 = vld [vmem:[#allocation40_spill] sm:$0xff]  ;;  %v7449_v48 = vand.u32 4294901760, %v7448_v30  ;;  %v17527_v6 = vand.u32 4294901760, %v7841_v62  ;;  %20724 = vst [vmem:[#allocation25_spill] sm:$0xff] %v17596_v57  ;;  %v17638_v30 = vand.u32 4294901760, %v7821_v47 }
 0x4e4   :  { %11806 = vmatprep.subr.mxu0 %v20708_v27  ;;  %11849 = vmatprep.subr.mxu1 %v17198_v35  ;;  %v7842_v35 = vld [vmem:[%s19465_s11 + $0xf8] sm:$0xff]  ;;  %v17623_v27 = vsub.f32 %v7824_v43, %v17575_v28 }
 0x4e5   :  { %11807 = vmatpush3.msra.mxu0 %v20709_v16  ;;  %11850 = vmatpush3.msra.mxu1 %v17208_v3  ;;  %v7826_v3 = vld [vmem:[%s19465_s11 + $0x78] sm:$0xff]  ;;  %v17513_v11 = vand.u32 4294901760, %v7842_v35  ;;  %v17559_v46 = vsub.f32 %v7841_v62, %v17527_v6  ;;  %v20727_v16 = vld [vmem:[#allocation14_spill] sm:$0xff]  ;;  %v17685_v43 = vsub.f32 %v7821_v47, %v17638_v30  ;;  %v7832_v62 = vld [vmem:[%s19465_s11 + $0xa8] sm:$0xff] }
 0x4e6   :  { %11808 = vmatprep.subr.mxu0 %v20710_v25  ;;  %7315 = vmatmul.mubr.f32.vlgmr.msra.gmra.mxu1 %v20711_v33  ;;  %v17520_v13 = vand.u32 4294901760, %v7826_v3  ;;  %20725 = vst [vmem:[#allocation18_spill] sm:$0xff] %v17623_v27  ;;  %v19859_v25 = vand.u32 4294901760, %v17588_v45 }
 0x4e7   :  { %12813 = vmatprep.subr.mxu1 %v20712_v59  ;;  %11809 = vmatpush3.msra.mxu0 %v20713_v36  ;;  %20717 = vst [vmem:[#allocation117_spill] sm:$0xff] %v17513_v11  ;;  %v17536_v15 = vsub.f32 %v7842_v35, %v17513_v11  ;;  %v19860_v2 = vand.u32 4294901760, %v17559_v46  ;;  %v17649_v35 = vsub.f32 %v7838_v8, %v17598_v54  ;;  %20733 = vst [vmem:[#allocation24_spill] sm:$0xff] %v17685_v43  ;;  %v7818_v8 = vld [vmem:[%s19465_s11 + $0x38] sm:$0xff] }
 0x4e8   :  { %12814 = vmatpush3.msra.mxu1 %v7428_v9  ;;  %11810 = vmatprep.subr.mxu0 %v20714_v4  ;;  %v17544_v40 = vsub.f32 %v7826_v3, %v17520_v13  ;;  %v17626_v9 = vsub.f32 %v7839_v23, %v17577_v38  ;;  %v7820_v4 = vld [vmem:[%s19465_s11 + $0x48] sm:$0xff]  ;;  %v17657_v3 = vsub.f32 %v7822_v44, %v17610_v58  ;;  %v17732_v18 = vand.u32 4294901760, %v7818_v8 }
 0x4e9   :  { %12815 = vmatprep.subr.mxu1 %v20712_v59  ;;  %11811 = vmatpush3.msra.mxu0 %v20715_v52  ;;  %20721 = vst [vmem:[#allocation120_spill] sm:$0xff] %v17536_v15  ;;  %v19863_v55 = vand.u32 4294901760, %v17536_v15  ;;  %v17645_v36 = vsub.f32 %v17559_v46, %v19860_v2  ;;  %20730 = vst [vmem:[#allocation33_spill] sm:$0xff] %v17649_v35  ;;  %v17660_v52 = vsub.f32 %v7837_v26, %v17612_v41 }
 0x4ea   :  { %12816 = vmatpush3.msra.mxu1 %v7435_v37  ;;  %11812 = vmatprep.subr.mxu0 %v20716_v5  ;;  %v19862_v19 = vand.u32 4294901760, %v17544_v40  ;;  %20726 = vst [vmem:[#allocation31_spill] sm:$0xff] %v17626_v9  ;;  %v17636_v37 = vsub.f32 %v7823_v20, %v17590_v7  ;;  %20731 = vst [vmem:[#allocation22_spill] sm:$0xff] %v17657_v3  ;;  %v7835_v5 = vld [vmem:[%s19465_s11 + $0xc0] sm:$0xff]  ;;  %v17687_v23 = vand.u32 4294901760, %v7820_v4  ;;  %v7834_v20 = vld [vmem:[%s19465_s11 + $0xb8] sm:$0xff] }
 0x4eb   :  { %12817 = vmatprep.subr.mxu1 %v20712_v59  ;;  %11813 = vmatpush3.msra.mxu0 %v20718_v21  ;;  %v17608_v29 = vsub.f32 %v17536_v15, %v19863_v55  ;;  %20732 = vst [vmem:[#allocation36_spill] sm:$0xff] %v17660_v52  ;;  %v19869_v47 = vand.u32 4294901760, %v17649_v35  ;;  %v17713_v2 = vand.u32 4294901760, %v7819_v63  ;;  %v17730_v55 = vand.u32 4294901760, %v7834_v20 }
 0x4ec   :  { %12818 = vmatpush3.msra.mxu1 %v7442_v10  ;;  %11814 = vmatprep.subr.mxu0 %v20719_v14  ;;  %v17620_v56 = vsub.f32 %v17544_v40, %v19862_v19  ;;  %20728 = vst [vmem:[#allocation20_spill] sm:$0xff] %v17636_v37  ;;  %v19861_v10 = vand.u32 4294901760, %v17596_v57  ;;  %v19865_v14 = vand.u32 4294901760, %v17623_v27  ;;  %v19868_v31 = vand.u32 4294901760, %v17636_v37 }
 0x4ed   :  { %12819 = vmatprep.subr.mxu1 %v20712_v59  ;;  %11815 = vmatpush3.msra.mxu0 %v20720_v53  ;;  %v19867_v53 = vand.u32 4294901760, %v17626_v9  ;;  %v19875_v60 = vand.u32 4294901760, %v17685_v43  ;;  %v17778_v49 = vsub.f32 %v7819_v63, %v17713_v2  ;;  %v7816_v63 = vld [vmem:[%s19465_s11 + $0x28] sm:$0xff] }
 0x4ee   :  { %12820 = vmatpush3.msra.mxu1 %v7449_v48  ;;  %12821 = vmatprep.mubr.msk.f32.mxu1 %vm13225_vm0, %v20712_v59  ;;  %v17662_v48 = vand.u32 4294901760, %v7836_v17  ;;  %v17701_v26 = vsub.f32 %v17596_v57, %v19861_v10  ;;  %v7833_v10 = vld [vmem:[%s19465_s11 + $0xb0] sm:$0xff]  ;;  %v17723_v19 = vsub.f32 %v17623_v27, %v19865_v14  ;;  %v17740_v14 = vsub.f32 %v17636_v37, %v19868_v31  ;;  %v7830_v37 = vld [vmem:[%s19465_s11 + $0x98] sm:$0xff] }
 0x4ef   :  { %7211 = vmatmul.mubr.f32.vlgmr.msra.gmra.mxu0 %v20711_v33  ;;  %12802 = vmatprep.subr.mxu0 %v20712_v59  ;;  %v20729_v33 = vld [vmem:[#allocation13_spill] sm:$0xff]  ;;  %v17758_v21 = vand.u32 4294901760, %v7833_v10  ;;  %20738 = vst [vmem:[#allocation30_spill] sm:$0xff] %v17778_v49 }
 0x4f0   :  { %12822 = vmatmul.mubr.f32.vlgmr.msra.gmra.mxu1 %v20722_v12  ;;  %12835 = vmatprep.subr.mxu1 %v20712_v59  ;;  %v8105_v44 = vand.u32 4294901760, %v17701_v26 }
 0x4f1   :  { %12803 = vmatpush3.msra.mxu0 %v17399_v32  ;;  %12836 = vmatpush3.msra.mxu1 %v17399_v32 }
 0x4f2   :  { %12804 = vmatprep.subr.mxu0 %v20712_v59  ;;  %12837 = vmatprep.subr.mxu1 %v20712_v59 }
 0x4f3   :  { %12805 = vmatpush3.msra.mxu0 %v17410_v51  ;;  %12838 = vmatpush3.msra.mxu1 %v17410_v51 }
 0x4f4   :  { %12806 = vmatprep.subr.mxu0 %v20712_v59  ;;  %12839 = vmatprep.subr.mxu1 %v20712_v59 }
 0x4f5   :  { %12807 = vmatpush3.msra.mxu0 %v17424_v1  ;;  %12840 = vmatpush3.msra.mxu1 %v17424_v1 }
 0x4f6   :  { %12808 = vmatprep.subr.mxu0 %v20712_v59  ;;  %12841 = vmatprep.subr.mxu1 %v20712_v59 }
 0x4f7   :  { %12809 = vmatpush3.msra.mxu0 %v17435_v61  ;;  %12810 = vmatprep.mubr.msk.f32.mxu0 %vm13225_vm0, %v20712_v59 }
 0x4f8   :  { %12842 = vmatpush3.msra.mxu1 %v17435_v61  ;;  %12843 = vmatprep.mubr.msk.f32.mxu1 %vm13225_vm0, %v20712_v59 }
 0x4f9   :  { %12811 = vmatmul.mubr.f32.vlgmr.msra.gmra.mxu0 %v20727_v16  ;;  %12824 = vmatprep.subr.mxu0 %v20712_v59  ;;  %v17704_v16 = vand.u32 4294901760, %v7835_v5 }
 0x4fa   :  { %12844 = vmatmul.mubr.f32.vlgmr.msra.gmra.mxu1 %v20729_v33  ;;  %12857 = vmatprep.subr.mxu1 %v20712_v59  ;;  %v19871_v33 = vand.u32 4294901760, %v17657_v3 }
 0x4fb   :  { %12825 = vmatpush3.msra.mxu0 %v17422_v50  ;;  %12858 = vmatpush3.msra.mxu1 %v17399_v32  ;;  %v17681_v32 = vsub.f32 %v17588_v45, %v19859_v25  ;;  %v17711_v25 = vsub.f32 %v7836_v17, %v17662_v48  ;;  %v17728_v17 = vsub.f32 %v17626_v9, %v19867_v53  ;;  %v20741_v50 = vand.u32 4294901760, %v17608_v29 }
 0x4fc   :  { %12826 = vmatprep.subr.mxu0 %v20712_v59  ;;  %12859 = vmatprep.subr.mxu1 %v20712_v59  ;;  %v17744_v53 = vsub.f32 %v7820_v4, %v17687_v23  ;;  %v17756_v31 = vsub.f32 %v7835_v5, %v17704_v16  ;;  %v7817_v4 = vld [vmem:[%s19465_s11 + $0x30] sm:$0xff]  ;;  %v17769_v26 = vsub.f32 %v17657_v3, %v19871_v33  ;;  %v20743_v3 = vand.u32 4294901760, %v17433_v42 }
 0x4fd   :  { %12827 = vmatpush3.msra.mxu0 %v17433_v42  ;;  %12860 = vmatpush3.msra.mxu1 %v17410_v51  ;;  %v19872_v51 = vand.u32 4294901760, %v17660_v52  ;;  %20734 = vst [vmem:[#allocation9_spill] sm:$0xff] %v17711_v25  ;;  %v8112_v33 = vand.u32 4294901760, %v17728_v17  ;;  %v17807_v17 = vand.u32 4294901760, %v7817_v4  ;;  %v20746_v42 = vand.u32 4294901760, %v17645_v36 }
 0x4fe   :  { %12828 = vmatprep.subr.mxu0 %v20712_v59  ;;  %12861 = vmatprep.subr.mxu1 %v20712_v59  ;;  %20735 = vst [vmem:[#allocation26_spill] sm:$0xff] %v17744_v53  ;;  %20736 = vst [vmem:[#allocation32_spill] sm:$0xff] %v17756_v31  ;;  %v8007_v29 = vand.u32 4294901760, %v17769_v26  ;;  %v20748_v36 = vand.u32 4294901760, %v17744_v53 }
 0x4ff   :  { %12829 = vmatpush3.msra.mxu0 %v17445_v22  ;;  %12862 = vmatpush3.msra.mxu1 %v17424_v1  ;;  %v7986_v1 = vand.u32 4294901760, %v17681_v32  ;;  %v17753_v32 = vsub.f32 %v17649_v35, %v19869_v47  ;;  %v17774_v5 = vsub.f32 %v17660_v52, %v19872_v51  ;;  %v17788_v51 = vsub.f32 %v7834_v20, %v17730_v55  ;;  %v7831_v52 = vld [vmem:[%s19465_s11 + $0xa0] sm:$0xff] }
 0x500   :  { %12830 = vmatprep.subr.mxu0 %v20712_v59  ;;  %12863 = vmatprep.subr.mxu1 %v20712_v59  ;;  %v17791_v47 = vsub.f32 %v7818_v8, %v17732_v18  ;;  %v17804_v20 = vsub.f32 %v17685_v43, %v19875_v60  ;;  %v17818_v60 = vsub.f32 %v7833_v10, %v17758_v21  ;;  %v17820_v43 = vand.u32 4294901760, %v7832_v62  ;;  %v7815_v8 = vld [vmem:[%s19465_s11 + $0x20] sm:$0xff] }
 0x501   :  { %12831 = vmatpush3.msra.mxu0 %v17455_v39  ;;  %12832 = vmatprep.mubr.msk.f32.mxu0 %vm13225_vm0, %v20712_v59  ;;  %20739 = vst [vmem:[#allocation34_spill] sm:$0xff] %v17788_v51  ;;  %v20744_v35 = vand.u32 4294901760, %v17620_v56  ;;  %v8126_v56 = vand.u32 4294901760, %v17774_v5  ;;  %v17847_v26 = vand.u32 4294901760, %v7831_v52  ;;  %v20747_v10 = vand.u32 4294901760, %v17445_v22 }
 0x502   :  { %12864 = vmatpush3.msra.mxu1 %v17435_v61  ;;  %12865 = vmatprep.mubr.msk.f32.mxu1 %vm13225_vm0, %v20712_v59  ;;  %v20737_v61 = vld [vmem:[#allocation12_spill] sm:$0xff]  ;;  %20740 = vst [vmem:[#allocation49_spill] sm:$0xff] %v17791_v47  ;;  %20742 = vst [vmem:[#allocation50_spill] sm:$0xff] %v17818_v60  ;;  %v17858_v5 = vsub.f32 %v17744_v53, %v20748_v36  ;;  %v20749_v22 = vand.u32 4294901760, %v17756_v31  ;;  %v20750_v53 = vand.u32 4294901760, %v17455_v39  ;;  %v20752_v39 = vand.u32 4294901760, %v17788_v51 }
 0x503   :  { %12833 = vmatmul.mubr.f32.vlgmr.msra.gmra.mxu0 %v20737_v61  ;;  %12846 = vmatprep.subr.mxu0 %v20712_v59  ;;  %v7993_v61 = vand.u32 4294901760, %v17723_v19  ;;  %v8000_v19 = vand.u32 4294901760, %v17740_v14  ;;  %v17836_v14 = vand.u32 4294901760, %v7816_v63  ;;  %v7813_v36 = vld [vmem:[%s19465_s11 + $0x10] sm:$0xff] }
 0x504   :  { %12866 = vmatmul.mubr.f32.vlgmr.msra.gmra.mxu1 %v20722_v12  ;;  %12847 = vmatpush3.msra.mxu0 %v7426_v0  ;;  %v8119_v0 = vand.u32 4294901760, %v17753_v32  ;;  %v20745_v32 = vand.u32 4294901760, %v17711_v25 }
 0x505   :  { %12854 = vmatprep.mubr.msk.f32.mxu0 %vm13225_vm0, %v20712_v59  ;;  %12848 = vmatprep.subr.mxu0 %v20712_v59 }
 0x506   :  { %11919 = vmatprep.subr.mxu1 %v20741_v50  ;;  %12849 = vmatpush3.msra.mxu0 %v20743_v3  ;;  %v17833_v50 = vsub.f32 %v17711_v25, %v20745_v32  ;;  %v7814_v32 = vld [vmem:[%s19465_s11 + $0x18] sm:$0xff]  ;;  %v8014_v25 = vand.u32 4294901760, %v17804_v20  ;;  %v17863_v3 = vand.u32 4294901760, %v7815_v8  ;;  %v17890_v20 = vsub.f32 %v7816_v63, %v17836_v14 }
 0x507   :  { %11920 = vmatpush3.msra.mxu1 %v20744_v35  ;;  %12850 = vmatprep.subr.mxu0 %v20712_v59  ;;  %v7829_v35 = vld [vmem:[%s19465_s11 + $0x90] sm:$0xff]  ;;  %v17907_v63 = vsub.f32 %v7831_v52, %v17847_v26  ;;  %v7827_v52 = vld [vmem:[%s19465_s11 + $0x80] sm:$0xff] }
 0x508   :  { %11921 = vmatprep.subr.mxu1 %v20746_v42  ;;  %12851 = vmatpush3.msra.mxu0 %v20747_v10  ;;  %v17861_v42 = vsub.f32 %v7817_v4, %v17807_v17  ;;  %v17876_v10 = vsub.f32 %v7832_v62, %v17820_v43  ;;  %v17878_v4 = vand.u32 4294901760, %v7830_v37  ;;  %v17892_v62 = vand.u32 4294901760, %v7814_v32 }
 0x509   :  { %11922 = vmatpush3.msra.mxu1 %v7986_v1  ;;  %12852 = vmatprep.subr.mxu0 %v20712_v59  ;;  %v17872_v1 = vsub.f32 %v17756_v31, %v20749_v22  ;;  %v20751_v22 = vand.u32 4294901760, %v17778_v49  ;;  %v7828_v31 = vld [vmem:[%s19465_s11 + $0x88] sm:$0xff]  ;;  %v17951_v57 = vand.u32 4294901760, %v7827_v52 }
 0x50a   :  { %11923 = vmatprep.subr.mxu1 %v8105_v44  ;;  %12853 = vmatpush3.msra.mxu0 %v20750_v53  ;;  %v8133_v44 = vand.u32 4294901760, %v17833_v50  ;;  %v8146_v53 = vsub.f32 %v17788_v51, %v20752_v39  ;;  %v17918_v39 = vsub.f32 %v7815_v8, %v17863_v3  ;;  %v7811_v8 = vld [vmem:[%s19465_s11] sm:$0xff]  ;;  %v20760_v27 = vand.u32 4294901760, %v17876_v10 }
 0x50b   :  { %11924 = vmatpush3.msra.mxu1 %v7993_v61  ;;  %v8027_v59 = vsub.f32 %v17778_v49, %v20751_v22  ;;  %12855 = vmatmul.mubr.f32.vlgmr.msra.gmra.mxu0 %v20722_v12  ;;  %v20753_v61 = vand.u32 4294901760, %v17791_v47  ;;  %v17909_v22 = vand.u32 4294901760, %v7829_v35  ;;  %v7812_v49 = vld [vmem:[%s19465_s11 + $0x8] sm:$0xff]  ;;  %v8021_v12 = vand.u32 4294901760, %v17858_v5 }
 0x50c   :  { %11925 = vmatprep.subr.mxu1 %v8112_v33  ;;  %11884 = vmatprep.subr.mxu0 %v17513_v11  ;;  %v17929_v5 = vsub.f32 %v7830_v37, %v17878_v4  ;;  %v17931_v33 = vand.u32 4294901760, %v7828_v31  ;;  %v17944_v37 = vand.u32 4294901760, %v7812_v49 }
 0x50d   :  { %v17904_v50 = vsub.f32 %v17791_v47, %v20753_v61  ;;  %11926 = vmatpush3.msra.mxu1 %v8000_v19  ;;  %v17920_v61 = vand.u32 4294901760, %v7813_v36  ;;  %11885 = vmatpush3.msra.mxu0 %v17520_v13  ;;  %v8140_v19 = vand.u32 4294901760, %v17872_v1  ;;  %v17942_v47 = vsub.f32 %v7814_v32, %v17892_v62 }
 0x50e   :  { %11927 = vmatprep.subr.mxu1 %v8119_v0  ;;  %20754 = vst [vmem:[#allocation38_spill] sm:$0xff] %v17929_v5  ;;  %11886 = vmatprep.subr.mxu0 %v17527_v6  ;;  %v20755_v0 = vand.u32 4294901760, %v17818_v60  ;;  %v8028_v9 = vand.u32 4294901760, %v8027_v59  ;;  %v17961_v59 = vand.u32 4294901760, %v7811_v8  ;;  %v17969_v45 = vsub.f32 %v7828_v31, %v17931_v33 }
 0x50f   :  { %11928 = vmatpush3.msra.mxu1 %v8007_v29  ;;  %20756 = vst [vmem:[#allocation52_spill] sm:$0xff] %v17942_v47  ;;  %11887 = vmatpush3.msra.mxu0 %v17548_v34  ;;  %v17949_v29 = vsub.f32 %v7829_v35, %v17909_v22  ;;  %v8147_v35 = vand.u32 4294901760, %v8146_v53  ;;  %v17978_v1 = vsub.f32 %v7812_v49, %v17944_v37  ;;  %v20764_v31 = vand.u32 4294901760, %v17907_v63 }
 0x510   :  { %v8153_v51 = vsub.f32 %v17818_v60, %v20755_v0  ;;  %11929 = vmatprep.subr.mxu1 %v8126_v56  ;;  %11888 = vmatprep.subr.mxu0 %v17561_v24  ;;  %v20758_v0 = vand.u32 4294901760, %v17861_v42  ;;  %v17959_v56 = vsub.f32 %v7813_v36, %v17920_v61  ;;  %20761 = vst [vmem:[#allocation28_spill] sm:$0xff] %v17969_v45  ;;  %v8035_v36 = vand.u32 4294901760, %v17904_v50 }
 0x511   :  { %20757 = vst [vmem:[#allocation27_spill] sm:$0xff] %v17949_v29  ;;  %11930 = vmatpush3.msra.mxu1 %v8014_v25  ;;  %11889 = vmatpush3.msra.mxu0 %v17575_v28  ;;  %v8160_v25 = vsub.f32 %v17876_v10, %v20760_v27  ;;  %20763 = vst [vmem:[#allocation56_spill] sm:$0xff] %v17978_v1  ;;  %v17986_v50 = vsub.f32 %v7827_v52, %v17951_v57  ;;  %v20766_v49 = vand.u32 4294901760, %v17918_v39 }
 0x512   :  { %v8041_v32 = vsub.f32 %v17861_v42, %v20758_v0  ;;  %20759 = vst [vmem:[#allocation54_spill] sm:$0xff] %v17959_v56  ;;  %11931 = vmatprep.subr.mxu1 %v8133_v44  ;;  %11890 = vmatprep.subr.mxu0 %v17577_v38  ;;  %v20762_v0 = vand.u32 4294901760, %v17890_v20  ;;  %v8154_v27 = vand.u32 4294901760, %v8153_v51  ;;  %v17994_v51 = vsub.f32 %v7811_v8, %v17961_v59 }
 0x513   :  { %11932 = vmatpush3.msra.mxu1 %v8021_v12  ;;  %11891 = vmatpush3.msra.mxu0 %v17590_v7  ;;  %v8167_v12 = vsub.f32 %v17907_v63, %v20764_v31  ;;  %20765 = vst [vmem:[#allocation29_spill] sm:$0xff] %v17986_v50  ;;  %v8161_v31 = vand.u32 4294901760, %v8160_v25  ;;  %v20768_v52 = vand.u32 4294901760, %v17929_v5  ;;  %v20770_v25 = vand.u32 4294901760, %v17949_v29 }
 0x514   :  { %v8048_v44 = vsub.f32 %v17890_v20, %v20762_v0  ;;  %11933 = vmatprep.subr.mxu1 %v8140_v19  ;;  %11892 = vmatprep.subr.mxu0 %v17598_v54  ;;  %v8042_v0 = vand.u32 4294901760, %v8041_v32  ;;  %v8055_v19 = vsub.f32 %v17918_v39, %v20766_v49  ;;  %20767 = vst [vmem:[#allocation57_spill] sm:$0xff] %v17994_v51  ;;  %v20769_v49 = vand.u32 4294901760, %v17942_v47 }
 0x515   :  { %11934 = vmatpush3.msra.mxu1 %v8028_v9  ;;  %11893 = vmatpush3.msra.mxu0 %v17610_v58  ;;  %v8174_v9 = vsub.f32 %v17929_v5, %v20768_v52  ;;  %v8181_v52 = vsub.f32 %v17949_v29, %v20770_v25  ;;  %v19907_v8 = vand.u32 4294901760, %v17994_v51 }
 0x516   :  { %11935 = vmatprep.subr.mxu1 %v8147_v35  ;;  %11894 = vmatprep.subr.mxu0 %v17612_v41  ;;  %v8049_v32 = vand.u32 4294901760, %v8048_v44  ;;  %v8062_v53 = vsub.f32 %v17942_v47, %v20769_v49  ;;  %v8168_v35 = vand.u32 4294901760, %v8167_v12  ;;  %v20771_v44 = vand.u32 4294901760, %v17959_v56 }
 0x517   :  { %11936 = vmatpush3.msra.mxu1 %v8035_v36  ;;  %11895 = vmatpush3.msra.mxu0 %v17638_v30  ;;  %v8056_v36 = vand.u32 4294901760, %v8055_v19  ;;  %v20772_v12 = vand.u32 4294901760, %v17969_v45  ;;  %v20773_v19 = vand.u32 4294901760, %v17978_v1 }
 0x518   :  { %11937 = vmatprep.subr.mxu1 %v8154_v27  ;;  %11896 = vmatprep.subr.mxu0 %v17662_v48  ;;  %v8069_v49 = vsub.f32 %v17959_v56, %v20771_v44  ;;  %v8175_v27 = vand.u32 4294901760, %v8174_v9  ;;  %v8182_v44 = vand.u32 4294901760, %v8181_v52 }
 0x519   :  { %11938 = vmatpush3.msra.mxu1 %v8042_v0  ;;  %11897 = vmatpush3.msra.mxu0 %v17687_v23  ;;  %v8188_v25 = vsub.f32 %v17969_v45, %v20772_v12  ;;  %v8063_v0 = vand.u32 4294901760, %v8062_v53  ;;  %v8076_v60 = vsub.f32 %v17978_v1, %v20773_v19  ;;  %v8083_v53 = vsub.f32 %v17994_v51, %v19907_v8 }
 0x51a   :  { %11939 = vmatprep.subr.mxu1 %v8161_v31  ;;  %11898 = vmatprep.subr.mxu0 %v17704_v16  ;;  %v20774_v31 = vand.u32 4294901760, %v17986_v50  ;;  %v8070_v12 = vand.u32 4294901760, %v8069_v49  ;;  %v4771_v49 = vpop.f32.mrf.mxu0 }
 0x51b   :  { %11940 = vmatpush3.msra.mxu1 %v8049_v32  ;;  %11899 = vmatpush3.msra.mxu0 %v17713_v2  ;;  %v8189_v32 = vand.u32 4294901760, %v8188_v25 }
 0x51c   :  { %11941 = vmatprep.subr.mxu1 %v8168_v35  ;;  %v8195_v9 = vsub.f32 %v17986_v50, %v20774_v31  ;;  %11900 = vmatprep.subr.mxu0 %v17730_v55  ;;  %v8077_v35 = vand.u32 4294901760, %v8076_v60  ;;  %v18042_v60 = vld [vmem:[%s19464_s10] sm:$0x7]  ;;  %v4773_v31 = vpop.f32.mrf.mxu0 }
 0x51d   :  { %11942 = vmatpush3.msra.mxu1 %v8056_v36  ;;  %11901 = vmatpush3.msra.mxu0 %v17732_v18  ;;  %v8084_v36 = vand.u32 4294901760, %v8083_v53  ;;  %20775 = vst [vmem:[#allocation48_spill] sm:$0xff] %v18042_v60 }
 0x51e   :  { %11943 = vmatprep.subr.mxu1 %v8175_v27  ;;  %11902 = vmatprep.subr.mxu0 %v17758_v21  ;;  %v8196_v52 = vand.u32 4294901760, %v8195_v9  ;;  %v20776_v27 = vld [vmem:[#allocation37_spill] sm:$0xff] }
 0x51f   :  { %11944 = vmatpush3.msra.mxu1 %v8063_v0  ;;  %11903 = vmatpush3.msra.mxu0 %v17807_v17  ;;  %v4619_v25 = vrot.slane %v18042_v60, %v20776_v27  ;;  %v20777_v0 = vld [vmem:[#allocation39_spill] sm:$0xff] }
 0x520   :  { %11945 = vmatprep.subr.mxu1 %v8182_v44  ;;  %11904 = vmatprep.subr.mxu0 %v17820_v43  ;;  %v4623_v19 = vrot.slane %v18042_v60, %v20777_v0  ;;  %v5164_v44 = vpop.f32.mrf.mxu1 }
 0x521   :  { %11946 = vmatpush3.msra.mxu1 %v8070_v12  ;;  %11905 = vmatpush3.msra.mxu0 %v17836_v14  ;;  %v4772_v9 = vadd.f32 %v4771_v49, %v4619_v25  ;;  %v5367_v12 = vpop.f32.mrf.mxu0 }
 0x522   :  { %11947 = vmatprep.subr.mxu1 %v8189_v32  ;;  %11906 = vmatprep.subr.mxu0 %v17847_v26  ;;  %v4774_v53 = vadd.f32 %v4773_v31, %v4623_v19  ;;  %v5166_v32 = vpop.f32.mrf.mxu1 }
 0x523   :  { %11948 = vmatpush3.msra.mxu1 %v8077_v35  ;;  %11907 = vmatpush3.msra.mxu0 %v17863_v3  ;;  %v5165_v35 = vadd.f32 %v5164_v44, %v4772_v9 }
 0x524   :  { %11949 = vmatprep.subr.mxu1 %v8196_v52  ;;  %11908 = vmatprep.subr.mxu0 %v17878_v4  ;;  %v5508_v52 = vpop.f32.mrf.mxu1  ;;  %v5167_v8 = vadd.f32 %v5166_v32, %v4774_v53 }
 0x525   :  { %11950 = vmatpush3.msra.mxu1 %v8084_v36  ;;  %11909 = vmatpush3.msra.mxu0 %v17892_v62  ;;  %v5369_v36 = vpop.f32.mrf.mxu0  ;;  %v5368_v27 = vadd.f32 %v5367_v12, %v5165_v35 }
 0x526   :  { %11989 = vmatprep.subr.mxu1 %v17513_v11  ;;  %11910 = vmatprep.subr.mxu0 %v17909_v22  ;;  %v5370_v60 = vadd.f32 %v5369_v36, %v5167_v8  ;;  %v5510_v51 = vpop.f32.mrf.mxu1 }
 0x527   :  { %11911 = vmatpush3.msra.mxu0 %v17920_v61  ;;  %v5509_v50 = vadd.f32 %v5508_v52, %v5368_v27 }
 0x528   :  { %11912 = vmatprep.subr.mxu0 %v17931_v33  ;;  %v5910_v1 = vpop.f32.mrf.mxu1  ;;  %v5511_v49 = vadd.f32 %v5510_v51, %v5370_v60 }
 0x529   :  { %11913 = vmatpush3.msra.mxu0 %v17944_v37 }
 0x52a   :  { %11914 = vmatprep.subr.mxu0 %v17951_v57  ;;  %v5912_v47 = vpop.f32.mrf.mxu1 }
 0x52b   :  { %11915 = vmatpush3.msra.mxu0 %v17961_v59  ;;  %v5773_v0 = vpop.f32.mrf.mxu0 }
 0x52c   :  { %11954 = vmatprep.subr.mxu0 %v17536_v15  ;;  %v5774_v56 = vadd.f32 %v5773_v0, %v5509_v50  ;;  %v6106_v15 = vpop.f32.mrf.mxu1 }
 0x52d   :  { %v5775_v45 = vpop.f32.mrf.mxu0 }
 0x52e   :  { %v5776_v29 = vadd.f32 %v5775_v45, %v5511_v49  ;;  %v5911_v11 = vadd.f32 %v5910_v1, %v5774_v56  ;;  %v6108_v12 = vpop.f32.mrf.mxu1  ;;  %v20778_v56 = vld [vmem:[#allocation17_spill] sm:$0xff] }
 0x52f   :  { %v4503_v49 = vmax.f32 %v20778_v56, 0.0  ;;  %v20792_v56 = vld [vmem:[#allocation20_spill] sm:$0xff] }
 0x530   :  { %v5913_v44 = vadd.f32 %v5912_v47, %v5776_v29 }
 0x535   :  { %v5994_v25 = vpop.f32.mrf.mxu0 }
 0x536   :  { %v5995_v31 = vadd.f32 %v5994_v25, %v5911_v11  ;;  %v6277_v32 = vpop.f32.mrf.mxu1  ;;  %v20779_v25 = vld [vmem:[#allocation19_spill] sm:$0xff] }
 0x537   :  { %v5996_v19 = vpop.f32.mrf.mxu0 }
 0x538   :  { %v5997_v5 = vadd.f32 %v5996_v19, %v5913_v44  ;;  %v6107_v53 = vadd.f32 %v6106_v15, %v5995_v31  ;;  %v6279_v27 = vpop.f32.mrf.mxu1  ;;  %v4504_v19 = vmax.f32 %v20779_v25, 0.0  ;;  %v20797_v25 = vld [vmem:[#allocation9_spill] sm:$0xff] }
 0x53a   :  { %v6109_v52 = vadd.f32 %v6108_v12, %v5997_v5 }
 0x53f   :  { %v6195_v9 = vpop.f32.mrf.mxu0 }
 0x540   :  { %v6196_v35 = vadd.f32 %v6195_v9, %v6107_v53  ;;  %v6453_v51 = vpop.f32.mrf.mxu1 }
 0x541   :  { %v6197_v8 = vpop.f32.mrf.mxu0 }
 0x542   :  { %v6198_v36 = vadd.f32 %v6197_v8, %v6109_v52  ;;  %v6278_v50 = vadd.f32 %v6277_v32, %v6196_v35  ;;  %v6455_v29 = vpop.f32.mrf.mxu1 }
 0x544   :  { %v6280_v0 = vadd.f32 %v6279_v27, %v6198_v36 }
 0x54a   :  { %v6373_v60 = vpop.f32.mrf.mxu0 }
 0x54b   :  { %v6374_v45 = vadd.f32 %v6373_v60, %v6278_v50  ;;  %v20788_v60 = vld [vmem:[#allocation16_spill] sm:$0xff] }
 0x54c   :  { %v6375_v1 = vpop.f32.mrf.mxu0 }
 0x54d   :  { %v6454_v11 = vadd.f32 %v6453_v51, %v6374_v45  ;;  %v6376_v47 = vadd.f32 %v6375_v1, %v6280_v0  ;;  %v20789_v45 = vld [vmem:[#allocation25_spill] sm:$0xff]  ;;  %v20790_v0 = vld [vmem:[#allocation18_spill] sm:$0xff]  ;;  %v20791_v1 = vld [vmem:[#allocation31_spill] sm:$0xff] }
 0x54f   :  { %v7805_v15 = vadd.f32 %v6454_v11, %v4503_v49  ;;  %v6456_v31 = vadd.f32 %v6455_v29, %v6376_v47  ;;  %v20793_v49 = vld [vmem:[#allocation33_spill] sm:$0xff]  ;;  %v20794_v11 = vld [vmem:[#allocation22_spill] sm:$0xff]  ;;  %v20795_v47 = vld [vmem:[#allocation36_spill] sm:$0xff] }
 0x550   :  { %v20796_v29 = vld [vmem:[#allocation24_spill] sm:$0xff] }
 0x551   :  { %v7808_v44 = vmax.f32 %v7805_v15, 0.0  ;;  %v7806_v9 = vadd.f32 %v6456_v31, %v4504_v19  ;;  %v20798_v19 = vld [vmem:[#allocation26_spill] sm:$0xff]  ;;  %v20799_v15 = vld [vmem:[#allocation32_spill] sm:$0xff] }
 0x552   :  { %v20800_v31 = vld [vmem:[#allocation30_spill] sm:$0xff] }
 0x553   :  { %v18060_v5 = vand.u32 4294901760, %v7808_v44  ;;  %v7809_v12 = vmax.f32 %v7806_v9, 0.0  ;;  %v20802_v9 = vld [vmem:[#allocation49_spill] sm:$0xff] }
 0x555   :  { %20780 = vst [vmem:[#allocation59_spill] sm:$0xff] %v18060_v5  ;;  %v18063_v53 = vsub.f32 %v7808_v44, %v18060_v5  ;;  %v18065_v32 = vand.u32 4294901760, %v7809_v12  ;;  %v20801_v44 = vld [vmem:[#allocation34_spill] sm:$0xff] }
 0x557   :  { %20781 = vst [vmem:[#allocation51_spill] sm:$0xff] %v18063_v53  ;;  %20782 = vst [vmem:[#allocation61_spill] sm:$0xff] %v18065_v32  ;;  %v18068_v8 = vsub.f32 %v7809_v12, %v18065_v32  ;;  %8199 = vmatprep.mubr.f32.mxu1 %v18065_v32  ;;  %v18072_v35 = vand.u32 4294901760, %v18063_v53  ;;  %v20803_v12 = vld [vmem:[#allocation50_spill] sm:$0xff] }
 0x558   :  { %8201 = vmatmul.mubr.f32.vlgmr.msra.gmra.mxu1 %v18060_v5 }
 0x559   :  { %20783 = vst [vmem:[#allocation53_spill] sm:$0xff] %v18068_v8  ;;  %20784 = vst [vmem:[#allocation63_spill] sm:$0xff] %v18072_v35  ;;  %11990 = vmatpush3.msra.mxu1 %v17520_v13  ;;  %v18077_v52 = vand.u32 4294901760, %v18068_v8  ;;  %v7967_v36 = vsub.f32 %v18063_v53, %v18072_v35 }
 0x55a   :  { %11991 = vmatprep.subr.mxu1 %v17527_v6 }
 0x55b   :  { %20785 = vst [vmem:[#allocation55_spill] sm:$0xff] %v18077_v52  ;;  %11992 = vmatpush3.msra.mxu1 %v17548_v34  ;;  %8443 = vmatprep.mubr.f32.mxu1 %v18077_v52  ;;  %v7961_v27 = vsub.f32 %v18068_v8, %v18077_v52  ;;  %v18091_v51 = vand.u32 4294901760, %v7967_v36  ;;  %v20804_v36 = vld [vmem:[#allocation38_spill] sm:$0xff] }
 0x55c   :  { %11993 = vmatprep.subr.mxu1 %v17561_v24  ;;  %v20808_v52 = vld [vmem:[#allocation54_spill] sm:$0xff] }
 0x55d   :  { %11994 = vmatpush3.msra.mxu1 %v17575_v28  ;;  %v18088_v50 = vand.u32 4294901760, %v7961_v27  ;;  %20787 = vst [vmem:[#allocation58_spill] sm:$0xff] %v18091_v51  ;;  %v20805_v27 = vld [vmem:[#allocation117_spill] sm:$0xff] }
 0x55e   :  { %11995 = vmatprep.subr.mxu1 %v17577_v38 }
 0x55f   :  { %20786 = vst [vmem:[#allocation65_spill] sm:$0xff] %v18088_v50  ;;  %11996 = vmatpush3.msra.mxu1 %v17590_v7  ;;  %7963 = vmatprep.mubr.f32.mxu0 %v18088_v50  ;;  %v20809_v50 = vld [vmem:[#allocation28_spill] sm:$0xff] }
 0x560   :  { %11997 = vmatprep.subr.mxu1 %v17598_v54  ;;  %7969 = vmatmul.mubr.f32.vlgmr.msra.gmra.mxu0 %v18091_v51  ;;  %v20807_v51 = vld [vmem:[#allocation27_spill] sm:$0xff] }
 0x561   :  { %11955 = vmatpush3.msra.mxu0 %v17544_v40  ;;  %11998 = vmatpush3.msra.mxu1 %v17610_v58 }
 0x562   :  { %11956 = vmatprep.subr.mxu0 %v17559_v46  ;;  %8336 = vmatprep.mubr.f32.mxu0 %v18068_v8  ;;  %v20806_v8 = vld [vmem:[#allocation52_spill] sm:$0xff] }
 0x563   :  { %11999 = vmatprep.subr.mxu1 %v17612_v41  ;;  %11957 = vmatpush3.msra.mxu0 %v20788_v60 }
 0x564   :  { %12000 = vmatpush3.msra.mxu1 %v17638_v30  ;;  %11958 = vmatprep.subr.mxu0 %v20789_v45 }
 0x565   :  { %12001 = vmatprep.subr.mxu1 %v17662_v48  ;;  %11959 = vmatpush3.msra.mxu0 %v20790_v0 }
 0x566   :  { %12002 = vmatpush3.msra.mxu1 %v17687_v23  ;;  %11960 = vmatprep.subr.mxu0 %v20791_v1 }
 0x567   :  { %12003 = vmatprep.subr.mxu1 %v17704_v16  ;;  %11961 = vmatpush3.msra.mxu0 %v20792_v56 }
 0x568   :  { %12004 = vmatpush3.msra.mxu1 %v17713_v2  ;;  %11962 = vmatprep.subr.mxu0 %v20793_v49 }
 0x569   :  { %12005 = vmatprep.subr.mxu1 %v17730_v55  ;;  %11963 = vmatpush3.msra.mxu0 %v20794_v11 }
 0x56a   :  { %12006 = vmatpush3.msra.mxu1 %v17732_v18  ;;  %11964 = vmatprep.subr.mxu0 %v20795_v47 }
 0x56b   :  { %12007 = vmatprep.subr.mxu1 %v17758_v21  ;;  %11965 = vmatpush3.msra.mxu0 %v20796_v29 }
 0x56c   :  { %12008 = vmatpush3.msra.mxu1 %v17807_v17  ;;  %11966 = vmatprep.subr.mxu0 %v20797_v25 }
 0x56d   :  { %12009 = vmatprep.subr.mxu1 %v17820_v43  ;;  %11967 = vmatpush3.msra.mxu0 %v20798_v19 }
 0x56e   :  { %12010 = vmatpush3.msra.mxu1 %v17836_v14  ;;  %11968 = vmatprep.subr.mxu0 %v20799_v15 }
 0x56f   :  { %12011 = vmatprep.subr.mxu1 %v17847_v26  ;;  %11969 = vmatpush3.msra.mxu0 %v20800_v31 }
 0x570   :  { %12012 = vmatpush3.msra.mxu1 %v17863_v3  ;;  %11970 = vmatprep.subr.mxu0 %v20801_v44 }
 0x571   :  { %12013 = vmatprep.subr.mxu1 %v17878_v4  ;;  %11971 = vmatpush3.msra.mxu0 %v20802_v9 }
 0x572   :  { %12014 = vmatpush3.msra.mxu1 %v17892_v62  ;;  %11972 = vmatprep.subr.mxu0 %v20803_v12 }
 0x573   :  { %12015 = vmatprep.subr.mxu1 %v17909_v22  ;;  %11973 = vmatpush3.msra.mxu0 %v17861_v42 }
 0x574   :  { %12016 = vmatpush3.msra.mxu1 %v17920_v61  ;;  %11974 = vmatprep.subr.mxu0 %v17876_v10 }
 0x575   :  { %12017 = vmatprep.subr.mxu1 %v17931_v33  ;;  %11975 = vmatpush3.msra.mxu0 %v17890_v20 }
 0x576   :  { %12018 = vmatpush3.msra.mxu1 %v17944_v37  ;;  %11976 = vmatprep.subr.mxu0 %v17907_v63 }
 0x577   :  { %12019 = vmatprep.subr.mxu1 %v17951_v57  ;;  %11977 = vmatpush3.msra.mxu0 %v17918_v39 }
 0x578   :  { %12020 = vmatpush3.msra.mxu1 %v17961_v59  ;;  %11978 = vmatprep.subr.mxu0 %v20804_v36 }
 0x579   :  { %8447 = vmatmul.mubr.f32.vlgmr.msra.gmra.mxu1 %v18072_v35  ;;  %12059 = vmatprep.subr.mxu1 %v20805_v27  ;;  %v20810_v35 = vld [vmem:[#allocation56_spill] sm:$0xff]  ;;  %v20811_v27 = vld [vmem:[#allocation29_spill] sm:$0xff] }
 0x57a   :  { %11979 = vmatpush3.msra.mxu0 %v20806_v8  ;;  %12060 = vmatpush3.msra.mxu1 %v17520_v13  ;;  %v20812_v13 = vld [vmem:[#allocation57_spill] sm:$0xff] }
 0x57b   :  { %8717 = vmatprep.mubr.f32.mxu1 %v18065_v32  ;;  %11980 = vmatprep.subr.mxu0 %v20807_v51 }
 0x57c   :  { %12061 = vmatprep.subr.mxu1 %v17527_v6  ;;  %11981 = vmatpush3.msra.mxu0 %v20808_v52  ;;  %v20813_v6 = vld [vmem:[#allocation120_spill] sm:$0xff] }
 0x57d   :  { %12062 = vmatpush3.msra.mxu1 %v17548_v34  ;;  %11982 = vmatprep.subr.mxu0 %v20809_v50  ;;  %v20814_v34 = vand.u32 4294901760, %v20813_v6 }
 0x57e   :  { %12063 = vmatprep.subr.mxu1 %v17561_v24  ;;  %11983 = vmatpush3.msra.mxu0 %v20810_v35  ;;  %v20815_v24 = vand.u32 4294901760, %v17544_v40  ;;  %v7850_v40 = vld [vmem:[%s19465_s11 + $0x138] sm:$0xff] }
 0x57f   :  { %12064 = vmatpush3.msra.mxu1 %v17575_v28  ;;  %11984 = vmatprep.subr.mxu0 %v20811_v27  ;;  %v20816_v28 = vand.u32 4294901760, %v17559_v46  ;;  %v20820_v46 = vand.u32 4294901760, %v20791_v1 }
 0x580   :  { %12065 = vmatprep.subr.mxu1 %v17577_v38  ;;  %11985 = vmatpush3.msra.mxu0 %v20812_v13  ;;  %v20817_v38 = vand.u32 4294901760, %v20788_v60  ;;  %v20823_v60 = vand.u32 4294901760, %v20794_v11 }
 0x581   :  { %12066 = vmatpush3.msra.mxu1 %v17590_v7  ;;  %8339 = vmatmul.mubr.f32.vlgmr.msra.gmra.mxu0 %v18063_v53  ;;  %v20818_v7 = vand.u32 4294901760, %v20789_v45  ;;  %v20824_v45 = vand.u32 4294901760, %v20795_v47  ;;  %v7845_v47 = vld [vmem:[%s19465_s11 + $0x110] sm:$0xff]  ;;  %v9267_v53 = vld [vmem:[%s19467_s13 + $0x28] sm:$0xff] }
 0x582   :  { %12024 = vmatprep.subr.mxu0 %v20814_v34  ;;  %12067 = vmatprep.subr.mxu1 %v17598_v54  ;;  %v20819_v54 = vand.u32 4294901760, %v20790_v0  ;;  %v20825_v0 = vand.u32 4294901760, %v20796_v29  ;;  %v18262_v34 = vand.u32 4294901760, %v7845_v47 }
 0x583   :  { %12025 = vmatpush3.msra.mxu0 %v20815_v24  ;;  %8613 = vmatprep.mubr.f32.mxu0 %v18065_v32 }
 0x584   :  { %12068 = vmatpush3.msra.mxu1 %v17610_v58  ;;  %12026 = vmatprep.subr.mxu0 %v20816_v28  ;;  %v7849_v58 = vld [vmem:[%s19465_s11 + $0x130] sm:$0xff]  ;;  %v20834_v28 = vand.u32 4294901760, %v17876_v10  ;;  %v20836_v10 = vand.u32 4294901760, %v17907_v63  ;;  %v20838_v63 = vand.u32 4294901760, %v20804_v36  ;;  %v20841_v36 = vmov 0.0  }
 0x585   :  { %12069 = vmatprep.subr.mxu1 %v17612_v41  ;;  %12027 = vmatpush3.msra.mxu0 %v20817_v38  ;;  %v20821_v41 = vand.u32 4294901760, %v20792_v56  ;;  %v7846_v56 = vld [vmem:[%s19465_s11 + $0x118] sm:$0xff] }
 0x586   :  { %12070 = vmatpush3.msra.mxu1 %v17638_v30  ;;  %12028 = vmatprep.subr.mxu0 %v20818_v7  ;;  %v18193_v30 = vand.u32 4294901760, %v7850_v40  ;;  %v18293_v7 = vsub.f32 %v7845_v47, %v18262_v34  ;;  %v11676_v47 = vpop.f32.mrf.mxu0 }
 0x587   :  { %12071 = vmatprep.subr.mxu1 %v17662_v48  ;;  %12029 = vmatpush3.msra.mxu0 %v20819_v54  ;;  %v20822_v48 = vand.u32 4294901760, %v20793_v49 }
 0x588   :  { %12072 = vmatpush3.msra.mxu1 %v17687_v23  ;;  %12030 = vmatprep.subr.mxu0 %v20820_v46  ;;  %v7848_v23 = vld [vmem:[%s19465_s11 + $0x128] sm:$0xff] }
 0x589   :  { %12073 = vmatprep.subr.mxu1 %v17704_v16  ;;  %12031 = vmatpush3.msra.mxu0 %v20821_v41  ;;  %v18204_v16 = vand.u32 4294901760, %v7849_v58  ;;  %v18218_v1 = vand.u32 4294901760, %v7848_v23 }
 0x58a   :  { %12074 = vmatpush3.msra.mxu1 %v17713_v2  ;;  %12032 = vmatprep.subr.mxu0 %v20822_v48  ;;  %v7847_v2 = vld [vmem:[%s19465_s11 + $0x120] sm:$0xff]  ;;  %v20842_v48 = vand.u32 4294901760, %v20808_v52 }
 0x58b   :  { %12075 = vmatprep.subr.mxu1 %v17730_v55  ;;  %12033 = vmatpush3.msra.mxu0 %v20823_v60  ;;  %v18216_v55 = vsub.f32 %v7850_v40, %v18193_v30  ;;  %v18230_v49 = vsub.f32 %v7849_v58, %v18204_v16  ;;  %v18232_v11 = vand.u32 4294901760, %v7847_v2  ;;  %v19936_v58 = vand.u32 4294901760, %v18293_v7 }
 0x58c   :  { %12076 = vmatpush3.msra.mxu1 %v17732_v18  ;;  %12034 = vmatprep.subr.mxu0 %v20824_v45  ;;  %v20826_v18 = vand.u32 4294901760, %v20797_v25  ;;  %v18245_v25 = vsub.f32 %v7848_v23, %v18218_v1  ;;  %v20843_v45 = vand.u32 4294901760, %v20809_v50  ;;  %v20846_v50 = vand.u32 4294901760, %v20812_v13 }
 0x58d   :  { %12077 = vmatprep.subr.mxu1 %v17758_v21  ;;  %12035 = vmatpush3.msra.mxu0 %v20825_v0  ;;  %v20827_v21 = vand.u32 4294901760, %v20798_v19  ;;  %v8826_v29 = vand.u32 4294901760, %v18216_v55  ;;  %v18247_v19 = vand.u32 4294901760, %v7846_v56  ;;  %v18260_v6 = vsub.f32 %v7847_v2, %v18232_v11 }
 0x58e   :  { %12078 = vmatpush3.msra.mxu1 %v17807_v17  ;;  %12036 = vmatprep.subr.mxu0 %v20826_v18  ;;  %v20828_v17 = vand.u32 4294901760, %v20799_v15  ;;  %v7844_v15 = vld [vmem:[%s19465_s11 + $0x108] sm:$0xff]  ;;  %v8840_v24 = vand.u32 4294901760, %v18245_v25  ;;  %v20844_v2 = vand.u32 4294901760, %v20810_v35  ;;  %v8862_v0 = vsub.f32 %v18293_v7, %v19936_v58 }
 0x58f   :  { %12079 = vmatprep.subr.mxu1 %v17820_v43  ;;  %12037 = vmatpush3.msra.mxu0 %v20827_v21  ;;  %v20829_v43 = vand.u32 4294901760, %v20800_v31  ;;  %v8833_v31 = vand.u32 4294901760, %v18230_v49  ;;  %v8847_v38 = vand.u32 4294901760, %v18260_v6 }
 0x590   :  { %12080 = vmatpush3.msra.mxu1 %v17836_v14  ;;  %12038 = vmatprep.subr.mxu0 %v20828_v17  ;;  %v20830_v14 = vand.u32 4294901760, %v20801_v44  ;;  %v7843_v44 = vld [vmem:[%s19465_s11 + $0x100] sm:$0xff] }
 0x591   :  { %12081 = vmatprep.subr.mxu1 %v17847_v26  ;;  %12039 = vmatpush3.msra.mxu0 %v20829_v43  ;;  %v20831_v26 = vand.u32 4294901760, %v20802_v9  ;;  %v8827_v9 = vsub.f32 %v18216_v55, %v8826_v29  ;;  %v18295_v40 = vand.u32 4294901760, %v7843_v44 }
 0x592   :  { %12082 = vmatpush3.msra.mxu1 %v17863_v3  ;;  %12040 = vmatprep.subr.mxu0 %v20830_v14  ;;  %v20832_v3 = vand.u32 4294901760, %v20803_v12  ;;  %v18280_v12 = vand.u32 4294901760, %v7844_v15 }
 0x593   :  { %12083 = vmatprep.subr.mxu1 %v17878_v4  ;;  %12041 = vmatpush3.msra.mxu0 %v20831_v26  ;;  %v20833_v4 = vand.u32 4294901760, %v17861_v42  ;;  %v20835_v42 = vand.u32 4294901760, %v17890_v20  ;;  %v20837_v20 = vand.u32 4294901760, %v17918_v39  ;;  %v18321_v41 = vsub.f32 %v7843_v44, %v18295_v40 }
 0x594   :  { %12084 = vmatpush3.msra.mxu1 %v17892_v62  ;;  %12042 = vmatprep.subr.mxu0 %v20832_v3  ;;  %v18278_v62 = vsub.f32 %v7846_v56, %v18247_v19  ;;  %v18308_v46 = vsub.f32 %v7844_v15, %v18280_v12  ;;  %v20845_v56 = vand.u32 4294901760, %v20811_v27  ;;  %v8863_v27 = vand.u32 4294901760, %v8862_v0  ;;  %v11677_v15 = vpop.f32.mrf.mxu0 }
 0x595   :  { %12085 = vmatprep.subr.mxu1 %v17909_v22  ;;  %12043 = vmatpush3.msra.mxu0 %v20833_v4  ;;  %v8834_v22 = vsub.f32 %v18230_v49, %v8833_v31  ;;  %v19933_v18 = vand.u32 4294901760, %v18321_v41  ;;  %v20847_v4 = vld [vmem:[#allocation10_spill] sm:$0xff] }
 0x596   :  { %12086 = vmatpush3.msra.mxu1 %v17920_v61  ;;  %12044 = vmatprep.subr.mxu0 %v20834_v28  ;;  %v8841_v61 = vsub.f32 %v18245_v25, %v8840_v24  ;;  %v19938_v54 = vand.u32 4294901760, %v18278_v62  ;;  %v19934_v60 = vand.u32 4294901760, %v18308_v46  ;;  %v11746_v44 = vpop.f32.mrf.mxu0 }
 0x597   :  { %12087 = vmatprep.subr.mxu1 %v17931_v33  ;;  %12045 = vmatpush3.msra.mxu0 %v20835_v42  ;;  %v8828_v33 = vand.u32 4294901760, %v8827_v9  ;;  %v8835_v39 = vand.u32 4294901760, %v8834_v22  ;;  %v8876_v13 = vsub.f32 %v18321_v41, %v19933_v18  ;;  %v20848_v9 = vld [vmem:[#allocation48_spill] sm:$0xff]  ;;  %v11678_v42 = vadd.f32 %v11677_v15, %v11676_v47 }
 0x598   :  { %12088 = vmatpush3.msra.mxu1 %v17944_v37  ;;  %12046 = vmatprep.subr.mxu0 %v20836_v10  ;;  %v8848_v37 = vsub.f32 %v18260_v6, %v8847_v38  ;;  %v8855_v23 = vsub.f32 %v18278_v62, %v19938_v54  ;;  %v8869_v35 = vsub.f32 %v18308_v46, %v19934_v60  ;;  %v11747_v10 = vpop.f32.mrf.mxu0 }
 0x599   :  { %12089 = vmatprep.subr.mxu1 %v17951_v57  ;;  %12047 = vmatpush3.msra.mxu0 %v20837_v20  ;;  %v20839_v57 = vand.u32 4294901760, %v20806_v8  ;;  %v8842_v8 = vand.u32 4294901760, %v8841_v61  ;;  %v8877_v26 = vand.u32 4294901760, %v8876_v13  ;;  %v4627_v28 = vrot.slane %v20848_v9, %v20847_v4 }
 0x59a   :  { %12090 = vmatpush3.msra.mxu1 %v17961_v59  ;;  %12048 = vmatprep.subr.mxu0 %v20838_v63  ;;  %v20840_v59 = vand.u32 4294901760, %v20807_v51  ;;  %v11711_v51 = vpop.f32.mrf.mxu1  ;;  %v8849_v52 = vand.u32 4294901760, %v8848_v37  ;;  %v8856_v21 = vand.u32 4294901760, %v8855_v23  ;;  %v8870_v14 = vand.u32 4294901760, %v8869_v35 }
 0x59b   :  { %8719 = vmatmul.mubr.f32.vlgmr.msra.gmra.mxu1 %v18060_v5  ;;  %12049 = vmatpush3.msra.mxu0 %v20839_v57  ;;  %v6567_v20 = vadd.f32 %v11678_v42, %v4627_v28  ;;  %v11748_v63 = vadd.f32 %v11747_v10, %v11746_v44 }
 0x59c   :  { %12050 = vmatprep.subr.mxu0 %v20840_v59  ;;  %12887 = vmatprep.subr.mxu1 %v20841_v36  ;;  %v11712_v17 = vpop.f32.mrf.mxu1 }
 0x59d   :  { %12051 = vmatpush3.msra.mxu0 %v20842_v48  ;;  %12888 = vmatpush3.msra.mxu1 %v8828_v33  ;;  %v11713_v61 = vadd.f32 %v11712_v17, %v11711_v51 }
 0x59e   :  { %12052 = vmatprep.subr.mxu0 %v20843_v45  ;;  %12889 = vmatprep.subr.mxu1 %v20841_v36  ;;  %v11781_v43 = vpop.f32.mrf.mxu1 }
 0x59f   :  { %12053 = vmatpush3.msra.mxu0 %v20844_v2  ;;  %12890 = vmatpush3.msra.mxu1 %v8835_v39  ;;  %v6799_v37 = vadd.f32 %v11713_v61, %v6567_v20 }
 0x5a0   :  { %12054 = vmatprep.subr.mxu0 %v20845_v56  ;;  %12891 = vmatprep.subr.mxu1 %v20841_v36  ;;  %v11782_v3 = vpop.f32.mrf.mxu1 }
 0x5a1   :  { %12055 = vmatpush3.msra.mxu0 %v20846_v50  ;;  %12892 = vmatpush3.msra.mxu1 %v8842_v8  ;;  %v6937_v8 = vadd.f32 %v11748_v63, %v6799_v37  ;;  %v11783_v23 = vadd.f32 %v11782_v3, %v11781_v43  ;;  %v20849_v3 = vld [vmem:[#allocation21_spill] sm:$0xff] }
 0x5a2   :  { %8615 = vmatmul.mubr.f32.vlgmr.msra.gmra.mxu0 %v18060_v5  ;;  %12893 = vmatprep.subr.mxu1 %v20841_v36  ;;  %v4505_v28 = vmax.f32 %v20849_v3, 0.0  ;;  %v9293_v37 = vld [vmem:[%s19467_s13 + $0xf8] sm:$0xff] }
 0x5a3   :  { %12894 = vmatpush3.msra.mxu1 %v8849_v52  ;;  %12868 = vmatprep.subr.mxu0 %v20841_v36  ;;  %v7045_v51 = vadd.f32 %v11783_v23, %v6937_v8  ;;  %v9292_v8 = vld [vmem:[%s19467_s13 + $0xf0] sm:$0xff] }
 0x5a4   :  { %12895 = vmatprep.subr.mxu1 %v20841_v36  ;;  %12869 = vmatpush3.msra.mxu0 %v18193_v30  ;;  %v9276_v23 = vld [vmem:[%s19467_s13 + $0x70] sm:$0xff] }
 0x5a5   :  { %12896 = vmatpush3.msra.mxu1 %v8856_v21  ;;  %12870 = vmatprep.subr.mxu0 %v20841_v36 }
 0x5a6   :  { %12897 = vmatprep.subr.mxu1 %v20841_v36  ;;  %12871 = vmatpush3.msra.mxu0 %v18204_v16  ;;  %v11851_v22 = vpop.f32.mrf.mxu1 }
 0x5a7   :  { %12898 = vmatpush3.msra.mxu1 %v8863_v27  ;;  %12872 = vmatprep.subr.mxu0 %v20841_v36 }
 0x5a8   :  { %12899 = vmatprep.subr.mxu1 %v20841_v36  ;;  %12873 = vmatpush3.msra.mxu0 %v18218_v1  ;;  %v11852_v33 = vpop.f32.mrf.mxu1 }
 0x5a9   :  { %12900 = vmatpush3.msra.mxu1 %v8870_v14  ;;  %12874 = vmatprep.subr.mxu0 %v20841_v36  ;;  %v11853_v56 = vadd.f32 %v11852_v33, %v11851_v22 }
 0x5aa   :  { %12901 = vmatprep.subr.mxu1 %v20841_v36  ;;  %12875 = vmatpush3.msra.mxu0 %v18232_v11 }
 0x5ab   :  { %12902 = vmatpush3.msra.mxu1 %v8877_v26  ;;  %12876 = vmatprep.subr.mxu0 %v20841_v36 }
 0x5ac   :  { %12903 = vmatprep.mubr.msk.f32.mxu1 %vm13225_vm0, %v20841_v36  ;;  %12925 = vmatprep.subr.mxu1 %v20841_v36 }
 0x5ad   :  { %12877 = vmatpush3.msra.mxu0 %v18247_v19  ;;  %12884 = vmatprep.mubr.msk.f32.mxu0 %vm13225_vm0, %v20841_v36 }
 0x5ae   :  { %12878 = vmatprep.subr.mxu0 %v20841_v36 }
 0x5af   :  { %12879 = vmatpush3.msra.mxu0 %v18262_v34  ;;  %v11816_v57 = vpop.f32.mrf.mxu0 }
 0x5b0   :  { %12880 = vmatprep.subr.mxu0 %v20841_v36  ;;  %v7486_v39 = vpop.f32.mrf.mxu1 }
 0x5b1   :  { %12881 = vmatpush3.msra.mxu0 %v18280_v12  ;;  %v11817_v59 = vpop.f32.mrf.mxu0 }
 0x5b2   :  { %12882 = vmatprep.subr.mxu0 %v20841_v36  ;;  %v12823_v48 = vpop.f32.mrf.mxu1  ;;  %v11818_v45 = vadd.f32 %v11817_v59, %v11816_v57  ;;  %v9277_v59 = vld [vmem:[%s19467_s13 + $0x78] sm:$0xff] }
 0x5b3   :  { %12883 = vmatpush3.msra.mxu0 %v18295_v40  ;;  %v18421_v48 = vand.u32 4294901760, %v9293_v37 }
 0x5b4   :  { %12906 = vmatprep.subr.mxu0 %v20841_v36  ;;  %v7213_v2 = vadd.f32 %v11818_v45, %v7045_v51  ;;  %v18433_v45 = vand.u32 4294901760, %v9277_v59  ;;  %v9291_v51 = vld [vmem:[%s19467_s13 + $0xe8] sm:$0xff] }
 0x5b6   :  { %v7317_v35 = vadd.f32 %v11853_v56, %v7213_v2  ;;  %v18440_v2 = vand.u32 4294901760, %v9292_v8  ;;  %v18450_v56 = vand.u32 4294901760, %v9276_v23 }
 0x5b9   :  { %v7395_v52 = vpop.f32.mrf.mxu0 }
 0x5ba   :  { %v7643_v0 = vpop.f32.mrf.mxu1  ;;  %v7396_v17 = vadd.f32 %v7395_v52, %v7317_v35  ;;  %v9275_v52 = vld [vmem:[%s19467_s13 + $0x68] sm:$0xff]  ;;  %v9274_v35 = vld [vmem:[%s19467_s13 + $0x60] sm:$0xff] }
 0x5bb   :  { %v12812_v50 = vpop.f32.mrf.mxu0 }
 0x5bc   :  { %v12845_v21 = vpop.f32.mrf.mxu1  ;;  %v7487_v13 = vadd.f32 %v7486_v39, %v7396_v17  ;;  %v9290_v50 = vld [vmem:[%s19467_s13 + $0xe0] sm:$0xff]  ;;  %v18465_v17 = vsub.f32 %v9277_v59, %v18433_v45 }
 0x5bd   :  { %v18457_v21 = vand.u32 4294901760, %v9291_v51 }
 0x5be   :  { %v19935_v3 = vand.u32 4294901760, %v18465_v17 }
 0x5c3   :  { %v7566_v47 = vpop.f32.mrf.mxu0 }
 0x5c4   :  { %v7801_v27 = vpop.f32.mrf.mxu1  ;;  %v7567_v26 = vadd.f32 %v7566_v47, %v7487_v13  ;;  %v18467_v47 = vand.u32 4294901760, %v9275_v52  ;;  %v18475_v13 = vsub.f32 %v9292_v8, %v18440_v2 }
 0x5c5   :  { %v12834_v14 = vpop.f32.mrf.mxu0 }
 0x5c6   :  { %v12867_v15 = vpop.f32.mrf.mxu1  ;;  %v7644_v44 = vadd.f32 %v7643_v0, %v7567_v26  ;;  %v18448_v0 = vsub.f32 %v9293_v37, %v18421_v48  ;;  %20854 = vst [vmem:[#allocation71_spill] sm:$0xff] %v18475_v13  ;;  %v18477_v14 = vand.u32 4294901760, %v9290_v50  ;;  %v18486_v26 = vsub.f32 %v9276_v23, %v18450_v56 }
 0x5c8   :  { %v19932_v15 = vand.u32 4294901760, %v18448_v0  ;;  %20855 = vst [vmem:[#allocation73_spill] sm:$0xff] %v18486_v26  ;;  %v19940_v59 = vand.u32 4294901760, %v18486_v26 }
 0x5ca   :  { %v18531_v37 = vsub.f32 %v18448_v0, %v19932_v15  ;;  %v18587_v58 = vsub.f32 %v18486_v26, %v19940_v59 }
 0x5cb   :  { %v7726_v4 = vpop.f32.mrf.mxu0 }
 0x5cc   :  { %v7727_v9 = vadd.f32 %v7726_v4, %v7644_v44  ;;  %v18488_v44 = vand.u32 4294901760, %v9274_v35  ;;  %v9288_v4 = vld [vmem:[%s19467_s13 + $0xd0] sm:$0xff] }
 0x5cd   :  { %v12856_v43 = vpop.f32.mrf.mxu0 }
 0x5ce   :  { %v7802_v42 = vadd.f32 %v7801_v27, %v7727_v9  ;;  %v9289_v27 = vld [vmem:[%s19467_s13 + $0xd8] sm:$0xff]  ;;  %v18496_v9 = vsub.f32 %v9291_v51, %v18457_v21  ;;  %v9272_v43 = vld [vmem:[%s19467_s13 + $0x50] sm:$0xff]  ;;  %v18535_v8 = vsub.f32 %v9274_v35, %v18488_v44  ;;  %v9286_v51 = vld [vmem:[%s19467_s13 + $0xc0] sm:$0xff]  ;;  %v18556_v35 = vsub.f32 %v18465_v17, %v19935_v3 }
 0x5cf   :  { %v18537_v23 = vand.u32 4294901760, %v9272_v43  ;;  %v18578_v3 = vand.u32 4294901760, %v9286_v51 }
 0x5d0   :  { %v7807_v10 = vadd.f32 %v7802_v42, %v4505_v28  ;;  %20856 = vst [vmem:[#allocation66_spill] sm:$0xff] %v18496_v9  ;;  %v18507_v28 = vsub.f32 %v9275_v52, %v18467_v47  ;;  %20859 = vst [vmem:[#allocation79_spill] sm:$0xff] %v18535_v8 }
 0x5d1   :  { %v18591_v54 = vsub.f32 %v9272_v43, %v18537_v23  ;;  %v9285_v43 = vld [vmem:[%s19467_s13 + $0xb8] sm:$0xff] }
 0x5d2   :  { %v7810_v22 = vmax.f32 %v7807_v10, 0.0  ;;  %20857 = vst [vmem:[#allocation75_spill] sm:$0xff] %v18507_v28  ;;  %v9287_v10 = vld [vmem:[%s19467_s13 + $0xc8] sm:$0xff]  ;;  %v19942_v15 = vand.u32 4294901760, %v18507_v28 }
 0x5d3   :  { %20863 = vst [vmem:[#allocation86_spill] sm:$0xff] %v18591_v54 }
 0x5d4   :  { %v7860_v20 = vsel %vm7858_vm6, %v7810_v22, 0  ;;  %v19937_v22 = vand.u32 4294901760, %v18475_v13 }
 0x5d5   :  { %v18383_v33 = vand.u32 4294901760, %v7860_v20 }
 0x5d7   :  { %20850 = vst [vmem:[#allocation67_spill] sm:$0xff] %v18383_v33  ;;  %v18386_v61 = vsub.f32 %v7860_v20, %v18383_v33  ;;  %12904 = vmatmul.mubr.f32.vlgmr.msra.gmra.mxu1 %v18383_v33  ;;  %v18520_v20 = vand.u32 4294901760, %v9288_v4 }
 0x5d8   :  { %12926 = vmatpush3.msra.mxu1 %v18193_v30  ;;  %12941 = vmatprep.mubr.msk.f32.mxu1 %vm13225_vm0, %v20841_v36 }
 0x5d9   :  { %20851 = vst [vmem:[#allocation60_spill] sm:$0xff] %v18386_v61  ;;  %12927 = vmatprep.subr.mxu1 %v20841_v36  ;;  %v18394_v63 = vand.u32 4294901760, %v18386_v61 }
 0x5da   :  { %12928 = vmatpush3.msra.mxu1 %v18204_v16 }
 0x5db   :  { %20852 = vst [vmem:[#allocation69_spill] sm:$0xff] %v18394_v63  ;;  %12929 = vmatprep.subr.mxu1 %v20841_v36  ;;  %v8800_v57 = vsub.f32 %v18386_v61, %v18394_v63 }
 0x5dc   :  { %12930 = vmatpush3.msra.mxu1 %v18218_v1 }
 0x5dd   :  { %12931 = vmatprep.subr.mxu1 %v20841_v36  ;;  %v18402_v39 = vand.u32 4294901760, %v8800_v57  ;;  %v9271_v57 = vld [vmem:[%s19467_s13 + $0x48] sm:$0xff] }
 0x5de   :  { %12932 = vmatpush3.msra.mxu1 %v18232_v11  ;;  %v18562_v60 = vand.u32 4294901760, %v9271_v57 }
 0x5df   :  { %20853 = vst [vmem:[#allocation62_spill] sm:$0xff] %v18402_v39  ;;  %12933 = vmatprep.subr.mxu1 %v20841_v36  ;;  %12885 = vmatmul.mubr.f32.vlgmr.msra.gmra.mxu0 %v18402_v39 }
 0x5e0   :  { %12907 = vmatpush3.msra.mxu0 %v18216_v55  ;;  %12934 = vmatpush3.msra.mxu1 %v18247_v19  ;;  %v18572_v55 = vsub.f32 %v18475_v13, %v19937_v22  ;;  %v19943_v22 = vand.u32 4294901760, %v18535_v8  ;;  %v18620_v59 = vsub.f32 %v9271_v57, %v18562_v60  ;;  %v9269_v57 = vld [vmem:[%s19467_s13 + $0x38] sm:$0xff] }
 0x5e1   :  { %12908 = vmatprep.subr.mxu0 %v20841_v36  ;;  %12935 = vmatprep.subr.mxu1 %v20841_v36 }
 0x5e2   :  { %12909 = vmatpush3.msra.mxu0 %v18230_v49  ;;  %12936 = vmatpush3.msra.mxu1 %v18262_v34  ;;  %20865 = vst [vmem:[#allocation89_spill] sm:$0xff] %v18620_v59 }
 0x5e3   :  { %12910 = vmatprep.subr.mxu0 %v20841_v36  ;;  %12937 = vmatprep.subr.mxu1 %v20841_v36 }
 0x5e4   :  { %12911 = vmatpush3.msra.mxu0 %v18245_v25  ;;  %12938 = vmatpush3.msra.mxu1 %v18280_v12 }
 0x5e5   :  { %12912 = vmatprep.subr.mxu0 %v20841_v36  ;;  %12939 = vmatprep.subr.mxu1 %v20841_v36 }
 0x5e6   :  { %12913 = vmatpush3.msra.mxu0 %v18260_v6  ;;  %12940 = vmatpush3.msra.mxu1 %v18295_v40 }
 0x5e7   :  { %12914 = vmatprep.subr.mxu0 %v20841_v36  ;;  %12942 = vmatmul.mubr.f32.vlgmr.msra.gmra.mxu1 %v18394_v63 }
 0x5e8   :  { %12963 = vmatprep.subr.mxu1 %v20841_v36  ;;  %12915 = vmatpush3.msra.mxu0 %v18278_v62 }
 0x5e9   :  { %12964 = vmatpush3.msra.mxu1 %v18193_v30  ;;  %12916 = vmatprep.subr.mxu0 %v20841_v36  ;;  %v9273_v30 = vld [vmem:[%s19467_s13 + $0x58] sm:$0xff] }
 0x5ea   :  { %12965 = vmatprep.subr.mxu1 %v20841_v36  ;;  %12917 = vmatpush3.msra.mxu0 %v18293_v7  ;;  %v18509_v42 = vand.u32 4294901760, %v9273_v30 }
 0x5eb   :  { %12966 = vmatpush3.msra.mxu1 %v18204_v16  ;;  %12918 = vmatprep.subr.mxu0 %v20841_v36  ;;  %v18498_v16 = vand.u32 4294901760, %v9289_v27 }
 0x5ec   :  { %12967 = vmatprep.subr.mxu1 %v20841_v36  ;;  %12919 = vmatpush3.msra.mxu0 %v18308_v46  ;;  %v18560_v18 = vsub.f32 %v9273_v30, %v18509_v42  ;;  %v18576_v30 = vsub.f32 %v9288_v4, %v18520_v20 }
 0x5ed   :  { %12968 = vmatpush3.msra.mxu1 %v18218_v1  ;;  %12920 = vmatprep.subr.mxu0 %v20841_v36  ;;  %v18518_v1 = vsub.f32 %v9290_v50, %v18477_v14  ;;  %v18546_v52 = vsub.f32 %v9289_v27, %v18498_v16  ;;  %v18548_v50 = vand.u32 4294901760, %v9287_v10  ;;  %v9270_v27 = vld [vmem:[%s19467_s13 + $0x40] sm:$0xff] }
 0x5ee   :  { %12969 = vmatprep.subr.mxu1 %v20841_v36  ;;  %12921 = vmatpush3.msra.mxu0 %v18321_v41  ;;  %20861 = vst [vmem:[#allocation82_spill] sm:$0xff] %v18560_v18  ;;  %20862 = vst [vmem:[#allocation84_spill] sm:$0xff] %v18576_v30 }
 0x5ef   :  { %20858 = vst [vmem:[#allocation68_spill] sm:$0xff] %v18518_v1  ;;  %12922 = vmatprep.mubr.msk.f32.mxu0 %vm13225_vm0, %v20841_v36  ;;  %12970 = vmatpush3.msra.mxu1 %v18232_v11  ;;  %v19939_v11 = vand.u32 4294901760, %v18496_v9  ;;  %20860 = vst [vmem:[#allocation81_spill] sm:$0xff] %v18546_v52  ;;  %v18602_v4 = vsub.f32 %v9287_v10, %v18548_v50  ;;  %v19947_v10 = vand.u32 4294901760, %v18560_v18 }
 0x5f0   :  { %12923 = vmatmul.mubr.f32.vlgmr.msra.gmra.mxu0 %v18386_v61  ;;  %12944 = vmatprep.subr.mxu0 %v20841_v36  ;;  %v20869_v61 = vand.u32 4294901760, %v18278_v62 }
 0x5f1   :  { %12971 = vmatprep.subr.mxu1 %v20841_v36  ;;  %12945 = vmatpush3.msra.mxu0 %v8826_v29  ;;  %v19941_v29 = vand.u32 4294901760, %v18518_v1  ;;  %v18598_v49 = vsub.f32 %v18496_v9, %v19939_v11  ;;  %20864 = vst [vmem:[#allocation88_spill] sm:$0xff] %v18602_v4  ;;  %v18616_v11 = vsub.f32 %v18507_v28, %v19942_v15  ;;  %v9284_v15 = vld [vmem:[%s19467_s13 + $0xb0] sm:$0xff] }
 0x5f2   :  { %12972 = vmatpush3.msra.mxu1 %v18247_v19  ;;  %12946 = vmatprep.subr.mxu0 %v20841_v36  ;;  %v9538_v19 = vand.u32 4294901760, %v18531_v37  ;;  %v18604_v37 = vand.u32 4294901760, %v9270_v27 }
 0x5f3   :  { %12973 = vmatprep.subr.mxu1 %v20841_v36  ;;  %12947 = vmatpush3.msra.mxu0 %v8833_v31  ;;  %v9545_v31 = vand.u32 4294901760, %v18572_v55  ;;  %v18628_v25 = vsub.f32 %v18518_v1, %v19941_v29  ;;  %v18644_v55 = vsub.f32 %v18535_v8, %v19943_v22  ;;  %v9552_v6 = vand.u32 4294901760, %v18598_v49  ;;  %v20885_v8 = vld [vmem:[#allocation65_spill] sm:$0xff] }
 0x5f4   :  { %12974 = vmatpush3.msra.mxu1 %v18262_v34  ;;  %12948 = vmatprep.subr.mxu0 %v20841_v36  ;;  %v9426_v34 = vand.u32 4294901760, %v18556_v35  ;;  %v18632_v35 = vsub.f32 %v9286_v51, %v18578_v3  ;;  %v18647_v51 = vand.u32 4294901760, %v9285_v43  ;;  %v18663_v29 = vsub.f32 %v9270_v27, %v18604_v37  ;;  %v9283_v27 = vld [vmem:[%s19467_s13 + $0xa8] sm:$0xff] }
 0x5f5   :  { %12975 = vmatprep.subr.mxu1 %v20841_v36  ;;  %12949 = vmatpush3.msra.mxu0 %v8840_v24  ;;  %v9268_v24 = vld [vmem:[%s19467_s13 + $0x30] sm:$0xff]  ;;  %v18674_v49 = vsub.f32 %v18560_v18, %v19947_v10  ;;  %v18677_v22 = vand.u32 4294901760, %v9269_v57  ;;  %v9559_v63 = vand.u32 4294901760, %v18628_v25  ;;  %v9447_v62 = vand.u32 4294901760, %v18644_v55  ;;  %v9282_v10 = vld [vmem:[%s19467_s13 + $0xa0] sm:$0xff] }
 0x5f6   :  { %12976 = vmatpush3.msra.mxu1 %v18280_v12  ;;  %12950 = vmatprep.subr.mxu0 %v20841_v36  ;;  %20866 = vst [vmem:[#allocation91_spill] sm:$0xff] %v18632_v35  ;;  %v9433_v12 = vand.u32 4294901760, %v18587_v58  ;;  %20868 = vst [vmem:[#allocation93_spill] sm:$0xff] %v18663_v29  ;;  %v18704_v25 = vsub.f32 %v9285_v43, %v18647_v51  ;;  %v20873_v55 = vand.u32 4294901760, %v18602_v4  ;;  %v18719_v43 = vand.u32 4294901760, %v9283_v27 }
 0x5f7   :  { %12977 = vmatprep.subr.mxu1 %v20841_v36  ;;  %12951 = vmatpush3.msra.mxu0 %v8847_v38  ;;  %v20867_v38 = vand.u32 4294901760, %v18546_v52 }
 0x5f8   :  { %12978 = vmatpush3.msra.mxu1 %v18295_v40  ;;  %12979 = vmatprep.mubr.msk.f32.mxu1 %vm13225_vm0, %v20841_v36  ;;  %v9440_v40 = vand.u32 4294901760, %v18616_v11  ;;  %v20870_v11 = vand.u32 4294901760, %v18576_v30  ;;  %20872 = vst [vmem:[#allocation95_spill] sm:$0xff] %v18704_v25 }
 0x5f9   :  { %v18659_v58 = vsub.f32 %v18546_v52, %v20867_v38  ;;  %12952 = vmatprep.subr.mxu0 %v20841_v36  ;;  %12980 = vmatmul.mubr.f32.vlgmr.msra.gmra.mxu1 %v18383_v33  ;;  %v18691_v38 = vand.u32 4294901760, %v9284_v15  ;;  %v20882_v52 = vand.u32 4294901760, %v18321_v41 }
 0x5fa   :  { %12183 = vmatprep.subr.mxu1 %v9538_v19  ;;  %12953 = vmatpush3.msra.mxu0 %v20869_v61  ;;  %v18688_v39 = vsub.f32 %v18576_v30, %v20870_v11  ;;  %v20871_v61 = vand.u32 4294901760, %v18591_v54  ;;  %v18706_v11 = vand.u32 4294901760, %v9268_v24  ;;  %v20874_v30 = vand.u32 4294901760, %v18293_v7 }
 0x5fb   :  { %12184 = vmatpush3.msra.mxu1 %v9426_v34  ;;  %9646 = vmatprep.mubr.f32.mxu1 %v18065_v32  ;;  %v9566_v34 = vand.u32 4294901760, %v18659_v58  ;;  %v18716_v32 = vsub.f32 %v18602_v4, %v20873_v55  ;;  %v20875_v58 = vand.u32 4294901760, %v18620_v59  ;;  %v18733_v55 = vsub.f32 %v9269_v57, %v18677_v22  ;;  %v9281_v4 = vld [vmem:[%s19467_s13 + $0x98] sm:$0xff] }
 0x5fc   :  { %v18701_v19 = vsub.f32 %v18591_v54, %v20871_v61  ;;  %12954 = vmatprep.subr.mxu0 %v20841_v36  ;;  %12185 = vmatprep.subr.mxu1 %v9545_v31  ;;  %v9266_v54 = vld [vmem:[%s19467_s13 + $0x20] sm:$0xff]  ;;  %v9454_v31 = vand.u32 4294901760, %v18674_v49  ;;  %v18735_v61 = vand.u32 4294901760, %v9267_v53  ;;  %v9573_v7 = vand.u32 4294901760, %v18688_v39 }
 0x5fd   :  { %12955 = vmatpush3.msra.mxu0 %v20874_v30  ;;  %12186 = vmatpush3.msra.mxu1 %v9433_v12  ;;  %v18730_v18 = vsub.f32 %v18620_v59, %v20875_v58  ;;  %20876 = vst [vmem:[#allocation97_spill] sm:$0xff] %v18733_v55  ;;  %v20877_v30 = vand.u32 4294901760, %v18632_v35  ;;  %v18748_v49 = vsub.f32 %v9284_v15, %v18691_v38  ;;  %v18750_v57 = vand.u32 4294901760, %v9282_v10  ;;  %v9265_v58 = vld [vmem:[%s19467_s13 + $0x18] sm:$0xff]  ;;  %v9280_v15 = vld [vmem:[%s19467_s13 + $0x90] sm:$0xff] }
 0x5fe   :  { %12956 = vmatprep.subr.mxu0 %v20841_v36  ;;  %12187 = vmatprep.subr.mxu1 %v9552_v6  ;;  %v20879_v59 = vand.u32 4294901760, %v18308_v46  ;;  %v9461_v39 = vand.u32 4294901760, %v18701_v19  ;;  %v9580_v46 = vand.u32 4294901760, %v18716_v32  ;;  %v18775_v19 = vsub.f32 %v9283_v27, %v18719_v43  ;;  %v9264_v6 = vld [vmem:[%s19467_s13 + $0x10] sm:$0xff] }
 0x5ff   :  { %v18745_v12 = vsub.f32 %v18632_v35, %v20877_v30  ;;  %20878 = vst [vmem:[#allocation99_spill] sm:$0xff] %v18748_v49  ;;  %12188 = vmatpush3.msra.mxu1 %v9440_v40  ;;  %v18760_v30 = vsub.f32 %v9268_v24, %v18706_v11  ;;  %v18762_v35 = vand.u32 4294901760, %v9266_v54  ;;  %v18777_v24 = vand.u32 4294901760, %v9281_v4  ;;  %12960 = vmatprep.mubr.msk.f32.mxu0 %vm13225_vm0, %v20841_v36 }
 0x600   :  { %12957 = vmatpush3.msra.mxu0 %v20879_v59  ;;  %12189 = vmatprep.subr.mxu1 %v9559_v63  ;;  %v20881_v59 = vand.u32 4294901760, %v18663_v29  ;;  %v9468_v32 = vand.u32 4294901760, %v18730_v18  ;;  %v18791_v27 = vand.u32 4294901760, %v9265_v58  ;;  %v18800_v18 = vsub.f32 %v9282_v10, %v18750_v57 }
 0x601   :  { %20880 = vst [vmem:[#allocation94_spill] sm:$0xff] %v18760_v30  ;;  %12958 = vmatprep.subr.mxu0 %v20841_v36  ;;  %12190 = vmatpush3.msra.mxu1 %v9447_v62  ;;  %v9587_v41 = vand.u32 4294901760, %v18745_v12  ;;  %v18802_v63 = vand.u32 4294901760, %v9280_v15  ;;  %v20884_v62 = vand.u32 4294901760, %v18704_v25  ;;  %v18815_v10 = vand.u32 4294901760, %v9264_v6  ;;  %v9278_v36 = vld [vmem:[%s19467_s13 + $0x80] sm:$0xff] }
 0x602   :  { %v18772_v40 = vsub.f32 %v18663_v29, %v20881_v59  ;;  %12959 = vmatpush3.msra.mxu0 %v20882_v52  ;;  %v18789_v59 = vsub.f32 %v9267_v53, %v18735_v61  ;;  %v9279_v29 = vld [vmem:[%s19467_s13 + $0x88] sm:$0xff]  ;;  %12191 = vmatprep.subr.mxu1 %v9566_v34  ;;  %v18813_v52 = vsub.f32 %v9266_v54, %v18762_v35  ;;  %v9262_v54 = vld [vmem:[%s19467_s13] sm:$0xff]  ;;  %v20887_v28 = vand.u32 4294901760, %v18748_v49 }
 0x603   :  { %12961 = vmatmul.mubr.f32.vlgmr.msra.gmra.mxu0 %v18383_v33  ;;  %v9263_v53 = vld [vmem:[%s19467_s13 + $0x8] sm:$0xff]  ;;  %12148 = vmatprep.subr.mxu0 %v18421_v48  ;;  %v9593_v33 = vsub.f32 %v18704_v25, %v20884_v62  ;;  %v18825_v62 = vsub.f32 %v9281_v4, %v18777_v24  ;;  %v18827_v12 = vand.u32 4294901760, %v9279_v29  ;;  %v20886_v25 = vand.u32 4294901760, %v18733_v55 }
 0x604   :  { %20883 = vst [vmem:[#allocation96_spill] sm:$0xff] %v18789_v59  ;;  %12149 = vmatpush3.msra.mxu0 %v18433_v45  ;;  %9410 = vmatprep.mubr.f32.mxu0 %v20885_v8  ;;  %v9475_v34 = vand.u32 4294901760, %v18772_v40  ;;  %v18838_v1 = vsub.f32 %v9265_v58, %v18791_v27  ;;  %v18840_v4 = vand.u32 4294901760, %v9263_v53  ;;  %v18848_v26 = vsub.f32 %v9280_v15, %v18802_v63 }
 0x605   :  { %12192 = vmatpush3.msra.mxu1 %v9454_v31  ;;  %12150 = vmatprep.subr.mxu0 %v18440_v2  ;;  %v9481_v8 = vsub.f32 %v18733_v55, %v20886_v25  ;;  %v9600_v31 = vsub.f32 %v18748_v49, %v20887_v28  ;;  %v18850_v25 = vand.u32 4294901760, %v9278_v36  ;;  %v20888_v58 = vand.u32 4294901760, %v18760_v30 }
 0x606   :  { %12193 = vmatprep.subr.mxu1 %v9573_v7  ;;  %12151 = vmatpush3.msra.mxu0 %v18450_v56  ;;  %v18858_v55 = vsub.f32 %v9264_v6, %v18815_v10  ;;  %v18860_v28 = vand.u32 4294901760, %v9262_v54  ;;  %v9594_v15 = vand.u32 4294901760, %v9593_v33  ;;  %v20889_v9 = vand.u32 4294901760, %v18775_v19 }
 0x607   :  { %12194 = vmatpush3.msra.mxu1 %v9461_v39  ;;  %12152 = vmatprep.subr.mxu0 %v18457_v21  ;;  %v9488_v7 = vsub.f32 %v18760_v30, %v20888_v58  ;;  %v18868_v13 = vsub.f32 %v9279_v29, %v18827_v12  ;;  %v9482_v6 = vand.u32 4294901760, %v9481_v8  ;;  %v20890_v58 = vand.u32 4294901760, %v18789_v59 }
 0x608   :  { %12195 = vmatprep.subr.mxu1 %v9580_v46  ;;  %12153 = vmatpush3.msra.mxu0 %v18467_v47  ;;  %v9607_v39 = vsub.f32 %v18775_v19, %v20889_v9  ;;  %v18876_v33 = vsub.f32 %v9263_v53, %v18840_v4  ;;  %v9601_v9 = vand.u32 4294901760, %v9600_v31  ;;  %v20891_v29 = vand.u32 4294901760, %v18800_v18 }
 0x609   :  { %12196 = vmatpush3.msra.mxu1 %v9468_v32  ;;  %12154 = vmatprep.subr.mxu0 %v18477_v14  ;;  %v9495_v46 = vsub.f32 %v18789_v59, %v20890_v58  ;;  %v18884_v8 = vsub.f32 %v9278_v36, %v18850_v25  ;;  %v9489_v58 = vand.u32 4294901760, %v9488_v7  ;;  %v20892_v53 = vand.u32 4294901760, %v18813_v52 }
 0x60a   :  { %12197 = vmatprep.subr.mxu1 %v9587_v41  ;;  %12155 = vmatpush3.msra.mxu0 %v18488_v44  ;;  %v9614_v32 = vsub.f32 %v18800_v18, %v20891_v29  ;;  %v18892_v31 = vsub.f32 %v9262_v54, %v18860_v28  ;;  %v9608_v29 = vand.u32 4294901760, %v9607_v39  ;;  %v20893_v36 = vand.u32 4294901760, %v18825_v62 }
 0x60b   :  { %12198 = vmatpush3.msra.mxu1 %v9475_v34  ;;  %12156 = vmatprep.subr.mxu0 %v18498_v16  ;;  %v9502_v41 = vsub.f32 %v18813_v52, %v20892_v53  ;;  %v9496_v7 = vand.u32 4294901760, %v9495_v46  ;;  %v20894_v53 = vand.u32 4294901760, %v18838_v1  ;;  %v20895_v39 = vand.u32 4294901760, %v18848_v26 }
 0x60c   :  { %12199 = vmatprep.subr.mxu1 %v9594_v15  ;;  %12157 = vmatpush3.msra.mxu0 %v18509_v42  ;;  %v9621_v34 = vsub.f32 %v18825_v62, %v20893_v36  ;;  %v9615_v15 = vand.u32 4294901760, %v9614_v32  ;;  %v20896_v46 = vand.u32 4294901760, %v18858_v55  ;;  %v19988_v54 = vand.u32 4294901760, %v18892_v31 }
 0x60d   :  { %12200 = vmatpush3.msra.mxu1 %v9482_v6  ;;  %12158 = vmatprep.subr.mxu0 %v18520_v20  ;;  %v9509_v40 = vsub.f32 %v18838_v1, %v20894_v53  ;;  %v9628_v36 = vsub.f32 %v18848_v26, %v20895_v39  ;;  %v9503_v6 = vand.u32 4294901760, %v9502_v41  ;;  %v20897_v32 = vand.u32 4294901760, %v18868_v13 }
 0x60e   :  { %12201 = vmatprep.subr.mxu1 %v9601_v9  ;;  %12159 = vmatpush3.msra.mxu0 %v18537_v23  ;;  %v9516_v53 = vsub.f32 %v18858_v55, %v20896_v46  ;;  %v9622_v9 = vand.u32 4294901760, %v9621_v34  ;;  %v20898_v41 = vand.u32 4294901760, %v18876_v33 }
 0x60f   :  { %12202 = vmatpush3.msra.mxu1 %v9489_v58  ;;  %12160 = vmatprep.subr.mxu0 %v18548_v50  ;;  %v9635_v39 = vsub.f32 %v18868_v13, %v20897_v32  ;;  %v9510_v58 = vand.u32 4294901760, %v9509_v40  ;;  %v9629_v46 = vand.u32 4294901760, %v9628_v36  ;;  %v9530_v40 = vsub.f32 %v18892_v31, %v19988_v54  ;;  %v20918_v54 = vld [vmem:[#allocation97_spill] sm:$0xff] }
 0x610   :  { %12203 = vmatprep.subr.mxu1 %v9608_v29  ;;  %12161 = vmatpush3.msra.mxu0 %v18562_v60  ;;  %v9523_v49 = vsub.f32 %v18876_v33, %v20898_v41  ;;  %v20899_v29 = vand.u32 4294901760, %v18884_v8  ;;  %v9517_v32 = vand.u32 4294901760, %v9516_v53  ;;  %v20901_v53 = vld [vmem:[#allocation58_spill] sm:$0xff] }
 0x611   :  { %12204 = vmatpush3.msra.mxu1 %v9496_v7  ;;  %12162 = vmatprep.subr.mxu0 %v18578_v3  ;;  %v9636_v7 = vand.u32 4294901760, %v9635_v39  ;;  %v20903_v39 = vld [vmem:[#allocation71_spill] sm:$0xff]  ;;  %v20905_v41 = vld [vmem:[#allocation66_spill] sm:$0xff] }
 0x612   :  { %12205 = vmatprep.subr.mxu1 %v9615_v15  ;;  %12163 = vmatpush3.msra.mxu0 %v18604_v37  ;;  %v9642_v34 = vsub.f32 %v18884_v8, %v20899_v29  ;;  %v9524_v15 = vand.u32 4294901760, %v9523_v49  ;;  %v20900_v49 = vld [vmem:[#allocation55_spill] sm:$0xff]  ;;  %v20907_v29 = vld [vmem:[#allocation68_spill] sm:$0xff] }
 0x613   :  { %12206 = vmatpush3.msra.mxu1 %v9503_v6  ;;  %12164 = vmatprep.subr.mxu0 %v18647_v51  ;;  %v9531_v6 = vand.u32 4294901760, %v9530_v40  ;;  %v20910_v40 = vld [vmem:[#allocation82_spill] sm:$0xff] }
 0x614   :  { %12207 = vmatprep.subr.mxu1 %v9622_v9  ;;  %12165 = vmatpush3.msra.mxu0 %v18677_v22  ;;  %v9643_v36 = vand.u32 4294901760, %v9642_v34  ;;  %v20902_v9 = vld [vmem:[#allocation53_spill] sm:$0xff]  ;;  %v20908_v34 = vld [vmem:[#allocation79_spill] sm:$0xff] }
 0x615   :  { %12208 = vmatpush3.msra.mxu1 %v9510_v58  ;;  %12166 = vmatprep.subr.mxu0 %v18691_v38  ;;  %v20904_v58 = vld [vmem:[#allocation73_spill] sm:$0xff] }
 0x616   :  { %12209 = vmatprep.subr.mxu1 %v9629_v46  ;;  %12167 = vmatpush3.msra.mxu0 %v18706_v11  ;;  %v20906_v46 = vld [vmem:[#allocation75_spill] sm:$0xff] }
 0x617   :  { %12210 = vmatpush3.msra.mxu1 %v9517_v32  ;;  %12168 = vmatprep.subr.mxu0 %v18719_v43  ;;  %v20909_v32 = vld [vmem:[#allocation81_spill] sm:$0xff] }
 0x618   :  { %12211 = vmatprep.subr.mxu1 %v9636_v7  ;;  %12169 = vmatpush3.msra.mxu0 %v18735_v61  ;;  %v20911_v7 = vld [vmem:[#allocation84_spill] sm:$0xff] }
 0x619   :  { %12212 = vmatpush3.msra.mxu1 %v9524_v15  ;;  %12170 = vmatprep.subr.mxu0 %v18750_v57  ;;  %v20912_v15 = vld [vmem:[#allocation86_spill] sm:$0xff] }
 0x61a   :  { %12213 = vmatprep.subr.mxu1 %v9643_v36  ;;  %12171 = vmatpush3.msra.mxu0 %v18762_v35  ;;  %v20913_v36 = vld [vmem:[#allocation88_spill] sm:$0xff] }
 0x61b   :  { %12214 = vmatpush3.msra.mxu1 %v9531_v6  ;;  %12172 = vmatprep.subr.mxu0 %v18777_v24  ;;  %v20914_v6 = vld [vmem:[#allocation89_spill] sm:$0xff] }
 0x61c   :  { %9648 = vmatmul.mubr.f32.vlgmr.msra.gmra.mxu1 %v18060_v5  ;;  %12253 = vmatprep.subr.mxu1 %v18421_v48  ;;  %v20919_v5 = vld [vmem:[#allocation99_spill] sm:$0xff] }
 0x61d   :  { %12173 = vmatpush3.msra.mxu0 %v18791_v27  ;;  %12254 = vmatpush3.msra.mxu1 %v18433_v45 }
 0x61e   :  { %9890 = vmatprep.mubr.f32.mxu1 %v20900_v49  ;;  %12174 = vmatprep.subr.mxu0 %v18802_v63  ;;  %v20915_v49 = vld [vmem:[#allocation91_spill] sm:$0xff] }
 0x61f   :  { %12255 = vmatprep.subr.mxu1 %v18440_v2  ;;  %12175 = vmatpush3.msra.mxu0 %v18815_v10 }
 0x620   :  { %12256 = vmatpush3.msra.mxu1 %v18450_v56  ;;  %12176 = vmatprep.subr.mxu0 %v18827_v12 }
 0x621   :  { %12257 = vmatprep.subr.mxu1 %v18457_v21  ;;  %12177 = vmatpush3.msra.mxu0 %v18840_v4 }
 0x622   :  { %12258 = vmatpush3.msra.mxu1 %v18467_v47  ;;  %12178 = vmatprep.subr.mxu0 %v18850_v25 }
 0x623   :  { %12259 = vmatprep.subr.mxu1 %v18477_v14  ;;  %12179 = vmatpush3.msra.mxu0 %v18860_v28 }
 0x624   :  { %12260 = vmatpush3.msra.mxu1 %v18488_v44  ;;  %9416 = vmatmul.mubr.f32.vlgmr.msra.gmra.mxu0 %v20901_v53  ;;  %v20916_v53 = vld [vmem:[#allocation93_spill] sm:$0xff] }
 0x625   :  { %12218 = vmatprep.subr.mxu0 %v18448_v0  ;;  %12261 = vmatprep.subr.mxu1 %v18498_v16 }
 0x626   :  { %12219 = vmatpush3.msra.mxu0 %v18465_v17  ;;  %9783 = vmatprep.mubr.f32.mxu0 %v20902_v9  ;;  %v20917_v9 = vld [vmem:[#allocation95_spill] sm:$0xff] }
 0x627   :  { %12262 = vmatpush3.msra.mxu1 %v18509_v42  ;;  %12220 = vmatprep.subr.mxu0 %v20903_v39 }
 0x628   :  { %12263 = vmatprep.subr.mxu1 %v18520_v20  ;;  %12221 = vmatpush3.msra.mxu0 %v20904_v58 }
 0x629   :  { %12264 = vmatpush3.msra.mxu1 %v18537_v23  ;;  %12222 = vmatprep.subr.mxu0 %v20905_v41 }
 0x62a   :  { %12265 = vmatprep.subr.mxu1 %v18548_v50  ;;  %12223 = vmatpush3.msra.mxu0 %v20906_v46 }
 0x62b   :  { %12266 = vmatpush3.msra.mxu1 %v18562_v60  ;;  %12224 = vmatprep.subr.mxu0 %v20907_v29 }
 0x62c   :  { %12267 = vmatprep.subr.mxu1 %v18578_v3  ;;  %12225 = vmatpush3.msra.mxu0 %v20908_v34 }
 0x62d   :  { %12268 = vmatpush3.msra.mxu1 %v18604_v37  ;;  %12226 = vmatprep.subr.mxu0 %v20909_v32 }
 0x62e   :  { %12269 = vmatprep.subr.mxu1 %v18647_v51  ;;  %12227 = vmatpush3.msra.mxu0 %v20910_v40 }
 0x62f   :  { %12270 = vmatpush3.msra.mxu1 %v18677_v22  ;;  %12228 = vmatprep.subr.mxu0 %v20911_v7 }
 0x630   :  { %12271 = vmatprep.subr.mxu1 %v18691_v38  ;;  %12229 = vmatpush3.msra.mxu0 %v20912_v15 }
 0x631   :  { %12272 = vmatpush3.msra.mxu1 %v18706_v11  ;;  %12230 = vmatprep.subr.mxu0 %v20913_v36 }
 0x632   :  { %12273 = vmatprep.subr.mxu1 %v18719_v43  ;;  %12231 = vmatpush3.msra.mxu0 %v20914_v6 }
 0x633   :  { %12274 = vmatpush3.msra.mxu1 %v18735_v61  ;;  %12232 = vmatprep.subr.mxu0 %v20915_v49 }
 0x634   :  { %12275 = vmatprep.subr.mxu1 %v18750_v57  ;;  %12233 = vmatpush3.msra.mxu0 %v20916_v53 }
 0x635   :  { %12276 = vmatpush3.msra.mxu1 %v18762_v35  ;;  %12234 = vmatprep.subr.mxu0 %v20917_v9 }
 0x636   :  { %12277 = vmatprep.subr.mxu1 %v18777_v24  ;;  %12235 = vmatpush3.msra.mxu0 %v20918_v54 }
 0x637   :  { %12278 = vmatpush3.msra.mxu1 %v18791_v27  ;;  %12236 = vmatprep.subr.mxu0 %v20919_v5 }
 0x638   :  { %12279 = vmatprep.subr.mxu1 %v18802_v63  ;;  %12237 = vmatpush3.msra.mxu0 %v18760_v30  ;;  %v20920_v30 = vld [vmem:[#allocation63_spill] sm:$0xff] }
 0x639   :  { %12280 = vmatpush3.msra.mxu1 %v18815_v10  ;;  %12238 = vmatprep.subr.mxu0 %v18775_v19 }
 0x63a   :  { %12281 = vmatprep.subr.mxu1 %v18827_v12  ;;  %12239 = vmatpush3.msra.mxu0 %v18789_v59  ;;  %v20921_v59 = vld [vmem:[#allocation61_spill] sm:$0xff] }
 0x63b   :  { %12282 = vmatpush3.msra.mxu1 %v18840_v4  ;;  %12240 = vmatprep.subr.mxu0 %v18800_v18 }
 0x63c   :  { %12283 = vmatprep.subr.mxu1 %v18850_v25  ;;  %12241 = vmatpush3.msra.mxu0 %v18813_v52 }
 0x63d   :  { %12284 = vmatpush3.msra.mxu1 %v18860_v28  ;;  %12242 = vmatprep.subr.mxu0 %v18825_v62 }
 0x63e   :  { %9894 = vmatmul.mubr.f32.vlgmr.msra.gmra.mxu1 %v20920_v30  ;;  %12323 = vmatprep.subr.mxu1 %v18421_v48  ;;  %v20922_v48 = vld [vmem:[#allocation51_spill] sm:$0xff]  ;;  %v20933_v30 = vand.u32 4294901760, %v20911_v7 }
 0x63f   :  { %12243 = vmatpush3.msra.mxu0 %v18838_v1  ;;  %12324 = vmatpush3.msra.mxu1 %v18433_v45  ;;  %v20923_v45 = vand.u32 4294901760, %v18448_v0  ;;  %v9301_v0 = vld [vmem:[%s19467_s13 + $0x138] sm:$0xff] }
 0x640   :  { %10164 = vmatprep.mubr.f32.mxu1 %v20921_v59  ;;  %12244 = vmatprep.subr.mxu0 %v18848_v26 }
 0x641   :  { %12325 = vmatprep.subr.mxu1 %v18440_v2  ;;  %12245 = vmatpush3.msra.mxu0 %v18858_v55  ;;  %v20924_v2 = vand.u32 4294901760, %v18465_v17  ;;  %v20927_v17 = vand.u32 4294901760, %v20905_v41  ;;  %v9297_v41 = vld [vmem:[%s19467_s13 + $0x118] sm:$0xff] }
 0x642   :  { %12326 = vmatpush3.msra.mxu1 %v18450_v56  ;;  %12246 = vmatprep.subr.mxu0 %v18868_v13  ;;  %v20925_v56 = vand.u32 4294901760, %v20903_v39  ;;  %v20935_v39 = vand.u32 4294901760, %v20913_v36 }
 0x643   :  { %12327 = vmatprep.subr.mxu1 %v18457_v21  ;;  %12247 = vmatpush3.msra.mxu0 %v18876_v33  ;;  %v20926_v21 = vand.u32 4294901760, %v20904_v58 }
 0x644   :  { %12328 = vmatpush3.msra.mxu1 %v18467_v47  ;;  %12248 = vmatprep.subr.mxu0 %v18884_v8  ;;  %v20928_v47 = vand.u32 4294901760, %v20906_v46 }
 0x645   :  { %12329 = vmatprep.subr.mxu1 %v18477_v14  ;;  %12249 = vmatpush3.msra.mxu0 %v18892_v31  ;;  %v9300_v14 = vld [vmem:[%s19467_s13 + $0x130] sm:$0xff] }
 0x646   :  { %12330 = vmatpush3.msra.mxu1 %v18488_v44  ;;  %9786 = vmatmul.mubr.f32.vlgmr.msra.gmra.mxu0 %v20922_v48  ;;  %v20929_v44 = vand.u32 4294901760, %v20907_v29 }
 0x647   :  { %12288 = vmatprep.subr.mxu0 %v20923_v45  ;;  %12331 = vmatprep.subr.mxu1 %v18498_v16  ;;  %v19051_v16 = vand.u32 4294901760, %v9301_v0 }
 0x648   :  { %12289 = vmatpush3.msra.mxu0 %v20924_v2  ;;  %10060 = vmatprep.mubr.f32.mxu0 %v20921_v59 }
 0x649   :  { %12332 = vmatpush3.msra.mxu1 %v18509_v42  ;;  %12290 = vmatprep.subr.mxu0 %v20925_v56  ;;  %v20930_v42 = vand.u32 4294901760, %v20908_v34  ;;  %v9296_v34 = vld [vmem:[%s19467_s13 + $0x110] sm:$0xff] }
 0x64a   :  { %12333 = vmatprep.subr.mxu1 %v18520_v20  ;;  %12291 = vmatpush3.msra.mxu0 %v20926_v21  ;;  %v9299_v20 = vld [vmem:[%s19467_s13 + $0x128] sm:$0xff]  ;;  %v19123_v36 = vand.u32 4294901760, %v9296_v34 }
 0x64b   :  { %12334 = vmatpush3.msra.mxu1 %v18537_v23  ;;  %12292 = vmatprep.subr.mxu0 %v20927_v17  ;;  %v20931_v23 = vand.u32 4294901760, %v20909_v32  ;;  %v19076_v59 = vand.u32 4294901760, %v9299_v20  ;;  %v19108_v32 = vand.u32 4294901760, %v9297_v41 }
 0x64c   :  { %12335 = vmatprep.subr.mxu1 %v18548_v50  ;;  %12293 = vmatpush3.msra.mxu0 %v20928_v47  ;;  %v20932_v50 = vand.u32 4294901760, %v20910_v40  ;;  %v19154_v56 = vsub.f32 %v9296_v34, %v19123_v36  ;;  %v20959_v34 = vld [vmem:[#allocation67_spill] sm:$0xff] }
 0x64d   :  { %12336 = vmatpush3.msra.mxu1 %v18562_v60  ;;  %12294 = vmatprep.subr.mxu0 %v20929_v44  ;;  %v19062_v60 = vand.u32 4294901760, %v9300_v14  ;;  %v19100_v29 = vsub.f32 %v9299_v20, %v19076_v59  ;;  %v20950_v44 = vld [vmem:[#allocation59_spill] sm:$0xff]  ;;  %v20952_v20 = vand.u32 4294901760, %v18838_v1  ;;  %v20955_v1 = vand.u32 4294901760, %v18868_v13 }
 0x64e   :  { %12337 = vmatprep.subr.mxu1 %v18578_v3  ;;  %12295 = vmatpush3.msra.mxu0 %v20930_v42  ;;  %v9298_v3 = vld [vmem:[%s19467_s13 + $0x120] sm:$0xff] }
 0x64f   :  { %12338 = vmatpush3.msra.mxu1 %v18604_v37  ;;  %12296 = vmatprep.subr.mxu0 %v20931_v23  ;;  %v19074_v37 = vsub.f32 %v9301_v0, %v19051_v16  ;;  %v19087_v58 = vand.u32 4294901760, %v9298_v3 }
 0x650   :  { %12339 = vmatprep.subr.mxu1 %v18647_v51  ;;  %12297 = vmatpush3.msra.mxu0 %v20932_v50  ;;  %v20934_v51 = vand.u32 4294901760, %v20912_v15  ;;  %v9295_v15 = vld [vmem:[%s19467_s13 + $0x108] sm:$0xff] }
 0x651   :  { %12340 = vmatpush3.msra.mxu1 %v18677_v22  ;;  %12298 = vmatprep.subr.mxu0 %v20933_v30  ;;  %v19085_v22 = vsub.f32 %v9300_v14, %v19062_v60  ;;  %v10273_v46 = vand.u32 4294901760, %v19074_v37  ;;  %v19115_v7 = vsub.f32 %v9298_v3, %v19087_v58  ;;  %v20954_v3 = vand.u32 4294901760, %v18858_v55 }
 0x652   :  { %12341 = vmatprep.subr.mxu1 %v18691_v38  ;;  %12299 = vmatpush3.msra.mxu0 %v20934_v51  ;;  %v20936_v38 = vand.u32 4294901760, %v20914_v6  ;;  %v20957_v55 = vand.u32 4294901760, %v18884_v8 }
 0x653   :  { %12342 = vmatpush3.msra.mxu1 %v18706_v11  ;;  %12300 = vmatprep.subr.mxu0 %v20935_v39  ;;  %v20937_v11 = vand.u32 4294901760, %v20915_v49  ;;  %v10280_v40 = vand.u32 4294901760, %v19085_v22  ;;  %v10274_v6 = vsub.f32 %v19074_v37, %v10273_v46  ;;  %v10287_v49 = vand.u32 4294901760, %v19100_v29 }
 0x654   :  { %12343 = vmatprep.subr.mxu1 %v18719_v43  ;;  %12301 = vmatpush3.msra.mxu0 %v20936_v38  ;;  %v20938_v43 = vand.u32 4294901760, %v20916_v53  ;;  %v10294_v45 = vand.u32 4294901760, %v19115_v7  ;;  %v20956_v39 = vand.u32 4294901760, %v18876_v33  ;;  %v20958_v38 = vand.u32 4294901760, %v18892_v31 }
 0x655   :  { %12344 = vmatpush3.msra.mxu1 %v18735_v61  ;;  %12302 = vmatprep.subr.mxu0 %v20937_v11  ;;  %v20939_v61 = vand.u32 4294901760, %v20917_v9  ;;  %v20944_v9 = vand.u32 4294901760, %v18775_v19  ;;  %v10281_v48 = vsub.f32 %v19085_v22, %v10280_v40  ;;  %v20947_v19 = vand.u32 4294901760, %v18800_v18 }
 0x656   :  { %12345 = vmatprep.subr.mxu1 %v18750_v57  ;;  %12303 = vmatpush3.msra.mxu0 %v20938_v43  ;;  %v20940_v57 = vand.u32 4294901760, %v20918_v54  ;;  %v20942_v54 = vld [vmem:[#allocation94_spill] sm:$0xff]  ;;  %v10288_v0 = vsub.f32 %v19100_v29, %v10287_v49  ;;  %v20949_v18 = vand.u32 4294901760, %v18825_v62  ;;  %v10295_v14 = vsub.f32 %v19115_v7, %v10294_v45 }
 0x657   :  { %12346 = vmatpush3.msra.mxu1 %v18762_v35  ;;  %12304 = vmatprep.subr.mxu0 %v20939_v61  ;;  %v20941_v35 = vand.u32 4294901760, %v20919_v5  ;;  %v20943_v53 = vand.u32 4294901760, %v20942_v54  ;;  %v19141_v5 = vand.u32 4294901760, %v9295_v15  ;;  %v20960_v43 = vld [vmem:[#allocation62_spill] sm:$0xff]  ;;  %v20961_v61 = vld [vmem:[#allocation69_spill] sm:$0xff] }
 0x658   :  { %12347 = vmatprep.subr.mxu1 %v18777_v24  ;;  %12305 = vmatpush3.msra.mxu0 %v20940_v57  ;;  %v9294_v24 = vld [vmem:[%s19467_s13 + $0x100] sm:$0xff]  ;;  %v10289_v62 = vand.u32 4294901760, %v10288_v0  ;;  %v10296_v30 = vand.u32 4294901760, %v10295_v14 }
 0x659   :  { %12348 = vmatpush3.msra.mxu1 %v18791_v27  ;;  %12306 = vmatprep.subr.mxu0 %v20941_v35  ;;  %v19139_v27 = vsub.f32 %v9297_v41, %v19108_v32  ;;  %v19156_v21 = vand.u32 4294901760, %v9294_v24  ;;  %v19169_v47 = vsub.f32 %v9295_v15, %v19141_v5  ;;  %v19271_v15 = vpop.f32.mrf.mxu1  ;;  %v11916_v35 = vpop.f32.mrf.mxu0  ;;  %v11263_v54 = vld [vmem:[%s19466_s12] ss:$0 sm:$0xff]  ;;  %s13226_s12 = smov 96  }
 0x65a   :  { %12349 = vmatprep.subr.mxu1 %v18802_v63  ;;  %12307 = vmatpush3.msra.mxu0 %v20943_v53  ;;  %v20945_v63 = vld [vmem:[#allocation96_spill] sm:$0xff] }
 0x65b   :  { %12350 = vmatpush3.msra.mxu1 %v18815_v10  ;;  %12308 = vmatprep.subr.mxu0 %v20944_v9  ;;  %v20946_v2 = vand.u32 4294901760, %v20945_v63  ;;  %v10275_v10 = vand.u32 4294901760, %v10274_v6  ;;  %v10301_v17 = vand.u32 4294901760, %v19139_v27  ;;  %v19181_v42 = vsub.f32 %v9294_v24, %v19156_v21  ;;  %v11952_v57 = vpop.f32.mrf.mxu1 }
 0x65c   :  { %12351 = vmatprep.subr.mxu1 %v18827_v12  ;;  %v20948_v12 = vand.u32 4294901760, %v18813_v52  ;;  %v10308_v52 = vand.u32 4294901760, %v19154_v56  ;;  %v10315_v50 = vand.u32 4294901760, %v19169_v47 }
 0x65d   :  { %12309 = vmatpush3.msra.mxu0 %v20946_v2  ;;  %12352 = vmatpush3.msra.mxu1 %v18840_v4  ;;  %v10282_v4 = vand.u32 4294901760, %v10281_v48  ;;  %v10302_v23 = vsub.f32 %v19139_v27, %v10301_v17  ;;  %v10322_v51 = vand.u32 4294901760, %v19181_v42 }
 0x65e   :  { %12310 = vmatprep.subr.mxu0 %v20947_v19  ;;  %12353 = vmatprep.subr.mxu1 %v18850_v25  ;;  %v20951_v25 = vmov 0.0   ;;  %v10316_v13 = vsub.f32 %v19169_v47, %v10315_v50 }
 0x65f   :  { %12311 = vmatpush3.msra.mxu0 %v20948_v12  ;;  %12354 = vmatpush3.msra.mxu1 %v18860_v28  ;;  %v20953_v28 = vand.u32 4294901760, %v18848_v26  ;;  %v10309_v26 = vsub.f32 %v19154_v56, %v10308_v52  ;;  %v10303_v41 = vand.u32 4294901760, %v10302_v23  ;;  %v10323_v8 = vsub.f32 %v19181_v42, %v10322_v51 }
 0x660   :  { %12312 = vmatprep.subr.mxu0 %v20949_v18  ;;  %10166 = vmatmul.mubr.f32.vlgmr.msra.gmra.mxu1 %v20950_v44  ;;  %v10317_v11 = vand.u32 4294901760, %v10316_v13  ;;  %v10719_v13 = vld [vmem:[%s19469_s15] sm:$0xff] }
 0x661   :  { %13001 = vmatprep.subr.mxu1 %v20951_v25  ;;  %12313 = vmatpush3.msra.mxu0 %v20952_v20  ;;  %v10310_v33 = vand.u32 4294901760, %v10309_v26  ;;  %v10324_v31 = vand.u32 4294901760, %v10323_v8 }
 0x662   :  { %13002 = vmatpush3.msra.mxu1 %v10275_v10  ;;  %12314 = vmatprep.subr.mxu0 %v20953_v28 }
 0x663   :  { %13003 = vmatprep.subr.mxu1 %v20951_v25  ;;  %12315 = vmatpush3.msra.mxu0 %v20954_v3 }
 0x664   :  { %13004 = vmatpush3.msra.mxu1 %v10282_v4  ;;  %12316 = vmatprep.subr.mxu0 %v20955_v1 }
 0x665   :  { %13005 = vmatprep.subr.mxu1 %v20951_v25  ;;  %12317 = vmatpush3.msra.mxu0 %v20956_v39 }
 0x666   :  { %13006 = vmatpush3.msra.mxu1 %v10289_v62  ;;  %12318 = vmatprep.subr.mxu0 %v20957_v55 }
 0x667   :  { %13007 = vmatprep.subr.mxu1 %v20951_v25  ;;  %12319 = vmatpush3.msra.mxu0 %v20958_v38 }
 0x668   :  { %13008 = vmatpush3.msra.mxu1 %v10296_v30  ;;  %10062 = vmatmul.mubr.f32.vlgmr.msra.gmra.mxu0 %v20950_v44  ;;  %v10721_v30 = vld [vmem:[%s19469_s15 + $0x10] sm:$0xff] }
 0x669   :  { %12982 = vmatprep.subr.mxu0 %v20951_v25  ;;  %13009 = vmatprep.subr.mxu1 %v20951_v25  ;;  %v19352_v26 = vand.u32 4294901760, %v10721_v30 }
 0x66a   :  { %12983 = vmatpush3.msra.mxu0 %v19051_v16  ;;  %13010 = vmatpush3.msra.mxu1 %v10303_v41 }
 0x66b   :  { %12984 = vmatprep.subr.mxu0 %v20951_v25  ;;  %13011 = vmatprep.subr.mxu1 %v20951_v25  ;;  %v19361_v55 = vsub.f32 %v10721_v30, %v19352_v26 }
 0x66c   :  { %12985 = vmatpush3.msra.mxu0 %v19062_v60  ;;  %13012 = vmatpush3.msra.mxu1 %v10310_v33 }
 0x66d   :  { %12986 = vmatprep.subr.mxu0 %v20951_v25  ;;  %13013 = vmatprep.subr.mxu1 %v20951_v25  ;;  %v10846_v33 = vand.u32 4294901760, %v19361_v55 }
 0x66e   :  { %12987 = vmatpush3.msra.mxu0 %v19076_v59  ;;  %13014 = vmatpush3.msra.mxu1 %v10317_v11  ;;  %v19377_v11 = vand.u32 4294901760, %v10719_v13 }
 0x66f   :  { %12988 = vmatprep.subr.mxu0 %v20951_v25  ;;  %13015 = vmatprep.subr.mxu1 %v20951_v25 }
 0x670   :  { %12989 = vmatpush3.msra.mxu0 %v19087_v58  ;;  %13016 = vmatpush3.msra.mxu1 %v10324_v31 }
 0x671   :  { %13017 = vmatprep.mubr.msk.f32.mxu1 %vm13225_vm0, %v20951_v25  ;;  %12990 = vmatprep.subr.mxu0 %v20951_v25 }
 0x672   :  { %13018 = vmatmul.mubr.f32.vlgmr.msra.gmra.mxu1 %v20959_v34  ;;  %13039 = vmatprep.subr.mxu1 %v20951_v25 }
 0x673   :  { %12991 = vmatpush3.msra.mxu0 %v19108_v32  ;;  %13040 = vmatpush3.msra.mxu1 %v19051_v16 }
 0x674   :  { %12992 = vmatprep.subr.mxu0 %v20951_v25  ;;  %13041 = vmatprep.subr.mxu1 %v20951_v25 }
 0x675   :  { %12993 = vmatpush3.msra.mxu0 %v19123_v36  ;;  %13042 = vmatpush3.msra.mxu1 %v19062_v60 }
 0x676   :  { %12994 = vmatprep.subr.mxu0 %v20951_v25  ;;  %13043 = vmatprep.subr.mxu1 %v20951_v25 }
 0x677   :  { %12995 = vmatpush3.msra.mxu0 %v19141_v5  ;;  %13044 = vmatpush3.msra.mxu1 %v19076_v59 }
 0x678   :  { %12996 = vmatprep.subr.mxu0 %v20951_v25  ;;  %13045 = vmatprep.subr.mxu1 %v20951_v25 }
 0x679   :  { %12997 = vmatpush3.msra.mxu0 %v19156_v21  ;;  %12998 = vmatprep.mubr.msk.f32.mxu0 %vm13225_vm0, %v20951_v25 }
 0x67a   :  { %13046 = vmatpush3.msra.mxu1 %v19087_v58  ;;  %12999 = vmatmul.mubr.f32.vlgmr.msra.gmra.mxu0 %v20960_v43 }
 0x67b   :  { %13020 = vmatprep.subr.mxu0 %v20951_v25  ;;  %13047 = vmatprep.subr.mxu1 %v20951_v25 }
 0x67c   :  { %13021 = vmatpush3.msra.mxu0 %v19074_v37  ;;  %13048 = vmatpush3.msra.mxu1 %v19108_v32 }
 0x67d   :  { %13022 = vmatprep.subr.mxu0 %v20951_v25  ;;  %13049 = vmatprep.subr.mxu1 %v20951_v25 }
 0x67e   :  { %13023 = vmatpush3.msra.mxu0 %v19085_v22  ;;  %13050 = vmatpush3.msra.mxu1 %v19123_v36 }
 0x67f   :  { %13024 = vmatprep.subr.mxu0 %v20951_v25  ;;  %13051 = vmatprep.subr.mxu1 %v20951_v25 }
 0x680   :  { %13025 = vmatpush3.msra.mxu0 %v19100_v29  ;;  %13052 = vmatpush3.msra.mxu1 %v19141_v5 }
 0x681   :  { %13026 = vmatprep.subr.mxu0 %v20951_v25  ;;  %13053 = vmatprep.subr.mxu1 %v20951_v25 }
 0x682   :  { %13027 = vmatpush3.msra.mxu0 %v19115_v7  ;;  %13054 = vmatpush3.msra.mxu1 %v19156_v21 }
 0x683   :  { %13055 = vmatprep.mubr.msk.f32.mxu1 %vm13225_vm0, %v20951_v25  ;;  %13028 = vmatprep.subr.mxu0 %v20951_v25 }
 0x684   :  { %13056 = vmatmul.mubr.f32.vlgmr.msra.gmra.mxu1 %v20961_v61  ;;  %13077 = vmatprep.subr.mxu1 %v20951_v25  ;;  %v19387_v61 = vsub.f32 %v10719_v13, %v19377_v11 }
 0x685   :  { %13029 = vmatpush3.msra.mxu0 %v19139_v27  ;;  %13078 = vmatpush3.msra.mxu1 %v19051_v16  ;;  %v12021_v16 = vpop.f32.mrf.mxu1  ;;  %v11953_v27 = vadd.f32 %v11952_v57, %v19271_v15 }
 0x686   :  { %13030 = vmatprep.subr.mxu0 %v20951_v25  ;;  %13079 = vmatprep.subr.mxu1 %v20951_v25 }
 0x687   :  { %13031 = vmatpush3.msra.mxu0 %v19154_v56  ;;  %13080 = vmatpush3.msra.mxu1 %v19062_v60  ;;  %v20962_v60 = vld [vmem:[#allocation60_spill] sm:$0xff] }
 0x688   :  { %13032 = vmatprep.subr.mxu0 %v20951_v25  ;;  %13081 = vmatprep.subr.mxu1 %v20951_v25 }
 0x689   :  { %13033 = vmatpush3.msra.mxu0 %v19169_v47  ;;  %13082 = vmatpush3.msra.mxu1 %v19076_v59  ;;  %v12022_v59 = vpop.f32.mrf.mxu1 }
 0x68a   :  { %13034 = vmatprep.subr.mxu0 %v20951_v25  ;;  %13083 = vmatprep.subr.mxu1 %v20951_v25  ;;  %v12023_v2 = vadd.f32 %v12022_v59, %v12021_v16  ;;  %v10860_v16 = vand.u32 4294901760, %v19387_v61 }
 0x68b   :  { %13035 = vmatpush3.msra.mxu0 %v19181_v42  ;;  %13036 = vmatprep.mubr.msk.f32.mxu0 %vm13225_vm0, %v20951_v25  ;;  %v12091_v6 = vpop.f32.mrf.mxu1 }
 0x68c   :  { %13084 = vmatpush3.msra.mxu1 %v19087_v58  ;;  %13037 = vmatmul.mubr.f32.vlgmr.msra.gmra.mxu0 %v20962_v60  ;;  %v11917_v58 = vpop.f32.mrf.mxu0 }
 0x68d   :  { %13058 = vmatprep.subr.mxu0 %v20951_v25  ;;  %13085 = vmatprep.subr.mxu1 %v20951_v25  ;;  %v12092_v22 = vpop.f32.mrf.mxu1 }
 0x68e   :  { %13059 = vmatpush3.msra.mxu0 %v10273_v46  ;;  %13086 = vmatpush3.msra.mxu1 %v19108_v32  ;;  %v11986_v37 = vpop.f32.mrf.mxu0  ;;  %v12093_v12 = vadd.f32 %v12092_v22, %v12091_v6 }
 0x68f   :  { %13060 = vmatprep.subr.mxu0 %v20951_v25  ;;  %13087 = vmatprep.subr.mxu1 %v20951_v25 }
 0x690   :  { %13061 = vmatpush3.msra.mxu0 %v10280_v40  ;;  %13088 = vmatpush3.msra.mxu1 %v19123_v36  ;;  %v11987_v46 = vpop.f32.mrf.mxu0 }
 0x691   :  { %13062 = vmatprep.subr.mxu0 %v20951_v25  ;;  %13089 = vmatprep.subr.mxu1 %v20951_v25 }
 0x692   :  { %13063 = vmatpush3.msra.mxu0 %v10287_v49  ;;  %13090 = vmatpush3.msra.mxu1 %v19141_v5  ;;  %v12056_v32 = vpop.f32.mrf.mxu0  ;;  %v11918_v49 = vadd.f32 %v11917_v58, %v11916_v35  ;;  %v11988_v5 = vadd.f32 %v11987_v46, %v11986_v37  ;;  %v10861_v35 = vsub.f32 %v19387_v61, %v10860_v16 }
 0x693   :  { %13064 = vmatprep.subr.mxu0 %v20951_v25  ;;  %13091 = vmatprep.subr.mxu1 %v20951_v25 }
 0x694   :  { %13065 = vmatpush3.msra.mxu0 %v10294_v45  ;;  %13092 = vmatpush3.msra.mxu1 %v19156_v21  ;;  %v12057_v7 = vpop.f32.mrf.mxu0  ;;  %v7971_v53 = vadd.f32 %v11918_v49, %v11263_v54  ;;  %v10862_v59 = vand.u32 4294901760, %v10861_v35 }
 0x695   :  { %13093 = vmatprep.mubr.msk.f32.mxu1 %vm13225_vm0, %v20951_v25  ;;  %13066 = vmatprep.subr.mxu0 %v20951_v25  ;;  %v12058_v56 = vadd.f32 %v12057_v7, %v12056_v32 }
 0x696   :  { %13094 = vmatmul.mubr.f32.vlgmr.msra.gmra.mxu1 %v20959_v34  ;;  %13067 = vmatpush3.msra.mxu0 %v10301_v17  ;;  %v8203_v48 = vadd.f32 %v11953_v27, %v7971_v53 }
 0x697   :  { %13074 = vmatprep.mubr.msk.f32.mxu0 %vm13225_vm0, %v20951_v25  ;;  %13068 = vmatprep.subr.mxu0 %v20951_v25  ;;  %v8914_v29 = vpop.f32.mrf.mxu1 }
 0x698   :  { %13107 = vmatprep.subr.mxu1 %v20951_v25  ;;  %13069 = vmatpush3.msra.mxu0 %v10308_v52  ;;  %v8341_v63 = vadd.f32 %v11988_v5, %v8203_v48  ;;  %v11264_v48 = vld [vmem:[%s19468_s14] ss:$0 sm:$0xff] }
 0x699   :  { %13115 = vmatprep.mubr.msk.f32.mxu1 %vm13225_vm0, %v20951_v25  ;;  %13070 = vmatprep.subr.mxu0 %v20951_v25  ;;  %v12905_v40 = vpop.f32.mrf.mxu1 }
 0x69a   :  { %13071 = vmatpush3.msra.mxu0 %v10315_v50  ;;  %v8449_v21 = vadd.f32 %v12023_v2, %v8341_v63  ;;  %v10722_v50 = vld [vmem:[%s19469_s15 + $0x18] sm:$0xff] }
 0x69b   :  { %13072 = vmatprep.subr.mxu0 %v20951_v25  ;;  %v19344_v3 = vand.u32 4294901760, %v10722_v50 }
 0x69c   :  { %13073 = vmatpush3.msra.mxu0 %v10322_v51  ;;  %v8617_v10 = vadd.f32 %v12058_v56, %v8449_v21  ;;  %v10720_v51 = vld [vmem:[%s19469_s15 + $0x8] sm:$0xff] }
 0x69d   :  { %13075 = vmatmul.mubr.f32.vlgmr.msra.gmra.mxu0 %v20959_v34  ;;  %13096 = vmatprep.subr.mxu0 %v20951_v25  ;;  %v19350_v1 = vsub.f32 %v10722_v50, %v19344_v3  ;;  %v19363_v41 = vand.u32 4294901760, %v10720_v51  ;;  %v10847_v34 = vsub.f32 %v19361_v55, %v10846_v33 }
 0x69e   :  { %13104 = vmatprep.mubr.msk.f32.mxu0 %vm13225_vm0, %v20951_v25  ;;  %v8721_v17 = vadd.f32 %v12093_v12, %v8617_v10  ;;  %13097 = vmatpush3.msra.mxu0 %v19344_v3 }
 0x69f   :  { %v8803_v36 = vpop.f32.mrf.mxu0  ;;  %13098 = vmatprep.subr.mxu0 %v20951_v25  ;;  %v10839_v39 = vand.u32 4294901760, %v19350_v1  ;;  %v19375_v8 = vsub.f32 %v10720_v51, %v19363_v41  ;;  %v10848_v15 = vand.u32 4294901760, %v10847_v34 }
 0x6a0   :  { %v8804_v47 = vadd.f32 %v8803_v36, %v8721_v17  ;;  %13099 = vmatpush3.msra.mxu0 %v19352_v26 }
 0x6a1   :  { %v12886_v24 = vpop.f32.mrf.mxu0  ;;  %13100 = vmatprep.subr.mxu0 %v20951_v25  ;;  %v10840_v38 = vsub.f32 %v19350_v1, %v10839_v39  ;;  %v10853_v43 = vand.u32 4294901760, %v19375_v8 }
 0x6a2   :  { %v8915_v4 = vadd.f32 %v8914_v29, %v8804_v47  ;;  %13101 = vmatpush3.msra.mxu0 %v19363_v41 }
 0x6a3   :  { %13102 = vmatprep.subr.mxu0 %v20951_v25  ;;  %v10841_v31 = vand.u32 4294901760, %v10840_v38  ;;  %v10854_v57 = vsub.f32 %v19375_v8, %v10853_v43 }
 0x6a4   :  { %13103 = vmatpush3.msra.mxu0 %v19377_v11 }
 0x6a5   :  { %13118 = vmatprep.subr.mxu0 %v20951_v25  ;;  %13108 = vmatpush3.msra.mxu1 %v10841_v31  ;;  %v10855_v60 = vand.u32 4294901760, %v10854_v57 }
 0x6a6   :  { %13109 = vmatprep.subr.mxu1 %v20951_v25 }
 0x6a7   :  { %v9083_v9 = vpop.f32.mrf.mxu1  ;;  %13110 = vmatpush3.msra.mxu1 %v10848_v15 }
 0x6a8   :  { %13111 = vmatprep.subr.mxu1 %v20951_v25 }
 0x6a9   :  { %v12943_v45 = vpop.f32.mrf.mxu1  ;;  %13112 = vmatpush3.msra.mxu1 %v10855_v60 }
 0x6aa   :  { %13113 = vmatprep.subr.mxu1 %v20951_v25 }
 0x6ab   :  { %13114 = vmatpush3.msra.mxu1 %v10862_v59 }
 0x6ac   :  { %13129 = vmatprep.subr.mxu1 %v20951_v25 }
 0x6b0   :  { %v9002_v19 = vpop.f32.mrf.mxu0 }
 0x6b1   :  { %v9003_v44 = vadd.f32 %v9002_v19, %v8915_v4 }
 0x6b2   :  { %v12924_v0 = vpop.f32.mrf.mxu0 }
 0x6b3   :  { %v9084_v52 = vadd.f32 %v9083_v9, %v9003_v44 }
 0x6b9   :  { %v9257_v18 = vpop.f32.mrf.mxu1 }
 0x6bb   :  { %v12981_v14 = vpop.f32.mrf.mxu1 }
 0x6c3   :  { %v9178_v42 = vpop.f32.mrf.mxu0 }
 0x6c4   :  { %v9179_v20 = vadd.f32 %v9178_v42, %v9084_v52 }
 0x6c5   :  { %v12962_v62 = vpop.f32.mrf.mxu0 }
 0x6c6   :  { %v9258_v28 = vadd.f32 %v9257_v18, %v9179_v20 }
 0x6c8   :  { %v19337_v23 = vmax.f32 %v9258_v28, 0.0 }
 0x6ca   :  { %10709 = vrot.lane.b32.xlu0 %v19337_v23, %s13226_s12 }
 0x6ce   :  { %10713 = vrot.lane.b32.xlu0 %v19337_v23, %s13227_s5 }
 0x6dc   :  { %v12215_v58 = vpop.f32.mrf.mxu1 }
 0x6de   :  { %v12216_v6 = vpop.f32.mrf.mxu1 }
 0x6df   :  { %v12217_v63 = vadd.f32 %v12216_v6, %v12215_v58 }
 0x6e4   :  { %v12180_v22 = vpop.f32.mrf.mxu0 }
 0x6e6   :  { %v12181_v32 = vpop.f32.mrf.mxu0 }
 0x6e7   :  { %v12182_v5 = vadd.f32 %v12181_v32, %v12180_v22 }
 0x6e9   :  { %v9418_v45 = vadd.f32 %v12182_v5, %v11264_v48 }
 0x6eb   :  { %v9650_v21 = vadd.f32 %v12217_v63, %v9418_v45 }
 0x6fe   :  { %v12285_v37 = vpop.f32.mrf.mxu1 }
 0x700   :  { %v12286_v46 = vpop.f32.mrf.mxu1 }
 0x701   :  { %v12287_v0 = vadd.f32 %v12286_v46, %v12285_v37 }
 0x706   :  { %v12250_v40 = vpop.f32.mrf.mxu0 }
 0x708   :  { %v12251_v49 = vpop.f32.mrf.mxu0 }
 0x709   :  { %v12252_v2 = vadd.f32 %v12251_v49, %v12250_v40 }
 0x70b   :  { %v9788_v10 = vadd.f32 %v12252_v2, %v9650_v21 }
 0x70d   :  { %v9896_v17 = vadd.f32 %v12287_v0, %v9788_v10 }
 0x720   :  { %v12355_v29 = vpop.f32.mrf.mxu1 }
 0x722   :  { %v12356_v7 = vpop.f32.mrf.mxu1 }
 0x723   :  { %v12357_v4 = vadd.f32 %v12356_v7, %v12355_v29 }
 0x728   :  { %v12320_v54 = vpop.f32.mrf.mxu0 }
 0x72a   :  { %v12321_v53 = vpop.f32.mrf.mxu0 }
 0x72b   :  { %v12322_v12 = vadd.f32 %v12321_v53, %v12320_v54 }
 0x72d   :  { %v10064_v47 = vadd.f32 %v12322_v12, %v9896_v17 }
 0x72f   :  { %v10168_v44 = vadd.f32 %v12357_v4, %v10064_v47  ;;  %v13228_v4 = vmov -1.0  }
 0x732   :  { %v10361_v36 = vpop.f32.mrf.mxu1 }
 0x734   :  { %v13019_v24 = vpop.f32.mrf.mxu1 }
 0x73a   :  { %v10250_v27 = vpop.f32.mrf.mxu0 }
 0x73b   :  { %v10251_v52 = vadd.f32 %v10250_v27, %v10168_v44 }
 0x73c   :  { %v13000_v9 = vpop.f32.mrf.mxu0  ;;  %v10710_v62 = vpop.permute.xlu0 %10709 }
 0x73d   :  { %v10362_v20 = vadd.f32 %v10361_v36, %v10251_v52  ;;  %v10712_v38 = vmax.f32 %v19337_v23, %v10710_v62 }
 0x740   :  { %v10714_v51 = vpop.permute.xlu0 %10713 }
 0x741   :  { %v10716_v15 = vmax.f32 %v10712_v38, %v10714_v51 }
 0x744   :  { %v10530_v56 = vpop.f32.mrf.mxu1 }
 0x746   :  { %v13057_v19 = vpop.f32.mrf.mxu1 }
 0x74c   :  { %v10449_v18 = vpop.f32.mrf.mxu0 }
 0x74d   :  { %v10450_v50 = vadd.f32 %v10449_v18, %v10362_v20 }
 0x74e   :  { %v13038_v14 = vpop.f32.mrf.mxu0 }
 0x74f   :  { %v10531_v30 = vadd.f32 %v10530_v56, %v10450_v50 }
 0x756   :  { %v10704_v42 = vpop.f32.mrf.mxu1 }
 0x758   :  { %v13095_v28 = vpop.f32.mrf.mxu1 }
 0x75d   :  { %v10625_v13 = vpop.f32.mrf.mxu0 }
 0x75e   :  { %v10626_v31 = vadd.f32 %v10625_v13, %v10531_v30 }
 0x75f   :  { %v13076_v34 = vpop.f32.mrf.mxu0 }
 0x760   :  { %v10705_v57 = vadd.f32 %v10704_v42, %v10626_v31 }
 0x762   :  { %v10717_v60 = vadd.f32 %v10716_v15, %v10705_v57 }
 0x764   :  { %v10718_v35 = vmax.f32 %v10717_v60, 0.0 }
 0x766   :  { %v10731_v59 = vsel %vm1964_vm4, %v10718_v35, 0 }
 0x767   :  { %v10802_v58 = vand.u32 4294901760, %v10731_v59 }
 0x769   :  { %13116 = vmatmul.mubr.f32.vlgmr.msra.gmra.mxu1 %v10802_v58  ;;  %v10803_v6 = vsub.f32 %v10731_v59, %v10802_v58 }
 0x76a   :  { %13130 = vmatpush3.msra.mxu1 %v19344_v3  ;;  %13137 = vmatprep.mubr.msk.f32.mxu1 %vm13225_vm0, %v20951_v25 }
 0x76b   :  { %13131 = vmatprep.subr.mxu1 %v20951_v25  ;;  %v10804_v37 = vand.u32 4294901760, %v10803_v6 }
 0x76c   :  { %13132 = vmatpush3.msra.mxu1 %v19352_v26 }
 0x76d   :  { %13133 = vmatprep.subr.mxu1 %v20951_v25  ;;  %v10805_v23 = vsub.f32 %v10803_v6, %v10804_v37 }
 0x76e   :  { %13134 = vmatpush3.msra.mxu1 %v19363_v41 }
 0x76f   :  { %13135 = vmatprep.subr.mxu1 %v20951_v25  ;;  %v10806_v22 = vand.u32 4294901760, %v10805_v23 }
 0x770   :  { %13136 = vmatpush3.msra.mxu1 %v19377_v11 }
 0x771   :  { %13138 = vmatmul.mubr.f32.vlgmr.msra.gmra.mxu1 %v10804_v37  ;;  %13151 = vmatprep.subr.mxu1 %v20951_v25 }
 0x772   :  { %13105 = vmatmul.mubr.f32.vlgmr.msra.gmra.mxu0 %v10806_v22  ;;  %13152 = vmatpush3.msra.mxu1 %v19344_v3 }
 0x773   :  { %13119 = vmatpush3.msra.mxu0 %v19350_v1  ;;  %13153 = vmatprep.subr.mxu1 %v20951_v25 }
 0x774   :  { %13120 = vmatprep.subr.mxu0 %v20951_v25  ;;  %13154 = vmatpush3.msra.mxu1 %v19352_v26 }
 0x775   :  { %13121 = vmatpush3.msra.mxu0 %v19361_v55  ;;  %13155 = vmatprep.subr.mxu1 %v20951_v25  ;;  %v11265_v55 = vld [vmem:[%s19470_s16] ss:$0 sm:$0xff]  ;;  %s13229_s16 = smov [#allocation5]  }
 0x776   :  { %13122 = vmatprep.subr.mxu0 %v20951_v25  ;;  %13156 = vmatpush3.msra.mxu1 %v19363_v41  ;;  %s11252_s30 = sshll.u32 %s13229_s16, 4  ;;  %s11253_s30 = int_to_ptr.vmem [resolvable:$true] %s11252_s30 }
 0x777   :  { %13123 = vmatpush3.msra.mxu0 %v19375_v8  ;;  %13157 = vmatprep.subr.mxu1 %v20951_v25  ;;  %s13197_s18 = scalar_lea.vmem %s11253_s30, 128  ;;  %p13202_p6 = scmp.lt.s32.totalorder %s11253_s30, %s11253_s30 }
 0x778   :  { %13124 = vmatprep.subr.mxu0 %v20951_v25  ;;  %13126 = vmatprep.mubr.msk.f32.mxu0 %vm13225_vm0, %v20951_v25  ;;  %p13198_p5 = scmp.ne.s32.totalorder %s11253_s30, %s13197_s18  ;;  %p13203_p7 = scmp.lt.s32.totalorder %s13197_s18, %s13197_s18 }
 0x779   :  { %13125 = vmatpush3.msra.mxu0 %v19387_v61  ;;  %13158 = vmatpush3.msra.mxu1 %v19377_v11 }
 0x77a   :  { %13159 = vmatprep.mubr.msk.f32.mxu1 %vm13225_vm0, %v20951_v25  ;;  %13127 = vmatmul.mubr.f32.vlgmr.msra.gmra.mxu0 %v10803_v6  ;;  %p13204_p8 = por %p13203_p7, %p13202_p6 }
 0x77b   :  { %13140 = vmatprep.subr.mxu0 %v20951_v25  ;;  %13160 = vmatmul.mubr.f32.vlgmr.msra.gmra.mxu1 %v10802_v58 }
 0x77c   :  { %13141 = vmatpush3.msra.mxu0 %v10839_v39  ;;  %13148 = vmatprep.mubr.msk.f32.mxu0 %vm13225_vm0, %v20951_v25  ;;  %p13205_p9 = pnand %p13204_p8, %p13198_p5 }
 0x77d   :  { %13142 = vmatprep.subr.mxu0 %v20951_v25 }
 0x77e   :  { %13143 = vmatpush3.msra.mxu0 %v10846_v33 }
 0x77f   :  { %13144 = vmatprep.subr.mxu0 %v20951_v25 }
 0x780   :  { %13145 = vmatpush3.msra.mxu0 %v10853_v43 }
 0x781   :  { %13146 = vmatprep.subr.mxu0 %v20951_v25 }
 0x782   :  { %13147 = vmatpush3.msra.mxu0 %v10860_v16 }
 0x783   :  { %13149 = vmatmul.mubr.f32.vlgmr.msra.gmra.mxu0 %v10802_v58 }
 0x829   :  { %v10899_v3 = vpop.f32.mrf.mxu1 }
 0x82b   :  { %v13117_v1 = vpop.f32.mrf.mxu1 }
 0x831   :  { %v11056_v26 = vpop.f32.mrf.mxu1 }
 0x832   :  { %v10808_v39 = vpop.f32.mrf.mxu0 }
 0x833   :  { %v13139_v41 = vpop.f32.mrf.mxu1  ;;  %v10809_v33 = vadd.f32 %v11265_v55, %v10808_v39 }
 0x834   :  { %v13106_v11 = vpop.f32.mrf.mxu0 }
 0x835   :  { %v10900_v43 = vadd.f32 %v10899_v3, %v10809_v33 }
 0x83a   :  { %v10979_v46 = vpop.f32.mrf.mxu0 }
 0x83b   :  { %v11214_v8 = vpop.f32.mrf.mxu1  ;;  %v10980_v32 = vadd.f32 %v10979_v46, %v10900_v43 }
 0x83c   :  { %v13128_v29 = vpop.f32.mrf.mxu0 }
 0x83d   :  { %v13161_v25 = vpop.f32.mrf.mxu1  ;;  %v11057_v61 = vadd.f32 %v11056_v26, %v10980_v32 }
 0x843   :  { %v11139_v16 = vpop.f32.mrf.mxu0 }
 0x844   :  { %v11140_v40 = vadd.f32 %v11139_v16, %v11057_v61 }
 0x845   :  { %v13150_v7 = vpop.f32.mrf.mxu0 }
 0x846   :  { %v11215_v36 = vadd.f32 %v11214_v8, %v11140_v40 }
 0x848   :  { %v11219_v49 = vmul.f32 0.70710677, %v11215_v36  ;;  %v11218_v52 = vmul.f32 0.5, %v11215_v36 }
 0x84a   :  { %v11222_v24 = vand.u32 2147483647, %v11219_v49  ;;  %vm11220_vm7 = vcmp.ge.f32.partialorder %v11219_v49, 0.0 }
 0x84b   :  { %v11221_v14 = vsel %vm11220_vm7, 1.0, %v13228_v4 }
 0x84c   :  { %v11223_v54 = vmul.f32 0.3275911, %v11222_v24  ;;  %v11236_v27 = vsub.f32 0.0, %v11222_v24 }
 0x84e   :  { %v11224_v53 = vadd.f32 1.0, %v11223_v54  ;;  %v11237_v5 = vmul.f32 %v11236_v27, %v11222_v24 }
 0x850   :  { %13173 = vrcp.f32 %v11224_v53  ;;  %v11238_v48 = vmul.f32 1.442695, %v11237_v5 }
 0x852   :  { %13175 = vpow2.f32 %v11238_v48 }
 0x85d   :  { %v13174_v9 = vpop.eup %13173 }
 0x85e   :  { %v11227_v45 = vmul.f32 1.0614054, %v13174_v9 }
 0x85f   :  { %v13176_v17 = vpop.eup %13175 }
 0x860   :  { %v11228_v63 = vadd.f32 -1.4531521, %v11227_v45 }
 0x862   :  { %v11229_v2 = vmul.f32 %v13174_v9, %v11228_v63 }
 0x864   :  { %v11230_v56 = vadd.f32 1.4214138, %v11229_v2 }
 0x866   :  { %v11231_v21 = vmul.f32 %v13174_v9, %v11230_v56 }
 0x868   :  { %v11232_v19 = vadd.f32 -0.28449672, %v11231_v21 }
 0x86a   :  { %v11233_v10 = vmul.f32 %v13174_v9, %v11232_v19 }
 0x86c   :  { %v11234_v0 = vadd.f32 0.2548296, %v11233_v10 }
 0x86e   :  { %v11235_v12 = vmul.f32 %v13174_v9, %v11234_v0 }
 0x870   :  { %v11240_v47 = vmul.f32 %v13176_v17, %v11235_v12 }
 0x872   :  { %v11241_v18 = vsub.f32 1.0, %v11240_v47 }
 0x874   :  { %v11242_v44 = vmul.f32 %v11241_v18, %v11221_v14 }
 0x876   :  { %v11243_v42 = vadd.f32 1.0, %v11242_v44 }
 0x878   :  { %v11244_v20 = vmul.f32 %v11243_v42, %v11218_v52 }
 0x87a   :  { %11245 = vst [vmem:[#allocation5] sm:$0xff] %v11244_v20 }
 0x87b   :  { %13208 = shalt.err (!%p13205_p9)
}
 0x87c   :  { %11255 = dma.vmem_to_hbm [thread:$0]  %s11253_s30, 128, %s19471_s17, [#allocation4]  }
 0x87d   :  { %13219 = dma.done.wait [#allocation4], 128  }
 0x87e   :  { %13220 = vsyncadd [#allocation4], 4294967168 }
 0x87f   :  { %11259 = vsyncpa [#allocation3], 1 }
 0x880   :  { %11260 = vsyncpa [#allocation4], 1 }

</bundles_post_ra>
